<compile_context>
chip_gen: v7x
topology: tpu7x:2x2x1
jax: 0.10.0
libtpu: 0.0.40
codegen_flags: <defaults>
</compile_context>

<pallas_src>
import jax
import jax.numpy as jnp
from jax.experimental import pallas as pl
from jax.experimental.pallas import tpu as pltpu


# ---------------------------------------------------------------------------
# Pallas kernel: the full 8-layer MLP hot path (matmuls + bias + ReLU + tanh)
# ---------------------------------------------------------------------------
def sdf_decoder_kernel(x_ref,
                       w1, b1, w2, b2, w3, b3, w4, b4,
                       w5a, w5b, b5, w6, b6, w7, b7, w8r, b8,
                       o_ref):
    x_bf = x_ref[...].astype(jnp.bfloat16)                     # (tm, 258) bf16

    def dense_relu(h_bf16, w, b):
        # bf16 operands on the MXU, f32 accumulation; bias/ReLU in f32 (v5e-friendly).
        y = jnp.dot(h_bf16, w[...], preferred_element_type=jnp.float32) + b[...]
        return jnp.maximum(y, 0.0)

    # fc_stack_1
    h = dense_relu(x_bf, w1, b1)                               # (tm, 512) f32
    h = dense_relu(h.astype(jnp.bfloat16), w2, b2)             # (tm, 512)
    h = dense_relu(h.astype(jnp.bfloat16), w3, b3)             # (tm, 512)
    h = dense_relu(h.astype(jnp.bfloat16), w4, b4)             # (tm, 256)  (254 + 2 zero-pad cols)

    # skip connection: concat([h, x], -1) @ W5 == h @ W5[:256] + x @ W5[256:]
    s = (jnp.dot(h.astype(jnp.bfloat16), w5a[...], preferred_element_type=jnp.float32)
         + jnp.dot(x_bf, w5b[...], preferred_element_type=jnp.float32)
         + b5[...])
    h = jnp.maximum(s, 0.0)                                    # (tm, 512)

    # rest of fc_stack_2
    h = dense_relu(h.astype(jnp.bfloat16), w6, b6)             # (tm, 512)
    h = dense_relu(h.astype(jnp.bfloat16), w7, b7)             # (tm, 512)

    # final 512 -> 1 layer on the VPU/XLU: an N=1 MXU pass would waste >99% of the array.
    y = jnp.sum(h * w8r[...], axis=-1, keepdims=True) + b8[...]   # (tm, 1) f32
    o_ref[...] = jnp.tanh(y).astype(o_ref.dtype)


# Per-row MAC count (after padding 254 -> 256): used for the XLA cost estimate.
_MACS_PER_ROW = (258 * 512 + 512 * 512 + 512 * 512 + 512 * 256
                 + 256 * 512 + 258 * 512 + 512 * 512 + 512 * 512 + 512)


def sdf_decoder_forward(x, params, *, tm=256):
    """x: (B, N, 258) float32 -> (B, N, 1) float32."""
    B, N, F = x.shape
    assert F == 258
    M = B * N
    G = pl.cdiv(M, tm)
    Mp = G * tm

    x2 = x.reshape(M, F)
    if Mp != M:
        x2 = jnp.pad(x2, ((0, Mp - M), (0, 0)))                # pad rows; sliced off below

    (w1, b1, w2, b2, w3, b3, w4, b4,
     w5a, w5b, b5, w6, b6, w7, b7, w8r, b8) = params
    weight_args = (w1, b1, w2, b2, w3, b3, w4, b4,
                   w5a, w5b, b5, w6, b6, w7, b7, w8r, b8)

    def full_spec(arr):
        # whole array as a single block; constant index_map -> DMA'd once, stays in VMEM.
        nd = arr.ndim
        return pl.BlockSpec(arr.shape, lambda i, _nd=nd: (0,) * _nd)

    weight_bytes = sum(int(a.size) * a.dtype.itemsize for a in weight_args)
    cost = pl.CostEstimate(
        flops=int(2 * Mp * _MACS_PER_ROW),
        transcendentals=int(Mp),                               # one tanh per row
        bytes_accessed=int(weight_bytes + Mp * F * 4 + Mp * 4),
    )

    out = pl.pallas_call(
        sdf_decoder_kernel,
        out_shape=jax.ShapeDtypeStruct((Mp, 1), jnp.float32),
        grid_spec=pltpu.PrefetchScalarGridSpec(
            num_scalar_prefetch=0,
            grid=(G,),
            in_specs=[pl.BlockSpec((tm, F), lambda i: (i, 0))]
                     + [full_spec(a) for a in weight_args],
            out_specs=pl.BlockSpec((tm, 1), lambda i: (i, 0)),
        ),
        compiler_params=pltpu.CompilerParams(
            # No cross-iteration dependence -> let v7x shard rows over its 2 TensorCores.
            dimension_semantics=("parallel",),
            # Actual footprint is ~10 MB (bf16 weights double-buffered + f32 activations);
            # 48 MiB leaves headroom yet fits v7x's 64 MiB physical VMEM.
            vmem_limit_bytes=48 * 1024 * 1024,
        ),
        cost_estimate=cost,
    )(x2, *weight_args)

    return out[:M].reshape(B, N, 1)


# ---------------------------------------------------------------------------
# Deterministic parameter construction (resolving weight_norm at setup time)
# ---------------------------------------------------------------------------
def make_weightnorm_linear(key, in_f, out_f):
    """Return (W, b) with W in (in_f, out_f) layout, matching
    nn.utils.weight_norm(nn.Linear(in_f, out_f)) forward semantics."""
    kv, kg, kb = jax.random.split(key, 3)
    v = jax.random.normal(kv, (out_f, in_f), jnp.float32) * 0.05   # PyTorch layout
    g = 1.0 + 0.1 * jax.random.normal(kg, (out_f,), jnp.float32)
    b = 0.01 * jax.random.normal(kb, (out_f,), jnp.float32)
    norm = jnp.sqrt(jnp.sum(v * v, axis=1, keepdims=True))          # weight_norm dim=0
    w_torch = g[:, None] * v / norm                                 # (out_f, in_f)
    return w_torch.T, b.reshape(1, out_f)                           # (in_f, out_f), (1, out_f)


def make_params(key):
    keys = jax.random.split(key, 8)
    w1, b1 = make_weightnorm_linear(keys[0], 258, 512)
    w2, b2 = make_weightnorm_linear(keys[1], 512, 512)
    w3, b3 = make_weightnorm_linear(keys[2], 512, 512)
    w4, b4 = make_weightnorm_linear(keys[3], 512, 254)
    w5, b5 = make_weightnorm_linear(keys[4], 512, 512)
    w6, b6 = make_weightnorm_linear(keys[5], 512, 512)
    w7, b7 = make_weightnorm_linear(keys[6], 512, 512)
    w8, b8 = make_weightnorm_linear(keys[7], 512, 1)

    # Pad the 254-wide path to a lane-friendly 256 (zeros do not change the math):
    w4 = jnp.pad(w4, ((0, 0), (0, 2)))              # (512, 256), 2 zero output cols
    b4 = jnp.pad(b4, ((0, 0), (0, 2)))              # (1, 256)
    # Split W5 so the skip-connection concat becomes two matmuls (no in-kernel concat):
    # rows 0:254 multiply skip_out (padded to 256), rows 254:512 multiply x.
    w5a = jnp.pad(w5[:254, :], ((0, 2), (0, 0)))    # (256, 512), 2 zero input rows
    w5b = w5[254:, :]                               # (258, 512)

    bf = lambda w: w.astype(jnp.bfloat16)           # bf16 operands, f32 accumulation
    w8r = w8.T                                      # (1, 512) f32 row for the VPU epilogue
    return (bf(w1), b1, bf(w2), b2, bf(w3), b3, bf(w4), b4,
            bf(w5a), bf(w5b), b5, bf(w6), b6, bf(w7), b7,
            w8r, b8)                                # b8: (1, 1) f32


# ---------------------------------------------------------------------------
# Pure-JAX reference (same bf16-operand / f32-accumulate numerics) for checking
# ---------------------------------------------------------------------------
def reference_forward(x, params):
    (w1, b1, w2, b2, w3, b3, w4, b4,
     w5a, w5b, b5, w6, b6, w7, b7, w8r, b8) = params
    relu = lambda t: jnp.maximum(t, 0.0)
    dot = lambda a, w: jnp.dot(a.astype(jnp.bfloat16), w,
                               preferred_element_type=jnp.float32)
    h = relu(dot(x, w1) + b1)
    h = relu(dot(h, w2) + b2)
    h = relu(dot(h, w3) + b3)
    skip_out = relu(dot(h, w4) + b4)                     # (B, N, 256)
    skip_in = jnp.concatenate([skip_out, x], axis=2)     # (B, N, 514)
    w5 = jnp.concatenate([w5a, w5b], axis=0)             # (514, 512)
    h = relu(dot(skip_in, w5) + b5)
    h = relu(dot(h, w6) + b6)
    h = relu(dot(h, w7) + b7)
    y = jnp.sum(h * w8r, axis=-1, keepdims=True) + b8
    return jnp.tanh(y)


if __name__ == "__main__":
    key = jax.random.PRNGKey(0)
    kp, kx = jax.random.split(key)

    params = make_params(kp)

    B, N = 2, 200                                   # M = 400 -> padded to 512 in wrapper
    x = jax.random.normal(kx, (B, N, 258), jnp.float32)

    out = jax.block_until_ready(sdf_decoder_forward(x, params, tm=256))
    ref = reference_forward(x, params)

    assert out.shape == (B, N, 1)
    max_err = float(jnp.max(jnp.abs(out - ref)))
    assert max_err < 2e-3, max_err

    print("KERNEL_OK")
</pallas_src>

<mosaic_0001>
module attributes {stable_mosaic.version = 11 : i64} {
  func.func @sdf_decoder_kernel(%arg0: i32, %arg1: memref<256x258xf32, #tpu.memory_space<vmem>>, %arg2: memref<258x512xbf16, #tpu.memory_space<vmem>>, %arg3: memref<1x512xf32, #tpu.memory_space<vmem>>, %arg4: memref<512x512xbf16, #tpu.memory_space<vmem>>, %arg5: memref<1x512xf32, #tpu.memory_space<vmem>>, %arg6: memref<512x512xbf16, #tpu.memory_space<vmem>>, %arg7: memref<1x512xf32, #tpu.memory_space<vmem>>, %arg8: memref<512x256xbf16, #tpu.memory_space<vmem>>, %arg9: memref<1x256xf32, #tpu.memory_space<vmem>>, %arg10: memref<256x512xbf16, #tpu.memory_space<vmem>>, %arg11: memref<258x512xbf16, #tpu.memory_space<vmem>>, %arg12: memref<1x512xf32, #tpu.memory_space<vmem>>, %arg13: memref<512x512xbf16, #tpu.memory_space<vmem>>, %arg14: memref<1x512xf32, #tpu.memory_space<vmem>>, %arg15: memref<512x512xbf16, #tpu.memory_space<vmem>>, %arg16: memref<1x512xf32, #tpu.memory_space<vmem>>, %arg17: memref<1x512xf32, #tpu.memory_space<vmem>>, %arg18: memref<1x1xf32, #tpu.memory_space<vmem>>, %arg19: memref<256x1xf32, #tpu.memory_space<vmem>>) attributes {dimension_semantics = [#tpu.dimension_semantics<parallel>], iteration_bounds = array<i64: 2>, scalar_prefetch = 0 : i64, scratch_operands = 0 : i64, tpu.core_type = #tpu.core_type<tc>, window_params = [{transform_indices = @transform_0, window_bounds = array<i64: 256, 258>}, {pipeline_mode = #tpu.pipeline_mode<synchronous>, transform_indices = @transform_1, window_bounds = array<i64: 258, 512>}, {pipeline_mode = #tpu.pipeline_mode<synchronous>, transform_indices = @transform_2, window_bounds = array<i64: 1, 512>}, {pipeline_mode = #tpu.pipeline_mode<synchronous>, transform_indices = @transform_3, window_bounds = array<i64: 512, 512>}, {pipeline_mode = #tpu.pipeline_mode<synchronous>, transform_indices = @transform_4, window_bounds = array<i64: 1, 512>}, {pipeline_mode = #tpu.pipeline_mode<synchronous>, transform_indices = @transform_5, window_bounds = array<i64: 512, 512>}, {pipeline_mode = #tpu.pipeline_mode<synchronous>, transform_indices = @transform_6, window_bounds = array<i64: 1, 512>}, {pipeline_mode = #tpu.pipeline_mode<synchronous>, transform_indices = @transform_7, window_bounds = array<i64: 512, 256>}, {pipeline_mode = #tpu.pipeline_mode<synchronous>, transform_indices = @transform_8, window_bounds = array<i64: 1, 256>}, {pipeline_mode = #tpu.pipeline_mode<synchronous>, transform_indices = @transform_9, window_bounds = array<i64: 256, 512>}, {pipeline_mode = #tpu.pipeline_mode<synchronous>, transform_indices = @transform_10, window_bounds = array<i64: 258, 512>}, {pipeline_mode = #tpu.pipeline_mode<synchronous>, transform_indices = @transform_11, window_bounds = array<i64: 1, 512>}, {pipeline_mode = #tpu.pipeline_mode<synchronous>, transform_indices = @transform_12, window_bounds = array<i64: 512, 512>}, {pipeline_mode = #tpu.pipeline_mode<synchronous>, transform_indices = @transform_13, window_bounds = array<i64: 1, 512>}, {pipeline_mode = #tpu.pipeline_mode<synchronous>, transform_indices = @transform_14, window_bounds = array<i64: 512, 512>}, {pipeline_mode = #tpu.pipeline_mode<synchronous>, transform_indices = @transform_15, window_bounds = array<i64: 1, 512>}, {pipeline_mode = #tpu.pipeline_mode<synchronous>, transform_indices = @transform_16, window_bounds = array<i64: 1, 512>}, {pipeline_mode = #tpu.pipeline_mode<synchronous>, transform_indices = @transform_17, window_bounds = array<i64: 1, 1>}, {transform_indices = @transform_18, window_bounds = array<i64: 256, 1>}]} {
    %c0 = arith.constant 0 : index
    %c0_0 = arith.constant 0 : index
    %0 = vector.load %arg1[%c0, %c0_0] : memref<256x258xf32, #tpu.memory_space<vmem>>, vector<256x258xf32>
    %1 = arith.truncf %0 : vector<256x258xf32> to vector<256x258xbf16>
    %c0_1 = arith.constant 0 : index
    %c0_2 = arith.constant 0 : index
    %2 = vector.load %arg2[%c0_1, %c0_2] : memref<258x512xbf16, #tpu.memory_space<vmem>>, vector<258x512xbf16>
    %cst = arith.constant dense<0.000000e+00> : vector<256x512xf32>
    %3 = tpu.matmul %1, %2, %cst {dimension_numbers = #tpu.dot_dimension_numbers<[1], [0], [0], [1], [0, 0, 1, 1], [], []>} : vector<256x258xbf16>, vector<258x512xbf16>, vector<256x512xf32> -> vector<256x512xf32>
    %c0_3 = arith.constant 0 : index
    %c0_4 = arith.constant 0 : index
    %4 = vector.load %arg3[%c0_3, %c0_4] : memref<1x512xf32, #tpu.memory_space<vmem>>, vector<1x512xf32>
    %5 = vector.broadcast %4 : vector<1x512xf32> to vector<256x512xf32>
    %6 = arith.addf %3, %5 : vector<256x512xf32>
    %cst_5 = arith.constant 0.000000e+00 : f32
    %7 = vector.broadcast %cst_5 : f32 to vector<256x512xf32>
    %8 = arith.maximumf %6, %7 : vector<256x512xf32>
    %9 = arith.truncf %8 : vector<256x512xf32> to vector<256x512xbf16>
    %c0_6 = arith.constant 0 : index
    %c0_7 = arith.constant 0 : index
    %10 = vector.load %arg4[%c0_6, %c0_7] : memref<512x512xbf16, #tpu.memory_space<vmem>>, vector<512x512xbf16>
    %cst_8 = arith.constant dense<0.000000e+00> : vector<256x512xf32>
    %11 = tpu.matmul %9, %10, %cst_8 {dimension_numbers = #tpu.dot_dimension_numbers<[1], [0], [0], [1], [0, 0, 1, 1], [], []>} : vector<256x512xbf16>, vector<512x512xbf16>, vector<256x512xf32> -> vector<256x512xf32>
    %c0_9 = arith.constant 0 : index
    %c0_10 = arith.constant 0 : index
    %12 = vector.load %arg5[%c0_9, %c0_10] : memref<1x512xf32, #tpu.memory_space<vmem>>, vector<1x512xf32>
    %13 = vector.broadcast %12 : vector<1x512xf32> to vector<256x512xf32>
    %14 = arith.addf %11, %13 : vector<256x512xf32>
    %cst_11 = arith.constant 0.000000e+00 : f32
    %15 = vector.broadcast %cst_11 : f32 to vector<256x512xf32>
    %16 = arith.maximumf %14, %15 : vector<256x512xf32>
    %17 = arith.truncf %16 : vector<256x512xf32> to vector<256x512xbf16>
    %c0_12 = arith.constant 0 : index
    %c0_13 = arith.constant 0 : index
    %18 = vector.load %arg6[%c0_12, %c0_13] : memref<512x512xbf16, #tpu.memory_space<vmem>>, vector<512x512xbf16>
    %cst_14 = arith.constant dense<0.000000e+00> : vector<256x512xf32>
    %19 = tpu.matmul %17, %18, %cst_14 {dimension_numbers = #tpu.dot_dimension_numbers<[1], [0], [0], [1], [0, 0, 1, 1], [], []>} : vector<256x512xbf16>, vector<512x512xbf16>, vector<256x512xf32> -> vector<256x512xf32>
    %c0_15 = arith.constant 0 : index
    %c0_16 = arith.constant 0 : index
    %20 = vector.load %arg7[%c0_15, %c0_16] : memref<1x512xf32, #tpu.memory_space<vmem>>, vector<1x512xf32>
    %21 = vector.broadcast %20 : vector<1x512xf32> to vector<256x512xf32>
    %22 = arith.addf %19, %21 : vector<256x512xf32>
    %cst_17 = arith.constant 0.000000e+00 : f32
    %23 = vector.broadcast %cst_17 : f32 to vector<256x512xf32>
    %24 = arith.maximumf %22, %23 : vector<256x512xf32>
    %25 = arith.truncf %24 : vector<256x512xf32> to vector<256x512xbf16>
    %c0_18 = arith.constant 0 : index
    %c0_19 = arith.constant 0 : index
    %26 = vector.load %arg8[%c0_18, %c0_19] : memref<512x256xbf16, #tpu.memory_space<vmem>>, vector<512x256xbf16>
    %cst_20 = arith.constant dense<0.000000e+00> : vector<256x256xf32>
    %27 = tpu.matmul %25, %26, %cst_20 {dimension_numbers = #tpu.dot_dimension_numbers<[1], [0], [0], [1], [0, 0, 1, 1], [], []>} : vector<256x512xbf16>, vector<512x256xbf16>, vector<256x256xf32> -> vector<256x256xf32>
    %c0_21 = arith.constant 0 : index
    %c0_22 = arith.constant 0 : index
    %28 = vector.load %arg9[%c0_21, %c0_22] : memref<1x256xf32, #tpu.memory_space<vmem>>, vector<1x256xf32>
    %29 = vector.broadcast %28 : vector<1x256xf32> to vector<256x256xf32>
    %30 = arith.addf %27, %29 : vector<256x256xf32>
    %cst_23 = arith.constant 0.000000e+00 : f32
    %31 = vector.broadcast %cst_23 : f32 to vector<256x256xf32>
    %32 = arith.maximumf %30, %31 : vector<256x256xf32>
    %33 = arith.truncf %32 : vector<256x256xf32> to vector<256x256xbf16>
    %c0_24 = arith.constant 0 : index
    %c0_25 = arith.constant 0 : index
    %34 = vector.load %arg10[%c0_24, %c0_25] : memref<256x512xbf16, #tpu.memory_space<vmem>>, vector<256x512xbf16>
    %cst_26 = arith.constant dense<0.000000e+00> : vector<256x512xf32>
    %35 = tpu.matmul %33, %34, %cst_26 {dimension_numbers = #tpu.dot_dimension_numbers<[1], [0], [0], [1], [0, 0, 1, 1], [], []>} : vector<256x256xbf16>, vector<256x512xbf16>, vector<256x512xf32> -> vector<256x512xf32>
    %c0_27 = arith.constant 0 : index
    %c0_28 = arith.constant 0 : index
    %36 = vector.load %arg11[%c0_27, %c0_28] : memref<258x512xbf16, #tpu.memory_space<vmem>>, vector<258x512xbf16>
    %cst_29 = arith.constant dense<0.000000e+00> : vector<256x512xf32>
    %37 = tpu.matmul %1, %36, %cst_29 {dimension_numbers = #tpu.dot_dimension_numbers<[1], [0], [0], [1], [0, 0, 1, 1], [], []>} : vector<256x258xbf16>, vector<258x512xbf16>, vector<256x512xf32> -> vector<256x512xf32>
    %38 = arith.addf %35, %37 : vector<256x512xf32>
    %c0_30 = arith.constant 0 : index
    %c0_31 = arith.constant 0 : index
    %39 = vector.load %arg12[%c0_30, %c0_31] : memref<1x512xf32, #tpu.memory_space<vmem>>, vector<1x512xf32>
    %40 = vector.broadcast %39 : vector<1x512xf32> to vector<256x512xf32>
    %41 = arith.addf %38, %40 : vector<256x512xf32>
    %cst_32 = arith.constant 0.000000e+00 : f32
    %42 = vector.broadcast %cst_32 : f32 to vector<256x512xf32>
    %43 = arith.maximumf %41, %42 : vector<256x512xf32>
    %44 = arith.truncf %43 : vector<256x512xf32> to vector<256x512xbf16>
    %c0_33 = arith.constant 0 : index
    %c0_34 = arith.constant 0 : index
    %45 = vector.load %arg13[%c0_33, %c0_34] : memref<512x512xbf16, #tpu.memory_space<vmem>>, vector<512x512xbf16>
    %cst_35 = arith.constant dense<0.000000e+00> : vector<256x512xf32>
    %46 = tpu.matmul %44, %45, %cst_35 {dimension_numbers = #tpu.dot_dimension_numbers<[1], [0], [0], [1], [0, 0, 1, 1], [], []>} : vector<256x512xbf16>, vector<512x512xbf16>, vector<256x512xf32> -> vector<256x512xf32>
    %c0_36 = arith.constant 0 : index
    %c0_37 = arith.constant 0 : index
    %47 = vector.load %arg14[%c0_36, %c0_37] : memref<1x512xf32, #tpu.memory_space<vmem>>, vector<1x512xf32>
    %48 = vector.broadcast %47 : vector<1x512xf32> to vector<256x512xf32>
    %49 = arith.addf %46, %48 : vector<256x512xf32>
    %cst_38 = arith.constant 0.000000e+00 : f32
    %50 = vector.broadcast %cst_38 : f32 to vector<256x512xf32>
    %51 = arith.maximumf %49, %50 : vector<256x512xf32>
    %52 = arith.truncf %51 : vector<256x512xf32> to vector<256x512xbf16>
    %c0_39 = arith.constant 0 : index
    %c0_40 = arith.constant 0 : index
    %53 = vector.load %arg15[%c0_39, %c0_40] : memref<512x512xbf16, #tpu.memory_space<vmem>>, vector<512x512xbf16>
    %cst_41 = arith.constant dense<0.000000e+00> : vector<256x512xf32>
    %54 = tpu.matmul %52, %53, %cst_41 {dimension_numbers = #tpu.dot_dimension_numbers<[1], [0], [0], [1], [0, 0, 1, 1], [], []>} : vector<256x512xbf16>, vector<512x512xbf16>, vector<256x512xf32> -> vector<256x512xf32>
    %c0_42 = arith.constant 0 : index
    %c0_43 = arith.constant 0 : index
    %55 = vector.load %arg16[%c0_42, %c0_43] : memref<1x512xf32, #tpu.memory_space<vmem>>, vector<1x512xf32>
    %56 = vector.broadcast %55 : vector<1x512xf32> to vector<256x512xf32>
    %57 = arith.addf %54, %56 : vector<256x512xf32>
    %cst_44 = arith.constant 0.000000e+00 : f32
    %58 = vector.broadcast %cst_44 : f32 to vector<256x512xf32>
    %59 = arith.maximumf %57, %58 : vector<256x512xf32>
    %c0_45 = arith.constant 0 : index
    %c0_46 = arith.constant 0 : index
    %60 = vector.load %arg17[%c0_45, %c0_46] : memref<1x512xf32, #tpu.memory_space<vmem>>, vector<1x512xf32>
    %61 = vector.broadcast %60 : vector<1x512xf32> to vector<256x512xf32>
    %62 = arith.mulf %59, %61 : vector<256x512xf32>
    %cst_47 = arith.constant dense<0.000000e+00> : vector<256xf32>
    %63 = vector.multi_reduction <add>, %62, %cst_47 [1] : vector<256x512xf32> to vector<256xf32>
    %64 = vector.shape_cast %63 : vector<256xf32> to vector<256x1xf32>
    %c0_48 = arith.constant 0 : index
    %c0_49 = arith.constant 0 : index
    %65 = vector.load %arg18[%c0_48, %c0_49] : memref<1x1xf32, #tpu.memory_space<vmem>>, vector<1x1xf32>
    %66 = vector.broadcast %65 : vector<1x1xf32> to vector<256x1xf32>
    %67 = arith.addf %64, %66 : vector<256x1xf32>
    %68 = math.tanh %67 : vector<256x1xf32>
    %c0_50 = arith.constant 0 : index
    %c0_51 = arith.constant 0 : index
    %69 = vector.load %arg19[%c0_50, %c0_51] : memref<256x1xf32, #tpu.memory_space<vmem>>, vector<256x1xf32>
    tpu.vector_store %arg19[%c0_50, %c0_51], %68 {strides = array<i32>} : memref<256x1xf32, #tpu.memory_space<vmem>>, vector<256x1xf32>,
    return
  }
  func.func @transform_0(%arg0: i32) -> (i32, i32) {
    %c0_i32 = arith.constant 0 : i32
    %c0_i32_0 = arith.constant 0 : i32
    return %arg0, %c0_i32 : i32, i32
  }
  func.func @transform_1(%arg0: i32) -> (i32, i32) {
    %c0_i32 = arith.constant 0 : i32
    %c0_i32_0 = arith.constant 0 : i32
    %c0_i32_1 = arith.constant 0 : i32
    return %c0_i32, %c0_i32_0 : i32, i32
  }
  func.func @transform_2(%arg0: i32) -> (i32, i32) {
    %c0_i32 = arith.constant 0 : i32
    %c0_i32_0 = arith.constant 0 : i32
    %c0_i32_1 = arith.constant 0 : i32
    return %c0_i32, %c0_i32_0 : i32, i32
  }
  func.func @transform_3(%arg0: i32) -> (i32, i32) {
    %c0_i32 = arith.constant 0 : i32
    %c0_i32_0 = arith.constant 0 : i32
    %c0_i32_1 = arith.constant 0 : i32
    return %c0_i32, %c0_i32_0 : i32, i32
  }
  func.func @transform_4(%arg0: i32) -> (i32, i32) {
    %c0_i32 = arith.constant 0 : i32
    %c0_i32_0 = arith.constant 0 : i32
    %c0_i32_1 = arith.constant 0 : i32
    return %c0_i32, %c0_i32_0 : i32, i32
  }
  func.func @transform_5(%arg0: i32) -> (i32, i32) {
    %c0_i32 = arith.constant 0 : i32
    %c0_i32_0 = arith.constant 0 : i32
    %c0_i32_1 = arith.constant 0 : i32
    return %c0_i32, %c0_i32_0 : i32, i32
  }
  func.func @transform_6(%arg0: i32) -> (i32, i32) {
    %c0_i32 = arith.constant 0 : i32
    %c0_i32_0 = arith.constant 0 : i32
    %c0_i32_1 = arith.constant 0 : i32
    return %c0_i32, %c0_i32_0 : i32, i32
  }
  func.func @transform_7(%arg0: i32) -> (i32, i32) {
    %c0_i32 = arith.constant 0 : i32
    %c0_i32_0 = arith.constant 0 : i32
    %c0_i32_1 = arith.constant 0 : i32
    return %c0_i32, %c0_i32_0 : i32, i32
  }
  func.func @transform_8(%arg0: i32) -> (i32, i32) {
    %c0_i32 = arith.constant 0 : i32
    %c0_i32_0 = arith.constant 0 : i32
    %c0_i32_1 = arith.constant 0 : i32
    return %c0_i32, %c0_i32_0 : i32, i32
  }
  func.func @transform_9(%arg0: i32) -> (i32, i32) {
    %c0_i32 = arith.constant 0 : i32
    %c0_i32_0 = arith.constant 0 : i32
    %c0_i32_1 = arith.constant 0 : i32
    return %c0_i32, %c0_i32_0 : i32, i32
  }
  func.func @transform_10(%arg0: i32) -> (i32, i32) {
    %c0_i32 = arith.constant 0 : i32
    %c0_i32_0 = arith.constant 0 : i32
    %c0_i32_1 = arith.constant 0 : i32
    return %c0_i32, %c0_i32_0 : i32, i32
  }
  func.func @transform_11(%arg0: i32) -> (i32, i32) {
    %c0_i32 = arith.constant 0 : i32
    %c0_i32_0 = arith.constant 0 : i32
    %c0_i32_1 = arith.constant 0 : i32
    return %c0_i32, %c0_i32_0 : i32, i32
  }
  func.func @transform_12(%arg0: i32) -> (i32, i32) {
    %c0_i32 = arith.constant 0 : i32
    %c0_i32_0 = arith.constant 0 : i32
    %c0_i32_1 = arith.constant 0 : i32
    return %c0_i32, %c0_i32_0 : i32, i32
  }
  func.func @transform_13(%arg0: i32) -> (i32, i32) {
    %c0_i32 = arith.constant 0 : i32
    %c0_i32_0 = arith.constant 0 : i32
    %c0_i32_1 = arith.constant 0 : i32
    return %c0_i32, %c0_i32_0 : i32, i32
  }
  func.func @transform_14(%arg0: i32) -> (i32, i32) {
    %c0_i32 = arith.constant 0 : i32
    %c0_i32_0 = arith.constant 0 : i32
    %c0_i32_1 = arith.constant 0 : i32
    return %c0_i32, %c0_i32_0 : i32, i32
  }
  func.func @transform_15(%arg0: i32) -> (i32, i32) {
    %c0_i32 = arith.constant 0 : i32
    %c0_i32_0 = arith.constant 0 : i32
    %c0_i32_1 = arith.constant 0 : i32
    return %c0_i32, %c0_i32_0 : i32, i32
  }
  func.func @transform_16(%arg0: i32) -> (i32, i32) {
    %c0_i32 = arith.constant 0 : i32
    %c0_i32_0 = arith.constant 0 : i32
    %c0_i32_1 = arith.constant 0 : i32
    return %c0_i32, %c0_i32_0 : i32, i32
  }
  func.func @transform_17(%arg0: i32) -> (i32, i32) {
    %c0_i32 = arith.constant 0 : i32
    %c0_i32_0 = arith.constant 0 : i32
    %c0_i32_1 = arith.constant 0 : i32
    return %c0_i32, %c0_i32_0 : i32, i32
  }
  func.func @transform_18(%arg0: i32) -> (i32, i32) {
    %c0_i32 = arith.constant 0 : i32
    %c0_i32_0 = arith.constant 0 : i32
    return %arg0, %c0_i32 : i32, i32
  }
}

</mosaic_0001>

<bundles_post_ra>
// kernel: tpu_custom_call.1
= control target key start
LH: loop header
LB: loop body
LE: loop exit
PB: predicated region body
PF: predicated region fallthrough
CT: control target
= control target key end

     0   :  { %s20980_s0 = inlined_call_operand.vmem [shape: f32[512,258], index: 0, kind: input, shape index: {}]   ;;  %s20981_s1 = inlined_call_operand.vmem [shape: bf16[258,512], index: 1, kind: input, shape index: {}]   ;;  %s20982_s2 = inlined_call_operand.vmem [shape: f32[1,512], index: 2, kind: input, shape index: {}]   ;;  %s20983_s3 = inlined_call_operand.vmem [shape: bf16[512,512], index: 3, kind: input, shape index: {}]   ;;  %s20984_s4 = inlined_call_operand.vmem [shape: f32[1,512], index: 4, kind: input, shape index: {}]   ;;  %s20985_s5 = inlined_call_operand.vmem [shape: bf16[512,512], index: 5, kind: input, shape index: {}]   ;;  %s20986_s6 = inlined_call_operand.vmem [shape: f32[1,512], index: 6, kind: input, shape index: {}]   ;;  %s20987_s7 = inlined_call_operand.hbm [shape: bf16[512,256], index: 7, kind: input, shape index: {}]   ;;  %s20988_s8 = inlined_call_operand.vmem [shape: f32[1,256], index: 8, kind: input, shape index: {}]   ;;  %s20989_s9 = inlined_call_operand.hbm [shape: bf16[256,512], index: 9, kind: input, shape index: {}]   ;;  %s20990_s10 = inlined_call_operand.hbm [shape: bf16[258,512], index: 10, kind: input, shape index: {}]   ;;  %s20991_s11 = inlined_call_operand.vmem [shape: f32[1,512], index: 11, kind: input, shape index: {}]   ;;  %s20992_s12 = inlined_call_operand.hbm [shape: bf16[512,512], index: 12, kind: input, shape index: {}]   ;;  %s20993_s13 = inlined_call_operand.vmem [shape: f32[1,512], index: 13, kind: input, shape index: {}]   ;;  %s20994_s14 = inlined_call_operand.hbm [shape: bf16[512,512], index: 14, kind: input, shape index: {}]   ;;  %s20995_s15 = inlined_call_operand.vmem [shape: f32[1,512], index: 15, kind: input, shape index: {}]   ;;  %s20996_s16 = inlined_call_operand.vmem [shape: f32[1,512], index: 16, kind: input, shape index: {}]   ;;  %s20997_s17 = inlined_call_operand.<no memory space> [shape: f32[1,1], index: 17, kind: input, shape index: {}]   ;;  %s20998_s18 = inlined_call_operand.vmem [shape: f32[512,1], index: 18, kind: output, shape index: {}]  }
   0x1   :  { %21107 = sst [smem:[#allocation63_spill]] %s20980_s0  ;;  %v23_v0 = vstv %s20997_s17 }
   0x2   :  { %21108 = sst [smem:[#allocation64_spill]] %s20981_s1  ;;  %24 = vst [vmem:[#allocation2] sm:$0x1] %v23_v0 }
   0x3   :  { %21109 = sst [smem:[#allocation65_spill]] %s20982_s2 }
   0x4   :  { %21110 = sst [smem:[#allocation66_spill]] %s20995_s15 }
   0x5   :  { %21111 = sst [smem:[#allocation67_spill]] %s20996_s16 }
   0x6   :  { %21112 = sst [smem:[#allocation68_spill]] %s20998_s18 }
   0x7   :  { %25 = vsyncpa [#allocation4], 0 }
   0x8   :  { %26 = vsyncpa [#allocation6], 0 }
   0x9   :  { %27 = vsyncpa [#allocation9], 0  ;;  %s16976_s29 = smov 0  }
   0xa LB: > { %s16868_s30 = smov [#allocation5]   ;;  %s21001_s19 = sadd.s32 4294967295, %s16866_s29   ;;  %s16866_s29 = sphi %s16976_s29, %s33_s29  }
   0xb   : > { %s493_s0 = sshll.u32 %s16868_s30, 4  ;;  %p12890_p0 = scmp.ge.s32.totalorder %s16866_s29, 1  ;;  %s16990_s0 = int_to_ptr.vmem [resolvable:$true] %s493_s0 }
   0xc   : > { %p447_p1 = scmp.lt.s32.totalorder %s16866_s29, 3  ;;  %p16986_p2 = scmp.eq.s32.totalorder %s21001_s19, 0 }
   0xd   : > { %s16869_s20 = smov [#allocation8]   ;;  %s16870_s2 = smov [#allocation3]  }
   0xe   : > { %s21113_s17 = scalar_select %p16986_p2, 1, 0 }
   0xf   : > { %p16992_p3 = pnand %p12890_p0, %p447_p1  ;;  %s522_s21 = sshll.u32 %s16869_s20, 4  ;;  %s16998_s21 = int_to_ptr.vmem [resolvable:$true] %s522_s21 }
  0x10   : > { %s477_s23 = sshll.u32 %s16870_s2, 4  ;;  %s16708_s26 = scalar_lea.hbm %s20989_s9, 8192  ;;  %s17006_s23 = int_to_ptr.vmem [resolvable:$true] %s477_s23 }
  0x11   : > { %s21114_s1 = scalar_select %p16992_p3, 1, 0 }
  0x12   : > { %p15439_p4 = pneg %p16992_p3  ;;  %p16709_p6 = scmp.ne.s32.totalorder %s20989_s9, %s16708_s26 }
  0x13   : > { %p16715_p10 = scmp.lt.u32.totalorder %s16708_s26, %s20989_s9 }
  0x14   : > { %p17002_p5 = pnand %p16986_p2, %p15439_p4 }
  0x16   : > { %p17016_p7 = pneg %p17002_p5 }
  0x18   : > { %p16711_p8 = pnand %p17016_p7, %p16709_p6 }
  0x1a   : > { %p16712_p9 = pneg %p16711_p8 }
  0x1c   : > { %p16717_p11 = pnand %p16715_p10, %p16712_p9 }
  0x1e   : > { %16720 = shalt.err (!%p16717_p11)
}
  0x1f   : > { %s16721_s24 = scalar_lea.vmem %s16990_s0, 8192  ;;  %p16729_p1 = scmp.lt.s32.totalorder %s16990_s0, %s16990_s0 }
  0x20   : > { %p16722_p12 = scmp.ne.s32.totalorder %s16990_s0, %s16721_s24  ;;  %p16730_p4 = scmp.lt.s32.totalorder %s16721_s24, %s16721_s24 }
  0x22   : > { %p16724_p13 = pnand %p16722_p12, %p17016_p7  ;;  %p16731_p6 = por %p16730_p4, %p16729_p1 }
  0x24   : > { %p16725_p0 = pneg %p16724_p13 }
  0x26   : > { %p16732_p8 = pnand %p16731_p6, %p16725_p0 }
  0x28   : > { %16735 = shalt.err (!%p16732_p8)
}
  0x29   : > { %s21002_s25 = smov 256   ;;  %s21004_s26 = smov 16  }
  0x2a   : > { %15445 = dma.hbm_to_vmem [thread:$0]  (!%p17002_p5), %s20989_s9, 8192, %s16990_s0, [#allocation6], %s21002_s25, %s21002_s25, %s21004_s26  }
  0x2b   : > { %s16736_s24 = scalar_lea.hbm %s20992_s12, 16384 }
  0x2c   : > { %p16737_p9 = scmp.ne.s32.totalorder %s20992_s12, %s16736_s24  ;;  %p16743_p12 = scmp.lt.u32.totalorder %s16736_s24, %s20992_s12 }
  0x2e   : > { %p16739_p10 = pnand %p16737_p9, %p17016_p7 }
  0x30   : > { %p16740_p11 = pneg %p16739_p10 }
  0x32   : > { %p16745_p13 = pnand %p16743_p12, %p16740_p11 }
  0x34   : > { %16748 = shalt.err (!%p16745_p13)
}
  0x35   : > { %s16749_s0 = scalar_lea.vmem %s16998_s21, 16384  ;;  %p16757_p6 = scmp.lt.s32.totalorder %s16998_s21, %s16998_s21 }
  0x36   : > { %p16750_p0 = scmp.ne.s32.totalorder %s16998_s21, %s16749_s0  ;;  %p16758_p8 = scmp.lt.s32.totalorder %s16749_s0, %s16749_s0 }
  0x38   : > { %p16752_p1 = pnand %p16750_p0, %p17016_p7  ;;  %p16759_p9 = por %p16758_p8, %p16757_p6 }
  0x3a   : > { %p16753_p4 = pneg %p16752_p1 }
  0x3c   : > { %p16760_p10 = pnand %p16759_p9, %p16753_p4 }
  0x3e   : > { %16763 = shalt.err (!%p16760_p10)
}
  0x3f   : > { %15451 = dma.hbm_to_vmem [thread:$0]  (!%p17002_p5), %s20992_s12, 16384, %s16998_s21, [#allocation9], %s21002_s25, %s21002_s25, %s21004_s26  }
  0x40   : > { %s16764_s27 = scalar_lea.hbm %s20987_s7, 8192 }
  0x41   : > { %p16765_p11 = scmp.ne.s32.totalorder %s20987_s7, %s16764_s27  ;;  %p16771_p0 = scmp.lt.u32.totalorder %s16764_s27, %s20987_s7 }
  0x43   : > { %p16767_p12 = pnand %p16765_p11, %p17016_p7 }
  0x45   : > { %p16768_p13 = pneg %p16767_p12 }
  0x47   : > { %p16773_p1 = pnand %p16771_p0, %p16768_p13 }
  0x49   : > { %16776 = shalt.err (!%p16773_p1)
}
  0x4a   : > { %s16777_s21 = scalar_lea.vmem %s17006_s23, 8192  ;;  %p16785_p9 = scmp.lt.s32.totalorder %s17006_s23, %s17006_s23 }
  0x4b   : > { %p16778_p4 = scmp.ne.s32.totalorder %s17006_s23, %s16777_s21  ;;  %p16786_p10 = scmp.lt.s32.totalorder %s16777_s21, %s16777_s21 }
  0x4d   : > { %p16780_p6 = pnand %p16778_p4, %p17016_p7  ;;  %p16787_p11 = por %p16786_p10, %p16785_p9 }
  0x4f   : > { %p16781_p8 = pneg %p16780_p6 }
  0x51   : > { %p16788_p12 = pnand %p16787_p11, %p16781_p8 }
  0x53   : > { %16791 = shalt.err (!%p16788_p12)
}
  0x54   : > { %s16873_s0 = smov 128   ;;  %s16874_s15 = smov 8  }
  0x55   : > { %15442 = dma.hbm_to_vmem [thread:$0]  (!%p17002_p5), %s20987_s7, 8192, %s17006_s23, [#allocation4], %s16873_s0, %s16873_s0, %s16874_s15  }
  0x56   : > { %s16875_s19 = smov [#allocation7]   ;;  %s16876_s28 = smov [#allocation10]  }
  0x57   : > { %s506_s27 = sshll.u32 %s16875_s19, 4  ;;  %s538_s20 = sshll.u32 %s16876_s28, 4  ;;  %s507_s27 = int_to_ptr.vmem [resolvable:$true] %s506_s27  ;;  %s17089_s20 = int_to_ptr.vmem [resolvable:$true] %s538_s20 }
  0x58   : > { %s16792_s21 = scalar_lea.hbm %s20990_s10, 8448 }
  0x59   : > { %p16793_p13 = scmp.ne.s32.totalorder %s20990_s10, %s16792_s21  ;;  %p16799_p4 = scmp.lt.u32.totalorder %s16792_s21, %s20990_s10 }
  0x5b   : > { %p16795_p0 = pnand %p16793_p13, %p17016_p7 }
  0x5d   : > { %p16796_p1 = pneg %p16795_p0 }
  0x5f   : > { %p16801_p6 = pnand %p16799_p4, %p16796_p1 }
  0x61   : > { %16804 = shalt.err (!%p16801_p6)
}
  0x62   : > { %s16805_s0 = scalar_lea.vmem %s507_s27, 8448  ;;  %p16813_p11 = scmp.lt.s32.totalorder %s507_s27, %s507_s27 }
  0x63   : > { %p16806_p8 = scmp.ne.s32.totalorder %s507_s27, %s16805_s0  ;;  %p16814_p12 = scmp.lt.s32.totalorder %s16805_s0, %s16805_s0 }
  0x65   : > { %p16808_p9 = pnand %p16806_p8, %p17016_p7  ;;  %p16815_p2 = por %p16814_p12, %p16813_p11 }
  0x67   : > { %p16809_p10 = pneg %p16808_p9 }
  0x69   : > { %p16816_p3 = pnand %p16815_p2, %p16809_p10 }
  0x6b   : > { %16819 = shalt.err (!%p16816_p3)
}
  0x6c   : > { %s21117_s25 = smov 16   ;;  %s21118_s26 = smov 256  }
  0x6d   : > { %15448 = dma.hbm_to_vmem [thread:$0]  (!%p17002_p5), %s20990_s10, 8448, %s507_s27, [#allocation6], %s21118_s26, %s21118_s26, %s21117_s25  }
  0x6e   : > { %s16820_s2 = scalar_lea.hbm %s20994_s14, 16384 }
  0x6f   : > { %p16821_p13 = scmp.ne.s32.totalorder %s20994_s14, %s16820_s2  ;;  %p16827_p0 = scmp.lt.u32.totalorder %s16820_s2, %s20994_s14 }
  0x71   : > { %p16823_p2 = pnand %p16821_p13, %p17016_p7 }
  0x73   : > { %p16824_p3 = pneg %p16823_p2 }
  0x75   : > { %p16829_p1 = pnand %p16827_p0, %p16824_p3 }
  0x77   : > { %16832 = shalt.err (!%p16829_p1)
}
  0x78   : > { %s16833_s27 = scalar_lea.vmem %s17089_s20, 16384  ;;  %p16841_p9 = scmp.lt.s32.totalorder %s17089_s20, %s17089_s20 }
  0x79   : > { %p16834_p4 = scmp.ne.s32.totalorder %s17089_s20, %s16833_s27  ;;  %p16842_p10 = scmp.lt.s32.totalorder %s16833_s27, %s16833_s27 }
  0x7b   : > { %p16836_p6 = pnand %p16834_p4, %p17016_p7  ;;  %p16843_p11 = por %p16842_p10, %p16841_p9 }
  0x7d   : > { %p16837_p8 = pneg %p16836_p6 }
  0x7f   : > { %p16844_p12 = pnand %p16843_p11, %p16837_p8 }
  0x81   : > { %16847 = shalt.err (!%p16844_p12)
}
  0x82   : > { %15454 = dma.hbm_to_vmem [thread:$0]  (!%p17002_p5), %s20994_s14, 16384, %s17089_s20, [#allocation9], %s21118_s26, %s21118_s26, %s21117_s25  }
  0x83   : > { %p21119_p13 = scmp.ne.s32.totalorder %s21114_s1, 0 }
  0x85   : > { %573 = sbr.rel (%p21119_p13) target bundleno = 2855 (0xb27), region = 92 }
  0x8c   : > { %p21120_p7 = scmp.ne.s32.totalorder %s21113_s17, 0 }
  0x8e   : > { %16853 = dma.done.wait (%p21120_p7), [#allocation4], 8192  }
  0x8f   : > { %16855 = vsyncadd (%p21120_p7), [#allocation4], 4294959104 }
  0x90   : > { %16857 = dma.done.wait (%p21120_p7), [#allocation6], 16640  }
  0x91   : > { %16859 = vsyncadd (%p21120_p7), [#allocation6], 4294950656 }
  0x92   : > { %16861 = dma.done.wait (%p21120_p7), [#allocation9], 32768  }
  0x93   : > { %16863 = vsyncadd (%p21120_p7), [#allocation9], 4294934528  ;;  %v21009_v1 = vmov 0   ;;  %s21121_s30 = sld [smem:[#allocation64_spill]]  ;;  %s21122_s28 = sadd.s32 4294967295, %s16866_s29   ;;  %vm1269_vm0 = vcmask 1040384  }
  0x94   : > { %1507 = vmatprep.mubr.bf16.mxu0 %v21009_v1  ;;  %s12903_s2 = sshll.u32 %s21122_s28, 5  ;;  %s21123_s21 = sld [smem:[#allocation63_spill]]  ;;  %vm1220_vm1 = vcmask 15360   ;;  %vm12749_vm2 = vcmask 7168  }
  0x95   : > { %p645_p5 = scmp.lt.s32.totalorder %s12903_s2, 63  ;;  %s21163_s28 = sld [smem:[#allocation65_spill]] }
  0x96   : > { %s21271_s26 = sld [smem:[#allocation66_spill]]  ;;  %s21272_s17 = sld [smem:[#allocation67_spill]] }
  0x97   : > { %s21275_s2 = smov (!%p645_p5, %s12903_s2), 63  ;;  %s21273_s23 = sld [smem:[#allocation68_spill]] }
  0x98   : > { %s15418_s25 = smul.u32 24, %s21275_s2  ;;  %s12906_s19 = sshll.u32 %s21275_s2, 3 }
  0x99   : > { %v15483_v2 = vld [vmem:[%s21121_s30 + $0x4] ss:$16 sps:$4 sm:$0xff]   ;;  %v15485_v3 = vld [vmem:[%s21121_s30] ss:$16 sps:$4 sm:$0xff]   ;;  %v15535_v58 = vld [vmem:[%s21121_s30 + $0xc] ss:$16 sps:$4 sm:$0xff]  }
  0x9a   : > { %1282 = vmatprep.subr.bf16.mxu1 %v15483_v2  ;;  %v15486_v4 = vld [vmem:[%s21121_s30 + $0x24] ss:$16 sps:$4 sm:$0xff]   ;;  %v15488_v5 = vld [vmem:[%s21121_s30 + $0x20] ss:$16 sps:$4 sm:$0xff]   ;;  %s17194_s16 = scalar_lea.vmem %s21123_s21, %s15418_s25  ;;  %v15533_v0 = vld [vmem:[%s21121_s30 + $0x8] ss:$16 sps:$4 sm:$0xff]  }
  0x9b   : > { %1283 = vmatpush1.bf16.msra.mxu1 %v15485_v3  ;;  %v15489_v6 = vld [vmem:[%s21121_s30 + $0x44] ss:$16 sps:$4 sm:$0xff]   ;;  %v15491_v7 = vld [vmem:[%s21121_s30 + $0x40] ss:$16 sps:$4 sm:$0xff]   ;;  %v659_v16 = vld [vmem:[%s17194_s16 + $0x8] sm:$0xff] }
  0x9c   : > { %1284 = vmatprep.subr.bf16.mxu1 %v15486_v4  ;;  %v15492_v8 = vld [vmem:[%s21121_s30 + $0x64] ss:$16 sps:$4 sm:$0xff]   ;;  %v15494_v9 = vld [vmem:[%s21121_s30 + $0x60] ss:$16 sps:$4 sm:$0xff]   ;;  %v663_v25 = vld [vmem:[%s17194_s16 + $0x28] sm:$0xff] }
  0x9d   : > { %v15495_v10 = vld [vmem:[%s21121_s30 + $0x84] ss:$16 sps:$4 sm:$0xff]   ;;  %v15497_v11 = vld [vmem:[%s21121_s30 + $0x80] ss:$16 sps:$4 sm:$0xff]   ;;  %v669_v30 = vld [vmem:[%s17194_s16 + $0x58] sm:$0xff]  ;;  %s20882_s27 = scalar_lea.vmem %s21273_s23, %s12906_s19 }
  0x9e   : > { %v15498_v12 = vld [vmem:[%s21121_s30 + $0xa4] ss:$16 sps:$4 sm:$0xff]   ;;  %v15500_v13 = vld [vmem:[%s21121_s30 + $0xa0] ss:$16 sps:$4 sm:$0xff]   ;;  %v675_v37 = vld [vmem:[%s17194_s16 + $0x88] sm:$0xff] }
  0x9f   : > { %1285 = vmatpush1.bf16.msra.mxu1 %v15488_v5  ;;  %v15501_v14 = vld [vmem:[%s21121_s30 + $0xc4] ss:$16 sps:$4 sm:$0xff]   ;;  %v15503_v20 = vld [vmem:[%s21121_s30 + $0xc0] ss:$16 sps:$4 sm:$0xff]   ;;  %v681_v44 = vld [vmem:[%s17194_s16 + $0xb8] sm:$0xff] }
  0xa0   : > { %1286 = vmatprep.subr.bf16.mxu1 %v15489_v6  ;;  %v866_v15 = vld [vmem:[%s21121_s30 + $0x200] sm:$0x11]  ;;  %v660_v24 = vld [vmem:[%s17194_s16 + $0x10] sm:$0xff]  ;;  %v687_v51 = vld [vmem:[%s17194_s16 + $0xe8] sm:$0xff] }
  0xa1   : > { %v12972_v17 = vcombine.high %v866_v15, %v866_v15  ;;  %v662_v18 = vld [vmem:[%s17194_s16 + $0x20] sm:$0xff]  ;;  %v12971_v19 = vcombine.low %v866_v15, %v866_v15  ;;  %v17220_v26 = vpack.c.bf16 %v663_v25, %v660_v24  ;;  %v672_v36 = vld [vmem:[%s17194_s16 + $0x70] sm:$0xff]  ;;  %v661_v57 = vld [vmem:[%s17194_s16 + $0x18] sm:$0xff] }
  0xa2   : > { %v17210_v21 = vpack.c.bf16 %v662_v18, %v659_v16  ;;  %v15504_v22 = vld [vmem:[%s21121_s30 + $0xe4] ss:$16 sps:$4 sm:$0xff]   ;;  %v15506_v27 = vld [vmem:[%s21121_s30 + $0xe0] ss:$16 sps:$4 sm:$0xff]   ;;  %v17258_v40 = vpack.c.bf16 %v675_v37, %v672_v36  ;;  %v665_v59 = vld [vmem:[%s17194_s16 + $0x38] sm:$0xff] }
  0xa3   : > { %1287 = vmatpush1.bf16.msra.mxu1 %v15491_v7  ;;  %12975 = vmatprep.subr.msk.bf16.mxu0 %vm1269_vm0, %v12972_v17  ;;  %v1271_v23 = vsel %vm1269_vm0, %v12971_v19, 0  ;;  %21125 = vst [vmem:[#allocation15_spill] sm:$0xff] %v17220_v26  ;;  %v15507_v28 = vld [vmem:[%s21121_s30 + $0x104] ss:$16 sps:$4 sm:$0xff]   ;;  %v15509_v31 = vld [vmem:[%s21121_s30 + $0x100] ss:$16 sps:$4 sm:$0xff]  }
  0xa4   : > { %1288 = vmatprep.subr.bf16.mxu1 %v15492_v8  ;;  %21124 = vst [vmem:[#allocation14_spill] sm:$0xff] %v17210_v21  ;;  %1314 = vmatprep.mubr.bf16.mxu1 %v17210_v21  ;;  %v666_v29 = vld [vmem:[%s17194_s16 + $0x40] sm:$0xff]  ;;  %21127 = vst [vmem:[#allocation17_spill] sm:$0xff] %v17258_v40  ;;  %v684_v50 = vld [vmem:[%s17194_s16 + $0xd0] sm:$0xff] }
  0xa5   : > { %1476 = vmatpush1.bf16.msra.mxu0 %v1271_v23  ;;  %v15510_v32 = vld [vmem:[%s21121_s30 + $0x124] ss:$16 sps:$4 sm:$0xff]   ;;  %v17239_v33 = vpack.c.bf16 %v669_v30, %v666_v29  ;;  %v15512_v34 = vld [vmem:[%s21121_s30 + $0x120] ss:$16 sps:$4 sm:$0xff]   ;;  %v17296_v54 = vpack.c.bf16 %v687_v51, %v684_v50  ;;  %v693_v62 = vld [vmem:[%s17194_s16 + $0x118] sm:$0xff] }
  0xa6   : > { %v15513_v35 = vld [vmem:[%s21121_s30 + $0x144] ss:$16 sps:$4 sm:$0xff]   ;;  %v15515_v38 = vld [vmem:[%s21121_s30 + $0x140] ss:$16 sps:$4 sm:$0xff]   ;;  %v15538_v3 = vld [vmem:[%s21121_s30 + $0x2c] ss:$16 sps:$4 sm:$0xff]  }
  0xa7   : > { %1289 = vmatpush1.bf16.msra.mxu1 %v15494_v9  ;;  %21126 = vst [vmem:[#allocation16_spill] sm:$0xff] %v17239_v33  ;;  %v15516_v39 = vld [vmem:[%s21121_s30 + $0x164] ss:$16 sps:$4 sm:$0xff]   ;;  %v15518_v41 = vld [vmem:[%s21121_s30 + $0x160] ss:$16 sps:$4 sm:$0xff]   ;;  %21129 = vst [vmem:[#allocation19_spill] sm:$0xff] %v17296_v54 }
  0xa8   : > { %1290 = vmatprep.subr.bf16.mxu1 %v15495_v10  ;;  %12976 = vmatmul.mubr.msk.bf16.vlgmr.msra.gmra.mrb[0].mxu0 %vm1220_vm1, %v17220_v26  ;;  %v15519_v42 = vld [vmem:[%s21121_s30 + $0x184] ss:$16 sps:$4 sm:$0xff]   ;;  %v15521_v45 = vld [vmem:[%s21121_s30 + $0x180] ss:$16 sps:$4 sm:$0xff]   ;;  %v667_v6 = vld [vmem:[%s17194_s16 + $0x48] sm:$0xff] }
  0xa9   : > { %1517 = vmatprep.mubr.bf16.mxu0 %v21009_v1  ;;  %v678_v43 = vld [vmem:[%s17194_s16 + $0xa0] sm:$0xff]  ;;  %v668_v60 = vld [vmem:[%s17194_s16 + $0x50] sm:$0xff]  ;;  %v15536_v7 = vld [vmem:[%s21121_s30 + $0x28] ss:$16 sps:$4 sm:$0xff]  }
  0xaa   : > { %v15522_v46 = vld [vmem:[%s21121_s30 + $0x1a4] ss:$16 sps:$4 sm:$0xff]   ;;  %v17277_v47 = vpack.c.bf16 %v681_v44, %v678_v43  ;;  %v15524_v48 = vld [vmem:[%s21121_s30 + $0x1a0] ss:$16 sps:$4 sm:$0xff]   ;;  %v17318_v2 = vpack.c.bf16 %v668_v60, %v665_v59  ;;  %v671_v8 = vld [vmem:[%s17194_s16 + $0x68] sm:$0xff] }
  0xab   : > { %1291 = vmatpush1.bf16.msra.mxu1 %v15497_v11  ;;  %v15525_v49 = vld [vmem:[%s21121_s30 + $0x1c4] ss:$16 sps:$4 sm:$0xff]   ;;  %v15527_v52 = vld [vmem:[%s21121_s30 + $0x1c0] ss:$16 sps:$4 sm:$0xff]   ;;  %v15541_v10 = vld [vmem:[%s21121_s30 + $0x4c] ss:$16 sps:$4 sm:$0xff]  }
  0xac   : > { %1292 = vmatprep.subr.bf16.mxu1 %v15498_v12  ;;  %21128 = vst [vmem:[#allocation18_spill] sm:$0xff] %v17277_v47  ;;  %v15528_v53 = vld [vmem:[%s21121_s30 + $0x1e4] ss:$16 sps:$4 sm:$0xff]   ;;  %v15530_v55 = vld [vmem:[%s21121_s30 + $0x1e0] ss:$16 sps:$4 sm:$0xff]   ;;  %21131 = vst [vmem:[#allocation21_spill] sm:$0xff] %v17318_v2 }
  0xad   : > { %v658_v56 = vld [vmem:[%s17194_s16] sm:$0xff]  ;;  %v664_v5 = vld [vmem:[%s17194_s16 + $0x30] sm:$0xff]  ;;  %v699_v12 = vld [vmem:[%s17194_s16 + $0x148] sm:$0xff] }
  0xae   : > { %v690_v61 = vld [vmem:[%s17194_s16 + $0x100] sm:$0xff]  ;;  %v17313_v63 = vpack.c.bf16 %v661_v57, %v658_v56  ;;  %v696_v11 = vld [vmem:[%s17194_s16 + $0x130] sm:$0xff]  ;;  %v15539_v15 = vld [vmem:[%s21121_s30 + $0x48] ss:$16 sps:$4 sm:$0xff]  }
  0xaf   : > { %1293 = vmatpush1.bf16.msra.mxu1 %v15500_v13  ;;  %v17323_v4 = vpack.c.bf16 %v693_v62, %v690_v61  ;;  %v674_v9 = vld [vmem:[%s17194_s16 + $0x80] sm:$0xff]  ;;  %v17342_v13 = vpack.c.bf16 %v667_v6, %v664_v5  ;;  %v15544_v16 = vld [vmem:[%s21121_s30 + $0x6c] ss:$16 sps:$4 sm:$0xff]   ;;  %v17352_v17 = vpack.c.bf16 %v699_v12, %v696_v11  ;;  %v15542_v23 = vld [vmem:[%s21121_s30 + $0x68] ss:$16 sps:$4 sm:$0xff]  }
  0xb0   : > { %1294 = vmatprep.subr.bf16.mxu1 %v15501_v14  ;;  %12977 = vmatmul.mubr.msk.bf16.gmra.mrb[4].mxu0 %vm1220_vm1, %v17239_v33  ;;  %21130 = vst [vmem:[#allocation20_spill] sm:$0xff] %v17313_v63  ;;  %v17344_v14 = vpack.c.bf16 %v674_v9, %v671_v8  ;;  %v670_v18 = vld [vmem:[%s17194_s16 + $0x60] sm:$0xff]  ;;  %v673_v19 = vld [vmem:[%s17194_s16 + $0x78] sm:$0xff]  ;;  %v683_v37 = vld [vmem:[%s17194_s16 + $0xc8] sm:$0xff] }
  0xb1   : > { %1527 = vmatprep.mubr.bf16.mxu0 %v21009_v1  ;;  %21132 = vst [vmem:[#allocation22_spill] sm:$0xff] %v17323_v4  ;;  %21133 = vst [vmem:[#allocation23_spill] sm:$0xff] %v17342_v13  ;;  %v15547_v24 = vld [vmem:[%s21121_s30 + $0x8c] ss:$16 sps:$4 sm:$0xff]   ;;  %v702_v25 = vld [vmem:[%s17194_s16 + $0x160] sm:$0xff]  ;;  %v17374_v29 = vpack.c.bf16 %v673_v19, %v670_v18 }
  0xb2   : > { %21134 = vst [vmem:[#allocation24_spill] sm:$0xff] %v17344_v14  ;;  %v15550_v30 = vld [vmem:[%s21121_s30 + $0xac] ss:$16 sps:$4 sm:$0xff]   ;;  %v15548_v36 = vld [vmem:[%s21121_s30 + $0xa8] ss:$16 sps:$4 sm:$0xff]   ;;  %v714_v56 = vld [vmem:[%s17194_s16 + $0x1c0] sm:$0xff] }
  0xb3   : > { %1295 = vmatpush1.bf16.msra.mxu1 %v15503_v20  ;;  %v677_v20 = vld [vmem:[%s17194_s16 + $0x98] sm:$0xff]  ;;  %21135 = vst [vmem:[#allocation25_spill] sm:$0xff] %v17374_v29  ;;  %v691_v5 = vld [vmem:[%s17194_s16 + $0x108] sm:$0xff]  ;;  %v698_v9 = vld [vmem:[%s17194_s16 + $0x140] sm:$0xff] }
  0xb4   : > { %1296 = vmatprep.subr.bf16.mxu1 %v15504_v22  ;;  %v680_v22 = vld [vmem:[%s17194_s16 + $0xb0] sm:$0xff]  ;;  %v15551_v43 = vld [vmem:[%s21121_s30 + $0xc8] ss:$16 sps:$4 sm:$0xff]   ;;  %v15562_v60 = vld [vmem:[%s21121_s30 + $0x12c] ss:$16 sps:$4 sm:$0xff]  }
  0xb5   : > { %v685_v50 = vld [vmem:[%s17194_s16 + $0xd8] sm:$0xff]  ;;  %v695_v8 = vld [vmem:[%s17194_s16 + $0x128] sm:$0xff]  ;;  %v15588_v11 = vld [vmem:[%s20983_s3 + $0x24] ss:$16 sps:$4 sm:$0xff]  }
  0xb6   : > { %v15554_v51 = vld [vmem:[%s21121_s30 + $0xe8] ss:$16 sps:$4 sm:$0xff]   ;;  %v720_v12 = vld [vmem:[%s17194_s16 + $0x1f0] sm:$0xff] }
  0xb7   : > { %1297 = vmatpush1.bf16.msra.mxu1 %v15506_v27  ;;  %v705_v27 = vld [vmem:[%s17194_s16 + $0x178] sm:$0xff] }
  0xb8   : > { %1298 = vmatprep.subr.bf16.mxu1 %v15507_v28  ;;  %12978 = vmatmul.mubr.msk.bf16.gmra.mrb[8].mxu0 %vm1220_vm1, %v17258_v40  ;;  %v15545_v28 = vld [vmem:[%s21121_s30 + $0x88] ss:$16 sps:$4 sm:$0xff]  }
  0xb9   : > { %1537 = vmatprep.mubr.bf16.mxu0 %v21009_v1  ;;  %v717_v57 = vld [vmem:[%s17194_s16 + $0x1d8] sm:$0xff] }
  0xba   : > { %v17439_v62 = vpack.c.bf16 %v717_v57, %v714_v56  ;;  %v15560_v6 = vld [vmem:[%s21121_s30 + $0x128] ss:$16 sps:$4 sm:$0xff]   ;;  %v15595_v56 = vld [vmem:[%s20983_s3 + $0x80] ss:$16 sps:$4 sm:$0xff]  }
  0xbb   : > { %1299 = vmatpush1.bf16.msra.mxu1 %v15509_v31  ;;  %v17379_v31 = vpack.c.bf16 %v680_v22, %v677_v20  ;;  %v15563_v18 = vld [vmem:[%s21121_s30 + $0x148] ss:$16 sps:$4 sm:$0xff]   ;;  %v15568_v20 = vld [vmem:[%s21121_s30 + $0x16c] ss:$16 sps:$4 sm:$0xff]   ;;  %v17478_v22 = vpack.c.bf16 %v698_v9, %v695_v8 }
  0xbc   : > { %1300 = vmatprep.subr.bf16.mxu1 %v15510_v32  ;;  %v17381_v32 = vpack.c.bf16 %v705_v27, %v702_v25  ;;  %v694_v25 = vld [vmem:[%s17194_s16 + $0x120] sm:$0xff]  ;;  %v697_v27 = vld [vmem:[%s17194_s16 + $0x138] sm:$0xff]  ;;  %v707_v57 = vld [vmem:[%s17194_s16 + $0x188] sm:$0xff] }
  0xbd   : > { %21136 = vst [vmem:[#allocation26_spill] sm:$0xff] %v17379_v31  ;;  %21142 = vst [vmem:[#allocation32_spill] sm:$0xff] %v17478_v22  ;;  %v15580_v9 = vld [vmem:[%s21121_s30 + $0x1ec] ss:$16 sps:$4 sm:$0xff]  }
  0xbf   : > { %1301 = vmatpush1.bf16.msra.mxu1 %v15512_v34  ;;  %v676_v34 = vld [vmem:[%s17194_s16 + $0x90] sm:$0xff] }
  0xc0   : > { %1302 = vmatprep.subr.bf16.mxu1 %v15513_v35  ;;  %12979 = vmatmul.mubr.msk.bf16.gmra.mrb[12].mxu0 %vm1220_vm1, %v17277_v47  ;;  %v679_v35 = vld [vmem:[%s17194_s16 + $0xa8] sm:$0xff] }
  0xc1   : > { %1547 = vmatprep.mubr.bf16.mxu0 %v21009_v1  ;;  %v17403_v44 = vpack.c.bf16 %v679_v35, %v676_v34  ;;  %v701_v34 = vld [vmem:[%s17194_s16 + $0x158] sm:$0xff]  ;;  %v704_v35 = vld [vmem:[%s17194_s16 + $0x170] sm:$0xff] }
  0xc3   : > { %1303 = vmatpush1.bf16.msra.mxu1 %v15515_v38  ;;  %v686_v38 = vld [vmem:[%s17194_s16 + $0xe0] sm:$0xff]  ;;  %21137 = vst [vmem:[#allocation27_spill] sm:$0xff] %v17403_v44 }
  0xc4   : > { %1304 = vmatprep.subr.bf16.mxu1 %v15516_v39  ;;  %v15553_v39 = vld [vmem:[%s21121_s30 + $0xcc] ss:$16 sps:$4 sm:$0xff]  }
  0xc7   : > { %1305 = vmatpush1.bf16.msra.mxu1 %v15518_v41  ;;  %v708_v41 = vld [vmem:[%s17194_s16 + $0x190] sm:$0xff] }
  0xc8   : > { %1306 = vmatprep.subr.bf16.mxu1 %v15519_v42  ;;  %12980 = vmatmul.mubr.msk.bf16.gmra.mrb[16].mxu0 %vm1220_vm1, %v17296_v54  ;;  %v711_v42 = vld [vmem:[%s17194_s16 + $0x1a8] sm:$0xff] }
  0xc9   : > { %1557 = vmatprep.mubr.bf16.mxu0 %v21009_v1 }
  0xcb   : > { %1307 = vmatpush1.bf16.msra.mxu1 %v15521_v45  ;;  %v15556_v45 = vld [vmem:[%s21121_s30 + $0xec] ss:$16 sps:$4 sm:$0xff]  }
  0xcc   : > { %1308 = vmatprep.subr.bf16.mxu1 %v15522_v46  ;;  %v17408_v46 = vpack.c.bf16 %v686_v38, %v683_v37  ;;  %v15594_v37 = vld [vmem:[%s20983_s3 + $0x64] ss:$16 sps:$4 sm:$0xff]  }
  0xcd   : > { %v726_v38 = vld [vmem:[%s17194_s16 + $0x220] sm:$0xff] }
  0xce   : > { %21138 = vst [vmem:[#allocation28_spill] sm:$0xff] %v17408_v46 }
  0xcf   : > { %1309 = vmatpush1.bf16.msra.mxu1 %v15524_v48  ;;  %v17410_v48 = vpack.c.bf16 %v711_v42, %v708_v41  ;;  %v15592_v41 = vld [vmem:[%s20983_s3 + $0x60] ss:$16 sps:$4 sm:$0xff]   ;;  %v15569_v42 = vld [vmem:[%s21121_s30 + $0x188] ss:$16 sps:$4 sm:$0xff]  }
  0xd0   : > { %1310 = vmatprep.subr.bf16.mxu1 %v15525_v49  ;;  %12981 = vmatmul.mubr.msk.bf16.gmra.mrb[20].mxu0 %vm1220_vm1, %v17323_v4  ;;  %v682_v49 = vld [vmem:[%s17194_s16 + $0xc0] sm:$0xff] }
  0xd1   : > { %1567 = vmatprep.mubr.bf16.mxu0 %v21009_v1  ;;  %v17432_v59 = vpack.c.bf16 %v685_v50, %v682_v49  ;;  %v17519_v49 = vpack.c.bf16 %v704_v35, %v701_v34  ;;  %v741_v34 = vld [vmem:[%s17194_s16 + $0x298] sm:$0xff]  ;;  %v15604_v35 = vld [vmem:[%s20983_s3 + $0xe0] ss:$16 sps:$4 sm:$0xff]  }
  0xd3   : > { %1311 = vmatpush1.bf16.msra.mxu1 %v15527_v52  ;;  %v689_v52 = vld [vmem:[%s17194_s16 + $0xf8] sm:$0xff]  ;;  %21139 = vst [vmem:[#allocation29_spill] sm:$0xff] %v17432_v59  ;;  %21144 = vst [vmem:[#allocation34_spill] sm:$0xff] %v17519_v49 }
  0xd4   : > { %1312 = vmatprep.subr.bf16.mxu1 %v15528_v53  ;;  %v692_v53 = vld [vmem:[%s17194_s16 + $0x110] sm:$0xff] }
  0xd5   : > { %v17437_v61 = vpack.c.bf16 %v692_v53, %v689_v52  ;;  %v700_v52 = vld [vmem:[%s17194_s16 + $0x150] sm:$0xff]  ;;  %v703_v53 = vld [vmem:[%s17194_s16 + $0x168] sm:$0xff] }
  0xd6   : > { %v17555_v8 = vpack.c.bf16 %v703_v53, %v700_v52  ;;  %v719_v52 = vld [vmem:[%s17194_s16 + $0x1e8] sm:$0xff]  ;;  %v722_v53 = vld [vmem:[%s17194_s16 + $0x200] sm:$0xff] }
  0xd7   : > { %1313 = vmatpush1.bf16.msra.mxu1 %v15530_v55  ;;  %v15559_v55 = vld [vmem:[%s21121_s30 + $0x10c] ss:$16 sps:$4 sm:$0xff]   ;;  %21140 = vst [vmem:[#allocation30_spill] sm:$0xff] %v17437_v61 }
  0xd8   : > { %1668 = vmatprep.subr.bf16.mxu1 %v15535_v58  ;;  %12982 = vmatmul.mubr.msk.bf16.gmra.mrb[24].mxu0 %vm1220_vm1, %v17352_v17  ;;  %v15557_v58 = vld [vmem:[%s21121_s30 + $0x108] ss:$16 sps:$4 sm:$0xff]   ;;  %21145 = vst [vmem:[#allocation35_spill] sm:$0xff] %v17555_v8 }
  0xd9   : > { %1577 = vmatprep.mubr.bf16.mxu0 %v21009_v1 }
  0xda   : > { %1315 = vmatmul.mubr.bf16.vlgmr.msra.gmra.mrb[0].mxu1 %v17313_v63 }
  0xdb   : > { %1669 = vmatpush1.bf16.msra.mxu1 %v15533_v0  ;;  %1324 = vmatprep.mubr.bf16.mxu1 %v17318_v2  ;;  %v15585_v0 = vld [vmem:[%s20983_s3 + $0x4] ss:$16 sps:$4 sm:$0xff]  }
  0xdc   : > { %1670 = vmatprep.subr.bf16.mxu1 %v15538_v3  ;;  %v688_v3 = vld [vmem:[%s17194_s16 + $0xf0] sm:$0xff]  ;;  %3036 = vmatprep.subr.bf16.mxu0 %v15585_v0 }
  0xdd   : > { %v17473_v19 = vpack.c.bf16 %v691_v5, %v688_v3  ;;  %v15600_v0 = vld [vmem:[%s20983_s3 + $0xa4] ss:$16 sps:$4 sm:$0xff]   ;;  %v735_v5 = vld [vmem:[%s17194_s16 + $0x268] sm:$0xff] }
  0xde   : > { %v732_v3 = vld [vmem:[%s17194_s16 + $0x250] sm:$0xff] }
  0xdf   : > { %1671 = vmatpush1.bf16.msra.mxu1 %v15536_v7  ;;  %v15583_v7 = vld [vmem:[%s20983_s3] ss:$16 sps:$4 sm:$0xff]   ;;  %21141 = vst [vmem:[#allocation31_spill] sm:$0xff] %v17473_v19 }
  0xe0   : > { %1672 = vmatprep.subr.bf16.mxu1 %v15541_v10  ;;  %12983 = vmatmul.mubr.msk.bf16.gmra.mrb[28].mxu0 %vm1220_vm1, %v17381_v32  ;;  %v15565_v10 = vld [vmem:[%s21121_s30 + $0x14c] ss:$16 sps:$4 sm:$0xff]  }
  0xe1   : > { %1587 = vmatprep.mubr.bf16.mxu0 %v21009_v1  ;;  %3037 = vmatpush1.bf16.msra.mxu0 %v15583_v7  ;;  %v15575_v7 = vld [vmem:[%s21121_s30 + $0x1c8] ss:$16 sps:$4 sm:$0xff]  }
  0xe2   : > { %1325 = vmatmul.mubr.bf16.gmra.mrb[4].mxu1 %v17342_v13  ;;  %3038 = vmatprep.subr.bf16.mxu0 %v15588_v11  ;;  %v17565_v11 = vld [vmem:[%s21121_s30 + $0x208] sm:$0x11] }
  0xe3   : > { %1334 = vmatprep.mubr.bf16.mxu1 %v17344_v14  ;;  %1673 = vmatpush1.bf16.msra.mxu1 %v15539_v15  ;;  %v723_v15 = vld [vmem:[%s17194_s16 + $0x208] sm:$0xff] }
  0xe4   : > { %1674 = vmatprep.subr.bf16.mxu1 %v15544_v16  ;;  %v15586_v16 = vld [vmem:[%s20983_s3 + $0x20] ss:$16 sps:$4 sm:$0xff]  }
  0xe5   : > { %3039 = vmatpush1.bf16.msra.mxu0 %v15586_v16  ;;  %v706_v16 = vld [vmem:[%s17194_s16 + $0x180] sm:$0xff] }
  0xe7   : > { %1675 = vmatpush1.bf16.msra.mxu1 %v15542_v23  ;;  %v17480_v23 = vpack.c.bf16 %v723_v15, %v720_v12  ;;  %v17567_v12 = vpack.c.bf16 %v735_v5, %v732_v3  ;;  %v15603_v15 = vld [vmem:[%s20983_s3 + $0xc4] ss:$16 sps:$4 sm:$0xff]  }
  0xe8   : > { %1676 = vmatprep.subr.bf16.mxu1 %v15547_v24  ;;  %12984 = vmatmul.mubr.msk.bf16.gmra.mrb[32].mxu0 %vm1220_vm1, %v17410_v48  ;;  %v15591_v24 = vld [vmem:[%s20983_s3 + $0x44] ss:$16 sps:$4 sm:$0xff]  }
  0xe9   : > { %1597 = vmatprep.mubr.bf16.mxu0 %v21009_v1  ;;  %3040 = vmatprep.subr.bf16.mxu0 %v15591_v24  ;;  %v713_v24 = vld [vmem:[%s17194_s16 + $0x1b8] sm:$0xff]  ;;  %v15615_v5 = vld [vmem:[%s20983_s3 + $0x144] ss:$16 sps:$4 sm:$0xff]  }
  0xea   : > { %1335 = vmatmul.mubr.bf16.gmra.mrb[8].mxu1 %v17374_v29 }
  0xeb   : > { %1344 = vmatprep.mubr.bf16.mxu1 %v17379_v31  ;;  %1677 = vmatpush1.bf16.msra.mxu1 %v15545_v28  ;;  %v15566_v28 = vld [vmem:[%s21121_s30 + $0x168] ss:$16 sps:$4 sm:$0xff]  }
  0xec   : > { %1678 = vmatprep.subr.bf16.mxu1 %v15550_v30  ;;  %v15589_v30 = vld [vmem:[%s20983_s3 + $0x40] ss:$16 sps:$4 sm:$0xff]  }
  0xed   : > { %3041 = vmatpush1.bf16.msra.mxu0 %v15589_v30  ;;  %v738_v30 = vld [vmem:[%s17194_s16 + $0x280] sm:$0xff] }
  0xee   : > { %3042 = vmatprep.subr.bf16.mxu0 %v15594_v37 }
  0xef   : > { %1679 = vmatpush1.bf16.msra.mxu1 %v15548_v36  ;;  %v15571_v36 = vld [vmem:[%s21121_s30 + $0x18c] ss:$16 sps:$4 sm:$0xff]  }
  0xf0   : > { %1680 = vmatprep.subr.bf16.mxu1 %v15553_v39  ;;  %12985 = vmatmul.mubr.msk.bf16.gmra.mrb[36].mxu0 %vm1220_vm1, %v17439_v62  ;;  %v729_v39 = vld [vmem:[%s17194_s16 + $0x238] sm:$0xff] }
  0xf1   : > { %1607 = vmatprep.mubr.bf16.mxu0 %v21009_v1  ;;  %v17521_v50 = vpack.c.bf16 %v729_v39, %v726_v38  ;;  %3043 = vmatpush1.bf16.msra.mxu0 %v15592_v41  ;;  %v17601_v39 = vpack.c.bf16 %v741_v34, %v738_v30  ;;  %v15609_v41 = vld [vmem:[%s20983_s3 + $0x104] ss:$16 sps:$4 sm:$0xff]  }
  0xf2   : > { %1345 = vmatmul.mubr.bf16.gmra.mrb[12].mxu1 %v17403_v44  ;;  %v15621_v34 = vld [vmem:[%s20983_s3 + $0x184] ss:$16 sps:$4 sm:$0xff]  }
  0xf3   : > { %1354 = vmatprep.mubr.bf16.mxu1 %v17408_v46  ;;  %1681 = vmatpush1.bf16.msra.mxu1 %v15551_v43  ;;  %v17514_v43 = vpack.c.bf16 %v697_v27, %v694_v25  ;;  %v716_v25 = vld [vmem:[%s17194_s16 + $0x1d0] sm:$0xff]  ;;  %v15578_v27 = vld [vmem:[%s21121_s30 + $0x1e8] ss:$16 sps:$4 sm:$0xff]  }
  0xf4   : > { %1682 = vmatprep.subr.bf16.mxu1 %v15556_v45  ;;  %v15574_v45 = vld [vmem:[%s21121_s30 + $0x1ac] ss:$16 sps:$4 sm:$0xff]   ;;  %v17599_v38 = vpack.c.bf16 %v716_v25, %v713_v24  ;;  %v15616_v25 = vld [vmem:[%s20983_s3 + $0x160] ss:$16 sps:$4 sm:$0xff]  }
  0xf5   : > { %21143 = vst [vmem:[#allocation33_spill] sm:$0xff] %v17514_v43  ;;  %v753_v24 = vld [vmem:[%s17194_s16 + $0x2f8] sm:$0xff] }
  0xf6   : > { %21148 = vst [vmem:[#allocation38_spill] sm:$0xff] %v17599_v38 }
  0xf7   : > { %1683 = vmatpush1.bf16.msra.mxu1 %v15554_v51  ;;  %v15597_v51 = vld [vmem:[%s20983_s3 + $0x84] ss:$16 sps:$4 sm:$0xff]  }
  0xf8   : > { %1684 = vmatprep.subr.bf16.mxu1 %v15559_v55  ;;  %12986 = vmatmul.mubr.msk.bf16.gmra.mrb[40].mxu0 %vm1220_vm1, %v17480_v23  ;;  %v15572_v55 = vld [vmem:[%s21121_s30 + $0x1a8] ss:$16 sps:$4 sm:$0xff]  }
  0xf9   : > { %1617 = vmatprep.mubr.bf16.mxu0 %v21009_v1  ;;  %3044 = vmatprep.subr.bf16.mxu0 %v15597_v51  ;;  %v15607_v51 = vld [vmem:[%s20983_s3 + $0x100] ss:$16 sps:$4 sm:$0xff]  }
  0xfa   : > { %1355 = vmatmul.mubr.bf16.gmra.mrb[16].mxu1 %v17432_v59  ;;  %3045 = vmatpush1.bf16.msra.mxu0 %v15595_v56  ;;  %v744_v56 = vld [vmem:[%s17194_s16 + $0x2b0] sm:$0xff] }
  0xfb   : > { %1364 = vmatprep.mubr.bf16.mxu1 %v17437_v61  ;;  %1685 = vmatpush1.bf16.msra.mxu1 %v15557_v58  ;;  %v710_v58 = vld [vmem:[%s17194_s16 + $0x1a0] sm:$0xff] }
  0xfc   : > { %1686 = vmatprep.subr.bf16.mxu1 %v15562_v60  ;;  %v15577_v60 = vld [vmem:[%s21121_s30 + $0x1cc] ss:$16 sps:$4 sm:$0xff]   ;;  %3046 = vmatprep.subr.bf16.mxu0 %v15600_v0  ;;  %v17629_v0 = vpack.c.bf16 %v722_v53, %v719_v52  ;;  %v15622_v52 = vld [vmem:[%s20983_s3 + $0x1a0] ss:$16 sps:$4 sm:$0xff]  }
  0xfe   : > { %21150 = vst [vmem:[#allocation40_spill] sm:$0xff] %v17629_v0 }
  0xff   : > { %1687 = vmatpush1.bf16.msra.mxu1 %v15560_v6  ;;  %v15598_v6 = vld [vmem:[%s20983_s3 + $0xa0] ss:$16 sps:$4 sm:$0xff]  }
 0x100   : > { %1688 = vmatprep.subr.bf16.mxu1 %v15565_v10  ;;  %12987 = vmatmul.mubr.msk.bf16.gmra.mrb[44].mxu0 %vm1220_vm1, %v17521_v50  ;;  %v17560_v10 = vpack.c.bf16 %v710_v58, %v707_v57  ;;  %v747_v57 = vld [vmem:[%s17194_s16 + $0x2c8] sm:$0xff]  ;;  %v15610_v58 = vld [vmem:[%s20983_s3 + $0x120] ss:$16 sps:$4 sm:$0xff]  }
 0x101   : > { %1627 = vmatprep.mubr.bf16.mxu0 %v21009_v1  ;;  %3047 = vmatpush1.bf16.msra.mxu0 %v15598_v6  ;;  %v17631_v3 = vpack.c.bf16 %v747_v57, %v744_v56  ;;  %v718_v6 = vld [vmem:[%s17194_s16 + $0x1e0] sm:$0xff] }
 0x102   : > { %1365 = vmatmul.mubr.bf16.gmra.mrb[20].mxu1 %v17473_v19  ;;  %21146 = vst [vmem:[#allocation36_spill] sm:$0xff] %v17560_v10  ;;  %3048 = vmatprep.subr.bf16.mxu0 %v15603_v15  ;;  %v725_v15 = vld [vmem:[%s17194_s16 + $0x218] sm:$0xff]  ;;  %v15627_v56 = vld [vmem:[%s20983_s3 + $0x1c4] ss:$16 sps:$4 sm:$0xff]  }
 0x103   : > { %1374 = vmatprep.mubr.bf16.mxu1 %v17478_v22  ;;  %1689 = vmatpush1.bf16.msra.mxu1 %v15563_v18  ;;  %v709_v18 = vld [vmem:[%s17194_s16 + $0x198] sm:$0xff]  ;;  %v730_v57 = vld [vmem:[%s17194_s16 + $0x240] sm:$0xff] }
 0x104   : > { %1690 = vmatprep.subr.bf16.mxu1 %v15568_v20  ;;  %v15601_v20 = vld [vmem:[%s20983_s3 + $0xc0] ss:$16 sps:$4 sm:$0xff]   ;;  %v17597_v37 = vpack.c.bf16 %v709_v18, %v706_v16  ;;  %v15618_v18 = vld [vmem:[%s20983_s3 + $0x164] ss:$16 sps:$4 sm:$0xff]  }
 0x105   : > { %3049 = vmatpush1.bf16.msra.mxu0 %v15601_v20  ;;  %v728_v16 = vld [vmem:[%s17194_s16 + $0x230] sm:$0xff]  ;;  %v750_v20 = vld [vmem:[%s17194_s16 + $0x2e0] sm:$0xff] }
 0x106   : > { %21147 = vst [vmem:[#allocation37_spill] sm:$0xff] %v17597_v37  ;;  %v17660_v30 = vpack.c.bf16 %v753_v24, %v750_v20  ;;  %v736_v20 = vld [vmem:[%s17194_s16 + $0x270] sm:$0xff]  ;;  %v739_v24 = vld [vmem:[%s17194_s16 + $0x288] sm:$0xff] }
 0x107   : > { %1691 = vmatpush1.bf16.msra.mxu1 %v15566_v28  ;;  %v15606_v28 = vld [vmem:[%s20983_s3 + $0xe4] ss:$16 sps:$4 sm:$0xff]  }
 0x108   : > { %1692 = vmatprep.subr.bf16.mxu1 %v15571_v36  ;;  %12988 = vmatmul.mubr.msk.bf16.gmra.mrb[48].mxu0 %vm1220_vm1, %v17567_v12  ;;  %v12974_v36 = vcombine.high %v17565_v11, %v17565_v11 }
 0x109   : > { %1637 = vmatprep.mubr.bf16.mxu0 %v21009_v1  ;;  %3050 = vmatprep.subr.bf16.mxu0 %v15606_v28  ;;  %v17658_v28 = vpack.c.bf16 %v728_v16, %v725_v15  ;;  %v15628_v15 = vld [vmem:[%s20983_s3 + $0x1e0] ss:$16 sps:$4 sm:$0xff]  }
 0x10a   : > { %1375 = vmatmul.mubr.bf16.gmra.mrb[24].mxu1 %v17514_v43  ;;  %3051 = vmatpush1.bf16.msra.mxu0 %v15604_v35  ;;  %v724_v35 = vld [vmem:[%s17194_s16 + $0x210] sm:$0xff] }
 0x10b   : > { %1384 = vmatprep.mubr.bf16.mxu1 %v17519_v49  ;;  %1693 = vmatpush1.bf16.msra.mxu1 %v15569_v42  ;;  %v712_v42 = vld [vmem:[%s17194_s16 + $0x1b0] sm:$0xff]  ;;  %21152 = vst [vmem:[#allocation42_spill] sm:$0xff] %v17658_v28 }
 0x10c   : > { %1694 = vmatprep.subr.bf16.mxu1 %v15574_v45  ;;  %v715_v45 = vld [vmem:[%s17194_s16 + $0x1c8] sm:$0xff]  ;;  %3052 = vmatprep.subr.bf16.mxu0 %v15609_v41  ;;  %v15619_v41 = vld [vmem:[%s20983_s3 + $0x180] ss:$16 sps:$4 sm:$0xff]  }
 0x10e   : > { %3053 = vmatpush1.bf16.msra.mxu0 %v15607_v51  ;;  %v15624_v51 = vld [vmem:[%s20983_s3 + $0x1a4] ss:$16 sps:$4 sm:$0xff]  }
 0x10f   : > { %1695 = vmatpush1.bf16.msra.mxu1 %v15572_v55  ;;  %v15612_v55 = vld [vmem:[%s20983_s3 + $0x124] ss:$16 sps:$4 sm:$0xff]  }
 0x110   : > { %1696 = vmatprep.subr.bf16.mxu1 %v15577_v60  ;;  %12989 = vmatmul.mubr.msk.bf16.gmra.mrb[52].mxu0 %vm1220_vm1, %v17601_v39  ;;  %v17627_v60 = vpack.c.bf16 %v715_v45, %v712_v42  ;;  %v731_v42 = vld [vmem:[%s17194_s16 + $0x248] sm:$0xff]  ;;  %v734_v45 = vld [vmem:[%s17194_s16 + $0x260] sm:$0xff] }
 0x111   : > { %1647 = vmatprep.mubr.bf16.mxu0 %v21009_v1  ;;  %3054 = vmatprep.subr.bf16.mxu0 %v15612_v55  ;;  %v17684_v55 = vpack.c.bf16 %v734_v45, %v731_v42  ;;  %v745_v42 = vld [vmem:[%s17194_s16 + $0x2b8] sm:$0xff] }
 0x112   : > { %1385 = vmatmul.mubr.bf16.gmra.mrb[28].mxu1 %v17555_v8  ;;  %21149 = vst [vmem:[#allocation39_spill] sm:$0xff] %v17627_v60  ;;  %3055 = vmatpush1.bf16.msra.mxu0 %v15610_v58  ;;  %v733_v58 = vld [vmem:[%s17194_s16 + $0x258] sm:$0xff] }
 0x113   : > { %1394 = vmatprep.mubr.bf16.mxu1 %v17560_v10  ;;  %1697 = vmatpush1.bf16.msra.mxu1 %v15575_v7  ;;  %v721_v7 = vld [vmem:[%s17194_s16 + $0x1f8] sm:$0xff]  ;;  %21154 = vst [vmem:[#allocation44_spill] sm:$0xff] %v17684_v55  ;;  %v17704_v16 = vpack.c.bf16 %v733_v58, %v730_v57  ;;  %v748_v57 = vld [vmem:[%s17194_s16 + $0x2d0] sm:$0xff]  ;;  %v751_v58 = vld [vmem:[%s17194_s16 + $0x2e8] sm:$0xff] }
 0x114   : > { %1698 = vmatprep.subr.bf16.mxu1 %v15580_v9  ;;  %v15613_v9 = vld [vmem:[%s20983_s3 + $0x140] ss:$16 sps:$4 sm:$0xff]   ;;  %3056 = vmatprep.subr.bf16.mxu0 %v15615_v5  ;;  %v749_v45 = vld [vmem:[%s17194_s16 + $0x2d8] sm:$0xff] }
 0x115   : > { %v15625_v5 = vld [vmem:[%s20983_s3 + $0x1c0] ss:$16 sps:$4 sm:$0xff]   ;;  %21155 = vst [vmem:[#allocation45_spill] sm:$0xff] %v17704_v16 }
 0x116   : > { %3057 = vmatpush1.bf16.msra.mxu0 %v15613_v9  ;;  %v15630_v9 = vld [vmem:[%s20983_s3 + $0x1e4] ss:$16 sps:$4 sm:$0xff]  }
 0x117   : > { %1699 = vmatpush1.bf16.msra.mxu1 %v15578_v27  ;;  %v17656_v27 = vpack.c.bf16 %v721_v7, %v718_v6  ;;  %3058 = vmatprep.subr.bf16.mxu0 %v15618_v18  ;;  %v737_v6 = vld [vmem:[%s17194_s16 + $0x278] sm:$0xff]  ;;  %v740_v7 = vld [vmem:[%s17194_s16 + $0x290] sm:$0xff] }
 0x118   : > { %12992 = vmatprep.subr.msk.bf16.mxu1 %vm1269_vm0, %v12974_v36  ;;  %12990 = vmatmul.mubr.msk.bf16.gmra.mrb[56].mxu0 %vm1220_vm1, %v17631_v3  ;;  %v727_v36 = vld [vmem:[%s17194_s16 + $0x228] sm:$0xff]  ;;  %v17706_v18 = vpack.c.bf16 %v740_v7, %v737_v6  ;;  %v12973_v6 = vcombine.low %v17565_v11, %v17565_v11 }
 0x119   : > { %1657 = vmatprep.mubr.bf16.mxu0 %v21009_v1  ;;  %21151 = vst [vmem:[#allocation41_spill] sm:$0xff] %v17656_v27  ;;  %v17682_v53 = vpack.c.bf16 %v727_v36, %v724_v35  ;;  %v17714_v35 = vpack.c.bf16 %v739_v24, %v736_v20 }
 0x11a   : > { %1395 = vmatmul.mubr.bf16.gmra.mrb[32].mxu1 %v17597_v37  ;;  %3059 = vmatpush1.bf16.msra.mxu0 %v15616_v25  ;;  %21156 = vst [vmem:[#allocation46_spill] sm:$0xff] %v17706_v18  ;;  %v743_v25 = vld [vmem:[%s17194_s16 + $0x2a8] sm:$0xff]  ;;  %v1277_v7 = vsel %vm1269_vm0, %v12973_v6, 0  ;;  %v870_v6 = vlaneseq }
 0x11b   : > { %1404 = vmatprep.mubr.bf16.mxu1 %v17599_v38  ;;  %3060 = vmatprep.subr.bf16.mxu0 %v15621_v34  ;;  %21153 = vst [vmem:[#allocation43_spill] sm:$0xff] %v17682_v53  ;;  %v746_v34 = vld [vmem:[%s17194_s16 + $0x2c0] sm:$0xff]  ;;  %21157 = vst [vmem:[#allocation47_spill] sm:$0xff] %v17714_v35 }
 0x11c   : > { %v17716_v36 = vpack.c.bf16 %v746_v34, %v743_v25 }
 0x11e   : > { %3061 = vmatpush1.bf16.msra.mxu0 %v15619_v41  ;;  %21158 = vst [vmem:[#allocation48_spill] sm:$0xff] %v17716_v36  ;;  %v742_v41 = vld [vmem:[%s17194_s16 + $0x2a0] sm:$0xff] }
 0x11f   : > { %3062 = vmatprep.subr.bf16.mxu0 %v15624_v51  ;;  %v752_v51 = vld [vmem:[%s17194_s16 + $0x2f0] sm:$0xff] }
 0x120   : > { %12991 = vmatmul.mubr.msk.bf16.gmra.mrb[60].mxu0 %vm1220_vm1, %v17660_v30 }
 0x122   : > { %1405 = vmatmul.mubr.bf16.gmra.mrb[36].mxu1 %v17627_v60  ;;  %3063 = vmatpush1.bf16.msra.mxu0 %v15622_v52  ;;  %v17724_v52 = vpack.c.bf16 %v745_v42, %v742_v41 }
 0x123   : > { %1414 = vmatprep.mubr.bf16.mxu1 %v17629_v0  ;;  %3064 = vmatprep.subr.bf16.mxu0 %v15627_v56  ;;  %v17726_v56 = vpack.c.bf16 %v752_v51, %v749_v45  ;;  %v15633_v51 = vld [vmem:[%s20983_s3 + $0xc] ss:$16 sps:$4 sm:$0xff]  }
 0x124   : > { %21159 = vst [vmem:[#allocation49_spill] sm:$0xff] %v17724_v52 }
 0x125   : > { %21160 = vst [vmem:[#allocation50_spill] sm:$0xff] %v17726_v56 }
 0x126   : > { %3065 = vmatpush1.bf16.msra.mxu0 %v15625_v5  ;;  %v17732_v5 = vpack.c.bf16 %v751_v58, %v748_v57 }
 0x127   : > { %3066 = vmatprep.subr.bf16.mxu0 %v15630_v9 }
 0x128   : > { %21161 = vst [vmem:[#allocation51_spill] sm:$0xff] %v17732_v5 }
 0x12a   : > { %1415 = vmatmul.mubr.bf16.gmra.mrb[40].mxu1 %v17656_v27  ;;  %3067 = vmatpush1.bf16.msra.mxu0 %v15628_v15 }
 0x12b   : > { %1424 = vmatprep.mubr.bf16.mxu1 %v17658_v28 }
 0x132   : > { %1425 = vmatmul.mubr.bf16.gmra.mrb[44].mxu1 %v17682_v53 }
 0x133   : > { %1434 = vmatprep.mubr.bf16.mxu1 %v17684_v55 }
 0x13a   : > { %1435 = vmatmul.mubr.bf16.gmra.mrb[48].mxu1 %v17704_v16 }
 0x13b   : > { %1444 = vmatprep.mubr.bf16.mxu1 %v17706_v18 }
 0x142   : > { %1445 = vmatmul.mubr.bf16.gmra.mrb[52].mxu1 %v17714_v35 }
 0x143   : > { %1454 = vmatprep.mubr.bf16.mxu1 %v17716_v36 }
 0x14a   : > { %1455 = vmatmul.mubr.bf16.gmra.mrb[56].mxu1 %v17724_v52 }
 0x14b   : > { %1464 = vmatprep.mubr.bf16.mxu1 %v17726_v56 }
 0x152   : > { %1465 = vmatmul.mubr.bf16.gmra.mrb[60].mxu1 %v17732_v5 }
 0x153   : > { %1700 = vmatprep.mubr.bf16.mxu1 %v17210_v21 }
 0x15a   : > { %1701 = vmatmul.mubr.bf16.vlgmr.msra.gmra.mrb[64].mxu1 %v17313_v63 }
 0x15b   : > { %1862 = vmatpush1.bf16.msra.mxu1 %v1277_v7  ;;  %1710 = vmatprep.mubr.bf16.mxu1 %v17318_v2 }
 0x15c   : > { %3422 = vmatprep.subr.bf16.mxu1 %v15633_v51  ;;  %v868_v51 = vld [vmem:[%s21163_s28] sm:$0xf] }
 0x162   : > { %1711 = vmatmul.mubr.bf16.gmra.mrb[68].mxu1 %v17342_v13 }
 0x163   : > { %1720 = vmatprep.mubr.bf16.mxu1 %v17344_v14 }
 0x16a   : > { %1721 = vmatmul.mubr.bf16.gmra.mrb[72].mxu1 %v17374_v29 }
 0x16b   : > { %1730 = vmatprep.mubr.bf16.mxu1 %v17379_v31 }
 0x172   : > { %1731 = vmatmul.mubr.bf16.gmra.mrb[76].mxu1 %v17403_v44 }
 0x173   : > { %1740 = vmatprep.mubr.bf16.mxu1 %v17408_v46 }
 0x17a   : > { %1741 = vmatmul.mubr.bf16.gmra.mrb[80].mxu1 %v17432_v59 }
 0x17b   : > { %1750 = vmatprep.mubr.bf16.mxu1 %v17437_v61  ;;  %v1509_v11 = vpop.f32.mrb[0].mxu0 }
 0x17c   : > { %v1511_v9 = vpop.f32.mrb[1].mxu0 }
 0x17d   : > { %v1513_v15 = vpop.f32.mrb[2].mxu0 }
 0x17e   : > { %v1515_v20 = vpop.f32.mrb[3].mxu0 }
 0x182   : > { %1751 = vmatmul.mubr.bf16.gmra.mrb[84].mxu1 %v17473_v19 }
 0x183   : > { %1760 = vmatprep.mubr.bf16.mxu1 %v17478_v22  ;;  %v17753_v24 = vpop.f32.mrb[4].mxu0 }
 0x184   : > { %v17755_v25 = vpop.f32.mrb[5].mxu0 }
 0x185   : > { %v17757_v34 = vpop.f32.mrb[6].mxu0 }
 0x186   : > { %v17760_v41 = vpop.f32.mrb[7].mxu0 }
 0x18a   : > { %1761 = vmatmul.mubr.bf16.gmra.mrb[88].mxu1 %v17514_v43 }
 0x18b   : > { %1770 = vmatprep.mubr.bf16.mxu1 %v17519_v49  ;;  %v17763_v42 = vpop.f32.mrb[8].mxu0 }
 0x18c   : > { %v17765_v45 = vpop.f32.mrb[9].mxu0 }
 0x18d   : > { %v17770_v57 = vpop.f32.mrb[10].mxu0 }
 0x18e   : > { %v17773_v58 = vpop.f32.mrb[11].mxu0 }
 0x192   : > { %1771 = vmatmul.mubr.bf16.gmra.mrb[92].mxu1 %v17555_v8  ;;  %v17783_v8 = vshrl.u32 %v870_v6, 7 }
 0x193   : > { %1780 = vmatprep.mubr.bf16.mxu1 %v17560_v10  ;;  %v17776_v7 = vpop.f32.mrb[12].mxu0 }
 0x194   : > { %v17778_v1 = vpop.f32.mrb[13].mxu0  ;;  %21162 = vst [vmem:[#allocation52_spill] sm:$0xff] %v17783_v8 }
 0x195   : > { %v17780_v10 = vpop.f32.mrb[14].mxu0 }
 0x196   : > { %v17785_v49 = vpop.f32.mrb[15].mxu0 }
 0x19a   : > { %1781 = vmatmul.mubr.bf16.gmra.mrb[96].mxu1 %v17597_v37  ;;  %v17795_v37 = vsub.s32 1, %v17783_v8 }
 0x19b   : > { %1790 = vmatprep.mubr.bf16.mxu1 %v17599_v38  ;;  %v17792_v38 = vsub.s32 0, %v17783_v8  ;;  %v17797_v43 = vpop.f32.mrb[16].mxu0 }
 0x19c   : > { %21165 = vst [vmem:[#allocation54_spill] sm:$0xff] %v17795_v37  ;;  %v17799_v22 = vpop.f32.mrb[17].mxu0  ;;  %v17811_v19 = vrot.slane %v868_v51, %v17795_v37 }
 0x19d   : > { %21164 = vst [vmem:[#allocation53_spill] sm:$0xff] %v17792_v38  ;;  %v17801_v6 = vpop.f32.mrb[18].mxu0 }
 0x1a2   : > { %1791 = vmatmul.mubr.bf16.gmra.mrb[100].mxu1 %v17627_v60  ;;  %v17807_v60 = vpop.f32.mrb[19].mxu0 }
 0x1a3   : > { %1800 = vmatprep.mubr.bf16.mxu1 %v17629_v0  ;;  %v17805_v0 = vrot.slane %v868_v51, %v17792_v38  ;;  %v17815_v29 = vpop.f32.mrb[20].mxu0 }
 0x1a4   : > { %v17818_v2 = vpop.f32.mrb[21].mxu0 }
 0x1a5   : > { %v17821_v51 = vpop.f32.mrb[22].mxu0 }
 0x1aa   : > { %1801 = vmatmul.mubr.bf16.gmra.mrb[104].mxu1 %v17656_v27 }
 0x1ab   : > { %1810 = vmatprep.mubr.bf16.mxu1 %v17658_v28 }
 0x1ad   : > { %v1316_v61 = vpop.f32.mrb[0].mxu1 }
 0x1ae   : > { %v1317_v59 = vadd.f32 %v1316_v61, %v17805_v0  ;;  %v1318_v46 = vpop.f32.mrb[1].mxu1  ;;  %v17824_v61 = vpop.f32.mrb[23].mxu0 }
 0x1af   : > { %v1320_v44 = vpop.f32.mrb[2].mxu1  ;;  %v1319_v31 = vadd.f32 %v1318_v46, %v17811_v19 }
 0x1b0   : > { %v1321_v27 = vadd.f32 %v1320_v44, %v17805_v0  ;;  %v1510_v14 = vadd.f32 %v1509_v11, %v1317_v59  ;;  %v1322_v13 = vpop.f32.mrb[3].mxu1  ;;  %v15657_v44 = vld [vmem:[%s20983_s3 + $0x204] ss:$16 sps:$4 sm:$0xff]  }
 0x1b1   : > { %v1323_v28 = vadd.f32 %v1322_v13, %v17811_v19  ;;  %v1512_v63 = vadd.f32 %v1511_v9, %v1319_v31  ;;  %v15655_v31 = vld [vmem:[%s20983_s3 + $0x200] ss:$16 sps:$4 sm:$0xff]   ;;  %3229 = vmatprep.subr.bf16.mxu0 %v15657_v44 }
 0x1b2   : > { %v1514_v21 = vadd.f32 %v1513_v15, %v1321_v27  ;;  %1811 = vmatmul.mubr.bf16.gmra.mrb[108].mxu1 %v17682_v53  ;;  %v2054_v59 = vmax.f32 %v1510_v14, 0.0  ;;  %v17839_v14 = vpop.f32.mrb[24].mxu0 }
 0x1b3   : > { %1820 = vmatprep.mubr.bf16.mxu1 %v17684_v55  ;;  %v1516_v46 = vadd.f32 %v1515_v20, %v1323_v28  ;;  %v2055_v38 = vmax.f32 %v1512_v63, 0.0  ;;  %v17843_v53 = vpop.f32.mrb[25].mxu0 }
 0x1b4   : > { %v2058_v11 = vmax.f32 %v1514_v21, 0.0 }
 0x1b5   : > { %v1326_v37 = vpop.f32.mrb[4].mxu1  ;;  %v2059_v13 = vmax.f32 %v1516_v46, 0.0 }
 0x1b6   : > { %v17833_v27 = vpack.c.bf16 %v2058_v11, %v2054_v59  ;;  %v1328_v9 = vpop.f32.mrb[5].mxu1  ;;  %v1327_v15 = vadd.f32 %v1326_v37, %v17805_v0  ;;  %v17848_v59 = vpop.f32.mrb[26].mxu0 }
 0x1b7   : > { %v1330_v28 = vpop.f32.mrb[6].mxu1  ;;  %v17836_v20 = vpack.c.bf16 %v2059_v13, %v2055_v38  ;;  %v1329_v55 = vadd.f32 %v1328_v9, %v17811_v19  ;;  %v17853_v11 = vpop.f32.mrb[27].mxu0  ;;  %v15664_v13 = vld [vmem:[%s20983_s3 + $0x220] ss:$16 sps:$4 sm:$0xff]  }
 0x1b8   : > { %v1332_v21 = vpop.f32.mrb[7].mxu1  ;;  %v1331_v63 = vadd.f32 %v1330_v28, %v17805_v0  ;;  %v1520_v46 = vadd.f32 %v17753_v24, %v1327_v15 }
 0x1b9   : > { %3068 = vmatprep.mubr.bf16.mxu0 %v17836_v20  ;;  %v1333_v44 = vadd.f32 %v1332_v21, %v17811_v19  ;;  %v1522_v37 = vadd.f32 %v17755_v25, %v1329_v55  ;;  %v15666_v55 = vld [vmem:[%s20983_s3 + $0x224] ss:$16 sps:$4 sm:$0xff]  }
 0x1ba   : > { %1821 = vmatmul.mubr.bf16.gmra.mrb[112].mxu1 %v17704_v16  ;;  %3069 = vmatmul.mubr.bf16.vlgmr.msra.gmra.mrb[64].mxu0 %v17833_v27  ;;  %v1524_v38 = vadd.f32 %v17757_v34, %v1331_v63  ;;  %v2062_v25 = vmax.f32 %v1520_v46, 0.0  ;;  %v17869_v16 = vpop.f32.mrb[28].mxu0 }
 0x1bb   : > { %1830 = vmatprep.mubr.bf16.mxu1 %v17706_v18  ;;  %v1526_v24 = vadd.f32 %v17760_v41, %v1333_v44  ;;  %3230 = vmatpush1.bf16.msra.mxu0 %v15655_v31  ;;  %v2063_v28 = vmax.f32 %v1522_v37, 0.0 }
 0x1bc   : > { %v2066_v9 = vmax.f32 %v1524_v38, 0.0  ;;  %3231 = vmatprep.subr.bf16.mxu0 %v15666_v55  ;;  %v17873_v38 = vpop.f32.mrb[29].mxu0 }
 0x1bd   : > { %v1336_v15 = vpop.f32.mrb[8].mxu1  ;;  %v2067_v34 = vmax.f32 %v1526_v24, 0.0 }
 0x1be   : > { %v1338_v21 = vpop.f32.mrb[9].mxu1  ;;  %v17863_v63 = vpack.c.bf16 %v2066_v9, %v2062_v25  ;;  %v1337_v41 = vadd.f32 %v1336_v15, %v17805_v0  ;;  %v17878_v25 = vpop.f32.mrb[30].mxu0 }
 0x1bf   : > { %v1340_v31 = vpop.f32.mrb[10].mxu1  ;;  %v17866_v44 = vpack.c.bf16 %v2067_v34, %v2063_v28  ;;  %v1339_v18 = vadd.f32 %v1338_v21, %v17811_v19  ;;  %3232 = vmatpush1.bf16.msra.mxu0 %v15664_v13  ;;  %v17883_v9 = vpop.f32.mrb[31].mxu0 }
 0x1c0   : > { %v1342_v8 = vpop.f32.mrb[11].mxu1  ;;  %v1341_v46 = vadd.f32 %v1340_v31, %v17805_v0  ;;  %v1530_v37 = vadd.f32 %v17763_v42, %v1337_v41 }
 0x1c1   : > { %3078 = vmatprep.mubr.bf16.mxu0 %v17866_v44  ;;  %v1343_v24 = vadd.f32 %v1342_v8, %v17811_v19  ;;  %v1532_v55 = vadd.f32 %v17765_v45, %v1339_v18  ;;  %v15673_v8 = vld [vmem:[%s20983_s3 + $0x240] ss:$16 sps:$4 sm:$0xff]   ;;  %v15675_v18 = vld [vmem:[%s20983_s3 + $0x244] ss:$16 sps:$4 sm:$0xff]  }
 0x1c2   : > { %1831 = vmatmul.mubr.bf16.gmra.mrb[116].mxu1 %v17714_v35  ;;  %3079 = vmatmul.mubr.bf16.gmra.mrb[68].mxu0 %v17863_v63  ;;  %v1534_v13 = vadd.f32 %v17770_v57, %v1341_v46  ;;  %v2070_v45 = vmax.f32 %v1530_v37, 0.0 }
 0x1c3   : > { %1840 = vmatprep.mubr.bf16.mxu1 %v17716_v36  ;;  %v1536_v42 = vadd.f32 %v17773_v58, %v1343_v24  ;;  %v2071_v34 = vmax.f32 %v1532_v55, 0.0  ;;  %3233 = vmatprep.subr.bf16.mxu0 %v15675_v18  ;;  %v17899_v36 = vpop.f32.mrb[32].mxu0 }
 0x1c4   : > { %v2074_v15 = vmax.f32 %v1534_v13, 0.0  ;;  %3234 = vmatpush1.bf16.msra.mxu0 %v15673_v8  ;;  %v17903_v13 = vpop.f32.mrb[33].mxu0 }
 0x1c5   : > { %v1346_v28 = vpop.f32.mrb[12].mxu1  ;;  %v2075_v21 = vmax.f32 %v1536_v42, 0.0  ;;  %v17908_v18 = vpop.f32.mrb[34].mxu0 }
 0x1c6   : > { %v1348_v57 = vpop.f32.mrb[13].mxu1  ;;  %v17893_v41 = vpack.c.bf16 %v2074_v15, %v2070_v45  ;;  %v1347_v31 = vadd.f32 %v1346_v28, %v17805_v0  ;;  %v17913_v15 = vpop.f32.mrb[35].mxu0 }
 0x1c7   : > { %v1350_v58 = vpop.f32.mrb[14].mxu1  ;;  %v17896_v46 = vpack.c.bf16 %v2075_v21, %v2071_v34  ;;  %v1349_v24 = vadd.f32 %v1348_v57, %v17811_v19 }
 0x1c8   : > { %v1352_v35 = vpop.f32.mrb[15].mxu1  ;;  %v1351_v37 = vadd.f32 %v1350_v58, %v17805_v0  ;;  %v1540_v55 = vadd.f32 %v17776_v7, %v1347_v31 }
 0x1c9   : > { %3088 = vmatprep.mubr.bf16.mxu0 %v17896_v46  ;;  %v1353_v42 = vadd.f32 %v1352_v35, %v17811_v19  ;;  %v1542_v8 = vadd.f32 %v17778_v1, %v1349_v24  ;;  %v15682_v35 = vld [vmem:[%s20983_s3 + $0x260] ss:$16 sps:$4 sm:$0xff]   ;;  %v15684_v1 = vld [vmem:[%s20983_s3 + $0x264] ss:$16 sps:$4 sm:$0xff]  }
 0x1ca   : > { %1841 = vmatmul.mubr.bf16.gmra.mrb[120].mxu1 %v17724_v52  ;;  %3089 = vmatmul.mubr.bf16.gmra.mrb[72].mxu0 %v17893_v41  ;;  %v1544_v45 = vadd.f32 %v17780_v10, %v1351_v37  ;;  %v2078_v28 = vmax.f32 %v1540_v55, 0.0 }
 0x1cb   : > { %1850 = vmatprep.mubr.bf16.mxu1 %v17726_v56  ;;  %v1546_v7 = vadd.f32 %v17785_v49, %v1353_v42  ;;  %v2079_v57 = vmax.f32 %v1542_v8, 0.0  ;;  %3235 = vmatprep.subr.bf16.mxu0 %v15684_v1  ;;  %v17929_v56 = vpop.f32.mrb[36].mxu0 }
 0x1cc   : > { %v2082_v34 = vmax.f32 %v1544_v45, 0.0  ;;  %3236 = vmatpush1.bf16.msra.mxu0 %v15682_v35  ;;  %v17933_v45 = vpop.f32.mrb[37].mxu0 }
 0x1cd   : > { %v1356_v21 = vpop.f32.mrb[16].mxu1  ;;  %v2083_v31 = vmax.f32 %v1546_v7, 0.0  ;;  %v17938_v1 = vpop.f32.mrb[38].mxu0 }
 0x1ce   : > { %v1358_v10 = vpop.f32.mrb[17].mxu1  ;;  %v17923_v58 = vpack.c.bf16 %v2082_v34, %v2078_v28  ;;  %v1357_v24 = vadd.f32 %v1356_v21, %v17805_v0  ;;  %v17943_v34 = vpop.f32.mrb[39].mxu0  ;;  %v21167_v21 = vmov 0  }
 0x1cf   : > { %v1360_v49 = vpop.f32.mrb[18].mxu1  ;;  %v17926_v37 = vpack.c.bf16 %v2083_v31, %v2079_v57  ;;  %v1359_v42 = vadd.f32 %v1358_v10, %v17811_v19 }
 0x1d0   : > { %21166 = vst [vmem:[#allocation55_spill] sm:$0xff] %v17923_v58  ;;  %v1362_v52 = vpop.f32.mrb[19].mxu1  ;;  %v1361_v55 = vadd.f32 %v1360_v49, %v17805_v0  ;;  %v1550_v8 = vadd.f32 %v17797_v43, %v1357_v24 }
 0x1d1   : > { %3098 = vmatprep.mubr.bf16.mxu0 %v17926_v37  ;;  %v1363_v7 = vadd.f32 %v1362_v52, %v17811_v19  ;;  %v1552_v35 = vadd.f32 %v17799_v22, %v1359_v42  ;;  %v15691_v22 = vld [vmem:[%s20983_s3 + $0x280] ss:$16 sps:$4 sm:$0xff]   ;;  %v15693_v52 = vld [vmem:[%s20983_s3 + $0x284] ss:$16 sps:$4 sm:$0xff]  }
 0x1d2   : > { %1851 = vmatmul.mubr.bf16.gmra.mrb[124].mxu1 %v17732_v5  ;;  %3099 = vmatmul.mubr.bf16.gmra.mrb[76].mxu0 %v17923_v58  ;;  %v1554_v28 = vadd.f32 %v17801_v6, %v1361_v55  ;;  %v2086_v57 = vmax.f32 %v1550_v8, 0.0  ;;  %v15631_v6 = vld [vmem:[%s20983_s3 + $0x8] ss:$16 sps:$4 sm:$0xff]   ;;  %v15636_v8 = vld [vmem:[%s20983_s3 + $0x2c] ss:$16 sps:$4 sm:$0xff]  }
 0x1d3   : > { %1893 = vmatprep.mubr.bf16.mxu1 %v21167_v21  ;;  %v1556_v43 = vadd.f32 %v17807_v60, %v1363_v7  ;;  %v2087_v24 = vmax.f32 %v1552_v35, 0.0  ;;  %3237 = vmatprep.subr.bf16.mxu0 %v15693_v52 }
 0x1d4   : > { %v2090_v31 = vmax.f32 %v1554_v28, 0.0  ;;  %3238 = vmatpush1.bf16.msra.mxu0 %v15691_v22 }
 0x1d5   : > { %v1366_v10 = vpop.f32.mrb[20].mxu1  ;;  %v2091_v49 = vmax.f32 %v1556_v43, 0.0  ;;  %v17965_v43 = vpop.f32.mrb[40].mxu0 }
 0x1d6   : > { %v1368_v42 = vpop.f32.mrb[21].mxu1  ;;  %v17956_v55 = vpack.c.bf16 %v2090_v31, %v2086_v57  ;;  %v1367_v60 = vadd.f32 %v1366_v10, %v17805_v0  ;;  %v17969_v31 = vpop.f32.mrb[41].mxu0 }
 0x1d7   : > { %v1370_v7 = vpop.f32.mrb[22].mxu1  ;;  %v17962_v28 = vpack.c.bf16 %v2091_v49, %v2087_v24  ;;  %v1369_v35 = vadd.f32 %v1368_v42, %v17811_v19  ;;  %v17974_v24 = vpop.f32.mrb[42].mxu0  ;;  %v15634_v49 = vld [vmem:[%s20983_s3 + $0x28] ss:$16 sps:$4 sm:$0xff]   ;;  %v15694_v42 = vld [vmem:[%s20983_s3 + $0x2a0] ss:$16 sps:$4 sm:$0xff]  }
 0x1d8   : > { %21168 = vst [vmem:[#allocation56_spill] sm:$0xff] %v17956_v55  ;;  %v1372_v5 = vpop.f32.mrb[23].mxu1  ;;  %v1371_v58 = vadd.f32 %v1370_v7, %v17805_v0  ;;  %v1560_v57 = vadd.f32 %v17815_v29, %v1367_v60  ;;  %v17983_v22 = vpop.f32.mrb[43].mxu0  ;;  %v15696_v60 = vld [vmem:[%s20983_s3 + $0x2a4] ss:$16 sps:$4 sm:$0xff]  }
 0x1d9   : > { %21169 = vst [vmem:[#allocation57_spill] sm:$0xff] %v17962_v28  ;;  %3108 = vmatprep.mubr.bf16.mxu0 %v17962_v28  ;;  %v1373_v10 = vadd.f32 %v1372_v5, %v17811_v19  ;;  %v1562_v52 = vadd.f32 %v17818_v2, %v1369_v35  ;;  %v15639_v5 = vld [vmem:[%s20983_s3 + $0x4c] ss:$16 sps:$4 sm:$0xff]   ;;  %3239 = vmatprep.subr.bf16.mxu0 %v15696_v60 }
 0x1da   : > { %12993 = vmatmul.mubr.msk.bf16.vlgmr.msra.gmra.mrb[64].mxu1 %vm1220_vm1, %v17220_v26  ;;  %3109 = vmatmul.mubr.bf16.gmra.mrb[80].mxu0 %v17956_v55  ;;  %v1564_v29 = vadd.f32 %v17821_v51, %v1371_v58  ;;  %v2094_v51 = vmax.f32 %v1560_v57, 0.0  ;;  %v15637_v55 = vld [vmem:[%s20983_s3 + $0x48] ss:$16 sps:$4 sm:$0xff]   ;;  %v15642_v28 = vld [vmem:[%s20983_s3 + $0x6c] ss:$16 sps:$4 sm:$0xff]  }
 0x1db   : > { %1903 = vmatprep.mubr.bf16.mxu1 %v21167_v21  ;;  %v1566_v2 = vadd.f32 %v17824_v61, %v1373_v10  ;;  %3423 = vmatpush1.bf16.msra.mxu1 %v15631_v6  ;;  %v2095_v35 = vmax.f32 %v1562_v52, 0.0 }
 0x1dc   : > { %v2098_v58 = vmax.f32 %v1564_v29, 0.0  ;;  %3424 = vmatprep.subr.bf16.mxu1 %v15636_v8  ;;  %3240 = vmatpush1.bf16.msra.mxu0 %v15694_v42  ;;  %v18008_v29 = vpop.f32.mrb[44].mxu0 }
 0x1dd   : > { %v1376_v7 = vpop.f32.mrb[24].mxu1  ;;  %v2099_v26 = vmax.f32 %v1566_v2, 0.0 }
 0x1de   : > { %v1378_v61 = vpop.f32.mrb[25].mxu1  ;;  %v17999_v6 = vpack.c.bf16 %v2098_v58, %v2094_v51  ;;  %v1377_v10 = vadd.f32 %v1376_v7, %v17805_v0  ;;  %v18012_v58 = vpop.f32.mrb[45].mxu0 }
 0x1df   : > { %v1380_v57 = vpop.f32.mrb[26].mxu1  ;;  %v18005_v8 = vpack.c.bf16 %v2099_v26, %v2095_v35  ;;  %v1379_v52 = vadd.f32 %v1378_v61, %v17811_v19  ;;  %3425 = vmatpush1.bf16.msra.mxu1 %v15634_v49  ;;  %v18017_v7 = vpop.f32.mrb[46].mxu0  ;;  %v15640_v49 = vld [vmem:[%s20983_s3 + $0x68] ss:$16 sps:$4 sm:$0xff]   ;;  %v15645_v35 = vld [vmem:[%s20983_s3 + $0x8c] ss:$16 sps:$4 sm:$0xff]  }
 0x1e0   : > { %21170 = vst [vmem:[#allocation58_spill] sm:$0xff] %v17999_v6  ;;  %v1382_v2 = vpop.f32.mrb[27].mxu1  ;;  %v1381_v60 = vadd.f32 %v1380_v57, %v17805_v0  ;;  %v1570_v51 = vadd.f32 %v17839_v14, %v1377_v10  ;;  %3426 = vmatprep.subr.bf16.mxu1 %v15639_v5  ;;  %v18026_v5 = vpop.f32.mrb[47].mxu0  ;;  %v15697_v61 = vld [vmem:[%s20983_s3 + $0x2c0] ss:$16 sps:$4 sm:$0xff]  }
 0x1e1   : > { %3118 = vmatprep.mubr.bf16.mxu0 %v18005_v8  ;;  %v1383_v42 = vadd.f32 %v1382_v2, %v17811_v19  ;;  %v1572_v26 = vadd.f32 %v17843_v53, %v1379_v52  ;;  %v15699_v10 = vld [vmem:[%s20983_s3 + $0x2c4] ss:$16 sps:$4 sm:$0xff]  }
 0x1e2   : > { %12994 = vmatmul.mubr.msk.bf16.gmra.mrb[68].mxu1 %vm1220_vm1, %v17239_v33  ;;  %3119 = vmatmul.mubr.bf16.gmra.mrb[84].mxu0 %v17999_v6  ;;  %v1574_v14 = vadd.f32 %v17848_v59, %v1381_v60  ;;  %v2102_v59 = vmax.f32 %v1570_v51, 0.0  ;;  %v15643_v33 = vld [vmem:[%s20983_s3 + $0x88] ss:$16 sps:$4 sm:$0xff]   ;;  %v15648_v6 = vld [vmem:[%s20983_s3 + $0xac] ss:$16 sps:$4 sm:$0xff]  }
 0x1e3   : > { %1913 = vmatprep.mubr.bf16.mxu1 %v21167_v21  ;;  %v1576_v53 = vadd.f32 %v17853_v11, %v1383_v42  ;;  %3427 = vmatpush1.bf16.msra.mxu1 %v15637_v55  ;;  %v2103_v2 = vmax.f32 %v1572_v26, 0.0 }
 0x1e4   : > { %v2106_v57 = vmax.f32 %v1574_v14, 0.0  ;;  %3428 = vmatprep.subr.bf16.mxu1 %v15642_v28  ;;  %3241 = vmatprep.subr.bf16.mxu0 %v15699_v10  ;;  %v18051_v14 = vpop.f32.mrb[48].mxu0 }
 0x1e5   : > { %v1386_v52 = vpop.f32.mrb[28].mxu1  ;;  %v2107_v60 = vmax.f32 %v1576_v53, 0.0  ;;  %3242 = vmatpush1.bf16.msra.mxu0 %v15697_v61 }
 0x1e6   : > { %v1388_v11 = vpop.f32.mrb[29].mxu1  ;;  %v18042_v55 = vpack.c.bf16 %v2106_v57, %v2102_v59  ;;  %v1387_v42 = vadd.f32 %v1386_v52, %v17805_v0  ;;  %v18055_v57 = vpop.f32.mrb[49].mxu0 }
 0x1e7   : > { %v1390_v51 = vpop.f32.mrb[30].mxu1  ;;  %v18048_v28 = vpack.c.bf16 %v2107_v60, %v2103_v2  ;;  %v1389_v26 = vadd.f32 %v1388_v11, %v17811_v19  ;;  %3429 = vmatpush1.bf16.msra.mxu1 %v15640_v49  ;;  %v18060_v2 = vpop.f32.mrb[50].mxu0  ;;  %v15702_v11 = vld [vmem:[%s20983_s3 + $0x2e4] ss:$16 sps:$4 sm:$0xff]  }
 0x1e8   : > { %21171 = vst [vmem:[#allocation59_spill] sm:$0xff] %v18042_v55  ;;  %v1392_v53 = vpop.f32.mrb[31].mxu1  ;;  %v1391_v10 = vadd.f32 %v1390_v51, %v17805_v0  ;;  %v1580_v59 = vadd.f32 %v17869_v16, %v1387_v42  ;;  %3430 = vmatprep.subr.bf16.mxu1 %v15645_v35  ;;  %v18066_v60 = vpop.f32.mrb[51].mxu0  ;;  %v15700_v35 = vld [vmem:[%s20983_s3 + $0x2e0] ss:$16 sps:$4 sm:$0xff]   ;;  %3243 = vmatprep.subr.bf16.mxu0 %v15702_v11 }
 0x1e9   : > { %3128 = vmatprep.mubr.bf16.mxu0 %v18048_v28  ;;  %v1393_v61 = vadd.f32 %v1392_v53, %v17811_v19  ;;  %v1582_v52 = vadd.f32 %v17873_v38, %v1389_v26  ;;  %v15646_v38 = vld [vmem:[%s20983_s3 + $0xa8] ss:$16 sps:$4 sm:$0xff]   ;;  %3244 = vmatpush1.bf16.msra.mxu0 %v15700_v35  ;;  %v15654_v35 = vld [vmem:[%s20983_s3 + $0xec] ss:$16 sps:$4 sm:$0xff]  }
 0x1ea   : > { %12995 = vmatmul.mubr.msk.bf16.gmra.mrb[72].mxu1 %vm1220_vm1, %v17258_v40  ;;  %3129 = vmatmul.mubr.bf16.gmra.mrb[88].mxu0 %v18042_v55  ;;  %v1584_v49 = vadd.f32 %v17878_v25, %v1391_v10  ;;  %v2110_v25 = vmax.f32 %v1580_v59, 0.0 }
 0x1eb   : > { %1923 = vmatprep.mubr.bf16.mxu1 %v21167_v21  ;;  %v1586_v16 = vadd.f32 %v17883_v9, %v1393_v61  ;;  %3431 = vmatpush1.bf16.msra.mxu1 %v15643_v33  ;;  %v15651_v9 = vld [vmem:[%s20983_s3 + $0xcc] ss:$16 sps:$4 sm:$0xff]   ;;  %v2111_v51 = vmax.f32 %v1582_v52, 0.0  ;;  %v15649_v52 = vld [vmem:[%s20983_s3 + $0xc8] ss:$16 sps:$4 sm:$0xff]  }
 0x1ec   : > { %v2114_v42 = vmax.f32 %v1584_v49, 0.0  ;;  %3432 = vmatprep.subr.bf16.mxu1 %v15648_v6  ;;  %v18088_v6 = vpop.f32.mrb[52].mxu0 }
 0x1ed   : > { %v1396_v33 = vpop.f32.mrb[32].mxu1  ;;  %v2115_v26 = vmax.f32 %v1586_v16, 0.0 }
 0x1ee   : > { %v1398_v53 = vpop.f32.mrb[33].mxu1  ;;  %v18082_v10 = vpack.c.bf16 %v2114_v42, %v2110_v25  ;;  %v1397_v61 = vadd.f32 %v1396_v33, %v17805_v0  ;;  %v18095_v25 = vpop.f32.mrb[53].mxu0 }
 0x1ef   : > { %v1400_v40 = vpop.f32.mrb[34].mxu1  ;;  %v18085_v55 = vpack.c.bf16 %v2115_v26, %v2111_v51  ;;  %v1399_v59 = vadd.f32 %v1398_v53, %v17811_v19  ;;  %3433 = vmatpush1.bf16.msra.mxu1 %v15646_v38  ;;  %v18103_v33 = vpop.f32.mrb[54].mxu0  ;;  %v15703_v51 = vld [vmem:[%s20983_s3 + $0x300] ss:$16 sps:$4 sm:$0xff]   ;;  %v15705_v26 = vld [vmem:[%s20983_s3 + $0x304] ss:$16 sps:$4 sm:$0xff]  }
 0x1f0   : > { %21172 = vst [vmem:[#allocation60_spill] sm:$0xff] %v18082_v10  ;;  %v1402_v49 = vpop.f32.mrb[35].mxu1  ;;  %v1401_v16 = vadd.f32 %v1400_v40, %v17805_v0  ;;  %v1590_v11 = vadd.f32 %v17899_v36, %v1397_v61  ;;  %3434 = vmatprep.subr.bf16.mxu1 %v15651_v9  ;;  %v18109_v36 = vpop.f32.mrb[55].mxu0  ;;  %3245 = vmatprep.subr.bf16.mxu0 %v15705_v26 }
 0x1f1   : > { %3138 = vmatprep.mubr.bf16.mxu0 %v18085_v55  ;;  %v1403_v38 = vadd.f32 %v1402_v49, %v17811_v19  ;;  %v1592_v42 = vadd.f32 %v17903_v13, %v1399_v59  ;;  %v15652_v13 = vld [vmem:[%s20983_s3 + $0xe8] ss:$16 sps:$4 sm:$0xff]   ;;  %3246 = vmatpush1.bf16.msra.mxu0 %v15703_v51  ;;  %v15663_v51 = vld [vmem:[%s20983_s3 + $0x12c] ss:$16 sps:$4 sm:$0xff]  }
 0x1f2   : > { %12996 = vmatmul.mubr.msk.bf16.gmra.mrb[76].mxu1 %vm1220_vm1, %v17277_v47  ;;  %3139 = vmatmul.mubr.bf16.gmra.mrb[92].mxu0 %v18082_v10  ;;  %v1594_v40 = vadd.f32 %v17908_v18, %v1401_v16  ;;  %v2118_v18 = vmax.f32 %v1590_v11, 0.0 }
 0x1f3   : > { %1933 = vmatprep.mubr.bf16.mxu1 %v21167_v21  ;;  %v1596_v9 = vadd.f32 %v17913_v15, %v1403_v38  ;;  %3435 = vmatpush1.bf16.msra.mxu1 %v15649_v52  ;;  %v15660_v15 = vld [vmem:[%s20983_s3 + $0x10c] ss:$16 sps:$4 sm:$0xff]   ;;  %v2119_v59 = vmax.f32 %v1592_v42, 0.0  ;;  %v15658_v42 = vld [vmem:[%s20983_s3 + $0x108] ss:$16 sps:$4 sm:$0xff]  }
 0x1f4   : > { %v2122_v53 = vmax.f32 %v1594_v40, 0.0  ;;  %3436 = vmatprep.subr.bf16.mxu1 %v15654_v35  ;;  %v18131_v35 = vpop.f32.mrb[56].mxu0 }
 0x1f5   : > { %v1406_v61 = vpop.f32.mrb[36].mxu1  ;;  %v2123_v52 = vmax.f32 %v1596_v9, 0.0 }
 0x1f6   : > { %v1408_v49 = vpop.f32.mrb[37].mxu1  ;;  %v18125_v16 = vpack.c.bf16 %v2122_v53, %v2118_v18  ;;  %v1407_v38 = vadd.f32 %v1406_v61, %v17805_v0  ;;  %v18138_v18 = vpop.f32.mrb[57].mxu0 }
 0x1f7   : > { %v1410_v47 = vpop.f32.mrb[38].mxu1  ;;  %v18128_v10 = vpack.c.bf16 %v2123_v52, %v2119_v59  ;;  %v1409_v11 = vadd.f32 %v1408_v49, %v17811_v19  ;;  %3437 = vmatpush1.bf16.msra.mxu1 %v15652_v13  ;;  %v18146_v61 = vpop.f32.mrb[58].mxu0  ;;  %v15706_v59 = vld [vmem:[%s20983_s3 + $0x320] ss:$16 sps:$4 sm:$0xff]   ;;  %v15708_v52 = vld [vmem:[%s20983_s3 + $0x324] ss:$16 sps:$4 sm:$0xff]  }
 0x1f8   : > { %21173 = vst [vmem:[#allocation61_spill] sm:$0xff] %v18125_v16  ;;  %v1412_v40 = vpop.f32.mrb[39].mxu1  ;;  %v1411_v9 = vadd.f32 %v1410_v47, %v17805_v0  ;;  %v1600_v26 = vadd.f32 %v17929_v56, %v1407_v38  ;;  %3438 = vmatprep.subr.bf16.mxu1 %v15660_v15  ;;  %v18152_v56 = vpop.f32.mrb[59].mxu0  ;;  %3247 = vmatprep.subr.bf16.mxu0 %v15708_v52 }
 0x1f9   : > { %3148 = vmatprep.mubr.bf16.mxu0 %v18128_v10  ;;  %v1413_v13 = vadd.f32 %v1412_v40, %v17811_v19  ;;  %v1602_v53 = vadd.f32 %v17933_v45, %v1409_v11  ;;  %v15661_v45 = vld [vmem:[%s20983_s3 + $0x128] ss:$16 sps:$4 sm:$0xff]   ;;  %3248 = vmatpush1.bf16.msra.mxu0 %v15706_v59  ;;  %v15672_v59 = vld [vmem:[%s20983_s3 + $0x16c] ss:$16 sps:$4 sm:$0xff]  }
 0x1fa   : > { %12997 = vmatmul.mubr.msk.bf16.gmra.mrb[80].mxu1 %vm1220_vm1, %v17296_v54  ;;  %3149 = vmatmul.mubr.bf16.gmra.mrb[96].mxu0 %v18125_v16  ;;  %v1604_v47 = vadd.f32 %v17938_v1, %v1411_v9  ;;  %v2126_v1 = vmax.f32 %v1600_v26, 0.0 }
 0x1fb   : > { %1943 = vmatprep.mubr.bf16.mxu1 %v21167_v21  ;;  %v1606_v15 = vadd.f32 %v17943_v34, %v1413_v13  ;;  %3439 = vmatpush1.bf16.msra.mxu1 %v15658_v42  ;;  %v15669_v34 = vld [vmem:[%s20983_s3 + $0x14c] ss:$16 sps:$4 sm:$0xff]   ;;  %v2127_v11 = vmax.f32 %v1602_v53, 0.0  ;;  %v15667_v53 = vld [vmem:[%s20983_s3 + $0x148] ss:$16 sps:$4 sm:$0xff]  }
 0x1fc   : > { %v2130_v49 = vmax.f32 %v1604_v47, 0.0  ;;  %3440 = vmatprep.subr.bf16.mxu1 %v15663_v51  ;;  %v18174_v51 = vpop.f32.mrb[60].mxu0 }
 0x1fd   : > { %v1416_v38 = vpop.f32.mrb[40].mxu1  ;;  %v2131_v42 = vmax.f32 %v1606_v15, 0.0 }
 0x1fe   : > { %v1418_v40 = vpop.f32.mrb[41].mxu1  ;;  %v18168_v9 = vpack.c.bf16 %v2130_v49, %v2126_v1  ;;  %v1417_v13 = vadd.f32 %v1416_v38, %v17805_v0  ;;  %v18181_v1 = vpop.f32.mrb[61].mxu0 }
 0x1ff   : > { %v1420_v54 = vpop.f32.mrb[42].mxu1  ;;  %v18171_v16 = vpack.c.bf16 %v2131_v42, %v2127_v11  ;;  %v1419_v26 = vadd.f32 %v1418_v40, %v17811_v19  ;;  %3441 = vmatpush1.bf16.msra.mxu1 %v15661_v45  ;;  %v18189_v38 = vpop.f32.mrb[62].mxu0  ;;  %v15709_v11 = vld [vmem:[%s20983_s3 + $0x340] ss:$16 sps:$4 sm:$0xff]   ;;  %v15711_v42 = vld [vmem:[%s20983_s3 + $0x344] ss:$16 sps:$4 sm:$0xff]  }
 0x200   : > { %21174 = vst [vmem:[#allocation62_spill] sm:$0xff] %v18168_v9  ;;  %v1422_v47 = vpop.f32.mrb[43].mxu1  ;;  %v1421_v15 = vadd.f32 %v1420_v54, %v17805_v0  ;;  %v1610_v52 = vadd.f32 %v17965_v43, %v1417_v13  ;;  %3442 = vmatprep.subr.bf16.mxu1 %v15669_v34  ;;  %v18195_v43 = vpop.f32.mrb[63].mxu0  ;;  %3249 = vmatprep.subr.bf16.mxu0 %v15711_v42 }
 0x201   : > { %3158 = vmatprep.mubr.bf16.mxu0 %v18171_v16  ;;  %v1423_v45 = vadd.f32 %v1422_v47, %v17811_v19  ;;  %v1612_v49 = vadd.f32 %v17969_v31, %v1419_v26  ;;  %v15670_v31 = vld [vmem:[%s20983_s3 + $0x168] ss:$16 sps:$4 sm:$0xff]   ;;  %3250 = vmatpush1.bf16.msra.mxu0 %v15709_v11  ;;  %v15681_v11 = vld [vmem:[%s20983_s3 + $0x1ac] ss:$16 sps:$4 sm:$0xff]  }
 0x202   : > { %12998 = vmatmul.mubr.msk.bf16.gmra.mrb[84].mxu1 %vm1220_vm1, %v17323_v4  ;;  %3159 = vmatmul.mubr.bf16.gmra.mrb[100].mxu0 %v18168_v9  ;;  %v1614_v54 = vadd.f32 %v17974_v24, %v1421_v15  ;;  %v2134_v24 = vmax.f32 %v1610_v52, 0.0 }
 0x203   : > { %1953 = vmatprep.mubr.bf16.mxu1 %v21167_v21  ;;  %v1616_v34 = vadd.f32 %v17983_v22, %v1423_v45  ;;  %3443 = vmatpush1.bf16.msra.mxu1 %v15667_v53  ;;  %v15678_v22 = vld [vmem:[%s20983_s3 + $0x18c] ss:$16 sps:$4 sm:$0xff]   ;;  %v2135_v26 = vmax.f32 %v1612_v49, 0.0 }
 0x204   : > { %v2138_v40 = vmax.f32 %v1614_v54, 0.0  ;;  %3444 = vmatprep.subr.bf16.mxu1 %v15672_v59  ;;  %v15676_v59 = vld [vmem:[%s20983_s3 + $0x188] ss:$16 sps:$4 sm:$0xff]  }
 0x205   : > { %v1426_v13 = vpop.f32.mrb[44].mxu1  ;;  %v2139_v53 = vmax.f32 %v1616_v34, 0.0 }
 0x206   : > { %v1428_v47 = vpop.f32.mrb[45].mxu1  ;;  %v18211_v15 = vpack.c.bf16 %v2138_v40, %v2134_v24  ;;  %v1427_v45 = vadd.f32 %v1426_v13, %v17805_v0  ;;  %v15679_v24 = vld [vmem:[%s20983_s3 + $0x1a8] ss:$16 sps:$4 sm:$0xff]   ;;  %v15714_v40 = vld [vmem:[%s20983_s3 + $0x364] ss:$16 sps:$4 sm:$0xff]  }
 0x207   : > { %v1430_v4 = vpop.f32.mrb[46].mxu1  ;;  %v18214_v9 = vpack.c.bf16 %v2139_v53, %v2135_v26  ;;  %v1429_v52 = vadd.f32 %v1428_v47, %v17811_v19  ;;  %3445 = vmatpush1.bf16.msra.mxu1 %v15670_v31  ;;  %3251 = vmatprep.subr.bf16.mxu0 %v15714_v40  ;;  %v15688_v40 = vld [vmem:[%s20983_s3 + $0x1e8] ss:$16 sps:$4 sm:$0xff]  }
 0x208   : > { %v1432_v54 = vpop.f32.mrb[47].mxu1  ;;  %v1431_v49 = vadd.f32 %v1430_v4, %v17805_v0  ;;  %v1620_v34 = vadd.f32 %v18008_v29, %v1427_v45  ;;  %3446 = vmatprep.subr.bf16.mxu1 %v15678_v22 }
 0x209   : > { %3168 = vmatprep.mubr.bf16.mxu0 %v18214_v9  ;;  %v1433_v42 = vadd.f32 %v1432_v54, %v17811_v19  ;;  %v1622_v31 = vadd.f32 %v18012_v58, %v1429_v52  ;;  %v15712_v58 = vld [vmem:[%s20983_s3 + $0x360] ss:$16 sps:$4 sm:$0xff]  }
 0x20a   : > { %12999 = vmatmul.mubr.msk.bf16.gmra.mrb[88].mxu1 %vm1220_vm1, %v17352_v17  ;;  %3169 = vmatmul.mubr.bf16.gmra.mrb[104].mxu0 %v18211_v15  ;;  %v1624_v4 = vadd.f32 %v18017_v7, %v1431_v49  ;;  %v2142_v22 = vmax.f32 %v1620_v34, 0.0  ;;  %v15687_v7 = vld [vmem:[%s20983_s3 + $0x1cc] ss:$16 sps:$4 sm:$0xff]   ;;  %v15685_v34 = vld [vmem:[%s20983_s3 + $0x1c8] ss:$16 sps:$4 sm:$0xff]  }
 0x20b   : > { %1963 = vmatprep.mubr.bf16.mxu1 %v21167_v21  ;;  %v1626_v29 = vadd.f32 %v18026_v5, %v1433_v42  ;;  %3447 = vmatpush1.bf16.msra.mxu1 %v15676_v59  ;;  %v2143_v26 = vmax.f32 %v1622_v31, 0.0 }
 0x20c   : > { %v2146_v13 = vmax.f32 %v1624_v4, 0.0  ;;  %3448 = vmatprep.subr.bf16.mxu1 %v15681_v11  ;;  %3252 = vmatpush1.bf16.msra.mxu0 %v15712_v58  ;;  %v15690_v4 = vld [vmem:[%s20983_s3 + $0x1ec] ss:$16 sps:$4 sm:$0xff]  }
 0x20d   : > { %v1436_v5 = vpop.f32.mrb[48].mxu1  ;;  %v2147_v53 = vmax.f32 %v1626_v29, 0.0 }
 0x20e   : > { %v1438_v47 = vpop.f32.mrb[49].mxu1  ;;  %v18246_v45 = vpack.c.bf16 %v2146_v13, %v2142_v22  ;;  %v1437_v52 = vadd.f32 %v1436_v5, %v17805_v0  ;;  %v15717_v22 = vld [vmem:[%s20983_s3 + $0x384] ss:$16 sps:$4 sm:$0xff]  }
 0x20f   : > { %v1440_v59 = vpop.f32.mrb[50].mxu1  ;;  %v18249_v54 = vpack.c.bf16 %v2147_v53, %v2143_v26  ;;  %v1439_v49 = vadd.f32 %v1438_v47, %v17811_v19  ;;  %3449 = vmatpush1.bf16.msra.mxu1 %v15679_v24  ;;  %3253 = vmatprep.subr.bf16.mxu0 %v15717_v22 }
 0x210   : > { %v1442_v11 = vpop.f32.mrb[51].mxu1  ;;  %v1441_v42 = vadd.f32 %v1440_v59, %v17805_v0  ;;  %v1630_v31 = vadd.f32 %v18051_v14, %v1437_v52  ;;  %3450 = vmatprep.subr.bf16.mxu1 %v15687_v7 }
 0x211   : > { %3178 = vmatprep.mubr.bf16.mxu0 %v18249_v54  ;;  %v1443_v29 = vadd.f32 %v1442_v11, %v17811_v19  ;;  %v1632_v24 = vadd.f32 %v18055_v57, %v1439_v49  ;;  %v15715_v57 = vld [vmem:[%s20983_s3 + $0x380] ss:$16 sps:$4 sm:$0xff]  }
 0x212   : > { %13000 = vmatmul.mubr.msk.bf16.gmra.mrb[92].mxu1 %vm1220_vm1, %v17381_v32  ;;  %3179 = vmatmul.mubr.bf16.gmra.mrb[108].mxu0 %v18246_v45  ;;  %v1634_v58 = vadd.f32 %v18060_v2, %v1441_v42  ;;  %v2150_v13 = vmax.f32 %v1630_v31, 0.0  ;;  %v15720_v31 = vld [vmem:[%s20983_s3 + $0x20c] ss:$16 sps:$4 sm:$0xff]  }
 0x213   : > { %1973 = vmatprep.mubr.bf16.mxu1 %v21167_v21  ;;  %v1636_v14 = vadd.f32 %v18066_v60, %v1443_v29  ;;  %3451 = vmatpush1.bf16.msra.mxu1 %v15685_v34  ;;  %v2151_v5 = vmax.f32 %v1632_v24, 0.0 }
 0x214   : > { %v2154_v7 = vmax.f32 %v1634_v58, 0.0  ;;  %3452 = vmatprep.subr.bf16.mxu1 %v15690_v4  ;;  %3254 = vmatpush1.bf16.msra.mxu0 %v15715_v57 }
 0x215   : > { %v1446_v2 = vpop.f32.mrb[52].mxu1  ;;  %v2155_v26 = vmax.f32 %v1636_v14, 0.0 }
 0x216   : > { %v1448_v60 = vpop.f32.mrb[53].mxu1  ;;  %v18278_v53 = vpack.c.bf16 %v2154_v7, %v2150_v13  ;;  %v1447_v47 = vadd.f32 %v1446_v2, %v17805_v0 }
 0x217   : > { %v1450_v52 = vpop.f32.mrb[54].mxu1  ;;  %v18281_v59 = vpack.c.bf16 %v2155_v26, %v2151_v5  ;;  %v1449_v49 = vadd.f32 %v1448_v60, %v17811_v19  ;;  %3453 = vmatpush1.bf16.msra.mxu1 %v15688_v40  ;;  %v15724_v40 = vld [vmem:[%s20983_s3 + $0x3a0] ss:$16 sps:$4 sm:$0xff]  }
 0x218   : > { %v1452_v34 = vpop.f32.mrb[55].mxu1  ;;  %v1451_v11 = vadd.f32 %v1450_v52, %v17805_v0  ;;  %v1640_v42 = vadd.f32 %v18088_v6, %v1447_v47  ;;  %3615 = vmatprep.subr.bf16.mxu1 %v15720_v31 }
 0x219   : > { %3188 = vmatprep.mubr.bf16.mxu0 %v18281_v59  ;;  %v1453_v4 = vadd.f32 %v1452_v34, %v17811_v19  ;;  %v1642_v29 = vadd.f32 %v18095_v25, %v1449_v49  ;;  %v15726_v25 = vld [vmem:[%s20983_s3 + $0x3a4] ss:$16 sps:$4 sm:$0xff]  }
 0x21a   : > { %13001 = vmatmul.mubr.msk.bf16.gmra.mrb[96].mxu1 %vm1220_vm1, %v17410_v48  ;;  %3189 = vmatmul.mubr.bf16.gmra.mrb[112].mxu0 %v18278_v53  ;;  %v1644_v24 = vadd.f32 %v18103_v33, %v1451_v11  ;;  %v2158_v58 = vmax.f32 %v1640_v42, 0.0 }
 0x21b   : > { %1983 = vmatprep.mubr.bf16.mxu1 %v21167_v21  ;;  %v1646_v6 = vadd.f32 %v18109_v36, %v1453_v4  ;;  %v2159_v22 = vmax.f32 %v1642_v29, 0.0  ;;  %3255 = vmatprep.subr.bf16.mxu0 %v15726_v25 }
 0x21c   : > { %v2162_v14 = vmax.f32 %v1644_v24, 0.0  ;;  %3256 = vmatpush1.bf16.msra.mxu0 %v15724_v40 }
 0x21d   : > { %v1456_v57 = vpop.f32.mrb[56].mxu1  ;;  %v2163_v13 = vmax.f32 %v1646_v6, 0.0 }
 0x21e   : > { %v1458_v7 = vpop.f32.mrb[57].mxu1  ;;  %v18304_v33 = vpack.c.bf16 %v2162_v14, %v2158_v58  ;;  %v1457_v2 = vadd.f32 %v1456_v57, %v17805_v0 }
 0x21f   : > { %v1460_v36 = vpop.f32.mrb[58].mxu1  ;;  %v18307_v5 = vpack.c.bf16 %v2163_v13, %v2159_v22  ;;  %v1459_v26 = vadd.f32 %v1458_v7, %v17811_v19 }
 0x220   : > { %v1462_v60 = vpop.f32.mrb[59].mxu1  ;;  %v1461_v47 = vadd.f32 %v1460_v36, %v17805_v0  ;;  %v1650_v52 = vadd.f32 %v18131_v35, %v1457_v2  ;;  %v15733_v35 = vld [vmem:[%s20983_s3 + $0x3c0] ss:$16 sps:$4 sm:$0xff]  }
 0x221   : > { %3198 = vmatprep.mubr.bf16.mxu0 %v18307_v5  ;;  %v1463_v49 = vadd.f32 %v1462_v60, %v17811_v19  ;;  %v1652_v34 = vadd.f32 %v18138_v18, %v1459_v26  ;;  %v15735_v18 = vld [vmem:[%s20983_s3 + $0x3c4] ss:$16 sps:$4 sm:$0xff]  }
 0x222   : > { %13002 = vmatmul.mubr.msk.bf16.gmra.mrb[100].mxu1 %vm1220_vm1, %v17439_v62  ;;  %3199 = vmatmul.mubr.bf16.gmra.mrb[116].mxu0 %v18304_v33  ;;  %v1654_v11 = vadd.f32 %v18146_v61, %v1461_v47  ;;  %v2166_v31 = vmax.f32 %v1650_v52, 0.0 }
 0x223   : > { %1993 = vmatprep.mubr.bf16.mxu1 %v21167_v21  ;;  %v1656_v42 = vadd.f32 %v18152_v56, %v1463_v49  ;;  %v2167_v24 = vmax.f32 %v1652_v34, 0.0  ;;  %3257 = vmatprep.subr.bf16.mxu0 %v15735_v18  ;;  %v15723_v49 = vld [vmem:[%s20983_s3 + $0x22c] ss:$16 sps:$4 sm:$0xff]   ;;  %v15721_v34 = vld [vmem:[%s20983_s3 + $0x228] ss:$16 sps:$4 sm:$0xff]  }
 0x224   : > { %v2170_v4 = vmax.f32 %v1654_v11, 0.0  ;;  %3258 = vmatpush1.bf16.msra.mxu0 %v15733_v35  ;;  %v15727_v11 = vld [vmem:[%s20983_s3 + $0x248] ss:$16 sps:$4 sm:$0xff]  }
 0x225   : > { %v1466_v29 = vpop.f32.mrb[60].mxu1  ;;  %v2171_v6 = vmax.f32 %v1656_v42, 0.0  ;;  %v15738_v42 = vld [vmem:[%s20983_s3 + $0x28c] ss:$16 sps:$4 sm:$0xff]   ;;  %v15745_v35 = vld [vmem:[%s20983_s3 + $0x2c8] ss:$16 sps:$4 sm:$0xff]  }
 0x226   : > { %v1468_v58 = vpop.f32.mrb[61].mxu1  ;;  %v18327_v14 = vpack.c.bf16 %v2170_v4, %v2166_v31  ;;  %v1467_v61 = vadd.f32 %v1466_v29, %v17805_v0  ;;  %v15736_v31 = vld [vmem:[%s20983_s3 + $0x288] ss:$16 sps:$4 sm:$0xff]   ;;  %v15747_v4 = vld [vmem:[%s20983_s3 + $0x2cc] ss:$16 sps:$4 sm:$0xff]  }
 0x227   : > { %v1470_v56 = vpop.f32.mrb[62].mxu1  ;;  %v18330_v40 = vpack.c.bf16 %v2171_v6, %v2167_v24  ;;  %v1469_v25 = vadd.f32 %v1468_v58, %v17811_v19  ;;  %v21176_v18 = vld [vmem:[#allocation57_spill] sm:$0xff] }
 0x228   : > { %v1472_v57 = vpop.f32.mrb[63].mxu1  ;;  %v1471_v22 = vadd.f32 %v1470_v56, %v17805_v0  ;;  %v1660_v13 = vadd.f32 %v18174_v51, %v1467_v61  ;;  %v15748_v29 = vld [vmem:[%s20983_s3 + $0x2e8] ss:$16 sps:$4 sm:$0xff]   ;;  %v15753_v24 = vld [vmem:[%s20983_s3 + $0x30c] ss:$16 sps:$4 sm:$0xff]  }
 0x229   : > { %3208 = vmatprep.mubr.bf16.mxu0 %v18330_v40  ;;  %v1473_v7 = vadd.f32 %v1472_v57, %v17811_v19  ;;  %v1662_v2 = vadd.f32 %v18181_v1, %v1469_v25  ;;  %v15744_v1 = vld [vmem:[%s20983_s3 + $0x3e4] ss:$16 sps:$4 sm:$0xff]   ;;  %v15751_v6 = vld [vmem:[%s20983_s3 + $0x308] ss:$16 sps:$4 sm:$0xff]   ;;  %v15756_v58 = vld [vmem:[%s20983_s3 + $0x32c] ss:$16 sps:$4 sm:$0xff]  }
 0x22a   : > { %13003 = vmatmul.mubr.msk.bf16.gmra.mrb[104].mxu1 %vm1220_vm1, %v17480_v23  ;;  %3209 = vmatmul.mubr.bf16.gmra.mrb[120].mxu0 %v18327_v14  ;;  %v1664_v36 = vadd.f32 %v18189_v38, %v1471_v22  ;;  %v2174_v0 = vmax.f32 %v1660_v13, 0.0  ;;  %v15742_v38 = vld [vmem:[%s20983_s3 + $0x3e0] ss:$16 sps:$4 sm:$0xff]   ;;  %v15754_v56 = vld [vmem:[%s20983_s3 + $0x328] ss:$16 sps:$4 sm:$0xff]  }
 0x22b   : > { %2003 = vmatprep.mubr.bf16.mxu1 %v21167_v21  ;;  %v1666_v26 = vadd.f32 %v18195_v43, %v1473_v7  ;;  %v2175_v51 = vmax.f32 %v1662_v2, 0.0  ;;  %3259 = vmatprep.subr.bf16.mxu0 %v15744_v1  ;;  %v15718_v43 = vld [vmem:[%s20983_s3 + $0x208] ss:$16 sps:$4 sm:$0xff]   ;;  %v15759_v25 = vld [vmem:[%s20983_s3 + $0x34c] ss:$16 sps:$4 sm:$0xff]  }
 0x22c   : > { %v2178_v60 = vmax.f32 %v1664_v36, 0.0  ;;  %3260 = vmatpush1.bf16.msra.mxu0 %v15742_v38  ;;  %v21177_v61 = vld [vmem:[#allocation56_spill] sm:$0xff]  ;;  %v21178_v22 = vld [vmem:[#allocation58_spill] sm:$0xff]  ;;  %v15765_v7 = vld [vmem:[%s20983_s3 + $0x38c] ss:$16 sps:$4 sm:$0xff]  }
 0x22d   : > { %v2179_v47 = vmax.f32 %v1666_v26, 0.0  ;;  %v15757_v57 = vld [vmem:[%s20983_s3 + $0x348] ss:$16 sps:$4 sm:$0xff]   ;;  %v15777_v1 = vld [vmem:[%s20985_s5 + $0x4] ss:$16 sps:$4 sm:$0xff]  }
 0x22e   : > { %v18344_v52 = vpack.c.bf16 %v2178_v60, %v2174_v0  ;;  %v15760_v13 = vld [vmem:[%s20983_s3 + $0x368] ss:$16 sps:$4 sm:$0xff]   ;;  %v15771_v0 = vld [vmem:[%s20983_s3 + $0x3cc] ss:$16 sps:$4 sm:$0xff]   ;;  %4790 = vmatprep.subr.bf16.mxu0 %v15777_v1 }
 0x22f   : > { %v18346_v19 = vpack.c.bf16 %v2179_v47, %v2175_v51  ;;  %v15763_v2 = vld [vmem:[%s20983_s3 + $0x388] ss:$16 sps:$4 sm:$0xff]  }
 0x230   : > { %v21179_v36 = vld [vmem:[#allocation59_spill] sm:$0xff]  ;;  %v21180_v51 = vld [vmem:[#allocation60_spill] sm:$0xff]  ;;  %v21181_v38 = vld [vmem:[#allocation61_spill] sm:$0xff] }
 0x231   : > { %3218 = vmatprep.mubr.bf16.mxu0 %v18346_v19  ;;  %v15766_v26 = vld [vmem:[%s20983_s3 + $0x3a8] ss:$16 sps:$4 sm:$0xff]  }
 0x232   : > { %13004 = vmatmul.mubr.msk.bf16.gmra.mrb[108].mxu1 %vm1220_vm1, %v17521_v50  ;;  %3219 = vmatmul.mubr.bf16.gmra.mrb[124].mxu0 %v18344_v52  ;;  %v15769_v60 = vld [vmem:[%s20983_s3 + $0x3c8] ss:$16 sps:$4 sm:$0xff]  }
 0x233   : > { %2013 = vmatprep.mubr.bf16.mxu1 %v21167_v21  ;;  %v15772_v47 = vld [vmem:[%s20983_s3 + $0x3e8] ss:$16 sps:$4 sm:$0xff]  }
 0x23a   : > { %13005 = vmatmul.mubr.msk.bf16.gmra.mrb[112].mxu1 %vm1220_vm1, %v17567_v12 }
 0x23b   : > { %2023 = vmatprep.mubr.bf16.mxu1 %v21167_v21 }
 0x242   : > { %13006 = vmatmul.mubr.msk.bf16.gmra.mrb[116].mxu1 %vm1220_vm1, %v17601_v39 }
 0x243   : > { %2033 = vmatprep.mubr.bf16.mxu1 %v21167_v21 }
 0x24a   : > { %13007 = vmatmul.mubr.msk.bf16.gmra.mrb[120].mxu1 %vm1220_vm1, %v17631_v3 }
 0x24b   : > { %2043 = vmatprep.mubr.bf16.mxu1 %v21167_v21 }
 0x252   : > { %13008 = vmatmul.mubr.msk.bf16.gmra.mrb[124].mxu1 %vm1220_vm1, %v17660_v30 }
 0x253   : > { %3454 = vmatprep.mubr.bf16.mxu1 %v17836_v20  ;;  %v15729_v20 = vld [vmem:[%s20983_s3 + $0x24c] ss:$16 sps:$4 sm:$0xff]  }
 0x25a   : > { %3455 = vmatmul.mubr.bf16.vlgmr.msra.gmra.mrb[128].mxu1 %v17833_v27  ;;  %v15732_v27 = vld [vmem:[%s20983_s3 + $0x26c] ss:$16 sps:$4 sm:$0xff]  }
 0x25b   : > { %3464 = vmatprep.mubr.bf16.mxu1 %v17866_v44  ;;  %3616 = vmatpush1.bf16.msra.mxu1 %v15718_v43  ;;  %v15730_v44 = vld [vmem:[%s20983_s3 + $0x268] ss:$16 sps:$4 sm:$0xff]  }
 0x25c   : > { %3617 = vmatprep.subr.bf16.mxu1 %v15723_v49  ;;  %v21182_v43 = vld [vmem:[#allocation62_spill] sm:$0xff] }
 0x25f   : > { %3618 = vmatpush1.bf16.msra.mxu1 %v15721_v34 }
 0x260   : > { %3619 = vmatprep.subr.bf16.mxu1 %v15729_v20  ;;  %v16707_v20 = vld [vmem:[%s21163_s28] sm:$0xf] }
 0x262   : > { %3465 = vmatmul.mubr.bf16.gmra.mrb[132].mxu1 %v17863_v63  ;;  %v15741_v63 = vld [vmem:[%s20983_s3 + $0x2ac] ss:$16 sps:$4 sm:$0xff]  }
 0x263   : > { %3474 = vmatprep.mubr.bf16.mxu1 %v17896_v46  ;;  %3620 = vmatpush1.bf16.msra.mxu1 %v15727_v11  ;;  %v15739_v46 = vld [vmem:[%s20983_s3 + $0x2a8] ss:$16 sps:$4 sm:$0xff]  }
 0x264   : > { %3621 = vmatprep.subr.bf16.mxu1 %v15732_v27 }
 0x267   : > { %3622 = vmatpush1.bf16.msra.mxu1 %v15730_v44 }
 0x268   : > { %3623 = vmatprep.subr.bf16.mxu1 %v15738_v42 }
 0x26a   : > { %3475 = vmatmul.mubr.bf16.gmra.mrb[136].mxu1 %v17893_v41  ;;  %v15750_v41 = vld [vmem:[%s20983_s3 + $0x2ec] ss:$16 sps:$4 sm:$0xff]  }
 0x26b   : > { %3484 = vmatprep.mubr.bf16.mxu1 %v17926_v37  ;;  %3624 = vmatpush1.bf16.msra.mxu1 %v15736_v31  ;;  %v21175_v37 = vld [vmem:[#allocation55_spill] sm:$0xff] }
 0x26c   : > { %3625 = vmatprep.subr.bf16.mxu1 %v15741_v63 }
 0x26f   : > { %3626 = vmatpush1.bf16.msra.mxu1 %v15739_v46 }
 0x270   : > { %3627 = vmatprep.subr.bf16.mxu1 %v15747_v4 }
 0x272   : > { %3485 = vmatmul.mubr.bf16.gmra.mrb[140].mxu1 %v21175_v37 }
 0x273   : > { %3494 = vmatprep.mubr.bf16.mxu1 %v21176_v18  ;;  %3628 = vmatpush1.bf16.msra.mxu1 %v15745_v35 }
 0x274   : > { %3629 = vmatprep.subr.bf16.mxu1 %v15750_v41 }
 0x277   : > { %3630 = vmatpush1.bf16.msra.mxu1 %v15748_v29 }
 0x278   : > { %3631 = vmatprep.subr.bf16.mxu1 %v15753_v24  ;;  %v15775_v24 = vld [vmem:[%s20985_s5] ss:$16 sps:$4 sm:$0xff]  }
 0x27a   : > { %3495 = vmatmul.mubr.bf16.gmra.mrb[144].mxu1 %v21177_v61 }
 0x27b   : > { %3504 = vmatprep.mubr.bf16.mxu1 %v18005_v8  ;;  %3632 = vmatpush1.bf16.msra.mxu1 %v15751_v6  ;;  %v15762_v8 = vld [vmem:[%s20983_s3 + $0x36c] ss:$16 sps:$4 sm:$0xff]  }
 0x27c   : > { %3633 = vmatprep.subr.bf16.mxu1 %v15756_v58 }
 0x27f   : > { %3634 = vmatpush1.bf16.msra.mxu1 %v15754_v56 }
 0x280   : > { %3635 = vmatprep.subr.bf16.mxu1 %v15759_v25 }
 0x282   : > { %3505 = vmatmul.mubr.bf16.gmra.mrb[148].mxu1 %v21178_v22 }
 0x283   : > { %3514 = vmatprep.mubr.bf16.mxu1 %v18048_v28  ;;  %3636 = vmatpush1.bf16.msra.mxu1 %v15757_v57  ;;  %v15768_v28 = vld [vmem:[%s20983_s3 + $0x3ac] ss:$16 sps:$4 sm:$0xff]  }
 0x284   : > { %3637 = vmatprep.subr.bf16.mxu1 %v15762_v8  ;;  %v15778_v8 = vld [vmem:[%s20985_s5 + $0x20] ss:$16 sps:$4 sm:$0xff]  }
 0x287   : > { %3638 = vmatpush1.bf16.msra.mxu1 %v15760_v13 }
 0x288   : > { %3639 = vmatprep.subr.bf16.mxu1 %v15765_v7  ;;  %v15783_v7 = vld [vmem:[%s20985_s5 + $0x44] ss:$16 sps:$4 sm:$0xff]  }
 0x28a   : > { %3515 = vmatmul.mubr.bf16.gmra.mrb[152].mxu1 %v21179_v36 }
 0x28b   : > { %3524 = vmatprep.mubr.bf16.mxu1 %v18085_v55  ;;  %3640 = vmatpush1.bf16.msra.mxu1 %v15763_v2  ;;  %v15774_v55 = vld [vmem:[%s20983_s3 + $0x3ec] ss:$16 sps:$4 sm:$0xff]  }
 0x28c   : > { %3641 = vmatprep.subr.bf16.mxu1 %v15768_v28 }
 0x28f   : > { %3642 = vmatpush1.bf16.msra.mxu1 %v15766_v26 }
 0x290   : > { %3643 = vmatprep.subr.bf16.mxu1 %v15771_v0 }
 0x292   : > { %3525 = vmatmul.mubr.bf16.gmra.mrb[156].mxu1 %v21180_v51 }
 0x293   : > { %3534 = vmatprep.mubr.bf16.mxu1 %v18128_v10  ;;  %3644 = vmatpush1.bf16.msra.mxu1 %v15769_v60  ;;  %v21183_v10 = vld [vmem:[#allocation52_spill] sm:$0xff] }
 0x294   : > { %3645 = vmatprep.subr.bf16.mxu1 %v15774_v55  ;;  %v18488_v49 = vsub.s32 2, %v21183_v10  ;;  %v18491_v34 = vsub.s32 3, %v21183_v10  ;;  %v15784_v10 = vld [vmem:[%s20985_s5 + $0x60] ss:$16 sps:$4 sm:$0xff]  }
 0x296   : > { %21184 = vst [vmem:[#allocation55_spill] sm:$0xff] %v18488_v49  ;;  %21185 = vst [vmem:[#allocation57_spill] sm:$0xff] %v18491_v34  ;;  %v18498_v11 = vrot.slane %v16707_v20, %v18488_v49 }
 0x297   : > { %3646 = vmatpush1.bf16.msra.mxu1 %v15772_v47 }
 0x29a   : > { %3535 = vmatmul.mubr.bf16.gmra.mrb[160].mxu1 %v21181_v38 }
 0x29b   : > { %3544 = vmatprep.mubr.bf16.mxu1 %v18171_v16  ;;  %v18502_v16 = vrot.slane %v16707_v20, %v18491_v34 }
 0x2a2   : > { %3545 = vmatmul.mubr.bf16.gmra.mrb[164].mxu1 %v21182_v43 }
 0x2a3   : > { %3554 = vmatprep.mubr.bf16.mxu1 %v18214_v9 }
 0x2aa   : > { %3555 = vmatmul.mubr.bf16.gmra.mrb[168].mxu1 %v18211_v15 }
 0x2ab   : > { %3564 = vmatprep.mubr.bf16.mxu1 %v18249_v54 }
 0x2ad   : > { %v1895_v9 = vpop.f32.mrb[64].mxu1 }
 0x2ae   : > { %v13882_v27 = vadd.f32 %v1895_v9, %v18498_v11  ;;  %v1897_v44 = vpop.f32.mrb[65].mxu1 }
 0x2af   : > { %v13883_v42 = vadd.f32 %v1897_v44, %v18502_v16  ;;  %v1899_v31 = vpop.f32.mrb[66].mxu1 }
 0x2b0   : > { %v13884_v15 = vadd.f32 %v1899_v31, %v18498_v11  ;;  %v1901_v63 = vpop.f32.mrb[67].mxu1  ;;  %v2056_v4 = vmax.f32 %v13882_v27, 0.0  ;;  %v15789_v27 = vld [vmem:[%s20985_s5 + $0x84] ss:$16 sps:$4 sm:$0xff]  }
 0x2b1   : > { %v13885_v46 = vadd.f32 %v1901_v63, %v18502_v16  ;;  %v2057_v54 = vmax.f32 %v13883_v42, 0.0 }
 0x2b2   : > { %v2060_v35 = vmax.f32 %v13884_v15, 0.0  ;;  %3565 = vmatmul.mubr.bf16.gmra.mrb[172].mxu1 %v18246_v45  ;;  %v15780_v45 = vld [vmem:[%s20985_s5 + $0x24] ss:$16 sps:$4 sm:$0xff]  }
 0x2b3   : > { %3574 = vmatprep.mubr.bf16.mxu1 %v18281_v59  ;;  %v2061_v41 = vmax.f32 %v13885_v46, 0.0 }
 0x2b4   : > { %v18510_v37 = vpack.c.bf16 %v2060_v35, %v2056_v4 }
 0x2b5   : > { %v1905_v18 = vpop.f32.mrb[68].mxu1  ;;  %v18512_v29 = vpack.c.bf16 %v2061_v41, %v2057_v54 }
 0x2b6   : > { %v13886_v6 = vadd.f32 %v1905_v18, %v18498_v11  ;;  %v1907_v58 = vpop.f32.mrb[69].mxu1 }
 0x2b7   : > { %v13887_v59 = vadd.f32 %v1907_v58, %v18502_v16  ;;  %v1909_v61 = vpop.f32.mrb[70].mxu1  ;;  %3261 = vmatprep.mubr.bf16.mxu0 %v18512_v29 }
 0x2b8   : > { %v13888_v56 = vadd.f32 %v1909_v61, %v18498_v11  ;;  %v1911_v25 = vpop.f32.mrb[71].mxu1  ;;  %3262 = vmatmul.mubr.bf16.vlgmr.msra.gmra.mrb[64].mxu0 %v18510_v37  ;;  %v2064_v22 = vmax.f32 %v13886_v6, 0.0  ;;  %v15790_v6 = vld [vmem:[%s20985_s5 + $0xa0] ss:$16 sps:$4 sm:$0xff]  }
 0x2b9   : > { %v13889_v57 = vadd.f32 %v1911_v25, %v18502_v16  ;;  %4791 = vmatpush1.bf16.msra.mxu0 %v15775_v24  ;;  %v2065_v2 = vmax.f32 %v13887_v59, 0.0  ;;  %v15795_v59 = vld [vmem:[%s20985_s5 + $0xc4] ss:$16 sps:$4 sm:$0xff]  }
 0x2ba   : > { %3575 = vmatmul.mubr.bf16.gmra.mrb[176].mxu1 %v18278_v53  ;;  %v2068_v13 = vmax.f32 %v13888_v56, 0.0  ;;  %4792 = vmatprep.subr.bf16.mxu0 %v15780_v45  ;;  %v15781_v53 = vld [vmem:[%s20985_s5 + $0x40] ss:$16 sps:$4 sm:$0xff]  }
 0x2bb   : > { %3584 = vmatprep.mubr.bf16.mxu1 %v18307_v5  ;;  %v2069_v28 = vmax.f32 %v13889_v57, 0.0  ;;  %v15786_v5 = vld [vmem:[%s20985_s5 + $0x64] ss:$16 sps:$4 sm:$0xff]  }
 0x2bc   : > { %v18534_v36 = vpack.c.bf16 %v2068_v13, %v2064_v22 }
 0x2bd   : > { %v1915_v26 = vpop.f32.mrb[72].mxu1  ;;  %v18536_v0 = vpack.c.bf16 %v2069_v28, %v2065_v2  ;;  %4793 = vmatpush1.bf16.msra.mxu0 %v15778_v8 }
 0x2be   : > { %v13890_v60 = vadd.f32 %v1915_v26, %v18498_v11  ;;  %v1917_v55 = vpop.f32.mrb[73].mxu1  ;;  %4794 = vmatprep.subr.bf16.mxu0 %v15783_v7 }
 0x2bf   : > { %v13891_v51 = vadd.f32 %v1917_v55, %v18502_v16  ;;  %v1919_v47 = vpop.f32.mrb[74].mxu1  ;;  %3271 = vmatprep.mubr.bf16.mxu0 %v18536_v0 }
 0x2c0   : > { %v13892_v1 = vadd.f32 %v1919_v47, %v18498_v11  ;;  %v1921_v38 = vpop.f32.mrb[75].mxu1  ;;  %3272 = vmatmul.mubr.bf16.gmra.mrb[68].mxu0 %v18534_v36  ;;  %v2072_v20 = vmax.f32 %v13890_v60, 0.0  ;;  %v15796_v60 = vld [vmem:[%s20985_s5 + $0xe0] ss:$16 sps:$4 sm:$0xff]  }
 0x2c1   : > { %v13893_v43 = vadd.f32 %v1921_v38, %v18502_v16  ;;  %4795 = vmatpush1.bf16.msra.mxu0 %v15781_v53  ;;  %v2073_v44 = vmax.f32 %v13891_v51, 0.0  ;;  %v15801_v51 = vld [vmem:[%s20985_s5 + $0x104] ss:$16 sps:$4 sm:$0xff]   ;;  %v15804_v38 = vld [vmem:[%s20985_s5 + $0xc] ss:$16 sps:$4 sm:$0xff]  }
 0x2c2   : > { %3585 = vmatmul.mubr.bf16.gmra.mrb[180].mxu1 %v18304_v33  ;;  %v2076_v9 = vmax.f32 %v13892_v1, 0.0  ;;  %4796 = vmatprep.subr.bf16.mxu0 %v15786_v5  ;;  %v15787_v33 = vld [vmem:[%s20985_s5 + $0x80] ss:$16 sps:$4 sm:$0xff]  }
 0x2c3   : > { %3594 = vmatprep.mubr.bf16.mxu1 %v18330_v40  ;;  %v2077_v42 = vmax.f32 %v13893_v43, 0.0  ;;  %v15792_v40 = vld [vmem:[%s20985_s5 + $0xa4] ss:$16 sps:$4 sm:$0xff]   ;;  %5176 = vmatprep.subr.bf16.mxu1 %v15804_v38 }
 0x2c4   : > { %v18558_v31 = vpack.c.bf16 %v2076_v9, %v2072_v20 }
 0x2c5   : > { %v1925_v15 = vpop.f32.mrb[76].mxu1  ;;  %v18560_v63 = vpack.c.bf16 %v2077_v42, %v2073_v44  ;;  %4797 = vmatpush1.bf16.msra.mxu0 %v15784_v10 }
 0x2c6   : > { %v13894_v46 = vadd.f32 %v1925_v15, %v18498_v11  ;;  %v1927_v4 = vpop.f32.mrb[77].mxu1  ;;  %4798 = vmatprep.subr.bf16.mxu0 %v15789_v27  ;;  %v15810_v27 = vld [vmem:[%s20985_s5 + $0x124] ss:$16 sps:$4 sm:$0xff]   ;;  %v15802_v15 = vld [vmem:[%s20985_s5 + $0x8] ss:$16 sps:$4 sm:$0xff]  }
 0x2c7   : > { %v13895_v35 = vadd.f32 %v1927_v4, %v18502_v16  ;;  %v1929_v54 = vpop.f32.mrb[78].mxu1  ;;  %3281 = vmatprep.mubr.bf16.mxu0 %v18560_v63  ;;  %v15807_v4 = vld [vmem:[%s20985_s5 + $0x2c] ss:$16 sps:$4 sm:$0xff]  }
 0x2c8   : > { %v13896_v41 = vadd.f32 %v1929_v54, %v18498_v11  ;;  %v1931_v18 = vpop.f32.mrb[79].mxu1  ;;  %3282 = vmatmul.mubr.bf16.gmra.mrb[72].mxu0 %v18558_v31  ;;  %v2080_v58 = vmax.f32 %v13894_v46, 0.0 }
 0x2c9   : > { %v13897_v24 = vadd.f32 %v1931_v18, %v18502_v16  ;;  %4799 = vmatpush1.bf16.msra.mxu0 %v15787_v33  ;;  %v2081_v61 = vmax.f32 %v13895_v35, 0.0  ;;  %v15808_v35 = vld [vmem:[%s20985_s5 + $0x120] ss:$16 sps:$4 sm:$0xff]   ;;  %v15819_v18 = vld [vmem:[%s20985_s5 + $0x144] ss:$16 sps:$4 sm:$0xff]  }
 0x2ca   : > { %3595 = vmatmul.mubr.bf16.gmra.mrb[184].mxu1 %v18327_v14  ;;  %v2084_v45 = vmax.f32 %v13896_v41, 0.0  ;;  %4800 = vmatprep.subr.bf16.mxu0 %v15792_v40  ;;  %v15793_v14 = vld [vmem:[%s20985_s5 + $0xc0] ss:$16 sps:$4 sm:$0xff]  }
 0x2cb   : > { %3604 = vmatprep.mubr.bf16.mxu1 %v18346_v19  ;;  %v2085_v56 = vmax.f32 %v13897_v24, 0.0  ;;  %v15798_v19 = vld [vmem:[%s20985_s5 + $0xe4] ss:$16 sps:$4 sm:$0xff]  }
 0x2cc   : > { %v18582_v25 = vpack.c.bf16 %v2084_v45, %v2080_v58  ;;  %v15805_v58 = vld [vmem:[%s20985_s5 + $0x28] ss:$16 sps:$4 sm:$0xff]  }
 0x2cd   : > { %v1935_v57 = vpop.f32.mrb[80].mxu1  ;;  %v18584_v8 = vpack.c.bf16 %v2085_v56, %v2081_v61  ;;  %4801 = vmatpush1.bf16.msra.mxu0 %v15790_v6 }
 0x2ce   : > { %v13898_v22 = vadd.f32 %v1935_v57, %v18498_v11  ;;  %v1937_v13 = vpop.f32.mrb[81].mxu1  ;;  %4802 = vmatprep.subr.bf16.mxu0 %v15795_v59 }
 0x2cf   : > { %v13899_v7 = vadd.f32 %v1937_v13, %v18502_v16  ;;  %v1939_v2 = vpop.f32.mrb[82].mxu1  ;;  %3291 = vmatprep.mubr.bf16.mxu0 %v18584_v8 }
 0x2d0   : > { %v13900_v28 = vadd.f32 %v1939_v2, %v18498_v11  ;;  %v1941_v26 = vpop.f32.mrb[83].mxu1  ;;  %3292 = vmatmul.mubr.bf16.gmra.mrb[76].mxu0 %v18582_v25  ;;  %v2088_v55 = vmax.f32 %v13898_v22, 0.0 }
 0x2d1   : > { %v13901_v53 = vadd.f32 %v1941_v26, %v18502_v16  ;;  %4803 = vmatpush1.bf16.msra.mxu0 %v15793_v14  ;;  %v2089_v47 = vmax.f32 %v13899_v7, 0.0  ;;  %v15828_v14 = vld [vmem:[%s20985_s5 + $0x164] ss:$16 sps:$4 sm:$0xff]  }
 0x2d2   : > { %3605 = vmatmul.mubr.bf16.gmra.mrb[188].mxu1 %v18344_v52  ;;  %v2092_v5 = vmax.f32 %v13900_v28, 0.0  ;;  %4804 = vmatprep.subr.bf16.mxu0 %v15798_v19  ;;  %v15799_v52 = vld [vmem:[%s20985_s5 + $0x100] ss:$16 sps:$4 sm:$0xff]   ;;  %v15811_v19 = vld [vmem:[%s20985_s5 + $0x48] ss:$16 sps:$4 sm:$0xff]  }
 0x2d3   : > { %3647 = vmatprep.mubr.bf16.mxu1 %v18512_v29  ;;  %v2093_v1 = vmax.f32 %v13901_v53, 0.0  ;;  %v15816_v28 = vld [vmem:[%s20985_s5 + $0x6c] ss:$16 sps:$4 sm:$0xff]   ;;  %v15826_v53 = vld [vmem:[%s20985_s5 + $0x160] ss:$16 sps:$4 sm:$0xff]  }
 0x2d4   : > { %v18609_v43 = vpack.c.bf16 %v2092_v5, %v2088_v55  ;;  %v15837_v5 = vld [vmem:[%s20985_s5 + $0x184] ss:$16 sps:$4 sm:$0xff]  }
 0x2d5   : > { %v1945_v10 = vpop.f32.mrb[84].mxu1  ;;  %v18611_v20 = vpack.c.bf16 %v2093_v1, %v2089_v47  ;;  %4805 = vmatpush1.bf16.msra.mxu0 %v15796_v60  ;;  %v15814_v1 = vld [vmem:[%s20985_s5 + $0x68] ss:$16 sps:$4 sm:$0xff]  }
 0x2d6   : > { %v13902_v9 = vadd.f32 %v1945_v10, %v18498_v11  ;;  %v1947_v29 = vpop.f32.mrb[85].mxu1  ;;  %4806 = vmatprep.subr.bf16.mxu0 %v15801_v51 }
 0x2d7   : > { %v13903_v44 = vadd.f32 %v1947_v29, %v18502_v16  ;;  %v1949_v42 = vpop.f32.mrb[86].mxu1  ;;  %3301 = vmatprep.mubr.bf16.mxu0 %v18611_v20 }
 0x2d8   : > { %v13904_v33 = vadd.f32 %v1949_v42, %v18498_v11  ;;  %v1951_v46 = vpop.f32.mrb[87].mxu1  ;;  %3302 = vmatmul.mubr.bf16.gmra.mrb[80].mxu0 %v18609_v43  ;;  %v2096_v54 = vmax.f32 %v13902_v9, 0.0 }
 0x2d9   : > { %v13905_v40 = vadd.f32 %v1951_v46, %v18502_v16  ;;  %4807 = vmatpush1.bf16.msra.mxu0 %v15799_v52  ;;  %v2097_v24 = vmax.f32 %v13903_v44, 0.0 }
 0x2da   : > { %3648 = vmatmul.mubr.bf16.vlgmr.msra.gmra.mrb[128].mxu1 %v18510_v37  ;;  %v2100_v41 = vmax.f32 %v13904_v33, 0.0  ;;  %4808 = vmatprep.subr.bf16.mxu0 %v15810_v27  ;;  %v15813_v37 = vld [vmem:[%s20985_s5 + $0x4c] ss:$16 sps:$4 sm:$0xff]   ;;  %v15846_v27 = vld [vmem:[%s20985_s5 + $0x1a4] ss:$16 sps:$4 sm:$0xff]  }
 0x2db   : > { %3657 = vmatprep.mubr.bf16.mxu1 %v18536_v0  ;;  %v2101_v6 = vmax.f32 %v13905_v40, 0.0  ;;  %5177 = vmatpush1.bf16.msra.mxu1 %v15802_v15  ;;  %v15817_v0 = vld [vmem:[%s20985_s5 + $0x140] ss:$16 sps:$4 sm:$0xff]   ;;  %v15820_v15 = vld [vmem:[%s20985_s5 + $0x88] ss:$16 sps:$4 sm:$0xff]  }
 0x2dc   : > { %v18642_v45 = vpack.c.bf16 %v2100_v41, %v2096_v54  ;;  %5178 = vmatprep.subr.bf16.mxu1 %v15807_v4  ;;  %v15825_v4 = vld [vmem:[%s20985_s5 + $0xac] ss:$16 sps:$4 sm:$0xff]  }
 0x2dd   : > { %v1955_v59 = vpop.f32.mrb[88].mxu1  ;;  %v18647_v61 = vpack.c.bf16 %v2101_v6, %v2097_v24  ;;  %4809 = vmatpush1.bf16.msra.mxu0 %v15808_v35  ;;  %v15844_v35 = vld [vmem:[%s20985_s5 + $0x1a0] ss:$16 sps:$4 sm:$0xff]  }
 0x2de   : > { %v13906_v56 = vadd.f32 %v1955_v59, %v18498_v11  ;;  %v1957_v57 = vpop.f32.mrb[89].mxu1  ;;  %4810 = vmatprep.subr.bf16.mxu0 %v15819_v18  ;;  %v15855_v18 = vld [vmem:[%s20985_s5 + $0x1c4] ss:$16 sps:$4 sm:$0xff]  }
 0x2df   : > { %v13907_v22 = vadd.f32 %v1957_v57, %v18502_v16  ;;  %v1959_v13 = vpop.f32.mrb[90].mxu1  ;;  %3311 = vmatprep.mubr.bf16.mxu0 %v18647_v61  ;;  %5179 = vmatpush1.bf16.msra.mxu1 %v15805_v58  ;;  %v15823_v58 = vld [vmem:[%s20985_s5 + $0xa8] ss:$16 sps:$4 sm:$0xff]  }
 0x2e0   : > { %v13908_v7 = vadd.f32 %v1959_v13, %v18498_v11  ;;  %v1961_v2 = vpop.f32.mrb[91].mxu1  ;;  %3312 = vmatmul.mubr.bf16.gmra.mrb[84].mxu0 %v18642_v45  ;;  %5180 = vmatprep.subr.bf16.mxu1 %v15813_v37  ;;  %v2104_v60 = vmax.f32 %v13906_v56, 0.0  ;;  %v15829_v13 = vld [vmem:[%s20985_s5 + $0xc8] ss:$16 sps:$4 sm:$0xff]  }
 0x2e1   : > { %v13909_v26 = vadd.f32 %v1961_v2, %v18502_v16  ;;  %4811 = vmatpush1.bf16.msra.mxu0 %v15817_v0  ;;  %v2105_v51 = vmax.f32 %v13907_v22, 0.0  ;;  %v15834_v2 = vld [vmem:[%s20985_s5 + $0xec] ss:$16 sps:$4 sm:$0xff]  }
 0x2e2   : > { %3658 = vmatmul.mubr.bf16.gmra.mrb[132].mxu1 %v18534_v36  ;;  %v2108_v55 = vmax.f32 %v13908_v7, 0.0  ;;  %4812 = vmatprep.subr.bf16.mxu0 %v15828_v14  ;;  %v15822_v36 = vld [vmem:[%s20985_s5 + $0x8c] ss:$16 sps:$4 sm:$0xff]  }
 0x2e3   : > { %3667 = vmatprep.mubr.bf16.mxu1 %v18560_v63  ;;  %v2109_v47 = vmax.f32 %v13909_v26, 0.0  ;;  %5181 = vmatpush1.bf16.msra.mxu1 %v15811_v19  ;;  %v15835_v63 = vld [vmem:[%s20985_s5 + $0x180] ss:$16 sps:$4 sm:$0xff]  }
 0x2e4   : > { %v18678_v38 = vpack.c.bf16 %v2108_v55, %v2104_v60  ;;  %5182 = vmatprep.subr.bf16.mxu1 %v15816_v28 }
 0x2e5   : > { %v1965_v10 = vpop.f32.mrb[92].mxu1  ;;  %v18683_v52 = vpack.c.bf16 %v2109_v47, %v2105_v51  ;;  %4813 = vmatpush1.bf16.msra.mxu0 %v15826_v53  ;;  %v15840_v47 = vld [vmem:[%s20985_s5 + $0x10c] ss:$16 sps:$4 sm:$0xff]  }
 0x2e6   : > { %v13910_v9 = vadd.f32 %v1965_v10, %v18498_v11  ;;  %v1967_v29 = vpop.f32.mrb[93].mxu1  ;;  %4814 = vmatprep.subr.bf16.mxu0 %v15837_v5  ;;  %v15832_v5 = vld [vmem:[%s20985_s5 + $0xe8] ss:$16 sps:$4 sm:$0xff]  }
 0x2e7   : > { %v13911_v44 = vadd.f32 %v1967_v29, %v18502_v16  ;;  %v1969_v42 = vpop.f32.mrb[94].mxu1  ;;  %3321 = vmatprep.mubr.bf16.mxu0 %v18683_v52  ;;  %5183 = vmatpush1.bf16.msra.mxu1 %v15814_v1 }
 0x2e8   : > { %v13912_v33 = vadd.f32 %v1969_v42, %v18498_v11  ;;  %v1971_v46 = vpop.f32.mrb[95].mxu1  ;;  %3322 = vmatmul.mubr.bf16.gmra.mrb[88].mxu0 %v18678_v38  ;;  %5184 = vmatprep.subr.bf16.mxu1 %v15822_v36  ;;  %v2112_v54 = vmax.f32 %v13910_v9, 0.0  ;;  %v15838_v9 = vld [vmem:[%s20985_s5 + $0x108] ss:$16 sps:$4 sm:$0xff]  }
 0x2e9   : > { %v13913_v40 = vadd.f32 %v1971_v46, %v18502_v16  ;;  %4815 = vmatpush1.bf16.msra.mxu0 %v15835_v63  ;;  %v2113_v24 = vmax.f32 %v13911_v44, 0.0  ;;  %v15843_v44 = vld [vmem:[%s20985_s5 + $0x12c] ss:$16 sps:$4 sm:$0xff]  }
 0x2ea   : > { %3668 = vmatmul.mubr.bf16.gmra.mrb[136].mxu1 %v18558_v31  ;;  %v2116_v41 = vmax.f32 %v13912_v33, 0.0  ;;  %4816 = vmatprep.subr.bf16.mxu0 %v15846_v27  ;;  %v15831_v31 = vld [vmem:[%s20985_s5 + $0xcc] ss:$16 sps:$4 sm:$0xff]  }
 0x2eb   : > { %3677 = vmatprep.mubr.bf16.mxu1 %v18584_v8  ;;  %v2117_v6 = vmax.f32 %v13913_v40, 0.0  ;;  %5185 = vmatpush1.bf16.msra.mxu1 %v15820_v15  ;;  %v15853_v8 = vld [vmem:[%s20985_s5 + $0x1c0] ss:$16 sps:$4 sm:$0xff]   ;;  %v15841_v40 = vld [vmem:[%s20985_s5 + $0x128] ss:$16 sps:$4 sm:$0xff]  }
 0x2ec   : > { %v18714_v37 = vpack.c.bf16 %v2116_v41, %v2112_v54  ;;  %5186 = vmatprep.subr.bf16.mxu1 %v15825_v4  ;;  %v15849_v54 = vld [vmem:[%s20985_s5 + $0x14c] ss:$16 sps:$4 sm:$0xff]  }
 0x2ed   : > { %v1975_v59 = vpop.f32.mrb[96].mxu1  ;;  %v18719_v0 = vpack.c.bf16 %v2117_v6, %v2113_v24  ;;  %4817 = vmatpush1.bf16.msra.mxu0 %v15844_v35 }
 0x2ee   : > { %v13914_v56 = vadd.f32 %v1975_v59, %v18498_v11  ;;  %v1977_v57 = vpop.f32.mrb[97].mxu1  ;;  %4818 = vmatprep.subr.bf16.mxu0 %v15855_v18 }
 0x2ef   : > { %v13915_v14 = vadd.f32 %v1977_v57, %v18502_v16  ;;  %v1979_v22 = vpop.f32.mrb[98].mxu1  ;;  %3331 = vmatprep.mubr.bf16.mxu0 %v18719_v0  ;;  %5187 = vmatpush1.bf16.msra.mxu1 %v15823_v58  ;;  %v15847_v58 = vld [vmem:[%s20985_s5 + $0x148] ss:$16 sps:$4 sm:$0xff]  }
 0x2f0   : > { %v13916_v19 = vadd.f32 %v1979_v22, %v18498_v11  ;;  %v1981_v7 = vpop.f32.mrb[99].mxu1  ;;  %3332 = vmatmul.mubr.bf16.gmra.mrb[92].mxu0 %v18714_v37  ;;  %5188 = vmatprep.subr.bf16.mxu1 %v15831_v31  ;;  %v2120_v26 = vmax.f32 %v13914_v56, 0.0 }
 0x2f1   : > { %v13917_v28 = vadd.f32 %v1981_v7, %v18502_v16  ;;  %4819 = vmatpush1.bf16.msra.mxu0 %v15853_v8  ;;  %v2121_v60 = vmax.f32 %v13915_v14, 0.0  ;;  %v15852_v8 = vld [vmem:[%s20985_s5 + $0x16c] ss:$16 sps:$4 sm:$0xff]  }
 0x2f2   : > { %3678 = vmatmul.mubr.bf16.gmra.mrb[140].mxu1 %v18582_v25  ;;  %v2124_v53 = vmax.f32 %v13916_v19, 0.0  ;;  %v15850_v19 = vld [vmem:[%s20985_s5 + $0x168] ss:$16 sps:$4 sm:$0xff]  }
 0x2f3   : > { %3687 = vmatprep.mubr.bf16.mxu1 %v18611_v20  ;;  %v2125_v55 = vmax.f32 %v13917_v28, 0.0  ;;  %5189 = vmatpush1.bf16.msra.mxu1 %v15829_v13 }
 0x2f4   : > { %v18741_v51 = vpack.c.bf16 %v2124_v53, %v2120_v26  ;;  %5190 = vmatprep.subr.bf16.mxu1 %v15834_v2  ;;  %v15858_v2 = vld [vmem:[%s20985_s5 + $0x18c] ss:$16 sps:$4 sm:$0xff]  }
 0x2f5   : > { %v1985_v1 = vpop.f32.mrb[100].mxu1  ;;  %v18746_v25 = vpack.c.bf16 %v2125_v55, %v2121_v60  ;;  %v15856_v55 = vld [vmem:[%s20985_s5 + $0x188] ss:$16 sps:$4 sm:$0xff]  }
 0x2f6   : > { %v13918_v36 = vadd.f32 %v1985_v1, %v18498_v11  ;;  %v1987_v20 = vpop.f32.mrb[101].mxu1  ;;  %v15861_v1 = vld [vmem:[%s20985_s5 + $0x1ac] ss:$16 sps:$4 sm:$0xff]  }
 0x2f7   : > { %v13919_v10 = vadd.f32 %v1987_v20, %v18502_v16  ;;  %v1989_v63 = vpop.f32.mrb[102].mxu1  ;;  %3341 = vmatprep.mubr.bf16.mxu0 %v18746_v25  ;;  %5191 = vmatpush1.bf16.msra.mxu1 %v15832_v5 }
 0x2f8   : > { %v13920_v29 = vadd.f32 %v1989_v63, %v18498_v11  ;;  %v1991_v27 = vpop.f32.mrb[103].mxu1  ;;  %3342 = vmatmul.mubr.bf16.gmra.mrb[96].mxu0 %v18741_v51  ;;  %5192 = vmatprep.subr.bf16.mxu1 %v15840_v47  ;;  %v2128_v15 = vmax.f32 %v13918_v36, 0.0 }
 0x2f9   : > { %v13921_v42 = vadd.f32 %v1991_v27, %v18502_v16  ;;  %v2129_v46 = vmax.f32 %v13919_v10, 0.0 }
 0x2fa   : > { %3688 = vmatmul.mubr.bf16.gmra.mrb[144].mxu1 %v18609_v43  ;;  %v2132_v33 = vmax.f32 %v13920_v29, 0.0  ;;  %v15859_v29 = vld [vmem:[%s20985_s5 + $0x1a8] ss:$16 sps:$4 sm:$0xff]  }
 0x2fb   : > { %3697 = vmatprep.mubr.bf16.mxu1 %v18647_v61  ;;  %v2133_v4 = vmax.f32 %v13921_v42, 0.0  ;;  %5193 = vmatpush1.bf16.msra.mxu1 %v15838_v9 }
 0x2fc   : > { %v18765_v35 = vpack.c.bf16 %v2132_v33, %v2128_v15  ;;  %5194 = vmatprep.subr.bf16.mxu1 %v15843_v44  ;;  %v15867_v44 = vld [vmem:[%s20985_s5 + $0x1cc] ss:$16 sps:$4 sm:$0xff]  }
 0x2fd   : > { %v1995_v41 = vpop.f32.mrb[104].mxu1  ;;  %v18770_v43 = vpack.c.bf16 %v2133_v4, %v2129_v46 }
 0x2fe   : > { %v13922_v18 = vadd.f32 %v1995_v41, %v18498_v11  ;;  %v1997_v61 = vpop.f32.mrb[105].mxu1  ;;  %v15865_v41 = vld [vmem:[%s20985_s5 + $0x1c8] ss:$16 sps:$4 sm:$0xff]  }
 0x2ff   : > { %v13923_v24 = vadd.f32 %v1997_v61, %v18502_v16  ;;  %v1999_v6 = vpop.f32.mrb[106].mxu1  ;;  %3351 = vmatprep.mubr.bf16.mxu0 %v18770_v43  ;;  %5195 = vmatpush1.bf16.msra.mxu1 %v15841_v40  ;;  %v15862_v61 = vld [vmem:[%s20985_s5 + $0x1e0] ss:$16 sps:$4 sm:$0xff]  }
 0x300   : > { %v13924_v31 = vadd.f32 %v1999_v6, %v18498_v11  ;;  %v2001_v59 = vpop.f32.mrb[107].mxu1  ;;  %3352 = vmatmul.mubr.bf16.gmra.mrb[100].mxu0 %v18765_v35  ;;  %5196 = vmatprep.subr.bf16.mxu1 %v15849_v54  ;;  %v2136_v57 = vmax.f32 %v13922_v18, 0.0  ;;  %v15864_v54 = vld [vmem:[%s20985_s5 + $0x1e4] ss:$16 sps:$4 sm:$0xff]  }
 0x301   : > { %v13925_v56 = vadd.f32 %v2001_v59, %v18502_v16  ;;  %v2137_v22 = vmax.f32 %v13923_v24, 0.0  ;;  %v15870_v24 = vld [vmem:[%s20985_s5 + $0x1ec] ss:$16 sps:$4 sm:$0xff]   ;;  %4820 = vmatprep.subr.bf16.mxu0 %v15864_v54 }
 0x302   : > { %3698 = vmatmul.mubr.bf16.gmra.mrb[148].mxu1 %v18642_v45  ;;  %v2140_v14 = vmax.f32 %v13924_v31, 0.0  ;;  %4821 = vmatpush1.bf16.msra.mxu0 %v15862_v61 }
 0x303   : > { %3707 = vmatprep.mubr.bf16.mxu1 %v18683_v52  ;;  %v2141_v13 = vmax.f32 %v13925_v56, 0.0  ;;  %5197 = vmatpush1.bf16.msra.mxu1 %v15847_v58  ;;  %v15868_v56 = vld [vmem:[%s20985_s5 + $0x1e8] ss:$16 sps:$4 sm:$0xff]  }
 0x304   : > { %v18789_v7 = vpack.c.bf16 %v2140_v14, %v2136_v57  ;;  %5198 = vmatprep.subr.bf16.mxu1 %v15852_v8 }
 0x305   : > { %v2005_v28 = vpop.f32.mrb[108].mxu1  ;;  %v18794_v45 = vpack.c.bf16 %v2141_v13, %v2137_v22 }
 0x306   : > { %v13926_v26 = vadd.f32 %v2005_v28, %v18498_v11  ;;  %v2007_v52 = vpop.f32.mrb[109].mxu1 }
 0x307   : > { %v13927_v53 = vadd.f32 %v2007_v52, %v18502_v16  ;;  %v2009_v60 = vpop.f32.mrb[110].mxu1  ;;  %3361 = vmatprep.mubr.bf16.mxu0 %v18794_v45  ;;  %5199 = vmatpush1.bf16.msra.mxu1 %v15850_v19 }
 0x308   : > { %v13928_v5 = vadd.f32 %v2009_v60, %v18498_v11  ;;  %v2011_v47 = vpop.f32.mrb[111].mxu1  ;;  %3362 = vmatmul.mubr.bf16.gmra.mrb[104].mxu0 %v18789_v7  ;;  %5200 = vmatprep.subr.bf16.mxu1 %v15858_v2  ;;  %v2144_v20 = vmax.f32 %v13926_v26, 0.0 }
 0x309   : > { %v13929_v36 = vadd.f32 %v2011_v47, %v18502_v16  ;;  %v2145_v63 = vmax.f32 %v13927_v53, 0.0 }
 0x30a   : > { %3708 = vmatmul.mubr.bf16.gmra.mrb[152].mxu1 %v18678_v38  ;;  %v2148_v10 = vmax.f32 %v13928_v5, 0.0 }
 0x30b   : > { %3717 = vmatprep.mubr.bf16.mxu1 %v18719_v0  ;;  %v2149_v9 = vmax.f32 %v13929_v36, 0.0  ;;  %5201 = vmatpush1.bf16.msra.mxu1 %v15856_v55 }
 0x30c   : > { %v18813_v27 = vpack.c.bf16 %v2148_v10, %v2144_v20  ;;  %5202 = vmatprep.subr.bf16.mxu1 %v15861_v1 }
 0x30d   : > { %v2015_v42 = vpop.f32.mrb[112].mxu1  ;;  %v18818_v38 = vpack.c.bf16 %v2149_v9, %v2145_v63 }
 0x30e   : > { %v13930_v15 = vadd.f32 %v2015_v42, %v18498_v11  ;;  %v2017_v0 = vpop.f32.mrb[113].mxu1 }
 0x30f   : > { %v13931_v33 = vadd.f32 %v2017_v0, %v18502_v16  ;;  %v2019_v46 = vpop.f32.mrb[114].mxu1  ;;  %3371 = vmatprep.mubr.bf16.mxu0 %v18818_v38  ;;  %5203 = vmatpush1.bf16.msra.mxu1 %v15859_v29 }
 0x310   : > { %v13932_v4 = vadd.f32 %v2019_v46, %v18498_v11  ;;  %v2021_v40 = vpop.f32.mrb[115].mxu1  ;;  %3372 = vmatmul.mubr.bf16.gmra.mrb[108].mxu0 %v18813_v27  ;;  %5204 = vmatprep.subr.bf16.mxu1 %v15867_v44  ;;  %v2152_v6 = vmax.f32 %v13930_v15, 0.0 }
 0x311   : > { %v13933_v18 = vadd.f32 %v2021_v40, %v18502_v16  ;;  %v2153_v31 = vmax.f32 %v13931_v33, 0.0 }
 0x312   : > { %3718 = vmatmul.mubr.bf16.gmra.mrb[156].mxu1 %v18714_v37  ;;  %v2156_v58 = vmax.f32 %v13932_v4, 0.0 }
 0x313   : > { %3727 = vmatprep.mubr.bf16.mxu1 %v18746_v25  ;;  %v2157_v59 = vmax.f32 %v13933_v18, 0.0  ;;  %5205 = vmatpush1.bf16.msra.mxu1 %v15865_v41  ;;  %v15873_v25 = vld [vmem:[%s20985_s5 + $0x204] ss:$16 sps:$4 sm:$0xff]  }
 0x314   : > { %v18840_v8 = vpack.c.bf16 %v2156_v58, %v2152_v6  ;;  %5206 = vmatprep.subr.bf16.mxu1 %v15870_v24  ;;  %4983 = vmatprep.subr.bf16.mxu0 %v15873_v25 }
 0x315   : > { %v2025_v57 = vpop.f32.mrb[116].mxu1  ;;  %v2233_v14 = vpack.c.bf16 %v2157_v59, %v2153_v31 }
 0x316   : > { %v13934_v37 = vadd.f32 %v2025_v57, %v18498_v11  ;;  %v2027_v22 = vpop.f32.mrb[117].mxu1 }
 0x317   : > { %v13935_v13 = vadd.f32 %v2027_v22, %v18502_v16  ;;  %v2029_v19 = vpop.f32.mrb[118].mxu1  ;;  %3381 = vmatprep.mubr.bf16.mxu0 %v2233_v14  ;;  %5207 = vmatpush1.bf16.msra.mxu1 %v15868_v56 }
 0x318   : > { %v13936_v2 = vadd.f32 %v2029_v19, %v18498_v11  ;;  %v2031_v28 = vpop.f32.mrb[119].mxu1  ;;  %3382 = vmatmul.mubr.bf16.gmra.mrb[112].mxu0 %v18840_v8  ;;  %v2160_v52 = vmax.f32 %v13934_v37, 0.0 }
 0x319   : > { %v13937_v26 = vadd.f32 %v2031_v28, %v18502_v16  ;;  %v2161_v60 = vmax.f32 %v13935_v13, 0.0 }
 0x31a   : > { %3728 = vmatmul.mubr.bf16.gmra.mrb[160].mxu1 %v18741_v51  ;;  %v2164_v53 = vmax.f32 %v13936_v2, 0.0 }
 0x31b   : > { %3737 = vmatprep.mubr.bf16.mxu1 %v18770_v43  ;;  %v2165_v55 = vmax.f32 %v13937_v26, 0.0 }
 0x31c   : > { %v2236_v5 = vpack.c.bf16 %v2164_v53, %v2160_v52 }
 0x31d   : > { %v2035_v47 = vpop.f32.mrb[120].mxu1  ;;  %v2237_v1 = vpack.c.bf16 %v2165_v55, %v2161_v60 }
 0x31e   : > { %v13938_v36 = vadd.f32 %v2035_v47, %v18498_v11  ;;  %v2037_v20 = vpop.f32.mrb[121].mxu1  ;;  %v15898_v47 = vld [vmem:[%s20985_s5 + $0x208] ss:$16 sps:$4 sm:$0xff]  }
 0x31f   : > { %v13939_v10 = vadd.f32 %v2037_v20, %v18502_v16  ;;  %v2039_v63 = vpop.f32.mrb[122].mxu1  ;;  %3391 = vmatprep.mubr.bf16.mxu0 %v2237_v1  ;;  %v15876_v20 = vld [vmem:[%s20985_s5 + $0x224] ss:$16 sps:$4 sm:$0xff]  }
 0x320   : > { %v13940_v9 = vadd.f32 %v2039_v63, %v18498_v11  ;;  %v2041_v29 = vpop.f32.mrb[123].mxu1  ;;  %3392 = vmatmul.mubr.bf16.gmra.mrb[116].mxu0 %v2236_v5  ;;  %v2168_v43 = vmax.f32 %v13938_v36, 0.0 }
 0x321   : > { %v13941_v51 = vadd.f32 %v2041_v29, %v18502_v16  ;;  %v2169_v42 = vmax.f32 %v13939_v10, 0.0  ;;  %v15903_v10 = vld [vmem:[%s20985_s5 + $0x22c] ss:$16 sps:$4 sm:$0xff]  }
 0x322   : > { %3738 = vmatmul.mubr.bf16.gmra.mrb[164].mxu1 %v18765_v35  ;;  %v2172_v44 = vmax.f32 %v13940_v9, 0.0 }
 0x323   : > { %3747 = vmatprep.mubr.bf16.mxu1 %v18794_v45  ;;  %v2173_v15 = vmax.f32 %v13941_v51, 0.0 }
 0x324   : > { %v2240_v0 = vpack.c.bf16 %v2172_v44, %v2168_v43  ;;  %v15874_v44 = vld [vmem:[%s20985_s5 + $0x220] ss:$16 sps:$4 sm:$0xff]  }
 0x325   : > { %v2045_v33 = vpop.f32.mrb[124].mxu1  ;;  %v2241_v46 = vpack.c.bf16 %v2173_v15, %v2169_v42  ;;  %v15901_v42 = vld [vmem:[%s20985_s5 + $0x228] ss:$16 sps:$4 sm:$0xff]  }
 0x326   : > { %v13942_v4 = vadd.f32 %v2045_v33, %v18498_v11  ;;  %v2047_v40 = vpop.f32.mrb[125].mxu1  ;;  %v15879_v33 = vld [vmem:[%s20985_s5 + $0x244] ss:$16 sps:$4 sm:$0xff]  }
 0x327   : > { %v13943_v54 = vadd.f32 %v2047_v40, %v18502_v16  ;;  %v2049_v41 = vpop.f32.mrb[126].mxu1  ;;  %3401 = vmatprep.mubr.bf16.mxu0 %v2241_v46 }
 0x328   : > { %v13944_v18 = vadd.f32 %v2049_v41, %v18498_v11  ;;  %v2051_v61 = vpop.f32.mrb[127].mxu1  ;;  %3402 = vmatmul.mubr.bf16.gmra.mrb[120].mxu0 %v2240_v0  ;;  %v2176_v45 = vmax.f32 %v13942_v4, 0.0  ;;  %v15900_v11 = vld [vmem:[%s20985_s5 + $0x20c] ss:$16 sps:$4 sm:$0xff]  }
 0x329   : > { %v13945_v35 = vadd.f32 %v2051_v61, %v18502_v16  ;;  %v2177_v6 = vmax.f32 %v13943_v54, 0.0  ;;  %5369 = vmatprep.subr.bf16.mxu1 %v15900_v11  ;;  %v18875_v16 = vld [vmem:[%s20984_s4] sm:$0xf] }
 0x32a   : > { %3748 = vmatmul.mubr.bf16.gmra.mrb[168].mxu1 %v18789_v7  ;;  %v2180_v24 = vmax.f32 %v13944_v18, 0.0  ;;  %v21186_v7 = vld [vmem:[#allocation53_spill] sm:$0xff] }
 0x32b   : > { %3757 = vmatprep.mubr.bf16.mxu1 %v18818_v38  ;;  %v2181_v58 = vmax.f32 %v13945_v35, 0.0  ;;  %v21187_v38 = vld [vmem:[#allocation54_spill] sm:$0xff] }
 0x32c   : > { %v2244_v31 = vpack.c.bf16 %v2180_v24, %v2176_v45  ;;  %v15877_v61 = vld [vmem:[%s20985_s5 + $0x240] ss:$16 sps:$4 sm:$0xff]   ;;  %v15907_v35 = vld [vmem:[%s20985_s5 + $0x248] ss:$16 sps:$4 sm:$0xff]  }
 0x32d   : > { %v2245_v59 = vpack.c.bf16 %v2181_v58, %v2177_v6  ;;  %v15882_v6 = vld [vmem:[%s20985_s5 + $0x264] ss:$16 sps:$4 sm:$0xff]   ;;  %v15912_v58 = vld [vmem:[%s20985_s5 + $0x26c] ss:$16 sps:$4 sm:$0xff]  }
 0x32f   : > { %3411 = vmatprep.mubr.bf16.mxu0 %v2245_v59 }
 0x330   : > { %3412 = vmatmul.mubr.bf16.gmra.mrb[124].mxu0 %v2244_v31 }
 0x332   : > { %3758 = vmatmul.mubr.bf16.gmra.mrb[172].mxu1 %v18813_v27  ;;  %v18879_v27 = vrot.slane %v18875_v16, %v21186_v7 }
 0x333   : > { %3767 = vmatprep.mubr.bf16.mxu1 %v2233_v14 }
 0x33a   : > { %3768 = vmatmul.mubr.bf16.gmra.mrb[176].mxu1 %v18840_v8  ;;  %v18883_v8 = vrot.slane %v18875_v16, %v21187_v38 }
 0x33b   : > { %3777 = vmatprep.mubr.bf16.mxu1 %v2237_v1 }
 0x342   : > { %3778 = vmatmul.mubr.bf16.gmra.mrb[180].mxu1 %v2236_v5  ;;  %v15871_v5 = vld [vmem:[%s20985_s5 + $0x200] ss:$16 sps:$4 sm:$0xff]  }
 0x343   : > { %3787 = vmatprep.mubr.bf16.mxu1 %v2241_v46  ;;  %v15909_v46 = vld [vmem:[%s20985_s5 + $0x24c] ss:$16 sps:$4 sm:$0xff]  }
 0x34a   : > { %3788 = vmatmul.mubr.bf16.gmra.mrb[184].mxu1 %v2240_v0 }
 0x34b   : > { %3797 = vmatprep.mubr.bf16.mxu1 %v2245_v59 }
 0x352   : > { %3798 = vmatmul.mubr.bf16.gmra.mrb[188].mxu1 %v2244_v31 }
 0x38b   : > { %v3263_v56 = vpop.f32.mrb[64].mxu0 }
 0x38c   : > { %v13946_v57 = vadd.f32 %v3263_v56, %v18879_v27  ;;  %v3265_v14 = vpop.f32.mrb[65].mxu0 }
 0x38d   : > { %v13947_v37 = vadd.f32 %v3265_v14, %v18883_v8  ;;  %v3267_v22 = vpop.f32.mrb[66].mxu0  ;;  %v15880_v14 = vld [vmem:[%s20985_s5 + $0x260] ss:$16 sps:$4 sm:$0xff]  }
 0x38e   : > { %v13948_v13 = vadd.f32 %v3267_v22, %v18879_v27  ;;  %v3269_v19 = vpop.f32.mrb[67].mxu0  ;;  %v3808_v2 = vmax.f32 %v13946_v57, 0.0 }
 0x38f   : > { %v13949_v25 = vadd.f32 %v3269_v19, %v18883_v8  ;;  %v3809_v26 = vmax.f32 %v13947_v37, 0.0  ;;  %v15910_v37 = vld [vmem:[%s20985_s5 + $0x268] ss:$16 sps:$4 sm:$0xff]   ;;  %v15885_v19 = vld [vmem:[%s20985_s5 + $0x284] ss:$16 sps:$4 sm:$0xff]  }
 0x390   : > { %v3812_v28 = vmax.f32 %v13948_v13, 0.0 }
 0x391   : > { %v3813_v52 = vmax.f32 %v13949_v25, 0.0  ;;  %v15918_v25 = vld [vmem:[%s20985_s5 + $0x28c] ss:$16 sps:$4 sm:$0xff]  }
 0x392   : > { %v3936_v53 = vpack.c.bf16 %v3812_v28, %v3808_v2 }
 0x393   : > { %v3273_v60 = vpop.f32.mrb[68].mxu0  ;;  %v3937_v55 = vpack.c.bf16 %v3813_v52, %v3809_v26 }
 0x394   : > { %v13950_v1 = vadd.f32 %v3273_v60, %v18879_v27  ;;  %v3275_v36 = vpop.f32.mrb[69].mxu0  ;;  %v15883_v60 = vld [vmem:[%s20985_s5 + $0x280] ss:$16 sps:$4 sm:$0xff]  }
 0x395   : > { %v13951_v63 = vadd.f32 %v3275_v36, %v18883_v8  ;;  %v3277_v9 = vpop.f32.mrb[70].mxu0  ;;  %4822 = vmatprep.mubr.bf16.mxu0 %v3937_v55  ;;  %5208 = vmatprep.mubr.bf16.mxu1 %v3937_v55  ;;  %v15916_v55 = vld [vmem:[%s20985_s5 + $0x288] ss:$16 sps:$4 sm:$0xff]   ;;  %v15921_v36 = vld [vmem:[%s20985_s5 + $0x2ac] ss:$16 sps:$4 sm:$0xff]  }
 0x396   : > { %v13952_v29 = vadd.f32 %v3277_v9, %v18879_v27  ;;  %v3279_v51 = vpop.f32.mrb[71].mxu0  ;;  %4823 = vmatmul.mubr.bf16.vlgmr.msra.gmra.mrb[128].mxu0 %v3936_v53  ;;  %5209 = vmatmul.mubr.bf16.vlgmr.msra.gmra.mrb[192].mxu1 %v3936_v53  ;;  %v3816_v15 = vmax.f32 %v13950_v1, 0.0  ;;  %v15888_v1 = vld [vmem:[%s20985_s5 + $0x2a4] ss:$16 sps:$4 sm:$0xff]  }
 0x397   : > { %v13953_v43 = vadd.f32 %v3279_v51, %v18883_v8  ;;  %4984 = vmatpush1.bf16.msra.mxu0 %v15871_v5  ;;  %5370 = vmatpush1.bf16.msra.mxu1 %v15898_v47  ;;  %v3817_v4 = vmax.f32 %v13951_v63, 0.0  ;;  %v15886_v51 = vld [vmem:[%s20985_s5 + $0x2a0] ss:$16 sps:$4 sm:$0xff]  }
 0x398   : > { %v3820_v0 = vmax.f32 %v13952_v29, 0.0  ;;  %4985 = vmatprep.subr.bf16.mxu0 %v15876_v20  ;;  %5371 = vmatprep.subr.bf16.mxu1 %v15903_v10 }
 0x399   : > { %v3821_v40 = vmax.f32 %v13953_v43, 0.0  ;;  %v15919_v43 = vld [vmem:[%s20985_s5 + $0x2a8] ss:$16 sps:$4 sm:$0xff]  }
 0x39a   : > { %v3940_v54 = vpack.c.bf16 %v3820_v0, %v3816_v15  ;;  %v15891_v15 = vld [vmem:[%s20985_s5 + $0x2c4] ss:$16 sps:$4 sm:$0xff]   ;;  %v15927_v0 = vld [vmem:[%s20985_s5 + $0x2cc] ss:$16 sps:$4 sm:$0xff]  }
 0x39b   : > { %v3283_v41 = vpop.f32.mrb[72].mxu0  ;;  %v3941_v18 = vpack.c.bf16 %v3821_v40, %v3817_v4  ;;  %4986 = vmatpush1.bf16.msra.mxu0 %v15874_v44  ;;  %5372 = vmatpush1.bf16.msra.mxu1 %v15901_v42  ;;  %v18975_v4 = vrot.slane %v18875_v16, %v18488_v49 }
 0x39c   : > { %v13954_v45 = vadd.f32 %v3283_v41, %v18879_v27  ;;  %v3285_v24 = vpop.f32.mrb[73].mxu0  ;;  %4987 = vmatprep.subr.bf16.mxu0 %v15879_v33  ;;  %5373 = vmatprep.subr.bf16.mxu1 %v15909_v46 }
 0x39d   : > { %v13955_v31 = vadd.f32 %v3285_v24, %v18883_v8  ;;  %v3287_v59 = vpop.f32.mrb[74].mxu0  ;;  %4832 = vmatprep.mubr.bf16.mxu0 %v3941_v18  ;;  %5218 = vmatprep.mubr.bf16.mxu1 %v3941_v18  ;;  %v18979_v18 = vrot.slane %v18875_v16, %v18491_v34  ;;  %v15930_v16 = vld [vmem:[%s20985_s5 + $0x2ec] ss:$16 sps:$4 sm:$0xff]  }
 0x39e   : > { %v13956_v11 = vadd.f32 %v3287_v59, %v18879_v27  ;;  %v3289_v56 = vpop.f32.mrb[75].mxu0  ;;  %4833 = vmatmul.mubr.bf16.gmra.mrb[132].mxu0 %v3940_v54  ;;  %5219 = vmatmul.mubr.bf16.gmra.mrb[196].mxu1 %v3940_v54  ;;  %v3824_v22 = vmax.f32 %v13954_v45, 0.0 }
 0x39f   : > { %v13957_v57 = vadd.f32 %v3289_v56, %v18883_v8  ;;  %4988 = vmatpush1.bf16.msra.mxu0 %v15877_v61  ;;  %5374 = vmatpush1.bf16.msra.mxu1 %v15907_v35  ;;  %v3825_v2 = vmax.f32 %v13955_v31, 0.0  ;;  %v15889_v61 = vld [vmem:[%s20985_s5 + $0x2c0] ss:$16 sps:$4 sm:$0xff]   ;;  %v15925_v35 = vld [vmem:[%s20985_s5 + $0x2c8] ss:$16 sps:$4 sm:$0xff]  }
 0x3a0   : > { %v3828_v13 = vmax.f32 %v13956_v11, 0.0  ;;  %4989 = vmatprep.subr.bf16.mxu0 %v15882_v6  ;;  %5375 = vmatprep.subr.bf16.mxu1 %v15912_v58  ;;  %v15894_v6 = vld [vmem:[%s20985_s5 + $0x2e4] ss:$16 sps:$4 sm:$0xff]  }
 0x3a1   : > { %v3829_v28 = vmax.f32 %v13957_v57, 0.0 }
 0x3a2   : > { %v3944_v26 = vpack.c.bf16 %v3828_v13, %v3824_v22 }
 0x3a3   : > { %v3293_v52 = vpop.f32.mrb[76].mxu0  ;;  %v3945_v53 = vpack.c.bf16 %v3829_v28, %v3825_v2  ;;  %4990 = vmatpush1.bf16.msra.mxu0 %v15880_v14  ;;  %5376 = vmatpush1.bf16.msra.mxu1 %v15910_v37  ;;  %v15892_v37 = vld [vmem:[%s20985_s5 + $0x2e0] ss:$16 sps:$4 sm:$0xff]   ;;  %v15928_v2 = vld [vmem:[%s20985_s5 + $0x2e8] ss:$16 sps:$4 sm:$0xff]  }
 0x3a4   : > { %v13958_v5 = vadd.f32 %v3293_v52, %v18879_v27  ;;  %v3295_v47 = vpop.f32.mrb[77].mxu0  ;;  %4991 = vmatprep.subr.bf16.mxu0 %v15885_v19  ;;  %5377 = vmatprep.subr.bf16.mxu1 %v15918_v25  ;;  %v15897_v25 = vld [vmem:[%s20985_s5 + $0x304] ss:$16 sps:$4 sm:$0xff]  }
 0x3a5   : > { %v13959_v20 = vadd.f32 %v3295_v47, %v18883_v8  ;;  %v3297_v10 = vpop.f32.mrb[78].mxu0  ;;  %4842 = vmatprep.mubr.bf16.mxu0 %v3945_v53  ;;  %5228 = vmatprep.mubr.bf16.mxu1 %v3945_v53 }
 0x3a6   : > { %v13960_v63 = vadd.f32 %v3297_v10, %v18879_v27  ;;  %v3299_v9 = vpop.f32.mrb[79].mxu0  ;;  %4843 = vmatmul.mubr.bf16.gmra.mrb[136].mxu0 %v3944_v26  ;;  %5229 = vmatmul.mubr.bf16.gmra.mrb[200].mxu1 %v3944_v26  ;;  %v3832_v44 = vmax.f32 %v13958_v5, 0.0  ;;  %v15895_v10 = vld [vmem:[%s20985_s5 + $0x300] ss:$16 sps:$4 sm:$0xff]  }
 0x3a7   : > { %v13961_v29 = vadd.f32 %v3299_v9, %v18883_v8  ;;  %4992 = vmatpush1.bf16.msra.mxu0 %v15883_v60  ;;  %5378 = vmatpush1.bf16.msra.mxu1 %v15916_v55  ;;  %v3833_v33 = vmax.f32 %v13959_v20, 0.0  ;;  %v15936_v60 = vld [vmem:[%s20985_s5 + $0x30c] ss:$16 sps:$4 sm:$0xff]  }
 0x3a8   : > { %v3836_v42 = vmax.f32 %v13960_v63, 0.0  ;;  %4993 = vmatprep.subr.bf16.mxu0 %v15888_v1  ;;  %5379 = vmatprep.subr.bf16.mxu1 %v15921_v36 }
 0x3a9   : > { %v3837_v46 = vmax.f32 %v13961_v29, 0.0  ;;  %v15934_v29 = vld [vmem:[%s20985_s5 + $0x308] ss:$16 sps:$4 sm:$0xff]  }
 0x3aa   : > { %v3948_v40 = vpack.c.bf16 %v3836_v42, %v3832_v44 }
 0x3ab   : > { %v3303_v54 = vpop.f32.mrb[80].mxu0  ;;  %v3949_v41 = vpack.c.bf16 %v3837_v46, %v3833_v33  ;;  %4994 = vmatpush1.bf16.msra.mxu0 %v15886_v51  ;;  %5380 = vmatpush1.bf16.msra.mxu1 %v15919_v43  ;;  %v15939_v33 = vld [vmem:[%s20985_s5 + $0x32c] ss:$16 sps:$4 sm:$0xff]  }
 0x3ac   : > { %v13962_v45 = vadd.f32 %v3303_v54, %v18879_v27  ;;  %v3305_v24 = vpop.f32.mrb[81].mxu0  ;;  %4995 = vmatprep.subr.bf16.mxu0 %v15891_v15  ;;  %5381 = vmatprep.subr.bf16.mxu1 %v15927_v0  ;;  %v15906_v0 = vld [vmem:[%s20985_s5 + $0x324] ss:$16 sps:$4 sm:$0xff]  }
 0x3ad   : > { %v13963_v58 = vadd.f32 %v3305_v24, %v18883_v8  ;;  %v3307_v31 = vpop.f32.mrb[82].mxu0  ;;  %v3649_v59 = vpop.f32.mrb[128].mxu1  ;;  %4852 = vmatprep.mubr.bf16.mxu0 %v3949_v41  ;;  %5238 = vmatprep.mubr.bf16.mxu1 %v3949_v41 }
 0x3ae   : > { %v13964_v11 = vadd.f32 %v3307_v31, %v18879_v27  ;;  %v14010_v56 = vadd.f32 %v3649_v59, %v18975_v4  ;;  %v3309_v57 = vpop.f32.mrb[83].mxu0  ;;  %v3651_v14 = vpop.f32.mrb[129].mxu1  ;;  %4853 = vmatmul.mubr.bf16.gmra.mrb[140].mxu0 %v3948_v40  ;;  %5239 = vmatmul.mubr.bf16.gmra.mrb[204].mxu1 %v3948_v40  ;;  %v3840_v52 = vmax.f32 %v13962_v45, 0.0  ;;  %v15915_v59 = vld [vmem:[%s20985_s5 + $0x344] ss:$16 sps:$4 sm:$0xff]  }
 0x3af   : > { %v13965_v22 = vadd.f32 %v3309_v57, %v18883_v8  ;;  %v14011_v13 = vadd.f32 %v3651_v14, %v18979_v18  ;;  %v3653_v19 = vpop.f32.mrb[130].mxu1  ;;  %4996 = vmatpush1.bf16.msra.mxu0 %v15889_v61  ;;  %5382 = vmatpush1.bf16.msra.mxu1 %v15925_v35  ;;  %v3841_v5 = vmax.f32 %v13963_v58, 0.0 }
 0x3b0   : > { %v14012_v28 = vadd.f32 %v3653_v19, %v18975_v4  ;;  %v3655_v26 = vpop.f32.mrb[131].mxu1  ;;  %v3844_v53 = vmax.f32 %v13964_v11, 0.0  ;;  %4997 = vmatprep.subr.bf16.mxu0 %v15894_v6  ;;  %5383 = vmatprep.subr.bf16.mxu1 %v15930_v16  ;;  %v3810_v1 = vmax.f32 %v14010_v56, 0.0  ;;  %v15904_v6 = vld [vmem:[%s20985_s5 + $0x320] ss:$16 sps:$4 sm:$0xff]  }
 0x3b1   : > { %v14013_v55 = vadd.f32 %v3655_v26, %v18979_v18  ;;  %v3845_v47 = vmax.f32 %v13965_v22, 0.0  ;;  %v3811_v51 = vmax.f32 %v14011_v13, 0.0  ;;  %v15937_v11 = vld [vmem:[%s20985_s5 + $0x328] ss:$16 sps:$4 sm:$0xff]   ;;  %v15945_v22 = vld [vmem:[%s20985_s5 + $0x34c] ss:$16 sps:$4 sm:$0xff]  }
 0x3b2   : > { %v3814_v36 = vmax.f32 %v14012_v28, 0.0  ;;  %v3952_v20 = vpack.c.bf16 %v3844_v53, %v3840_v52  ;;  %v15913_v28 = vld [vmem:[%s20985_s5 + $0x340] ss:$16 sps:$4 sm:$0xff]  }
 0x3b3   : > { %v3313_v63 = vpop.f32.mrb[84].mxu0  ;;  %v3953_v9 = vpack.c.bf16 %v3845_v47, %v3841_v5  ;;  %4998 = vmatpush1.bf16.msra.mxu0 %v15892_v37  ;;  %5384 = vmatpush1.bf16.msra.mxu1 %v15928_v2  ;;  %v3815_v43 = vmax.f32 %v14013_v55, 0.0  ;;  %v15943_v55 = vld [vmem:[%s20985_s5 + $0x348] ss:$16 sps:$4 sm:$0xff]  }
 0x3b4   : > { %v19019_v44 = vpack.c.bf16 %v3814_v36, %v3810_v1  ;;  %v13966_v42 = vadd.f32 %v3313_v63, %v18879_v27  ;;  %v3315_v15 = vpop.f32.mrb[85].mxu0  ;;  %4999 = vmatprep.subr.bf16.mxu0 %v15897_v25  ;;  %5385 = vmatprep.subr.bf16.mxu1 %v15936_v60 }
 0x3b5   : > { %v13967_v46 = vadd.f32 %v3315_v15, %v18883_v8  ;;  %v3317_v40 = vpop.f32.mrb[86].mxu0  ;;  %v3659_v54 = vpop.f32.mrb[132].mxu1  ;;  %4862 = vmatprep.mubr.bf16.mxu0 %v3953_v9  ;;  %5248 = vmatprep.mubr.bf16.mxu1 %v3953_v9  ;;  %v19029_v41 = vpack.c.bf16 %v3815_v43, %v3811_v51 }
 0x3b6   : > { %v13968_v61 = vadd.f32 %v3317_v40, %v18879_v27  ;;  %v14014_v35 = vadd.f32 %v3659_v54, %v18975_v4  ;;  %v3319_v45 = vpop.f32.mrb[87].mxu0  ;;  %v3661_v24 = vpop.f32.mrb[133].mxu1  ;;  %4863 = vmatmul.mubr.bf16.gmra.mrb[144].mxu0 %v3952_v20  ;;  %5249 = vmatmul.mubr.bf16.gmra.mrb[208].mxu1 %v3952_v20  ;;  %v3848_v14 = vmax.f32 %v13966_v42, 0.0  ;;  %v15924_v20 = vld [vmem:[%s20985_s5 + $0x364] ss:$16 sps:$4 sm:$0xff]  }
 0x3b7   : > { %v13969_v16 = vadd.f32 %v3319_v45, %v18883_v8  ;;  %v14015_v58 = vadd.f32 %v3661_v24, %v18979_v18  ;;  %v3663_v31 = vpop.f32.mrb[134].mxu1  ;;  %5000 = vmatpush1.bf16.msra.mxu0 %v15895_v10  ;;  %5386 = vmatpush1.bf16.msra.mxu1 %v15934_v29  ;;  %v3849_v19 = vmax.f32 %v13967_v46, 0.0  ;;  %v15948_v10 = vld [vmem:[%s20985_s5 + $0x36c] ss:$16 sps:$4 sm:$0xff]   ;;  %v15922_v46 = vld [vmem:[%s20985_s5 + $0x360] ss:$16 sps:$4 sm:$0xff]  }
 0x3b8   : > { %v14016_v56 = vadd.f32 %v3663_v31, %v18975_v4  ;;  %v3665_v57 = vpop.f32.mrb[135].mxu1  ;;  %v3852_v37 = vmax.f32 %v13968_v61, 0.0  ;;  %5001 = vmatprep.subr.bf16.mxu0 %v15906_v0  ;;  %5387 = vmatprep.subr.bf16.mxu1 %v15939_v33  ;;  %v3818_v26 = vmax.f32 %v14014_v35, 0.0  ;;  %v15933_v35 = vld [vmem:[%s20985_s5 + $0x384] ss:$16 sps:$4 sm:$0xff]  }
 0x3b9   : > { %v14017_v13 = vadd.f32 %v3665_v57, %v18979_v18  ;;  %v3853_v25 = vmax.f32 %v13969_v16, 0.0  ;;  %v3819_v5 = vmax.f32 %v14015_v58, 0.0  ;;  %v15946_v45 = vld [vmem:[%s20985_s5 + $0x368] ss:$16 sps:$4 sm:$0xff]   ;;  %v15954_v31 = vld [vmem:[%s20985_s5 + $0x38c] ss:$16 sps:$4 sm:$0xff]  }
 0x3ba   : > { %v3956_v2 = vpack.c.bf16 %v3852_v37, %v3848_v14  ;;  %v3822_v52 = vmax.f32 %v14016_v56, 0.0  ;;  %v15931_v14 = vld [vmem:[%s20985_s5 + $0x380] ss:$16 sps:$4 sm:$0xff]  }
 0x3bb   : > { %v3323_v53 = vpop.f32.mrb[88].mxu0  ;;  %v3957_v60 = vpack.c.bf16 %v3853_v25, %v3849_v19  ;;  %5002 = vmatpush1.bf16.msra.mxu0 %v15904_v6  ;;  %5388 = vmatpush1.bf16.msra.mxu1 %v15937_v11  ;;  %v3823_v47 = vmax.f32 %v14017_v13, 0.0  ;;  %v15952_v25 = vld [vmem:[%s20985_s5 + $0x388] ss:$16 sps:$4 sm:$0xff]  }
 0x3bc   : > { %v13970_v1 = vadd.f32 %v3323_v53, %v18879_v27  ;;  %v3325_v36 = vpop.f32.mrb[89].mxu0  ;;  %5003 = vmatprep.subr.bf16.mxu0 %v15915_v59  ;;  %5389 = vmatprep.subr.bf16.mxu1 %v15945_v22  ;;  %v19062_v63 = vpack.c.bf16 %v3822_v52, %v3818_v26  ;;  %v15942_v53 = vld [vmem:[%s20985_s5 + $0x3a4] ss:$16 sps:$4 sm:$0xff]  }
 0x3bd   : > { %v13971_v9 = vadd.f32 %v3325_v36, %v18883_v8  ;;  %v3327_v29 = vpop.f32.mrb[90].mxu0  ;;  %v3669_v51 = vpop.f32.mrb[136].mxu1  ;;  %4872 = vmatprep.mubr.bf16.mxu0 %v3957_v60  ;;  %5258 = vmatprep.mubr.bf16.mxu1 %v3957_v60  ;;  %v19065_v43 = vpack.c.bf16 %v3823_v47, %v3819_v5  ;;  %v15957_v60 = vld [vmem:[%s20985_s5 + $0x3ac] ss:$16 sps:$4 sm:$0xff]  }
 0x3be   : > { %v13972_v42 = vadd.f32 %v3327_v29, %v18879_v27  ;;  %v14018_v15 = vadd.f32 %v3669_v51, %v18975_v4  ;;  %v3329_v0 = vpop.f32.mrb[91].mxu0  ;;  %v3671_v33 = vpop.f32.mrb[137].mxu1  ;;  %4873 = vmatmul.mubr.bf16.gmra.mrb[148].mxu0 %v3956_v2  ;;  %5259 = vmatmul.mubr.bf16.gmra.mrb[212].mxu1 %v3956_v2  ;;  %v3856_v16 = vmax.f32 %v13970_v1, 0.0  ;;  %v15940_v51 = vld [vmem:[%s20985_s5 + $0x3a0] ss:$16 sps:$4 sm:$0xff]  }
 0x3bf   : > { %v13973_v40 = vadd.f32 %v3329_v0, %v18883_v8  ;;  %v14019_v54 = vadd.f32 %v3671_v33, %v18979_v18  ;;  %v3673_v61 = vpop.f32.mrb[138].mxu1  ;;  %5004 = vmatpush1.bf16.msra.mxu0 %v15913_v28  ;;  %5390 = vmatpush1.bf16.msra.mxu1 %v15943_v55  ;;  %v3857_v11 = vmax.f32 %v13971_v9, 0.0  ;;  %v15951_v33 = vld [vmem:[%s20985_s5 + $0x3c4] ss:$16 sps:$4 sm:$0xff]  }
 0x3c0   : > { %v14020_v24 = vadd.f32 %v3673_v61, %v18975_v4  ;;  %v3675_v6 = vpop.f32.mrb[139].mxu1  ;;  %v3860_v58 = vmax.f32 %v13972_v42, 0.0  ;;  %5005 = vmatprep.subr.bf16.mxu0 %v15924_v20  ;;  %5391 = vmatprep.subr.bf16.mxu1 %v15948_v10  ;;  %v3826_v37 = vmax.f32 %v14018_v15, 0.0 }
 0x3c1   : > { %v14021_v59 = vadd.f32 %v3675_v6, %v18979_v18  ;;  %v3861_v56 = vmax.f32 %v13973_v40, 0.0  ;;  %v3827_v2 = vmax.f32 %v14019_v54, 0.0 }
 0x3c2   : > { %v3960_v57 = vpack.c.bf16 %v3860_v58, %v3856_v16  ;;  %v3830_v22 = vmax.f32 %v14020_v24, 0.0 }
 0x3c3   : > { %v3333_v13 = vpop.f32.mrb[92].mxu0  ;;  %v3961_v19 = vpack.c.bf16 %v3861_v56, %v3857_v11  ;;  %5006 = vmatpush1.bf16.msra.mxu0 %v15922_v46  ;;  %5392 = vmatpush1.bf16.msra.mxu1 %v15946_v45  ;;  %v3831_v28 = vmax.f32 %v14021_v59, 0.0  ;;  %v15955_v46 = vld [vmem:[%s20985_s5 + $0x3a8] ss:$16 sps:$4 sm:$0xff]   ;;  %v15963_v45 = vld [vmem:[%s20985_s5 + $0x3cc] ss:$16 sps:$4 sm:$0xff]  }
 0x3c4   : > { %v13974_v26 = vadd.f32 %v3333_v13, %v18879_v27  ;;  %v3335_v52 = vpop.f32.mrb[93].mxu0  ;;  %5007 = vmatprep.subr.bf16.mxu0 %v15933_v35  ;;  %5393 = vmatprep.subr.bf16.mxu1 %v15954_v31  ;;  %v19098_v55 = vpack.c.bf16 %v3830_v22, %v3826_v37  ;;  %v15949_v31 = vld [vmem:[%s20985_s5 + $0x3c0] ss:$16 sps:$4 sm:$0xff]  }
 0x3c5   : > { %v13975_v5 = vadd.f32 %v3335_v52, %v18883_v8  ;;  %v3337_v47 = vpop.f32.mrb[94].mxu0  ;;  %v3679_v1 = vpop.f32.mrb[140].mxu1  ;;  %4882 = vmatprep.mubr.bf16.mxu0 %v3961_v19  ;;  %5268 = vmatprep.mubr.bf16.mxu1 %v3961_v19  ;;  %v19101_v36 = vpack.c.bf16 %v3831_v28, %v3827_v2  ;;  %v15966_v2 = vld [vmem:[%s20985_s5 + $0x3ec] ss:$16 sps:$4 sm:$0xff]  }
 0x3c6   : > { %v13976_v20 = vadd.f32 %v3337_v47, %v18879_v27  ;;  %v14022_v10 = vadd.f32 %v3679_v1, %v18975_v4  ;;  %v3339_v9 = vpop.f32.mrb[95].mxu0  ;;  %v3681_v29 = vpop.f32.mrb[141].mxu1  ;;  %4883 = vmatmul.mubr.bf16.gmra.mrb[152].mxu0 %v3960_v57  ;;  %5269 = vmatmul.mubr.bf16.gmra.mrb[216].mxu1 %v3960_v57  ;;  %v3864_v61 = vmax.f32 %v13974_v26, 0.0 }
 0x3c7   : > { %v13977_v42 = vadd.f32 %v3339_v9, %v18883_v8  ;;  %v14023_v15 = vadd.f32 %v3681_v29, %v18979_v18  ;;  %v3683_v0 = vpop.f32.mrb[142].mxu1  ;;  %5008 = vmatpush1.bf16.msra.mxu0 %v15931_v14  ;;  %5394 = vmatpush1.bf16.msra.mxu1 %v15952_v25  ;;  %v3865_v6 = vmax.f32 %v13975_v5, 0.0  ;;  %v15961_v14 = vld [vmem:[%s20985_s5 + $0x3c8] ss:$16 sps:$4 sm:$0xff]   ;;  %v15960_v25 = vld [vmem:[%s20985_s5 + $0x3e4] ss:$16 sps:$4 sm:$0xff]  }
 0x3c8   : > { %v14024_v40 = vadd.f32 %v3683_v0, %v18975_v4  ;;  %v3685_v54 = vpop.f32.mrb[143].mxu1  ;;  %v3868_v35 = vmax.f32 %v13976_v20, 0.0  ;;  %5009 = vmatprep.subr.bf16.mxu0 %v15942_v53  ;;  %5395 = vmatprep.subr.bf16.mxu1 %v15957_v60  ;;  %v3834_v59 = vmax.f32 %v14022_v10, 0.0 }
 0x3c9   : > { %v14025_v24 = vadd.f32 %v3685_v54, %v18979_v18  ;;  %v3869_v16 = vmax.f32 %v13977_v42, 0.0  ;;  %v3835_v37 = vmax.f32 %v14023_v15, 0.0  ;;  %v15964_v42 = vld [vmem:[%s20985_s5 + $0x3e8] ss:$16 sps:$4 sm:$0xff]  }
 0x3ca   : > { %v3964_v58 = vpack.c.bf16 %v3868_v35, %v3864_v61  ;;  %v3838_v11 = vmax.f32 %v14024_v40, 0.0 }
 0x3cb   : > { %v3343_v56 = vpop.f32.mrb[96].mxu0  ;;  %v3965_v57 = vpack.c.bf16 %v3869_v16, %v3865_v6  ;;  %5010 = vmatpush1.bf16.msra.mxu0 %v15940_v51  ;;  %5396 = vmatpush1.bf16.msra.mxu1 %v15955_v46  ;;  %v3839_v22 = vmax.f32 %v14025_v24, 0.0  ;;  %v15958_v51 = vld [vmem:[%s20985_s5 + $0x3e0] ss:$16 sps:$4 sm:$0xff]  }
 0x3cc   : > { %v13978_v13 = vadd.f32 %v3343_v56, %v18879_v27  ;;  %v3345_v19 = vpop.f32.mrb[97].mxu0  ;;  %5011 = vmatprep.subr.bf16.mxu0 %v15951_v33  ;;  %5397 = vmatprep.subr.bf16.mxu1 %v15963_v45  ;;  %v19134_v28 = vpack.c.bf16 %v3838_v11, %v3834_v59 }
 0x3cd   : > { %v13979_v26 = vadd.f32 %v3345_v19, %v18883_v8  ;;  %v3347_v52 = vpop.f32.mrb[98].mxu0  ;;  %v3689_v53 = vpop.f32.mrb[144].mxu1  ;;  %4892 = vmatprep.mubr.bf16.mxu0 %v3965_v57  ;;  %5278 = vmatprep.mubr.bf16.mxu1 %v3965_v57  ;;  %v19137_v60 = vpack.c.bf16 %v3839_v22, %v3835_v37 }
 0x3ce   : > { %v13980_v5 = vadd.f32 %v3347_v52, %v18879_v27  ;;  %v14026_v47 = vadd.f32 %v3689_v53, %v18975_v4  ;;  %v3349_v1 = vpop.f32.mrb[99].mxu0  ;;  %v3691_v20 = vpop.f32.mrb[145].mxu1  ;;  %4893 = vmatmul.mubr.bf16.gmra.mrb[156].mxu0 %v3964_v58  ;;  %5279 = vmatmul.mubr.bf16.gmra.mrb[220].mxu1 %v3964_v58  ;;  %v3872_v33 = vmax.f32 %v13978_v13, 0.0 }
 0x3cf   : > { %v13981_v10 = vadd.f32 %v3349_v1, %v18883_v8  ;;  %v14027_v9 = vadd.f32 %v3691_v20, %v18979_v18  ;;  %v3693_v29 = vpop.f32.mrb[146].mxu1  ;;  %5012 = vmatpush1.bf16.msra.mxu0 %v15949_v31  ;;  %5398 = vmatpush1.bf16.msra.mxu1 %v15961_v14  ;;  %v3873_v54 = vmax.f32 %v13979_v26, 0.0 }
 0x3d0   : > { %v14028_v15 = vadd.f32 %v3693_v29, %v18975_v4  ;;  %v3695_v0 = vpop.f32.mrb[147].mxu1  ;;  %v3876_v46 = vmax.f32 %v13980_v5, 0.0  ;;  %5013 = vmatprep.subr.bf16.mxu0 %v15960_v25  ;;  %5399 = vmatprep.subr.bf16.mxu1 %v15966_v2  ;;  %v3842_v45 = vmax.f32 %v14026_v47, 0.0 }
 0x3d1   : > { %v14029_v40 = vadd.f32 %v3695_v0, %v18979_v18  ;;  %v3877_v61 = vmax.f32 %v13981_v10, 0.0  ;;  %v3843_v58 = vmax.f32 %v14027_v9, 0.0 }
 0x3d2   : > { %v3968_v35 = vpack.c.bf16 %v3876_v46, %v3872_v33  ;;  %v3846_v24 = vmax.f32 %v14028_v15, 0.0 }
 0x3d3   : > { %v3353_v6 = vpop.f32.mrb[100].mxu0  ;;  %v3969_v16 = vpack.c.bf16 %v3877_v61, %v3873_v54  ;;  %5014 = vmatpush1.bf16.msra.mxu0 %v15958_v51  ;;  %5400 = vmatpush1.bf16.msra.mxu1 %v15964_v42  ;;  %v3847_v31 = vmax.f32 %v14029_v40, 0.0 }
 0x3d4   : > { %v13982_v59 = vadd.f32 %v3353_v6, %v18879_v27  ;;  %v3355_v11 = vpop.f32.mrb[101].mxu0  ;;  %v19152_v56 = vpack.c.bf16 %v3846_v24, %v3842_v45 }
 0x3d5   : > { %v13983_v57 = vadd.f32 %v3355_v11, %v18883_v8  ;;  %v3357_v14 = vpop.f32.mrb[102].mxu0  ;;  %v3699_v37 = vpop.f32.mrb[148].mxu1  ;;  %4902 = vmatprep.mubr.bf16.mxu0 %v3969_v16  ;;  %5288 = vmatprep.mubr.bf16.mxu1 %v3969_v16  ;;  %v19155_v22 = vpack.c.bf16 %v3847_v31, %v3843_v58 }
 0x3d6   : > { %v13984_v13 = vadd.f32 %v3357_v14, %v18879_v27  ;;  %v14030_v19 = vadd.f32 %v3699_v37, %v18975_v4  ;;  %v3359_v25 = vpop.f32.mrb[103].mxu0  ;;  %v3701_v2 = vpop.f32.mrb[149].mxu1  ;;  %4903 = vmatmul.mubr.bf16.gmra.mrb[160].mxu0 %v3968_v35  ;;  %5289 = vmatmul.mubr.bf16.gmra.mrb[224].mxu1 %v3968_v35  ;;  %v3880_v1 = vmax.f32 %v13982_v59, 0.0 }
 0x3d7   : > { %v13985_v26 = vadd.f32 %v3359_v25, %v18883_v8  ;;  %v14031_v52 = vadd.f32 %v3701_v2, %v18979_v18  ;;  %v3703_v53 = vpop.f32.mrb[150].mxu1  ;;  %v3881_v9 = vmax.f32 %v13983_v57, 0.0 }
 0x3d8   : > { %v14032_v5 = vadd.f32 %v3703_v53, %v18975_v4  ;;  %v3705_v47 = vpop.f32.mrb[151].mxu1  ;;  %v3884_v20 = vmax.f32 %v13984_v13, 0.0  ;;  %v3850_v42 = vmax.f32 %v14030_v19, 0.0 }
 0x3d9   : > { %v14033_v10 = vadd.f32 %v3705_v47, %v18979_v18  ;;  %v3885_v29 = vmax.f32 %v13985_v26, 0.0  ;;  %v3851_v46 = vmax.f32 %v14031_v52, 0.0 }
 0x3da   : > { %v3972_v51 = vpack.c.bf16 %v3884_v20, %v3880_v1  ;;  %v3854_v15 = vmax.f32 %v14032_v5, 0.0 }
 0x3db   : > { %v3363_v0 = vpop.f32.mrb[104].mxu0  ;;  %v3973_v33 = vpack.c.bf16 %v3885_v29, %v3881_v9  ;;  %v3855_v40 = vmax.f32 %v14033_v10, 0.0 }
 0x3dc   : > { %v13986_v54 = vadd.f32 %v3363_v0, %v18879_v27  ;;  %v3365_v61 = vpop.f32.mrb[105].mxu0  ;;  %v19164_v35 = vpack.c.bf16 %v3854_v15, %v3850_v42 }
 0x3dd   : > { %v13987_v45 = vadd.f32 %v3365_v61, %v18883_v8  ;;  %v3367_v24 = vpop.f32.mrb[106].mxu0  ;;  %v3709_v6 = vpop.f32.mrb[152].mxu1  ;;  %4912 = vmatprep.mubr.bf16.mxu0 %v3973_v33  ;;  %5298 = vmatprep.mubr.bf16.mxu1 %v3973_v33  ;;  %v19167_v16 = vpack.c.bf16 %v3855_v40, %v3851_v46 }
 0x3de   : > { %v13988_v58 = vadd.f32 %v3367_v24, %v18879_v27  ;;  %v14034_v31 = vadd.f32 %v3709_v6, %v18975_v4  ;;  %v3369_v59 = vpop.f32.mrb[107].mxu0  ;;  %v3711_v11 = vpop.f32.mrb[153].mxu1  ;;  %4913 = vmatmul.mubr.bf16.gmra.mrb[164].mxu0 %v3972_v51  ;;  %5299 = vmatmul.mubr.bf16.gmra.mrb[228].mxu1 %v3972_v51  ;;  %v3888_v25 = vmax.f32 %v13986_v54, 0.0 }
 0x3df   : > { %v13989_v57 = vadd.f32 %v3369_v59, %v18883_v8  ;;  %v14035_v14 = vadd.f32 %v3711_v11, %v18979_v18  ;;  %v3713_v37 = vpop.f32.mrb[154].mxu1  ;;  %v3889_v52 = vmax.f32 %v13987_v45, 0.0 }
 0x3e0   : > { %v14036_v13 = vadd.f32 %v3713_v37, %v18975_v4  ;;  %v3715_v19 = vpop.f32.mrb[155].mxu1  ;;  %v3892_v2 = vmax.f32 %v13988_v58, 0.0  ;;  %v3858_v47 = vmax.f32 %v14034_v31, 0.0 }
 0x3e1   : > { %v14037_v26 = vadd.f32 %v3715_v19, %v18979_v18  ;;  %v3893_v53 = vmax.f32 %v13989_v57, 0.0  ;;  %v3859_v9 = vmax.f32 %v14035_v14, 0.0 }
 0x3e2   : > { %v3976_v5 = vpack.c.bf16 %v3892_v2, %v3888_v25  ;;  %v3862_v1 = vmax.f32 %v14036_v13, 0.0 }
 0x3e3   : > { %v3373_v20 = vpop.f32.mrb[108].mxu0  ;;  %v3977_v10 = vpack.c.bf16 %v3893_v53, %v3889_v52  ;;  %v3863_v29 = vmax.f32 %v14037_v26, 0.0 }
 0x3e4   : > { %v13990_v51 = vadd.f32 %v3373_v20, %v18879_v27  ;;  %v3375_v42 = vpop.f32.mrb[109].mxu0  ;;  %v19176_v15 = vpack.c.bf16 %v3862_v1, %v3858_v47 }
 0x3e5   : > { %v13991_v0 = vadd.f32 %v3375_v42, %v18883_v8  ;;  %v3377_v33 = vpop.f32.mrb[110].mxu0  ;;  %v3719_v46 = vpop.f32.mrb[156].mxu1  ;;  %4922 = vmatprep.mubr.bf16.mxu0 %v3977_v10  ;;  %5308 = vmatprep.mubr.bf16.mxu1 %v3977_v10  ;;  %v19179_v40 = vpack.c.bf16 %v3863_v29, %v3859_v9 }
 0x3e6   : > { %v13992_v54 = vadd.f32 %v3377_v33, %v18879_v27  ;;  %v14038_v61 = vadd.f32 %v3719_v46, %v18975_v4  ;;  %v3379_v45 = vpop.f32.mrb[111].mxu0  ;;  %v3721_v24 = vpop.f32.mrb[157].mxu1  ;;  %4923 = vmatmul.mubr.bf16.gmra.mrb[168].mxu0 %v3976_v5  ;;  %5309 = vmatmul.mubr.bf16.gmra.mrb[232].mxu1 %v3976_v5  ;;  %v3896_v57 = vmax.f32 %v13990_v51, 0.0 }
 0x3e7   : > { %v13993_v6 = vadd.f32 %v3379_v45, %v18883_v8  ;;  %v14039_v58 = vadd.f32 %v3721_v24, %v18979_v18  ;;  %v3723_v31 = vpop.f32.mrb[158].mxu1  ;;  %v3897_v13 = vmax.f32 %v13991_v0, 0.0 }
 0x3e8   : > { %v14040_v59 = vadd.f32 %v3723_v31, %v18975_v4  ;;  %v3725_v11 = vpop.f32.mrb[159].mxu1  ;;  %v3900_v14 = vmax.f32 %v13992_v54, 0.0  ;;  %v3866_v2 = vmax.f32 %v14038_v61, 0.0 }
 0x3e9   : > { %v14041_v37 = vadd.f32 %v3725_v11, %v18979_v18  ;;  %v3901_v19 = vmax.f32 %v13993_v6, 0.0  ;;  %v3867_v5 = vmax.f32 %v14039_v58, 0.0  ;;  %v15969_v6 = vld [vmem:[#allocation3 + $0x4] ss:$8 sps:$4 sm:$0xff]  }
 0x3ea   : > { %v3980_v25 = vpack.c.bf16 %v3900_v14, %v3896_v57  ;;  %v3870_v26 = vmax.f32 %v14040_v59, 0.0  ;;  %6150 = vmatprep.subr.bf16.mxu0 %v15969_v6 }
 0x3eb   : > { %v3383_v52 = vpop.f32.mrb[112].mxu0  ;;  %v3981_v53 = vpack.c.bf16 %v3901_v19, %v3897_v13  ;;  %v3871_v47 = vmax.f32 %v14041_v37, 0.0 }
 0x3ec   : > { %v13994_v1 = vadd.f32 %v3383_v52, %v18879_v27  ;;  %v3385_v20 = vpop.f32.mrb[113].mxu0  ;;  %v19188_v10 = vpack.c.bf16 %v3870_v26, %v3866_v2 }
 0x3ed   : > { %v13995_v9 = vadd.f32 %v3385_v20, %v18883_v8  ;;  %v3387_v29 = vpop.f32.mrb[114].mxu0  ;;  %v3729_v51 = vpop.f32.mrb[160].mxu1  ;;  %4932 = vmatprep.mubr.bf16.mxu0 %v3981_v53  ;;  %5318 = vmatprep.mubr.bf16.mxu1 %v3981_v53  ;;  %v19191_v42 = vpack.c.bf16 %v3871_v47, %v3867_v5 }
 0x3ee   : > { %v13996_v0 = vadd.f32 %v3387_v29, %v18879_v27  ;;  %v14042_v33 = vadd.f32 %v3729_v51, %v18975_v4  ;;  %v3389_v46 = vpop.f32.mrb[115].mxu0  ;;  %v3731_v54 = vpop.f32.mrb[161].mxu1  ;;  %4933 = vmatmul.mubr.bf16.gmra.mrb[172].mxu0 %v3980_v25  ;;  %5319 = vmatmul.mubr.bf16.gmra.mrb[236].mxu1 %v3980_v25  ;;  %v3904_v59 = vmax.f32 %v13994_v1, 0.0 }
 0x3ef   : > { %v13997_v61 = vadd.f32 %v3389_v46, %v18883_v8  ;;  %v14043_v45 = vadd.f32 %v3731_v54, %v18979_v18  ;;  %v3733_v24 = vpop.f32.mrb[162].mxu1  ;;  %v3905_v14 = vmax.f32 %v13995_v9, 0.0 }
 0x3f0   : > { %v14044_v58 = vadd.f32 %v3733_v24, %v18975_v4  ;;  %v3735_v31 = vpop.f32.mrb[163].mxu1  ;;  %v3908_v11 = vmax.f32 %v13996_v0, 0.0  ;;  %v3874_v19 = vmax.f32 %v14042_v33, 0.0 }
 0x3f1   : > { %v14045_v57 = vadd.f32 %v3735_v31, %v18979_v18  ;;  %v3909_v37 = vmax.f32 %v13997_v61, 0.0  ;;  %v3875_v52 = vmax.f32 %v14043_v45, 0.0 }
 0x3f2   : > { %v3984_v13 = vpack.c.bf16 %v3908_v11, %v3904_v59  ;;  %v3878_v2 = vmax.f32 %v14044_v58, 0.0 }
 0x3f3   : > { %v3393_v25 = vpop.f32.mrb[116].mxu0  ;;  %v3985_v26 = vpack.c.bf16 %v3909_v37, %v3905_v14  ;;  %v3879_v53 = vmax.f32 %v14045_v57, 0.0 }
 0x3f4   : > { %v13998_v5 = vadd.f32 %v3393_v25, %v18879_v27  ;;  %v3395_v47 = vpop.f32.mrb[117].mxu0  ;;  %v19200_v20 = vpack.c.bf16 %v3878_v2, %v3874_v19 }
 0x3f5   : > { %v13999_v1 = vadd.f32 %v3395_v47, %v18883_v8  ;;  %v3397_v29 = vpop.f32.mrb[118].mxu0  ;;  %v3739_v51 = vpop.f32.mrb[164].mxu1  ;;  %4942 = vmatprep.mubr.bf16.mxu0 %v3985_v26  ;;  %5328 = vmatprep.mubr.bf16.mxu1 %v3985_v26  ;;  %v19203_v9 = vpack.c.bf16 %v3879_v53, %v3875_v52 }
 0x3f6   : > { %v14000_v0 = vadd.f32 %v3397_v29, %v18879_v27  ;;  %v14046_v33 = vadd.f32 %v3739_v51, %v18975_v4  ;;  %v3399_v46 = vpop.f32.mrb[119].mxu0  ;;  %v3741_v54 = vpop.f32.mrb[165].mxu1  ;;  %4943 = vmatmul.mubr.bf16.gmra.mrb[176].mxu0 %v3984_v13  ;;  %5329 = vmatmul.mubr.bf16.gmra.mrb[240].mxu1 %v3984_v13  ;;  %v3912_v31 = vmax.f32 %v13998_v5, 0.0 }
 0x3f7   : > { %v14001_v61 = vadd.f32 %v3399_v46, %v18883_v8  ;;  %v14047_v45 = vadd.f32 %v3741_v54, %v18979_v18  ;;  %v3743_v24 = vpop.f32.mrb[166].mxu1  ;;  %v3913_v57 = vmax.f32 %v13999_v1, 0.0 }
 0x3f8   : > { %v14048_v6 = vadd.f32 %v3743_v24, %v18975_v4  ;;  %v3745_v58 = vpop.f32.mrb[167].mxu1  ;;  %v3916_v59 = vmax.f32 %v14000_v0, 0.0  ;;  %v3882_v19 = vmax.f32 %v14046_v33, 0.0 }
 0x3f9   : > { %v14049_v11 = vadd.f32 %v3745_v58, %v18979_v18  ;;  %v3917_v14 = vmax.f32 %v14001_v61, 0.0  ;;  %v3883_v13 = vmax.f32 %v14047_v45, 0.0 }
 0x3fa   : > { %v3988_v37 = vpack.c.bf16 %v3916_v59, %v3912_v31  ;;  %v3886_v2 = vmax.f32 %v14048_v6, 0.0 }
 0x3fb   : > { %v3403_v25 = vpop.f32.mrb[120].mxu0  ;;  %v3989_v26 = vpack.c.bf16 %v3917_v14, %v3913_v57  ;;  %v3887_v52 = vmax.f32 %v14049_v11, 0.0 }
 0x3fc   : > { %v14002_v53 = vadd.f32 %v3403_v25, %v18879_v27  ;;  %v3405_v47 = vpop.f32.mrb[121].mxu0  ;;  %v19212_v29 = vpack.c.bf16 %v3886_v2, %v3882_v19 }
 0x3fd   : > { %v14003_v51 = vadd.f32 %v3405_v47, %v18883_v8  ;;  %v3407_v5 = vpop.f32.mrb[122].mxu0  ;;  %v3749_v0 = vpop.f32.mrb[168].mxu1  ;;  %4952 = vmatprep.mubr.bf16.mxu0 %v3989_v26  ;;  %5338 = vmatprep.mubr.bf16.mxu1 %v3989_v26  ;;  %v19215_v1 = vpack.c.bf16 %v3887_v52, %v3883_v13 }
 0x3fe   : > { %v14004_v33 = vadd.f32 %v3407_v5, %v18879_v27  ;;  %v14050_v46 = vadd.f32 %v3749_v0, %v18975_v4  ;;  %v3409_v54 = vpop.f32.mrb[123].mxu0  ;;  %v3751_v61 = vpop.f32.mrb[169].mxu1  ;;  %4953 = vmatmul.mubr.bf16.gmra.mrb[180].mxu0 %v3988_v37  ;;  %5339 = vmatmul.mubr.bf16.gmra.mrb[244].mxu1 %v3988_v37  ;;  %v3920_v59 = vmax.f32 %v14002_v53, 0.0 }
 0x3ff   : > { %v14005_v45 = vadd.f32 %v3409_v54, %v18883_v8  ;;  %v14051_v24 = vadd.f32 %v3751_v61, %v18979_v18  ;;  %v3753_v6 = vpop.f32.mrb[170].mxu1  ;;  %v3921_v14 = vmax.f32 %v14003_v51, 0.0 }
 0x400   : > { %v14052_v58 = vadd.f32 %v3753_v6, %v18975_v4  ;;  %v3755_v31 = vpop.f32.mrb[171].mxu1  ;;  %v3924_v11 = vmax.f32 %v14004_v33, 0.0  ;;  %v3890_v25 = vmax.f32 %v14050_v46, 0.0 }
 0x401   : > { %v14053_v57 = vadd.f32 %v3755_v31, %v18979_v18  ;;  %v3925_v19 = vmax.f32 %v14005_v45, 0.0  ;;  %v3891_v37 = vmax.f32 %v14051_v24, 0.0 }
 0x402   : > { %v3992_v2 = vpack.c.bf16 %v3924_v11, %v3920_v59  ;;  %v3894_v26 = vmax.f32 %v14052_v58, 0.0 }
 0x403   : > { %v3413_v13 = vpop.f32.mrb[124].mxu0  ;;  %v3993_v52 = vpack.c.bf16 %v3925_v19, %v3921_v14  ;;  %v3895_v47 = vmax.f32 %v14053_v57, 0.0 }
 0x404   : > { %v14006_v5 = vadd.f32 %v3413_v13, %v18879_v27  ;;  %v3415_v0 = vpop.f32.mrb[125].mxu0  ;;  %v19224_v54 = vpack.c.bf16 %v3894_v26, %v3890_v25 }
 0x405   : > { %v14007_v61 = vadd.f32 %v3415_v0, %v18883_v8  ;;  %v3417_v53 = vpop.f32.mrb[126].mxu0  ;;  %v3759_v33 = vpop.f32.mrb[172].mxu1  ;;  %4962 = vmatprep.mubr.bf16.mxu0 %v3993_v52  ;;  %5348 = vmatprep.mubr.bf16.mxu1 %v3993_v52  ;;  %v19227_v51 = vpack.c.bf16 %v3895_v47, %v3891_v37 }
 0x406   : > { %v14008_v46 = vadd.f32 %v3417_v53, %v18879_v27  ;;  %v14054_v45 = vadd.f32 %v3759_v33, %v18975_v4  ;;  %v3419_v6 = vpop.f32.mrb[127].mxu0  ;;  %v3761_v24 = vpop.f32.mrb[173].mxu1  ;;  %4963 = vmatmul.mubr.bf16.gmra.mrb[184].mxu0 %v3992_v2  ;;  %5349 = vmatmul.mubr.bf16.gmra.mrb[248].mxu1 %v3992_v2  ;;  %v3928_v14 = vmax.f32 %v14006_v5, 0.0 }
 0x407   : > { %v14009_v58 = vadd.f32 %v3419_v6, %v18883_v8  ;;  %v14055_v31 = vadd.f32 %v3761_v24, %v18979_v18  ;;  %v3763_v59 = vpop.f32.mrb[174].mxu1  ;;  %v3929_v26 = vmax.f32 %v14007_v61, 0.0 }
 0x408   : > { %v14056_v11 = vadd.f32 %v3763_v59, %v18975_v4  ;;  %v3765_v57 = vpop.f32.mrb[175].mxu1  ;;  %v3932_v19 = vmax.f32 %v14008_v46, 0.0  ;;  %v3898_v52 = vmax.f32 %v14054_v45, 0.0 }
 0x409   : > { %v14057_v25 = vadd.f32 %v3765_v57, %v18979_v18  ;;  %v3933_v27 = vmax.f32 %v14009_v58, 0.0  ;;  %v3899_v0 = vmax.f32 %v14055_v31, 0.0 }
 0x40a   : > { %v3996_v13 = vpack.c.bf16 %v3932_v19, %v3928_v14  ;;  %v3902_v37 = vmax.f32 %v14056_v11, 0.0  ;;  %v15967_v14 = vld [vmem:[#allocation3] ss:$8 sps:$4 sm:$0xff]  }
 0x40b   : > { %v3997_v47 = vpack.c.bf16 %v3933_v27, %v3929_v26  ;;  %v3903_v2 = vmax.f32 %v14057_v25, 0.0  ;;  %v15972_v27 = vld [vmem:[#allocation3 + $0x14] ss:$8 sps:$4 sm:$0xff]  }
 0x40c   : > { %v19235_v53 = vpack.c.bf16 %v3902_v37, %v3898_v52 }
 0x40d   : > { %v3769_v8 = vpop.f32.mrb[176].mxu1  ;;  %4972 = vmatprep.mubr.bf16.mxu0 %v3997_v47  ;;  %5358 = vmatprep.mubr.bf16.mxu1 %v3997_v47  ;;  %v19237_v33 = vpack.c.bf16 %v3903_v2, %v3899_v0  ;;  %v15970_v2 = vld [vmem:[#allocation3 + $0x10] ss:$8 sps:$4 sm:$0xff]  }
 0x40e   : > { %v14058_v5 = vadd.f32 %v3769_v8, %v18975_v4  ;;  %v3771_v46 = vpop.f32.mrb[177].mxu1  ;;  %4973 = vmatmul.mubr.bf16.gmra.mrb[188].mxu0 %v3996_v13  ;;  %5359 = vmatmul.mubr.bf16.gmra.mrb[252].mxu1 %v3996_v13 }
 0x40f   : > { %v14059_v61 = vadd.f32 %v3771_v46, %v18979_v18  ;;  %v3773_v6 = vpop.f32.mrb[178].mxu1  ;;  %5015 = vmatprep.mubr.bf16.mxu0 %v19029_v41  ;;  %5401 = vmatprep.mubr.bf16.mxu1 %v19029_v41 }
 0x410   : > { %v14060_v45 = vadd.f32 %v3773_v6, %v18975_v4  ;;  %v3775_v24 = vpop.f32.mrb[179].mxu1  ;;  %v3906_v31 = vmax.f32 %v14058_v5, 0.0  ;;  %v15975_v5 = vld [vmem:[#allocation3 + $0x24] ss:$8 sps:$4 sm:$0xff]  }
 0x411   : > { %v14061_v58 = vadd.f32 %v3775_v24, %v18979_v18  ;;  %v3907_v11 = vmax.f32 %v14059_v61, 0.0  ;;  %v15973_v24 = vld [vmem:[#allocation3 + $0x20] ss:$8 sps:$4 sm:$0xff]  }
 0x412   : > { %v3910_v59 = vmax.f32 %v14060_v45, 0.0 }
 0x413   : > { %v3911_v57 = vmax.f32 %v14061_v58, 0.0 }
 0x414   : > { %v19245_v19 = vpack.c.bf16 %v3910_v59, %v3906_v31 }
 0x415   : > { %v3779_v25 = vpop.f32.mrb[180].mxu1  ;;  %v19247_v26 = vpack.c.bf16 %v3911_v57, %v3907_v11 }
 0x416   : > { %v14062_v13 = vadd.f32 %v3779_v25, %v18975_v4  ;;  %v3781_v52 = vpop.f32.mrb[181].mxu1  ;;  %5016 = vmatmul.mubr.bf16.vlgmr.msra.gmra.mrb[128].mxu0 %v19019_v44  ;;  %5402 = vmatmul.mubr.bf16.vlgmr.msra.gmra.mrb[192].mxu1 %v19019_v44 }
 0x417   : > { %v14063_v41 = vadd.f32 %v3781_v52, %v18979_v18  ;;  %v3783_v37 = vpop.f32.mrb[182].mxu1  ;;  %5025 = vmatprep.mubr.bf16.mxu0 %v19065_v43  ;;  %5411 = vmatprep.mubr.bf16.mxu1 %v19065_v43  ;;  %v15978_v43 = vld [vmem:[#allocation3 + $0x34] ss:$8 sps:$4 sm:$0xff]  }
 0x418   : > { %v14064_v47 = vadd.f32 %v3783_v37, %v18975_v4  ;;  %v3785_v0 = vpop.f32.mrb[183].mxu1  ;;  %6151 = vmatpush1.bf16.msra.mxu0 %v15967_v14  ;;  %v3914_v46 = vmax.f32 %v14062_v13, 0.0  ;;  %v15976_v13 = vld [vmem:[#allocation3 + $0x30] ss:$8 sps:$4 sm:$0xff]  }
 0x419   : > { %v14065_v8 = vadd.f32 %v3785_v0, %v18979_v18  ;;  %6152 = vmatprep.subr.bf16.mxu0 %v15972_v27  ;;  %v3915_v6 = vmax.f32 %v14063_v41, 0.0  ;;  %v15981_v41 = vld [vmem:[#allocation3 + $0x44] ss:$8 sps:$4 sm:$0xff]  }
 0x41a   : > { %v3918_v61 = vmax.f32 %v14064_v47, 0.0 }
 0x41b   : > { %v3919_v44 = vmax.f32 %v14065_v8, 0.0  ;;  %v15979_v8 = vld [vmem:[#allocation3 + $0x40] ss:$8 sps:$4 sm:$0xff]  }
 0x41c   : > { %6153 = vmatpush1.bf16.msra.mxu0 %v15970_v2  ;;  %v19257_v45 = vpack.c.bf16 %v3918_v61, %v3914_v46 }
 0x41d   : > { %v3789_v58 = vpop.f32.mrb[184].mxu1  ;;  %v19259_v31 = vpack.c.bf16 %v3919_v44, %v3915_v6  ;;  %6154 = vmatprep.subr.bf16.mxu0 %v15975_v5 }
 0x41e   : > { %v14066_v59 = vadd.f32 %v3789_v58, %v18975_v4  ;;  %v3791_v11 = vpop.f32.mrb[185].mxu1  ;;  %5026 = vmatmul.mubr.bf16.gmra.mrb[132].mxu0 %v19062_v63  ;;  %5412 = vmatmul.mubr.bf16.gmra.mrb[196].mxu1 %v19062_v63 }
 0x41f   : > { %v14067_v57 = vadd.f32 %v3791_v11, %v18979_v18  ;;  %v3793_v14 = vpop.f32.mrb[186].mxu1  ;;  %5035 = vmatprep.mubr.bf16.mxu0 %v19101_v36  ;;  %5421 = vmatprep.mubr.bf16.mxu1 %v19101_v36  ;;  %v15984_v36 = vld [vmem:[#allocation3 + $0x54] ss:$8 sps:$4 sm:$0xff]  }
 0x420   : > { %v14068_v25 = vadd.f32 %v3793_v14, %v18975_v4  ;;  %v3795_v27 = vpop.f32.mrb[187].mxu1  ;;  %6155 = vmatpush1.bf16.msra.mxu0 %v15973_v24  ;;  %v3922_v37 = vmax.f32 %v14066_v59, 0.0  ;;  %v15982_v59 = vld [vmem:[#allocation3 + $0x50] ss:$8 sps:$4 sm:$0xff]  }
 0x421   : > { %v14069_v52 = vadd.f32 %v3795_v27, %v18979_v18  ;;  %6156 = vmatprep.subr.bf16.mxu0 %v15978_v43  ;;  %v3923_v0 = vmax.f32 %v14067_v57, 0.0  ;;  %v15987_v57 = vld [vmem:[#allocation3 + $0x64] ss:$8 sps:$4 sm:$0xff]  }
 0x422   : > { %v3926_v47 = vmax.f32 %v14068_v25, 0.0 }
 0x423   : > { %v3927_v63 = vmax.f32 %v14069_v52, 0.0  ;;  %v15985_v52 = vld [vmem:[#allocation3 + $0x60] ss:$8 sps:$4 sm:$0xff]  }
 0x424   : > { %v19269_v2 = vpack.c.bf16 %v3926_v47, %v3922_v37  ;;  %6157 = vmatpush1.bf16.msra.mxu0 %v15976_v13  ;;  %v15991_v37 = vld [vmem:[#allocation3 + $0x80] ss:$8 sps:$4 sm:$0xff]   ;;  %v15996_v47 = vld [vmem:[#allocation3 + $0x94] ss:$8 sps:$4 sm:$0xff]  }
 0x425   : > { %v3799_v5 = vpop.f32.mrb[188].mxu1  ;;  %v19271_v46 = vpack.c.bf16 %v3927_v63, %v3923_v0  ;;  %6158 = vmatprep.subr.bf16.mxu0 %v15981_v41  ;;  %v15997_v0 = vld [vmem:[#allocation3 + $0xa0] ss:$8 sps:$4 sm:$0xff]   ;;  %v16002_v63 = vld [vmem:[#allocation3 + $0xb4] ss:$8 sps:$4 sm:$0xff]  }
 0x426   : > { %v14070_v61 = vadd.f32 %v3799_v5, %v18975_v4  ;;  %v3801_v6 = vpop.f32.mrb[189].mxu1  ;;  %5036 = vmatmul.mubr.bf16.gmra.mrb[136].mxu0 %v19098_v55  ;;  %5422 = vmatmul.mubr.bf16.gmra.mrb[200].mxu1 %v19098_v55  ;;  %v16008_v5 = vld [vmem:[#allocation3 + $0xd4] ss:$8 sps:$4 sm:$0xff]  }
 0x427   : > { %v14071_v44 = vadd.f32 %v3801_v6, %v18979_v18  ;;  %v3803_v24 = vpop.f32.mrb[190].mxu1  ;;  %5045 = vmatprep.mubr.bf16.mxu0 %v19137_v60  ;;  %5431 = vmatprep.mubr.bf16.mxu1 %v19137_v60  ;;  %v15990_v60 = vld [vmem:[#allocation3 + $0x74] ss:$8 sps:$4 sm:$0xff]  }
 0x428   : > { %v14072_v58 = vadd.f32 %v3803_v24, %v18975_v4  ;;  %v3805_v43 = vpop.f32.mrb[191].mxu1  ;;  %6159 = vmatpush1.bf16.msra.mxu0 %v15979_v8  ;;  %v3930_v14 = vmax.f32 %v14070_v61, 0.0  ;;  %v15988_v4 = vld [vmem:[#allocation3 + $0x70] ss:$8 sps:$4 sm:$0xff]   ;;  %v16003_v8 = vld [vmem:[#allocation3 + $0xc0] ss:$8 sps:$4 sm:$0xff]  }
 0x429   : > { %v14073_v11 = vadd.f32 %v3805_v43, %v18979_v18  ;;  %6160 = vmatprep.subr.bf16.mxu0 %v15984_v36  ;;  %v3931_v27 = vmax.f32 %v14071_v44, 0.0  ;;  %v15993_v18 = vld [vmem:[#allocation3 + $0x84] ss:$8 sps:$4 sm:$0xff]   ;;  %v16009_v36 = vld [vmem:[#allocation3 + $0xe0] ss:$8 sps:$4 sm:$0xff]  }
 0x42a   : > { %v3934_v25 = vmax.f32 %v14072_v58, 0.0  ;;  %v16054_v61 = vld [vmem:[#allocation7 + $0xc0] ss:$16 sps:$4 sm:$0xff]   ;;  %v16062_v6 = vld [vmem:[#allocation7 + $0xe4] ss:$16 sps:$4 sm:$0xff]  }
 0x42b   : > { %v3935_v55 = vmax.f32 %v14073_v11, 0.0  ;;  %v16060_v44 = vld [vmem:[#allocation7 + $0xe0] ss:$16 sps:$4 sm:$0xff]   ;;  %v16065_v24 = vld [vmem:[#allocation7 + $0x104] ss:$16 sps:$4 sm:$0xff]  }
 0x42c   : > { %v19281_v13 = vpack.c.bf16 %v3934_v25, %v3930_v14  ;;  %6161 = vmatpush1.bf16.msra.mxu0 %v15982_v59  ;;  %v16063_v58 = vld [vmem:[#allocation7 + $0x100] ss:$16 sps:$4 sm:$0xff]   ;;  %v16071_v43 = vld [vmem:[#allocation7 + $0x124] ss:$16 sps:$4 sm:$0xff]  }
 0x42d   : > { %v19283_v41 = vpack.c.bf16 %v3935_v55, %v3931_v27  ;;  %6162 = vmatprep.subr.bf16.mxu0 %v15987_v57  ;;  %v16069_v59 = vld [vmem:[#allocation7 + $0x120] ss:$16 sps:$4 sm:$0xff]   ;;  %v16074_v11 = vld [vmem:[#allocation7 + $0x144] ss:$16 sps:$4 sm:$0xff]  }
 0x42e   : > { %5046 = vmatmul.mubr.bf16.gmra.mrb[140].mxu0 %v19134_v28  ;;  %5432 = vmatmul.mubr.bf16.gmra.mrb[204].mxu1 %v19134_v28  ;;  %v15994_v28 = vld [vmem:[#allocation3 + $0x90] ss:$8 sps:$4 sm:$0xff]   ;;  %v16080_v14 = vld [vmem:[#allocation7 + $0x164] ss:$16 sps:$4 sm:$0xff]  }
 0x42f   : > { %5055 = vmatprep.mubr.bf16.mxu0 %v19155_v22  ;;  %5441 = vmatprep.mubr.bf16.mxu1 %v19155_v22  ;;  %v15999_v22 = vld [vmem:[#allocation3 + $0xa4] ss:$8 sps:$4 sm:$0xff]   ;;  %v16072_v57 = vld [vmem:[#allocation7 + $0x140] ss:$16 sps:$4 sm:$0xff]  }
 0x430   : > { %6163 = vmatpush1.bf16.msra.mxu0 %v15985_v52  ;;  %v16078_v25 = vld [vmem:[#allocation7 + $0x160] ss:$16 sps:$4 sm:$0xff]   ;;  %v16083_v27 = vld [vmem:[#allocation7 + $0x184] ss:$16 sps:$4 sm:$0xff]  }
 0x431   : > { %6164 = vmatprep.subr.bf16.mxu0 %v15990_v60  ;;  %v16081_v55 = vld [vmem:[#allocation7 + $0x180] ss:$16 sps:$4 sm:$0xff]  }
 0x432   : > { %v16087_v52 = vld [vmem:[#allocation7 + $0x1a0] ss:$16 sps:$4 sm:$0xff]  }
 0x433   : > { %v16090_v60 = vld [vmem:[#allocation7 + $0x1c0] ss:$16 sps:$4 sm:$0xff]  }
 0x434   : > { %6165 = vmatpush1.bf16.msra.mxu0 %v15988_v4  ;;  %v16098_v4 = vld [vmem:[#allocation7 + $0x1e4] ss:$16 sps:$4 sm:$0xff]  }
 0x435   : > { %6166 = vmatprep.subr.bf16.mxu0 %v15993_v18  ;;  %v16096_v18 = vld [vmem:[#allocation7 + $0x1e0] ss:$16 sps:$4 sm:$0xff]  }
 0x436   : > { %5056 = vmatmul.mubr.bf16.gmra.mrb[144].mxu0 %v19152_v56  ;;  %5442 = vmatmul.mubr.bf16.gmra.mrb[208].mxu1 %v19152_v56  ;;  %v16000_v56 = vld [vmem:[#allocation3 + $0xb0] ss:$8 sps:$4 sm:$0xff]  }
 0x437   : > { %5065 = vmatprep.mubr.bf16.mxu0 %v19167_v16  ;;  %5451 = vmatprep.mubr.bf16.mxu1 %v19167_v16  ;;  %v16005_v16 = vld [vmem:[#allocation3 + $0xc4] ss:$8 sps:$4 sm:$0xff]  }
 0x438   : > { %6167 = vmatpush1.bf16.msra.mxu0 %v15991_v37  ;;  %v21189_v37 = vld [vmem:[#allocation20_spill] sm:$0xff] }
 0x439   : > { %6168 = vmatprep.subr.bf16.mxu0 %v15996_v47  ;;  %v21190_v47 = vld [vmem:[#allocation21_spill] sm:$0xff] }
 0x43c   : > { %6169 = vmatpush1.bf16.msra.mxu0 %v15994_v28  ;;  %v21191_v28 = vld [vmem:[#allocation23_spill] sm:$0xff] }
 0x43d   : > { %6170 = vmatprep.subr.bf16.mxu0 %v15999_v22  ;;  %v21192_v22 = vld [vmem:[#allocation24_spill] sm:$0xff] }
 0x43e   : > { %5066 = vmatmul.mubr.bf16.gmra.mrb[148].mxu0 %v19164_v35  ;;  %5452 = vmatmul.mubr.bf16.gmra.mrb[212].mxu1 %v19164_v35  ;;  %v16006_v35 = vld [vmem:[#allocation3 + $0xd0] ss:$8 sps:$4 sm:$0xff]  }
 0x43f   : > { %5075 = vmatprep.mubr.bf16.mxu0 %v19179_v40  ;;  %5461 = vmatprep.mubr.bf16.mxu1 %v19179_v40  ;;  %v16011_v40 = vld [vmem:[#allocation3 + $0xe4] ss:$8 sps:$4 sm:$0xff]  }
 0x440   : > { %6171 = vmatpush1.bf16.msra.mxu0 %v15997_v0  ;;  %v21193_v0 = vld [vmem:[#allocation25_spill] sm:$0xff] }
 0x441   : > { %6172 = vmatprep.subr.bf16.mxu0 %v16002_v63  ;;  %v4128_v63 = vld [vmem:[%s20986_s6] sm:$0xf] }
 0x444   : > { %6173 = vmatpush1.bf16.msra.mxu0 %v16000_v56  ;;  %v21194_v56 = vld [vmem:[#allocation26_spill] sm:$0xff] }
 0x445   : > { %6174 = vmatprep.subr.bf16.mxu0 %v16005_v16  ;;  %v19346_v16 = vrot.slane %v4128_v63, %v21186_v7 }
 0x446   : > { %5076 = vmatmul.mubr.bf16.gmra.mrb[152].mxu0 %v19176_v15  ;;  %5462 = vmatmul.mubr.bf16.gmra.mrb[216].mxu1 %v19176_v15  ;;  %v16014_v15 = vld [vmem:[#allocation3 + $0xf4] ss:$8 sps:$4 sm:$0xff]  }
 0x447   : > { %5085 = vmatprep.mubr.bf16.mxu0 %v19191_v42  ;;  %5471 = vmatprep.mubr.bf16.mxu1 %v19191_v42  ;;  %v16017_v42 = vld [vmem:[#allocation3 + $0x104] ss:$8 sps:$4 sm:$0xff]  }
 0x448   : > { %6175 = vmatpush1.bf16.msra.mxu0 %v16003_v8  ;;  %v19349_v8 = vrot.slane %v4128_v63, %v18488_v49 }
 0x449   : > { %6176 = vmatprep.subr.bf16.mxu0 %v16008_v5  ;;  %v19352_v5 = vrot.slane %v4128_v63, %v21187_v38 }
 0x44c   : > { %6177 = vmatpush1.bf16.msra.mxu0 %v16006_v35  ;;  %v19355_v35 = vrot.slane %v4128_v63, %v18491_v34  ;;  %v16023_v63 = vld [vmem:[#allocation3 + $0x114] ss:$8 sps:$4 sm:$0xff]  }
 0x44d   : > { %6178 = vmatprep.subr.bf16.mxu0 %v16011_v40 }
 0x44e   : > { %5086 = vmatmul.mubr.bf16.gmra.mrb[156].mxu0 %v19188_v10  ;;  %5472 = vmatmul.mubr.bf16.gmra.mrb[220].mxu1 %v19188_v10  ;;  %v16012_v10 = vld [vmem:[#allocation3 + $0xf0] ss:$8 sps:$4 sm:$0xff]  }
 0x44f   : > { %5095 = vmatprep.mubr.bf16.mxu0 %v19203_v9  ;;  %5481 = vmatprep.mubr.bf16.mxu1 %v19203_v9  ;;  %v16020_v9 = vld [vmem:[#allocation7 + $0x4] ss:$16 sps:$4 sm:$0xff]  }
 0x450   : > { %6179 = vmatpush1.bf16.msra.mxu0 %v16009_v36  ;;  %7104 = vmatprep.subr.bf16.mxu1 %v16020_v9  ;;  %v21195_v9 = vld [vmem:[#allocation27_spill] sm:$0xff] }
 0x451   : > { %6180 = vmatprep.subr.bf16.mxu0 %v16014_v15 }
 0x454   : > { %6181 = vmatpush1.bf16.msra.mxu0 %v16012_v10 }
 0x455   : > { %6343 = vmatprep.subr.bf16.mxu0 %v16017_v42 }
 0x456   : > { %5096 = vmatmul.mubr.bf16.gmra.mrb[160].mxu0 %v19200_v20  ;;  %5482 = vmatmul.mubr.bf16.gmra.mrb[224].mxu1 %v19200_v20  ;;  %v16018_v20 = vld [vmem:[#allocation7] ss:$16 sps:$4 sm:$0xff]  }
 0x457   : > { %5105 = vmatprep.mubr.bf16.mxu0 %v19215_v1  ;;  %5491 = vmatprep.mubr.bf16.mxu1 %v19215_v1  ;;  %v16026_v1 = vld [vmem:[#allocation7 + $0x24] ss:$16 sps:$4 sm:$0xff]  }
 0x458   : > { %7105 = vmatpush1.bf16.msra.mxu1 %v16018_v20 }
 0x459   : > { %7106 = vmatprep.subr.bf16.mxu1 %v16026_v1 }
 0x45e   : > { %5106 = vmatmul.mubr.bf16.gmra.mrb[164].mxu0 %v19212_v29  ;;  %5492 = vmatmul.mubr.bf16.gmra.mrb[228].mxu1 %v19212_v29  ;;  %v16024_v29 = vld [vmem:[#allocation7 + $0x20] ss:$16 sps:$4 sm:$0xff]  }
 0x45f   : > { %5115 = vmatprep.mubr.bf16.mxu0 %v19227_v51  ;;  %5501 = vmatprep.mubr.bf16.mxu1 %v19227_v51  ;;  %v16032_v51 = vld [vmem:[#allocation7 + $0x44] ss:$16 sps:$4 sm:$0xff]  }
 0x460   : > { %7107 = vmatpush1.bf16.msra.mxu1 %v16024_v29 }
 0x461   : > { %7108 = vmatprep.subr.bf16.mxu1 %v16032_v51 }
 0x466   : > { %5116 = vmatmul.mubr.bf16.gmra.mrb[168].mxu0 %v19224_v54  ;;  %5502 = vmatmul.mubr.bf16.gmra.mrb[232].mxu1 %v19224_v54  ;;  %v16030_v54 = vld [vmem:[#allocation7 + $0x40] ss:$16 sps:$4 sm:$0xff]  }
 0x467   : > { %5125 = vmatprep.mubr.bf16.mxu0 %v19237_v33  ;;  %5511 = vmatprep.mubr.bf16.mxu1 %v19237_v33  ;;  %v16036_v33 = vld [vmem:[#allocation7 + $0x60] ss:$16 sps:$4 sm:$0xff]  }
 0x468   : > { %7109 = vmatpush1.bf16.msra.mxu1 %v16030_v54 }
 0x46e   : > { %5126 = vmatmul.mubr.bf16.gmra.mrb[172].mxu0 %v19235_v53  ;;  %5512 = vmatmul.mubr.bf16.gmra.mrb[236].mxu1 %v19235_v53  ;;  %v21188_v53 = vld [vmem:[#allocation14_spill] sm:$0xff] }
 0x46f   : > { %5135 = vmatprep.mubr.bf16.mxu0 %v19247_v26  ;;  %5521 = vmatprep.mubr.bf16.mxu1 %v19247_v26  ;;  %v16042_v26 = vld [vmem:[#allocation7 + $0x80] ss:$16 sps:$4 sm:$0xff]  }
 0x476   : > { %5136 = vmatmul.mubr.bf16.gmra.mrb[176].mxu0 %v19245_v19  ;;  %5522 = vmatmul.mubr.bf16.gmra.mrb[240].mxu1 %v19245_v19  ;;  %v16038_v19 = vld [vmem:[#allocation7 + $0x64] ss:$16 sps:$4 sm:$0xff]  }
 0x477   : > { %5145 = vmatprep.mubr.bf16.mxu0 %v19259_v31  ;;  %5531 = vmatprep.mubr.bf16.mxu1 %v19259_v31  ;;  %v16048_v31 = vld [vmem:[#allocation7 + $0xa0] ss:$16 sps:$4 sm:$0xff]  }
 0x478   : > { %7110 = vmatprep.subr.bf16.mxu1 %v16038_v19 }
 0x479   : > { %7111 = vmatpush1.bf16.msra.mxu1 %v16036_v33  ;;  %v21196_v33 = vld [vmem:[#allocation28_spill] sm:$0xff] }
 0x47e   : > { %5146 = vmatmul.mubr.bf16.gmra.mrb[180].mxu0 %v19257_v45  ;;  %5532 = vmatmul.mubr.bf16.gmra.mrb[244].mxu1 %v19257_v45  ;;  %v16044_v45 = vld [vmem:[#allocation7 + $0x84] ss:$16 sps:$4 sm:$0xff]  }
 0x47f   : > { %5155 = vmatprep.mubr.bf16.mxu0 %v19271_v46  ;;  %5541 = vmatprep.mubr.bf16.mxu1 %v19271_v46  ;;  %v16056_v46 = vld [vmem:[#allocation7 + $0xc4] ss:$16 sps:$4 sm:$0xff]  }
 0x480   : > { %7112 = vmatprep.subr.bf16.mxu1 %v16044_v45 }
 0x481   : > { %7113 = vmatpush1.bf16.msra.mxu1 %v16042_v26 }
 0x486   : > { %5156 = vmatmul.mubr.bf16.gmra.mrb[184].mxu0 %v19269_v2  ;;  %5542 = vmatmul.mubr.bf16.gmra.mrb[248].mxu1 %v19269_v2  ;;  %v16050_v2 = vld [vmem:[#allocation7 + $0xa4] ss:$16 sps:$4 sm:$0xff]  }
 0x487   : > { %5165 = vmatprep.mubr.bf16.mxu0 %v19283_v41  ;;  %5551 = vmatprep.mubr.bf16.mxu1 %v19283_v41  ;;  %v16092_v41 = vld [vmem:[#allocation7 + $0x1c4] ss:$16 sps:$4 sm:$0xff]  }
 0x488   : > { %7114 = vmatprep.subr.bf16.mxu1 %v16050_v2 }
 0x489   : > { %7115 = vmatpush1.bf16.msra.mxu1 %v16048_v31 }
 0x48a   : > { %7116 = vmatprep.subr.bf16.mxu1 %v16056_v46 }
 0x48d   : > { %7117 = vmatpush1.bf16.msra.mxu1 %v16054_v61 }
 0x48e   : > { %5166 = vmatmul.mubr.bf16.gmra.mrb[188].mxu0 %v19281_v13  ;;  %5552 = vmatmul.mubr.bf16.gmra.mrb[252].mxu1 %v19281_v13  ;;  %v16089_v13 = vld [vmem:[#allocation7 + $0x1a4] ss:$16 sps:$4 sm:$0xff]  }
 0x48f   : > { %7136 = vmatprep.mubr.bf16.mxu1 %v21188_v53  ;;  %7118 = vmatprep.subr.bf16.mxu1 %v16062_v6 }
 0x491   : > { %7119 = vmatpush1.bf16.msra.mxu1 %v16060_v44 }
 0x492   : > { %7120 = vmatprep.subr.bf16.mxu1 %v16065_v24 }
 0x495   : > { %7121 = vmatpush1.bf16.msra.mxu1 %v16063_v58 }
 0x496   : > { %7122 = vmatprep.subr.bf16.mxu1 %v16071_v43 }
 0x499   : > { %7123 = vmatpush1.bf16.msra.mxu1 %v16069_v59 }
 0x49a   : > { %7124 = vmatprep.subr.bf16.mxu1 %v16074_v11 }
 0x49d   : > { %7125 = vmatpush1.bf16.msra.mxu1 %v16072_v57 }
 0x49e   : > { %7126 = vmatprep.subr.bf16.mxu1 %v16080_v14 }
 0x4a1   : > { %7127 = vmatpush1.bf16.msra.mxu1 %v16078_v25 }
 0x4a2   : > { %7128 = vmatprep.subr.bf16.mxu1 %v16083_v27 }
 0x4a5   : > { %7129 = vmatpush1.bf16.msra.mxu1 %v16081_v55 }
 0x4a6   : > { %7130 = vmatprep.subr.bf16.mxu1 %v16089_v13 }
 0x4a9   : > { %7131 = vmatpush1.bf16.msra.mxu1 %v16087_v52  ;;  %v16015_v52 = vld [vmem:[#allocation3 + $0x100] ss:$8 sps:$4 sm:$0xff]  }
 0x4aa   : > { %7132 = vmatprep.subr.bf16.mxu1 %v16092_v41 }
 0x4ad   : > { %7133 = vmatpush1.bf16.msra.mxu1 %v16090_v60 }
 0x4ae   : > { %7134 = vmatprep.subr.bf16.mxu1 %v16098_v4 }
 0x4b1   : > { %7135 = vmatpush1.bf16.msra.mxu1 %v16096_v18 }
 0x4b4   : > { %7137 = vmatmul.mubr.bf16.vlgmr.msra.gmra.mrb[0].mxu1 %v21189_v37 }
 0x4b5   : > { %7146 = vmatprep.mubr.bf16.mxu1 %v21190_v47 }
 0x4bc   : > { %7147 = vmatmul.mubr.bf16.gmra.mrb[4].mxu1 %v21191_v28 }
 0x4bd   : > { %7156 = vmatprep.mubr.bf16.mxu1 %v21192_v22 }
 0x4c4   : > { %7157 = vmatmul.mubr.bf16.gmra.mrb[8].mxu1 %v21193_v0 }
 0x4c5   : > { %7166 = vmatprep.mubr.bf16.mxu1 %v21194_v56 }
 0x4cc   : > { %7167 = vmatmul.mubr.bf16.gmra.mrb[12].mxu1 %v21195_v9 }
 0x4cd   : > { %7176 = vmatprep.mubr.bf16.mxu1 %v21196_v33 }
 0x4e9   : > { %v5017_v40 = vpop.f32.mrb[128].mxu0  ;;  %v5403_v36 = vpop.f32.mrb[192].mxu1 }
 0x4ea   : > { %v14074_v15 = vadd.f32 %v5017_v40, %v19346_v16  ;;  %v14138_v10 = vadd.f32 %v5403_v36, %v19349_v8  ;;  %v5019_v42 = vpop.f32.mrb[129].mxu0  ;;  %v5405_v20 = vpop.f32.mrb[193].mxu1  ;;  %v21197_v40 = vld [vmem:[#allocation29_spill] sm:$0xff] }
 0x4eb   : > { %v14075_v29 = vadd.f32 %v5019_v42, %v19352_v5  ;;  %v14139_v1 = vadd.f32 %v5405_v20, %v19355_v35  ;;  %v5021_v54 = vpop.f32.mrb[130].mxu0  ;;  %v5407_v51 = vpop.f32.mrb[194].mxu1  ;;  %7177 = vmatmul.mubr.bf16.gmra.mrb[16].mxu1 %v21197_v40  ;;  %v21198_v20 = vld [vmem:[#allocation30_spill] sm:$0xff] }
 0x4ec   : > { %v14076_v19 = vadd.f32 %v5021_v54, %v19346_v16  ;;  %v14140_v26 = vadd.f32 %v5407_v51, %v19349_v8  ;;  %v5023_v45 = vpop.f32.mrb[131].mxu0  ;;  %v5409_v31 = vpop.f32.mrb[195].mxu1  ;;  %v5562_v61 = vmax.f32 %v14074_v15, 0.0  ;;  %v5564_v6 = vmax.f32 %v14138_v10, 0.0  ;;  %7186 = vmatprep.mubr.bf16.mxu1 %v21198_v20 }
 0x4ed   : > { %v14077_v2 = vadd.f32 %v5023_v45, %v19352_v5  ;;  %v14141_v46 = vadd.f32 %v5409_v31, %v19355_v35  ;;  %v5565_v58 = vmax.f32 %v14139_v1, 0.0  ;;  %v5563_v59 = vmax.f32 %v14075_v29, 0.0 }
 0x4ee   : > { %v5566_v44 = vmax.f32 %v14076_v19, 0.0  ;;  %v5568_v24 = vmax.f32 %v14140_v26, 0.0  ;;  %v6760_v19 = vld [vmem:[#allocation7 + $0x200] sm:$0x11] }
 0x4ef   : > { %v5569_v43 = vmax.f32 %v14141_v46, 0.0  ;;  %v5567_v11 = vmax.f32 %v14077_v2, 0.0  ;;  %v16021_v46 = vld [vmem:[#allocation3 + $0x110] ss:$8 sps:$4 sm:$0xff]  }
 0x4f0   : > { %v5690_v57 = vpack.c.bf16 %v5566_v44, %v5562_v61  ;;  %v19367_v14 = vpack.c.bf16 %v5568_v24, %v5564_v6  ;;  %v16029_v44 = vld [vmem:[#allocation3 + $0x124] ss:$8 sps:$4 sm:$0xff]   ;;  %v13394_v24 = vcombine.high %v6760_v19, %v6760_v19 }
 0x4f1   : > { %v19369_v25 = vpack.c.bf16 %v5569_v43, %v5565_v58  ;;  %v5027_v27 = vpop.f32.mrb[132].mxu0  ;;  %v5413_v55 = vpop.f32.mrb[196].mxu1  ;;  %v5691_v13 = vpack.c.bf16 %v5567_v11, %v5563_v59  ;;  %v13393_v58 = vcombine.low %v6760_v19, %v6760_v19 }
 0x4f2   : > { %v14078_v41 = vadd.f32 %v5027_v27, %v19346_v16  ;;  %v14142_v60 = vadd.f32 %v5413_v55, %v19349_v8  ;;  %v5029_v4 = vpop.f32.mrb[133].mxu0  ;;  %v5415_v18 = vpop.f32.mrb[197].mxu1  ;;  %13397 = vmatprep.subr.msk.bf16.mxu1 %vm1269_vm0, %v13394_v24 }
 0x4f3   : > { %v14079_v36 = vadd.f32 %v5029_v4, %v19352_v5  ;;  %v14143_v15 = vadd.f32 %v5415_v18, %v19355_v35  ;;  %v5031_v10 = vpop.f32.mrb[134].mxu0  ;;  %v5417_v42 = vpop.f32.mrb[198].mxu1  ;;  %6182 = vmatprep.mubr.bf16.mxu0 %v5691_v13  ;;  %v7093_v13 = vsel %vm1269_vm0, %v13393_v58, 0  ;;  %v16027_v18 = vld [vmem:[#allocation3 + $0x120] ss:$8 sps:$4 sm:$0xff]  }
 0x4f4   : > { %v14080_v29 = vadd.f32 %v5031_v10, %v19346_v16  ;;  %v14144_v1 = vadd.f32 %v5417_v42, %v19349_v8  ;;  %v5033_v54 = vpop.f32.mrb[135].mxu0  ;;  %v5419_v51 = vpop.f32.mrb[199].mxu1  ;;  %6183 = vmatmul.mubr.bf16.vlgmr.msra.gmra.mrb[192].mxu0 %v5690_v57  ;;  %v5572_v26 = vmax.f32 %v14142_v60, 0.0  ;;  %v5570_v2 = vmax.f32 %v14078_v41, 0.0  ;;  %7298 = vmatpush1.bf16.msra.mxu1 %v7093_v13  ;;  %v16035_v42 = vld [vmem:[#allocation3 + $0x134] ss:$8 sps:$4 sm:$0xff]  }
 0x4f5   : > { %v14081_v45 = vadd.f32 %v5033_v54, %v19352_v5  ;;  %v14145_v31 = vadd.f32 %v5419_v51, %v19355_v35  ;;  %6344 = vmatpush1.bf16.msra.mxu0 %v16015_v52  ;;  %v5573_v43 = vmax.f32 %v14143_v15, 0.0  ;;  %v5571_v11 = vmax.f32 %v14079_v36, 0.0 }
 0x4f6   : > { %v5576_v61 = vmax.f32 %v14144_v1, 0.0  ;;  %v5574_v6 = vmax.f32 %v14080_v29, 0.0  ;;  %6345 = vmatprep.subr.bf16.mxu0 %v16023_v63  ;;  %v21199_v29 = vld [vmem:[#allocation31_spill] sm:$0xff] }
 0x4f7   : > { %v5577_v59 = vmax.f32 %v14145_v31, 0.0  ;;  %v5575_v27 = vmax.f32 %v14081_v45, 0.0  ;;  %7187 = vmatmul.mubr.bf16.gmra.mrb[20].mxu1 %v21199_v29 }
 0x4f8   : > { %v19381_v57 = vpack.c.bf16 %v5576_v61, %v5572_v26  ;;  %v5694_v55 = vpack.c.bf16 %v5574_v6, %v5570_v2  ;;  %v21200_v26 = vld [vmem:[#allocation32_spill] sm:$0xff] }
 0x4f9   : > { %v19385_v52 = vpack.c.bf16 %v5577_v59, %v5573_v43  ;;  %v5037_v41 = vpop.f32.mrb[136].mxu0  ;;  %v5423_v60 = vpop.f32.mrb[200].mxu1  ;;  %v5695_v4 = vpack.c.bf16 %v5575_v27, %v5571_v11  ;;  %6346 = vmatpush1.bf16.msra.mxu0 %v16021_v46  ;;  %7196 = vmatprep.mubr.bf16.mxu1 %v21200_v26  ;;  %v16041_v11 = vld [vmem:[#allocation3 + $0x144] ss:$8 sps:$4 sm:$0xff]  }
 0x4fa   : > { %v14082_v63 = vadd.f32 %v5037_v41, %v19346_v16  ;;  %v14146_v36 = vadd.f32 %v5423_v60, %v19349_v8  ;;  %v5039_v15 = vpop.f32.mrb[137].mxu0  ;;  %v5425_v10 = vpop.f32.mrb[201].mxu1  ;;  %6347 = vmatprep.subr.bf16.mxu0 %v16029_v44  ;;  %v16033_v44 = vld [vmem:[#allocation3 + $0x130] ss:$8 sps:$4 sm:$0xff]  }
 0x4fb   : > { %v14083_v1 = vadd.f32 %v5039_v15, %v19352_v5  ;;  %v14147_v54 = vadd.f32 %v5425_v10, %v19355_v35  ;;  %v5041_v51 = vpop.f32.mrb[138].mxu0  ;;  %v5427_v19 = vpop.f32.mrb[202].mxu1  ;;  %6192 = vmatprep.mubr.bf16.mxu0 %v5695_v4 }
 0x4fc   : > { %v14084_v45 = vadd.f32 %v5041_v51, %v19346_v16  ;;  %v14148_v31 = vadd.f32 %v5427_v19, %v19349_v8  ;;  %v5043_v2 = vpop.f32.mrb[139].mxu0  ;;  %v5429_v46 = vpop.f32.mrb[203].mxu1  ;;  %6193 = vmatmul.mubr.bf16.gmra.mrb[196].mxu0 %v5694_v55  ;;  %v5580_v24 = vmax.f32 %v14146_v36, 0.0  ;;  %v5578_v43 = vmax.f32 %v14082_v63, 0.0 }
 0x4fd   : > { %v14085_v61 = vadd.f32 %v5043_v2, %v19352_v5  ;;  %v14149_v6 = vadd.f32 %v5429_v46, %v19355_v35  ;;  %6348 = vmatpush1.bf16.msra.mxu0 %v16027_v18  ;;  %v5581_v27 = vmax.f32 %v14147_v54, 0.0  ;;  %v5579_v41 = vmax.f32 %v14083_v1, 0.0  ;;  %v16039_v18 = vld [vmem:[#allocation3 + $0x140] ss:$8 sps:$4 sm:$0xff]   ;;  %v16047_v54 = vld [vmem:[#allocation3 + $0x154] ss:$8 sps:$4 sm:$0xff]  }
 0x4fe   : > { %v5584_v58 = vmax.f32 %v14148_v31, 0.0  ;;  %v5582_v59 = vmax.f32 %v14084_v45, 0.0  ;;  %6349 = vmatprep.subr.bf16.mxu0 %v16035_v42  ;;  %v21201_v1 = vld [vmem:[#allocation33_spill] sm:$0xff] }
 0x4ff   : > { %v5585_v13 = vmax.f32 %v14149_v6, 0.0  ;;  %v5583_v60 = vmax.f32 %v14085_v61, 0.0  ;;  %7197 = vmatmul.mubr.bf16.gmra.mrb[24].mxu1 %v21201_v1  ;;  %v21202_v6 = vld [vmem:[#allocation34_spill] sm:$0xff] }
 0x500   : > { %v19397_v4 = vpack.c.bf16 %v5584_v58, %v5580_v24  ;;  %v5698_v15 = vpack.c.bf16 %v5582_v59, %v5578_v43  ;;  %7206 = vmatprep.mubr.bf16.mxu1 %v21202_v6 }
 0x501   : > { %v19399_v55 = vpack.c.bf16 %v5585_v13, %v5581_v27  ;;  %v5047_v10 = vpop.f32.mrb[140].mxu0  ;;  %v5433_v51 = vpop.f32.mrb[204].mxu1  ;;  %v5699_v19 = vpack.c.bf16 %v5583_v60, %v5579_v41  ;;  %6350 = vmatpush1.bf16.msra.mxu0 %v16033_v44  ;;  %v16045_v27 = vld [vmem:[#allocation3 + $0x150] ss:$8 sps:$4 sm:$0xff]  }
 0x502   : > { %v14086_v36 = vadd.f32 %v5047_v10, %v19346_v16  ;;  %v14150_v63 = vadd.f32 %v5433_v51, %v19349_v8  ;;  %v5049_v42 = vpop.f32.mrb[141].mxu0  ;;  %v5435_v45 = vpop.f32.mrb[205].mxu1  ;;  %6351 = vmatprep.subr.bf16.mxu0 %v16041_v11  ;;  %v16053_v51 = vld [vmem:[#allocation3 + $0x164] ss:$8 sps:$4 sm:$0xff]  }
 0x503   : > { %v14087_v31 = vadd.f32 %v5049_v42, %v19352_v5  ;;  %v14151_v2 = vadd.f32 %v5435_v45, %v19355_v35  ;;  %v5051_v46 = vpop.f32.mrb[142].mxu0  ;;  %v5437_v61 = vpop.f32.mrb[206].mxu1  ;;  %6202 = vmatprep.mubr.bf16.mxu0 %v5699_v19 }
 0x504   : > { %v14088_v44 = vadd.f32 %v5051_v46, %v19346_v16  ;;  %v14152_v24 = vadd.f32 %v5437_v61, %v19349_v8  ;;  %v5053_v58 = vpop.f32.mrb[143].mxu0  ;;  %v5439_v43 = vpop.f32.mrb[207].mxu1  ;;  %6203 = vmatmul.mubr.bf16.gmra.mrb[200].mxu0 %v5698_v15  ;;  %v5588_v13 = vmax.f32 %v14150_v63, 0.0  ;;  %v5586_v60 = vmax.f32 %v14086_v36, 0.0 }
 0x505   : > { %v14089_v59 = vadd.f32 %v5053_v58, %v19352_v5  ;;  %v14153_v11 = vadd.f32 %v5439_v43, %v19355_v35  ;;  %6352 = vmatpush1.bf16.msra.mxu0 %v16039_v18  ;;  %v5589_v19 = vmax.f32 %v14151_v2, 0.0  ;;  %v5587_v45 = vmax.f32 %v14087_v31, 0.0  ;;  %v16051_v18 = vld [vmem:[#allocation3 + $0x160] ss:$8 sps:$4 sm:$0xff]   ;;  %v16059_v2 = vld [vmem:[#allocation3 + $0x174] ss:$8 sps:$4 sm:$0xff]  }
 0x506   : > { %v5592_v41 = vmax.f32 %v14152_v24, 0.0  ;;  %v5590_v10 = vmax.f32 %v14088_v44, 0.0  ;;  %6353 = vmatprep.subr.bf16.mxu0 %v16047_v54  ;;  %v21203_v31 = vld [vmem:[#allocation35_spill] sm:$0xff] }
 0x507   : > { %v5593_v42 = vmax.f32 %v14153_v11, 0.0  ;;  %v5591_v46 = vmax.f32 %v14089_v59, 0.0  ;;  %7207 = vmatmul.mubr.bf16.gmra.mrb[28].mxu1 %v21203_v31 }
 0x508   : > { %v19411_v61 = vpack.c.bf16 %v5592_v41, %v5588_v13  ;;  %v5702_v34 = vpack.c.bf16 %v5590_v10, %v5586_v60  ;;  %v21204_v41 = vld [vmem:[#allocation36_spill] sm:$0xff] }
 0x509   : > { %v19413_v15 = vpack.c.bf16 %v5593_v42, %v5589_v19  ;;  %v5057_v58 = vpop.f32.mrb[144].mxu0  ;;  %v5443_v49 = vpop.f32.mrb[208].mxu1  ;;  %v5703_v43 = vpack.c.bf16 %v5591_v46, %v5587_v45  ;;  %6354 = vmatpush1.bf16.msra.mxu0 %v16045_v27  ;;  %7216 = vmatprep.mubr.bf16.mxu1 %v21204_v41  ;;  %v16057_v42 = vld [vmem:[#allocation3 + $0x170] ss:$8 sps:$4 sm:$0xff]  }
 0x50a   : > { %v14090_v63 = vadd.f32 %v5057_v58, %v19346_v16  ;;  %v14154_v36 = vadd.f32 %v5443_v49, %v19349_v8  ;;  %v5059_v54 = vpop.f32.mrb[145].mxu0  ;;  %v5445_v44 = vpop.f32.mrb[209].mxu1  ;;  %6355 = vmatprep.subr.bf16.mxu0 %v16053_v51 }
 0x50b   : > { %v14091_v24 = vadd.f32 %v5059_v54, %v19352_v5  ;;  %v14155_v59 = vadd.f32 %v5445_v44, %v19355_v35  ;;  %v5061_v11 = vpop.f32.mrb[146].mxu0  ;;  %v5447_v13 = vpop.f32.mrb[210].mxu1  ;;  %6212 = vmatprep.mubr.bf16.mxu0 %v5703_v43  ;;  %v16068_v43 = vld [vmem:[#allocation3 + $0x184] ss:$8 sps:$4 sm:$0xff]  }
 0x50c   : > { %v14092_v27 = vadd.f32 %v5061_v11, %v19346_v16  ;;  %v14156_v60 = vadd.f32 %v5447_v13, %v19349_v8  ;;  %v5063_v49 = vpop.f32.mrb[147].mxu0  ;;  %v5449_v10 = vpop.f32.mrb[211].mxu1  ;;  %6213 = vmatmul.mubr.bf16.gmra.mrb[204].mxu0 %v5702_v34  ;;  %v5596_v45 = vmax.f32 %v14154_v36, 0.0  ;;  %v5594_v58 = vmax.f32 %v14090_v63, 0.0 }
 0x50d   : > { %v14093_v51 = vadd.f32 %v5063_v49, %v19352_v5  ;;  %v14157_v19 = vadd.f32 %v5449_v10, %v19355_v35  ;;  %6356 = vmatpush1.bf16.msra.mxu0 %v16051_v18  ;;  %v5597_v44 = vmax.f32 %v14155_v59, 0.0  ;;  %v5595_v11 = vmax.f32 %v14091_v24, 0.0  ;;  %v16066_v18 = vld [vmem:[#allocation3 + $0x180] ss:$8 sps:$4 sm:$0xff]   ;;  %v16077_v59 = vld [vmem:[#allocation3 + $0x194] ss:$8 sps:$4 sm:$0xff]  }
 0x50e   : > { %v5600_v46 = vmax.f32 %v14156_v60, 0.0  ;;  %v5598_v54 = vmax.f32 %v14092_v27, 0.0  ;;  %6357 = vmatprep.subr.bf16.mxu0 %v16059_v2  ;;  %v21205_v24 = vld [vmem:[#allocation37_spill] sm:$0xff] }
 0x50f   : > { %v5601_v38 = vmax.f32 %v14157_v19, 0.0  ;;  %v5599_v7 = vmax.f32 %v14093_v51, 0.0  ;;  %7217 = vmatmul.mubr.bf16.gmra.mrb[32].mxu1 %v21205_v24 }
 0x510   : > { %v19425_v13 = vpack.c.bf16 %v5600_v46, %v5596_v45  ;;  %v5706_v41 = vpack.c.bf16 %v5598_v54, %v5594_v58 }
 0x511   : > { %v19427_v34 = vpack.c.bf16 %v5601_v38, %v5597_v44  ;;  %v5067_v49 = vpop.f32.mrb[148].mxu0  ;;  %v5453_v31 = vpop.f32.mrb[212].mxu1  ;;  %v5707_v10 = vpack.c.bf16 %v5599_v7, %v5595_v11  ;;  %6358 = vmatpush1.bf16.msra.mxu0 %v16057_v42  ;;  %v21206_v7 = vld [vmem:[#allocation38_spill] sm:$0xff] }
 0x512   : > { %v14094_v36 = vadd.f32 %v5067_v49, %v19346_v16  ;;  %v14158_v63 = vadd.f32 %v5453_v31, %v19349_v8  ;;  %v5069_v2 = vpop.f32.mrb[149].mxu0  ;;  %v5455_v27 = vpop.f32.mrb[213].mxu1  ;;  %6359 = vmatprep.subr.bf16.mxu0 %v16068_v43  ;;  %7226 = vmatprep.mubr.bf16.mxu1 %v21206_v7  ;;  %v16075_v43 = vld [vmem:[#allocation3 + $0x190] ss:$8 sps:$4 sm:$0xff]  }
 0x513   : > { %v14095_v60 = vadd.f32 %v5069_v2, %v19352_v5  ;;  %v14159_v38 = vadd.f32 %v5455_v27, %v19355_v35  ;;  %v5071_v51 = vpop.f32.mrb[150].mxu0  ;;  %v5457_v19 = vpop.f32.mrb[214].mxu1  ;;  %6222 = vmatprep.mubr.bf16.mxu0 %v5707_v10  ;;  %v16086_v10 = vld [vmem:[#allocation3 + $0x1a4] ss:$8 sps:$4 sm:$0xff]  }
 0x514   : > { %v14096_v42 = vadd.f32 %v5071_v51, %v19346_v16  ;;  %v14160_v45 = vadd.f32 %v5457_v19, %v19349_v8  ;;  %v5073_v31 = vpop.f32.mrb[151].mxu0  ;;  %v5459_v46 = vpop.f32.mrb[215].mxu1  ;;  %6223 = vmatmul.mubr.bf16.gmra.mrb[208].mxu0 %v5706_v41  ;;  %v5604_v44 = vmax.f32 %v14158_v63, 0.0  ;;  %v5602_v49 = vmax.f32 %v14094_v36, 0.0 }
 0x515   : > { %v14097_v58 = vadd.f32 %v5073_v31, %v19352_v5  ;;  %v14161_v54 = vadd.f32 %v5459_v46, %v19355_v35  ;;  %6360 = vmatpush1.bf16.msra.mxu0 %v16066_v18  ;;  %v5605_v27 = vmax.f32 %v14159_v38, 0.0  ;;  %v5603_v51 = vmax.f32 %v14095_v60, 0.0  ;;  %v16084_v18 = vld [vmem:[#allocation3 + $0x1a0] ss:$8 sps:$4 sm:$0xff]   ;;  %v16095_v38 = vld [vmem:[#allocation3 + $0x1b4] ss:$8 sps:$4 sm:$0xff]  }
 0x516   : > { %v5608_v11 = vmax.f32 %v14160_v45, 0.0  ;;  %v5606_v2 = vmax.f32 %v14096_v42, 0.0  ;;  %6361 = vmatprep.subr.bf16.mxu0 %v16077_v59  ;;  %v21207_v60 = vld [vmem:[#allocation39_spill] sm:$0xff] }
 0x517   : > { %v5609_v7 = vmax.f32 %v14161_v54, 0.0  ;;  %v5607_v24 = vmax.f32 %v14097_v58, 0.0  ;;  %7227 = vmatmul.mubr.bf16.gmra.mrb[36].mxu1 %v21207_v60 }
 0x518   : > { %v19439_v19 = vpack.c.bf16 %v5608_v11, %v5604_v44  ;;  %v5710_v6 = vpack.c.bf16 %v5606_v2, %v5602_v49 }
 0x519   : > { %v19441_v41 = vpack.c.bf16 %v5609_v7, %v5605_v27  ;;  %v5077_v31 = vpop.f32.mrb[152].mxu0  ;;  %v5463_v1 = vpop.f32.mrb[216].mxu1  ;;  %v5711_v46 = vpack.c.bf16 %v5607_v24, %v5603_v51  ;;  %6362 = vmatpush1.bf16.msra.mxu0 %v16075_v43  ;;  %v21208_v24 = vld [vmem:[#allocation40_spill] sm:$0xff] }
 0x51a   : > { %v14098_v63 = vadd.f32 %v5077_v31, %v19346_v16  ;;  %v14162_v36 = vadd.f32 %v5463_v1, %v19349_v8  ;;  %v5079_v59 = vpop.f32.mrb[153].mxu0  ;;  %v5465_v42 = vpop.f32.mrb[217].mxu1  ;;  %6363 = vmatprep.subr.bf16.mxu0 %v16086_v10  ;;  %7236 = vmatprep.mubr.bf16.mxu1 %v21208_v24  ;;  %v16093_v10 = vld [vmem:[#allocation3 + $0x1b0] ss:$8 sps:$4 sm:$0xff]  }
 0x51b   : > { %v14099_v45 = vadd.f32 %v5079_v59, %v19352_v5  ;;  %v14163_v7 = vadd.f32 %v5465_v42, %v19355_v35  ;;  %v5081_v58 = vpop.f32.mrb[154].mxu0  ;;  %v5467_v54 = vpop.f32.mrb[218].mxu1  ;;  %6232 = vmatprep.mubr.bf16.mxu0 %v5711_v46  ;;  %v16101_v46 = vld [vmem:[#allocation3 + $0x1c4] ss:$8 sps:$4 sm:$0xff]  }
 0x51c   : > { %v14100_v43 = vadd.f32 %v5081_v58, %v19346_v16  ;;  %v14164_v44 = vadd.f32 %v5467_v54, %v19349_v8  ;;  %v5083_v1 = vpop.f32.mrb[155].mxu0  ;;  %v5469_v11 = vpop.f32.mrb[219].mxu1  ;;  %6233 = vmatmul.mubr.bf16.gmra.mrb[212].mxu0 %v5710_v6  ;;  %v5612_v27 = vmax.f32 %v14162_v36, 0.0  ;;  %v5610_v31 = vmax.f32 %v14098_v63, 0.0 }
 0x51d   : > { %v14101_v49 = vadd.f32 %v5083_v1, %v19352_v5  ;;  %v14165_v2 = vadd.f32 %v5469_v11, %v19355_v35  ;;  %6364 = vmatpush1.bf16.msra.mxu0 %v16084_v18  ;;  %v5613_v42 = vmax.f32 %v14163_v7, 0.0  ;;  %v5611_v58 = vmax.f32 %v14099_v45, 0.0  ;;  %v16099_v18 = vld [vmem:[#allocation3 + $0x1c0] ss:$8 sps:$4 sm:$0xff]   ;;  %v16104_v7 = vld [vmem:[#allocation3 + $0x1d4] ss:$8 sps:$4 sm:$0xff]  }
 0x51e   : > { %v5616_v51 = vmax.f32 %v14164_v44, 0.0  ;;  %v5614_v59 = vmax.f32 %v14100_v43, 0.0  ;;  %6365 = vmatprep.subr.bf16.mxu0 %v16095_v38  ;;  %v21209_v45 = vld [vmem:[#allocation41_spill] sm:$0xff] }
 0x51f   : > { %v5617_v24 = vmax.f32 %v14165_v2, 0.0  ;;  %v5615_v60 = vmax.f32 %v14101_v49, 0.0  ;;  %7237 = vmatmul.mubr.bf16.gmra.mrb[40].mxu1 %v21209_v45 }
 0x520   : > { %v19453_v54 = vpack.c.bf16 %v5616_v51, %v5612_v27  ;;  %v5714_v26 = vpack.c.bf16 %v5614_v59, %v5610_v31 }
 0x521   : > { %v19455_v6 = vpack.c.bf16 %v5617_v24, %v5613_v42  ;;  %v5087_v1 = vpop.f32.mrb[156].mxu0  ;;  %v5473_v29 = vpop.f32.mrb[220].mxu1  ;;  %v5715_v11 = vpack.c.bf16 %v5615_v60, %v5611_v58  ;;  %6366 = vmatpush1.bf16.msra.mxu0 %v16093_v10  ;;  %v21210_v60 = vld [vmem:[#allocation42_spill] sm:$0xff] }
 0x522   : > { %v14102_v36 = vadd.f32 %v5087_v1, %v19346_v16  ;;  %v14166_v63 = vadd.f32 %v5473_v29, %v19349_v8  ;;  %v5089_v38 = vpop.f32.mrb[157].mxu0  ;;  %v5475_v43 = vpop.f32.mrb[221].mxu1  ;;  %6367 = vmatprep.subr.bf16.mxu0 %v16101_v46  ;;  %7246 = vmatprep.mubr.bf16.mxu1 %v21210_v60  ;;  %v16102_v46 = vld [vmem:[#allocation3 + $0x1d0] ss:$8 sps:$4 sm:$0xff]  }
 0x523   : > { %v14103_v44 = vadd.f32 %v5089_v38, %v19352_v5  ;;  %v14167_v24 = vadd.f32 %v5475_v43, %v19355_v35  ;;  %v5091_v49 = vpop.f32.mrb[158].mxu0  ;;  %v5477_v2 = vpop.f32.mrb[222].mxu1  ;;  %6242 = vmatprep.mubr.bf16.mxu0 %v5715_v11  ;;  %v16107_v11 = vld [vmem:[#allocation3 + $0x1e4] ss:$8 sps:$4 sm:$0xff]  }
 0x524   : > { %v14104_v10 = vadd.f32 %v5091_v49, %v19346_v16  ;;  %v14168_v27 = vadd.f32 %v5477_v2, %v19349_v8  ;;  %v5093_v29 = vpop.f32.mrb[159].mxu0  ;;  %v5479_v51 = vpop.f32.mrb[223].mxu1  ;;  %6243 = vmatmul.mubr.bf16.gmra.mrb[216].mxu0 %v5714_v26  ;;  %v5620_v42 = vmax.f32 %v14166_v63, 0.0  ;;  %v5618_v1 = vmax.f32 %v14102_v36, 0.0 }
 0x525   : > { %v14105_v31 = vadd.f32 %v5093_v29, %v19352_v5  ;;  %v14169_v59 = vadd.f32 %v5479_v51, %v19355_v35  ;;  %6368 = vmatpush1.bf16.msra.mxu0 %v16099_v18  ;;  %v5621_v43 = vmax.f32 %v14167_v24, 0.0  ;;  %v5619_v49 = vmax.f32 %v14103_v44, 0.0  ;;  %v16105_v18 = vld [vmem:[#allocation3 + $0x1e0] ss:$8 sps:$4 sm:$0xff]   ;;  %v16110_v24 = vld [vmem:[#allocation3 + $0x1f4] ss:$8 sps:$4 sm:$0xff]  }
 0x526   : > { %v5624_v58 = vmax.f32 %v14168_v27, 0.0  ;;  %v5622_v38 = vmax.f32 %v14104_v10, 0.0  ;;  %6369 = vmatprep.subr.bf16.mxu0 %v16104_v7  ;;  %v21211_v44 = vld [vmem:[#allocation43_spill] sm:$0xff] }
 0x527   : > { %v5625_v60 = vmax.f32 %v14169_v59, 0.0  ;;  %v5623_v45 = vmax.f32 %v14105_v31, 0.0  ;;  %7247 = vmatmul.mubr.bf16.gmra.mrb[44].mxu1 %v21211_v44 }
 0x528   : > { %v19467_v2 = vpack.c.bf16 %v5624_v58, %v5620_v42  ;;  %v5718_v20 = vpack.c.bf16 %v5622_v38, %v5618_v1 }
 0x529   : > { %v19469_v26 = vpack.c.bf16 %v5625_v60, %v5621_v43  ;;  %v5097_v29 = vpop.f32.mrb[160].mxu0  ;;  %v5483_v40 = vpop.f32.mrb[224].mxu1  ;;  %v5719_v51 = vpack.c.bf16 %v5623_v45, %v5619_v49  ;;  %6370 = vmatpush1.bf16.msra.mxu0 %v16102_v46  ;;  %v21212_v45 = vld [vmem:[#allocation44_spill] sm:$0xff] }
 0x52a   : > { %v14106_v63 = vadd.f32 %v5097_v29, %v19346_v16  ;;  %v14170_v36 = vadd.f32 %v5483_v40, %v19349_v8  ;;  %v5099_v7 = vpop.f32.mrb[161].mxu0  ;;  %v5485_v10 = vpop.f32.mrb[225].mxu1  ;;  %6371 = vmatprep.subr.bf16.mxu0 %v16107_v11  ;;  %7256 = vmatprep.mubr.bf16.mxu1 %v21212_v45  ;;  %v16108_v11 = vld [vmem:[#allocation3 + $0x1f0] ss:$8 sps:$4 sm:$0xff]  }
 0x52b   : > { %v14107_v27 = vadd.f32 %v5099_v7, %v19352_v5  ;;  %v14171_v60 = vadd.f32 %v5485_v10, %v19355_v35  ;;  %v5101_v31 = vpop.f32.mrb[162].mxu0  ;;  %v5487_v59 = vpop.f32.mrb[226].mxu1  ;;  %6252 = vmatprep.mubr.bf16.mxu0 %v5719_v51  ;;  %v16114_v51 = vld [vmem:[#allocation7 + $0xc] ss:$16 sps:$4 sm:$0xff]  }
 0x52c   : > { %v14108_v46 = vadd.f32 %v5101_v31, %v19346_v16  ;;  %v14172_v42 = vadd.f32 %v5487_v59, %v19349_v8  ;;  %v5103_v40 = vpop.f32.mrb[163].mxu0  ;;  %v5489_v58 = vpop.f32.mrb[227].mxu1  ;;  %6253 = vmatmul.mubr.bf16.gmra.mrb[220].mxu0 %v5718_v20  ;;  %v5628_v43 = vmax.f32 %v14170_v36, 0.0  ;;  %v5626_v29 = vmax.f32 %v14106_v63, 0.0 }
 0x52d   : > { %v14109_v1 = vadd.f32 %v5103_v40, %v19352_v5  ;;  %v14173_v38 = vadd.f32 %v5489_v58, %v19355_v35  ;;  %6372 = vmatpush1.bf16.msra.mxu0 %v16105_v18  ;;  %v5629_v10 = vmax.f32 %v14171_v60, 0.0  ;;  %v5627_v31 = vmax.f32 %v14107_v27, 0.0  ;;  %v21213_v60 = vld [vmem:[#allocation45_spill] sm:$0xff] }
 0x52e   : > { %v5632_v49 = vmax.f32 %v14172_v42, 0.0  ;;  %v5630_v7 = vmax.f32 %v14108_v46, 0.0  ;;  %6373 = vmatprep.subr.bf16.mxu0 %v16110_v24 }
 0x52f   : > { %v5633_v45 = vmax.f32 %v14173_v38, 0.0  ;;  %v5631_v44 = vmax.f32 %v14109_v1, 0.0  ;;  %7257 = vmatmul.mubr.bf16.gmra.mrb[48].mxu1 %v21213_v60  ;;  %v21214_v1 = vld [vmem:[#allocation46_spill] sm:$0xff] }
 0x530   : > { %v19481_v59 = vpack.c.bf16 %v5632_v49, %v5628_v43  ;;  %v5722_v33 = vpack.c.bf16 %v5630_v7, %v5626_v29  ;;  %7266 = vmatprep.mubr.bf16.mxu1 %v21214_v1 }
 0x531   : > { %v19483_v20 = vpack.c.bf16 %v5633_v45, %v5629_v10  ;;  %v5107_v40 = vpop.f32.mrb[164].mxu0  ;;  %v5493_v9 = vpop.f32.mrb[228].mxu1  ;;  %v5723_v58 = vpack.c.bf16 %v5631_v44, %v5627_v31  ;;  %6374 = vmatpush1.bf16.msra.mxu0 %v16108_v11 }
 0x532   : > { %v14110_v18 = vadd.f32 %v5107_v40, %v19346_v16  ;;  %v14174_v63 = vadd.f32 %v5493_v9, %v19349_v8  ;;  %v5109_v36 = vpop.f32.mrb[165].mxu0  ;;  %v5495_v24 = vpop.f32.mrb[229].mxu1  ;;  %7490 = vmatprep.subr.bf16.mxu0 %v16114_v51 }
 0x533   : > { %v14111_v27 = vadd.f32 %v5109_v36, %v19352_v5  ;;  %v14175_v46 = vadd.f32 %v5495_v24, %v19355_v35  ;;  %v5111_v42 = vpop.f32.mrb[166].mxu0  ;;  %v5497_v45 = vpop.f32.mrb[230].mxu1  ;;  %6262 = vmatprep.mubr.bf16.mxu0 %v5723_v58 }
 0x534   : > { %v14112_v44 = vadd.f32 %v5111_v42, %v19346_v16  ;;  %v14176_v38 = vadd.f32 %v5497_v45, %v19349_v8  ;;  %v5113_v11 = vpop.f32.mrb[167].mxu0  ;;  %v5499_v9 = vpop.f32.mrb[231].mxu1  ;;  %6263 = vmatmul.mubr.bf16.gmra.mrb[224].mxu0 %v5722_v33  ;;  %v5636_v29 = vmax.f32 %v14174_v63, 0.0  ;;  %v5634_v51 = vmax.f32 %v14110_v18, 0.0  ;;  %v21215_v18 = vld [vmem:[#allocation47_spill] sm:$0xff] }
 0x535   : > { %v14113_v43 = vadd.f32 %v5113_v11, %v19352_v5  ;;  %v14177_v49 = vadd.f32 %v5499_v9, %v19355_v35  ;;  %v5637_v31 = vmax.f32 %v14175_v46, 0.0  ;;  %v5635_v58 = vmax.f32 %v14111_v27, 0.0 }
 0x536   : > { %v5640_v7 = vmax.f32 %v14176_v38, 0.0  ;;  %v5638_v10 = vmax.f32 %v14112_v44, 0.0 }
 0x537   : > { %v5641_v40 = vmax.f32 %v14177_v49, 0.0  ;;  %v5639_v36 = vmax.f32 %v14113_v43, 0.0  ;;  %7267 = vmatmul.mubr.bf16.gmra.mrb[52].mxu1 %v21215_v18  ;;  %v21216_v49 = vld [vmem:[#allocation48_spill] sm:$0xff] }
 0x538   : > { %v19495_v24 = vpack.c.bf16 %v5640_v7, %v5636_v29  ;;  %v5726_v42 = vpack.c.bf16 %v5638_v10, %v5634_v51  ;;  %7276 = vmatprep.mubr.bf16.mxu1 %v21216_v49 }
 0x539   : > { %v19497_v1 = vpack.c.bf16 %v5641_v40, %v5637_v31  ;;  %v5117_v45 = vpop.f32.mrb[168].mxu0  ;;  %v5503_v60 = vpop.f32.mrb[232].mxu1  ;;  %v5727_v33 = vpack.c.bf16 %v5639_v36, %v5635_v58 }
 0x53a   : > { %v14114_v11 = vadd.f32 %v5117_v45, %v19346_v16  ;;  %v14178_v9 = vadd.f32 %v5503_v60, %v19349_v8  ;;  %v5119_v63 = vpop.f32.mrb[169].mxu0  ;;  %v5505_v38 = vpop.f32.mrb[233].mxu1 }
 0x53b   : > { %v14115_v46 = vadd.f32 %v5119_v63, %v19352_v5  ;;  %v14179_v27 = vadd.f32 %v5505_v38, %v19355_v35  ;;  %v5121_v44 = vpop.f32.mrb[170].mxu0  ;;  %v5507_v43 = vpop.f32.mrb[234].mxu1  ;;  %6272 = vmatprep.mubr.bf16.mxu0 %v5727_v33 }
 0x53c   : > { %v14116_v29 = vadd.f32 %v5121_v44, %v19346_v16  ;;  %v14180_v7 = vadd.f32 %v5507_v43, %v19349_v8  ;;  %v5123_v51 = vpop.f32.mrb[171].mxu0  ;;  %v5509_v10 = vpop.f32.mrb[235].mxu1  ;;  %6273 = vmatmul.mubr.bf16.gmra.mrb[228].mxu0 %v5726_v42  ;;  %v5644_v40 = vmax.f32 %v14178_v9, 0.0  ;;  %v5642_v36 = vmax.f32 %v14114_v11, 0.0  ;;  %v21217_v11 = vld [vmem:[#allocation49_spill] sm:$0xff] }
 0x53d   : > { %v14117_v60 = vadd.f32 %v5123_v51, %v19352_v5  ;;  %v14181_v31 = vadd.f32 %v5509_v10, %v19355_v35  ;;  %v5645_v63 = vmax.f32 %v14179_v27, 0.0  ;;  %v5643_v33 = vmax.f32 %v14115_v46, 0.0 }
 0x53e   : > { %v5648_v58 = vmax.f32 %v14180_v7, 0.0  ;;  %v5646_v45 = vmax.f32 %v14116_v29, 0.0 }
 0x53f   : > { %v5649_v38 = vmax.f32 %v14181_v31, 0.0  ;;  %v5647_v18 = vmax.f32 %v14117_v60, 0.0  ;;  %7277 = vmatmul.mubr.bf16.gmra.mrb[56].mxu1 %v21217_v11  ;;  %v21218_v31 = vld [vmem:[#allocation50_spill] sm:$0xff] }
 0x540   : > { %v19509_v49 = vpack.c.bf16 %v5648_v58, %v5644_v40  ;;  %v5730_v44 = vpack.c.bf16 %v5646_v45, %v5642_v36  ;;  %7286 = vmatprep.mubr.bf16.mxu1 %v21218_v31 }
 0x541   : > { %v19511_v56 = vpack.c.bf16 %v5649_v38, %v5645_v63  ;;  %v5127_v43 = vpop.f32.mrb[172].mxu0  ;;  %v5513_v0 = vpop.f32.mrb[236].mxu1  ;;  %v5731_v42 = vpack.c.bf16 %v5647_v18, %v5643_v33 }
 0x542   : > { %v14118_v51 = vadd.f32 %v5127_v43, %v19346_v16  ;;  %v14182_v10 = vadd.f32 %v5513_v0, %v19349_v8  ;;  %v5129_v9 = vpop.f32.mrb[173].mxu0  ;;  %v5515_v7 = vpop.f32.mrb[237].mxu1 }
 0x543   : > { %v14119_v27 = vadd.f32 %v5129_v9, %v19352_v5  ;;  %v14183_v46 = vadd.f32 %v5515_v7, %v19355_v35  ;;  %v5131_v29 = vpop.f32.mrb[174].mxu0  ;;  %v5517_v60 = vpop.f32.mrb[238].mxu1  ;;  %6282 = vmatprep.mubr.bf16.mxu0 %v5731_v42 }
 0x544   : > { %v14120_v40 = vadd.f32 %v5131_v29, %v19346_v16  ;;  %v14184_v18 = vadd.f32 %v5517_v60, %v19349_v8  ;;  %v5133_v58 = vpop.f32.mrb[175].mxu0  ;;  %v5519_v36 = vpop.f32.mrb[239].mxu1  ;;  %6283 = vmatmul.mubr.bf16.gmra.mrb[232].mxu0 %v5730_v44  ;;  %v5652_v63 = vmax.f32 %v14182_v10, 0.0  ;;  %v5650_v33 = vmax.f32 %v14118_v51, 0.0  ;;  %v21219_v51 = vld [vmem:[#allocation51_spill] sm:$0xff] }
 0x545   : > { %v14121_v0 = vadd.f32 %v5133_v58, %v19352_v5  ;;  %v14185_v45 = vadd.f32 %v5519_v36, %v19355_v35  ;;  %v5653_v9 = vmax.f32 %v14183_v46, 0.0  ;;  %v5651_v42 = vmax.f32 %v14119_v27, 0.0 }
 0x546   : > { %v5656_v38 = vmax.f32 %v14184_v18, 0.0  ;;  %v5654_v43 = vmax.f32 %v14120_v40, 0.0 }
 0x547   : > { %v5657_v7 = vmax.f32 %v14185_v45, 0.0  ;;  %v5655_v11 = vmax.f32 %v14121_v0, 0.0  ;;  %7287 = vmatmul.mubr.bf16.gmra.mrb[60].mxu1 %v21219_v51 }
 0x548   : > { %v19523_v31 = vpack.c.bf16 %v5656_v38, %v5652_v63  ;;  %v5734_v29 = vpack.c.bf16 %v5654_v43, %v5650_v33  ;;  %7329 = vmatprep.mubr.bf16.mxu1 %v21167_v21 }
 0x549   : > { %v19525_v22 = vpack.c.bf16 %v5657_v7, %v5653_v9  ;;  %v5137_v60 = vpop.f32.mrb[176].mxu0  ;;  %v5523_v28 = vpop.f32.mrb[240].mxu1  ;;  %v5735_v44 = vpack.c.bf16 %v5655_v11, %v5651_v42 }
 0x54a   : > { %v14122_v58 = vadd.f32 %v5137_v60, %v19346_v16  ;;  %v14186_v36 = vadd.f32 %v5523_v28, %v19349_v8  ;;  %v5139_v10 = vpop.f32.mrb[177].mxu0  ;;  %v5525_v18 = vpop.f32.mrb[241].mxu1 }
 0x54b   : > { %v14123_v46 = vadd.f32 %v5139_v10, %v19352_v5  ;;  %v14187_v27 = vadd.f32 %v5525_v18, %v19355_v35  ;;  %v5141_v40 = vpop.f32.mrb[178].mxu0  ;;  %v5527_v0 = vpop.f32.mrb[242].mxu1  ;;  %6292 = vmatprep.mubr.bf16.mxu0 %v5735_v44 }
 0x54c   : > { %v14124_v45 = vadd.f32 %v5141_v40, %v19346_v16  ;;  %v14188_v11 = vadd.f32 %v5527_v0, %v19349_v8  ;;  %v5143_v63 = vpop.f32.mrb[179].mxu0  ;;  %v5529_v38 = vpop.f32.mrb[243].mxu1  ;;  %6293 = vmatmul.mubr.bf16.gmra.mrb[236].mxu0 %v5734_v29  ;;  %v5660_v43 = vmax.f32 %v14186_v36, 0.0  ;;  %v5658_v7 = vmax.f32 %v14122_v58, 0.0  ;;  %v21221_v58 = vld [vmem:[#allocation15_spill] sm:$0xff] }
 0x54d   : > { %v14125_v28 = vadd.f32 %v5143_v63, %v19352_v5  ;;  %v14189_v33 = vadd.f32 %v5529_v38, %v19355_v35  ;;  %v5661_v60 = vmax.f32 %v14187_v27, 0.0  ;;  %v5659_v44 = vmax.f32 %v14123_v46, 0.0 }
 0x54e   : > { %v5664_v9 = vmax.f32 %v14188_v11, 0.0  ;;  %v5662_v42 = vmax.f32 %v14124_v45, 0.0 }
 0x54f   : > { %v5665_v10 = vmax.f32 %v14189_v33, 0.0  ;;  %v5663_v18 = vmax.f32 %v14125_v28, 0.0  ;;  %13398 = vmatmul.mubr.msk.bf16.vlgmr.msra.gmra.mrb[0].mxu1 %vm1220_vm1, %v21221_v58 }
 0x550   : > { %v19537_v51 = vpack.c.bf16 %v5664_v9, %v5660_v43  ;;  %v5738_v40 = vpack.c.bf16 %v5662_v42, %v5658_v7  ;;  %7339 = vmatprep.mubr.bf16.mxu1 %v21167_v21 }
 0x551   : > { %v19539_v47 = vpack.c.bf16 %v5665_v10, %v5661_v60  ;;  %v5147_v0 = vpop.f32.mrb[180].mxu0  ;;  %v5533_v37 = vpop.f32.mrb[244].mxu1  ;;  %v5739_v29 = vpack.c.bf16 %v5663_v18, %v5659_v44 }
 0x552   : > { %21220 = vst [vmem:[#allocation56_spill] sm:$0xff] %v19537_v51  ;;  %v14126_v63 = vadd.f32 %v5147_v0, %v19346_v16  ;;  %v14190_v38 = vadd.f32 %v5533_v37, %v19349_v8  ;;  %v5149_v36 = vpop.f32.mrb[181].mxu0  ;;  %v5535_v11 = vpop.f32.mrb[245].mxu1 }
 0x553   : > { %v14127_v46 = vadd.f32 %v5149_v36, %v19352_v5  ;;  %v14191_v27 = vadd.f32 %v5535_v11, %v19355_v35  ;;  %v5151_v45 = vpop.f32.mrb[182].mxu0  ;;  %v5537_v28 = vpop.f32.mrb[246].mxu1  ;;  %6302 = vmatprep.mubr.bf16.mxu0 %v5739_v29 }
 0x554   : > { %v14128_v33 = vadd.f32 %v5151_v45, %v19346_v16  ;;  %v14192_v43 = vadd.f32 %v5537_v28, %v19349_v8  ;;  %v5153_v9 = vpop.f32.mrb[183].mxu0  ;;  %v5539_v37 = vpop.f32.mrb[247].mxu1  ;;  %6303 = vmatmul.mubr.bf16.gmra.mrb[240].mxu0 %v5738_v40  ;;  %v5668_v60 = vmax.f32 %v14190_v38, 0.0  ;;  %v5666_v44 = vmax.f32 %v14126_v63, 0.0  ;;  %v21224_v63 = vld [vmem:[#allocation16_spill] sm:$0xff] }
 0x555   : > { %v14129_v7 = vadd.f32 %v5153_v9, %v19352_v5  ;;  %v14193_v42 = vadd.f32 %v5539_v37, %v19355_v35  ;;  %v5669_v0 = vmax.f32 %v14191_v27, 0.0  ;;  %v5667_v29 = vmax.f32 %v14127_v46, 0.0 }
 0x556   : > { %v5672_v10 = vmax.f32 %v14192_v43, 0.0  ;;  %v5670_v18 = vmax.f32 %v14128_v33, 0.0 }
 0x557   : > { %v5673_v36 = vmax.f32 %v14193_v42, 0.0  ;;  %v5671_v11 = vmax.f32 %v14129_v7, 0.0  ;;  %13399 = vmatmul.mubr.msk.bf16.gmra.mrb[4].mxu1 %vm1220_vm1, %v21224_v63 }
 0x558   : > { %v19552_v58 = vpack.c.bf16 %v5672_v10, %v5668_v60  ;;  %v5742_v45 = vpack.c.bf16 %v5670_v18, %v5666_v44  ;;  %7349 = vmatprep.mubr.bf16.mxu1 %v21167_v21 }
 0x559   : > { %v19554_v53 = vpack.c.bf16 %v5673_v36, %v5669_v0  ;;  %v5157_v28 = vpop.f32.mrb[184].mxu0  ;;  %v5543_v51 = vpop.f32.mrb[248].mxu1  ;;  %v5743_v40 = vpack.c.bf16 %v5671_v11, %v5667_v29 }
 0x55a   : > { %21222 = vst [vmem:[#allocation58_spill] sm:$0xff] %v19552_v58  ;;  %v14130_v9 = vadd.f32 %v5157_v28, %v19346_v16  ;;  %v14194_v37 = vadd.f32 %v5543_v51, %v19349_v8  ;;  %v5159_v38 = vpop.f32.mrb[185].mxu0  ;;  %v5545_v43 = vpop.f32.mrb[249].mxu1 }
 0x55b   : > { %21223 = vst [vmem:[#allocation59_spill] sm:$0xff] %v19554_v53  ;;  %v14131_v46 = vadd.f32 %v5159_v38, %v19352_v5  ;;  %v14195_v27 = vadd.f32 %v5545_v43, %v19355_v35  ;;  %v5161_v33 = vpop.f32.mrb[186].mxu0  ;;  %v5547_v7 = vpop.f32.mrb[250].mxu1  ;;  %6312 = vmatprep.mubr.bf16.mxu0 %v5743_v40 }
 0x55c   : > { %v14132_v42 = vadd.f32 %v5161_v33, %v19346_v16  ;;  %v14196_v60 = vadd.f32 %v5547_v7, %v19349_v8  ;;  %v5163_v10 = vpop.f32.mrb[187].mxu0  ;;  %v5549_v51 = vpop.f32.mrb[251].mxu1  ;;  %6313 = vmatmul.mubr.bf16.gmra.mrb[244].mxu0 %v5742_v45  ;;  %v5676_v0 = vmax.f32 %v14194_v37, 0.0  ;;  %v5674_v29 = vmax.f32 %v14130_v9, 0.0  ;;  %v21225_v9 = vld [vmem:[#allocation17_spill] sm:$0xff] }
 0x55d   : > { %v14133_v44 = vadd.f32 %v5163_v10, %v19352_v5  ;;  %v14197_v18 = vadd.f32 %v5549_v51, %v19355_v35  ;;  %v5677_v28 = vmax.f32 %v14195_v27, 0.0  ;;  %v5675_v40 = vmax.f32 %v14131_v46, 0.0 }
 0x55e   : > { %v5680_v36 = vmax.f32 %v14196_v60, 0.0  ;;  %v5678_v11 = vmax.f32 %v14132_v42, 0.0 }
 0x55f   : > { %v5681_v38 = vmax.f32 %v14197_v18, 0.0  ;;  %v5679_v43 = vmax.f32 %v14133_v44, 0.0  ;;  %13400 = vmatmul.mubr.msk.bf16.gmra.mrb[8].mxu1 %vm1220_vm1, %v21225_v9 }
 0x560   : > { %v19567_v63 = vpack.c.bf16 %v5680_v36, %v5676_v0  ;;  %v5746_v33 = vpack.c.bf16 %v5678_v11, %v5674_v29  ;;  %7359 = vmatprep.mubr.bf16.mxu1 %v21167_v21 }
 0x561   : > { %v19569_v58 = vpack.c.bf16 %v5681_v38, %v5677_v28  ;;  %v5167_v7 = vpop.f32.mrb[188].mxu0  ;;  %v5553_v53 = vpop.f32.mrb[252].mxu1  ;;  %v5747_v45 = vpack.c.bf16 %v5679_v43, %v5675_v40 }
 0x562   : > { %v14134_v10 = vadd.f32 %v5167_v7, %v19346_v16  ;;  %v14198_v51 = vadd.f32 %v5553_v53, %v19349_v8  ;;  %v5169_v37 = vpop.f32.mrb[189].mxu0  ;;  %v5555_v60 = vpop.f32.mrb[253].mxu1 }
 0x563   : > { %v14135_v46 = vadd.f32 %v5169_v37, %v19352_v5  ;;  %v14199_v27 = vadd.f32 %v5555_v60, %v19355_v35  ;;  %v5171_v42 = vpop.f32.mrb[190].mxu0  ;;  %v5557_v44 = vpop.f32.mrb[254].mxu1  ;;  %6322 = vmatprep.mubr.bf16.mxu0 %v5747_v45 }
 0x564   : > { %v14136_v18 = vadd.f32 %v5171_v42, %v19346_v16  ;;  %v14200_v0 = vadd.f32 %v5557_v44, %v19349_v8  ;;  %v5173_v36 = vpop.f32.mrb[191].mxu0  ;;  %v5559_v53 = vpop.f32.mrb[255].mxu1  ;;  %6323 = vmatmul.mubr.bf16.gmra.mrb[248].mxu0 %v5746_v33  ;;  %v5684_v28 = vmax.f32 %v14198_v51, 0.0  ;;  %v5682_v40 = vmax.f32 %v14134_v10, 0.0  ;;  %v21226_v44 = vld [vmem:[#allocation18_spill] sm:$0xff]  ;;  %v21227_v33 = vld [vmem:[#allocation19_spill] sm:$0xff] }
 0x565   : > { %v14137_v29 = vadd.f32 %v5173_v36, %v19352_v5  ;;  %v14201_v11 = vadd.f32 %v5559_v53, %v19355_v35  ;;  %v5685_v7 = vmax.f32 %v14199_v27, 0.0  ;;  %v5683_v45 = vmax.f32 %v14135_v46, 0.0  ;;  %v16112_v5 = vld [vmem:[#allocation7 + $0x8] ss:$16 sps:$4 sm:$0xff]   ;;  %v16118_v35 = vld [vmem:[#allocation7 + $0x2c] ss:$16 sps:$4 sm:$0xff]  }
 0x566   : > { %v5688_v38 = vmax.f32 %v14200_v0, 0.0  ;;  %v5686_v43 = vmax.f32 %v14136_v18, 0.0  ;;  %v16162_v10 = vld [vmem:[#allocation5] ss:$16 sps:$4 sm:$0xff]   ;;  %v16164_v51 = vld [vmem:[#allocation5 + $0x4] ss:$16 sps:$4 sm:$0xff]  }
 0x567   : > { %v5689_v37 = vmax.f32 %v14201_v11, 0.0  ;;  %v5687_v60 = vmax.f32 %v14137_v29, 0.0  ;;  %13401 = vmatmul.mubr.msk.bf16.gmra.mrb[12].mxu1 %vm1220_vm1, %v21226_v44  ;;  %v16116_v46 = vld [vmem:[#allocation7 + $0x28] ss:$16 sps:$4 sm:$0xff]   ;;  %v16121_v27 = vld [vmem:[#allocation7 + $0x4c] ss:$16 sps:$4 sm:$0xff]   ;;  %8196 = vmatprep.subr.bf16.mxu1 %v16164_v51 }
 0x568   : > { %v19582_v9 = vpack.c.bf16 %v5688_v38, %v5684_v28  ;;  %v5750_v16 = vpack.c.bf16 %v5686_v43, %v5682_v40  ;;  %7369 = vmatprep.mubr.bf16.mxu1 %v21167_v21  ;;  %8197 = vmatpush1.bf16.msra.mxu1 %v16162_v10  ;;  %v16124_v18 = vld [vmem:[#allocation7 + $0x6c] ss:$16 sps:$4 sm:$0xff]   ;;  %v21228_v0 = vld [vmem:[#allocation22_spill] sm:$0xff]  ;;  %v16125_v29 = vld [vmem:[#allocation7 + $0x88] ss:$16 sps:$4 sm:$0xff]  }
 0x569   : > { %v19584_v42 = vpack.c.bf16 %v5689_v37, %v5685_v7  ;;  %v5751_v8 = vpack.c.bf16 %v5687_v60, %v5683_v45  ;;  %v16168_v36 = vld [vmem:[#allocation5 + $0x24] ss:$16 sps:$4 sm:$0xff]   ;;  %v16127_v53 = vld [vmem:[#allocation7 + $0x8c] ss:$16 sps:$4 sm:$0xff]   ;;  %v16131_v40 = vld [vmem:[#allocation7 + $0xc8] ss:$16 sps:$4 sm:$0xff]  }
 0x56a   : > { %8198 = vmatprep.subr.bf16.mxu1 %v16168_v36  ;;  %v16130_v11 = vld [vmem:[#allocation7 + $0xac] ss:$16 sps:$4 sm:$0xff]   ;;  %v16171_v28 = vld [vmem:[#allocation5 + $0x44] ss:$16 sps:$4 sm:$0xff]   ;;  %v16137_v45 = vld [vmem:[#allocation7 + $0x108] ss:$16 sps:$4 sm:$0xff]  }
 0x56b   : > { %6332 = vmatprep.mubr.bf16.mxu0 %v5751_v8  ;;  %v16133_v38 = vld [vmem:[#allocation7 + $0xcc] ss:$16 sps:$4 sm:$0xff]   ;;  %v16174_v7 = vld [vmem:[#allocation5 + $0x64] ss:$16 sps:$4 sm:$0xff]  }
 0x56c   : > { %6333 = vmatmul.mubr.bf16.gmra.mrb[252].mxu0 %v5750_v16  ;;  %v16136_v43 = vld [vmem:[#allocation7 + $0xec] ss:$16 sps:$4 sm:$0xff]   ;;  %v16177_v16 = vld [vmem:[#allocation5 + $0x84] ss:$16 sps:$4 sm:$0xff]  }
 0x56d   : > { %6375 = vmatprep.mubr.bf16.mxu0 %v19369_v25  ;;  %v16119_v25 = vld [vmem:[#allocation7 + $0x48] ss:$16 sps:$4 sm:$0xff]   ;;  %v16139_v37 = vld [vmem:[#allocation7 + $0x10c] ss:$16 sps:$4 sm:$0xff]   ;;  %v16180_v10 = vld [vmem:[#allocation5 + $0xa4] ss:$16 sps:$4 sm:$0xff]  }
 0x56e   : > { %v16142_v60 = vld [vmem:[#allocation7 + $0x12c] ss:$16 sps:$4 sm:$0xff]  }
 0x56f   : > { %13402 = vmatmul.mubr.msk.bf16.gmra.mrb[16].mxu1 %vm1220_vm1, %v21227_v33  ;;  %v16145_v8 = vld [vmem:[#allocation7 + $0x14c] ss:$16 sps:$4 sm:$0xff]  }
 0x570   : > { %7379 = vmatprep.mubr.bf16.mxu1 %v21167_v21  ;;  %v16151_v51 = vld [vmem:[#allocation7 + $0x18c] ss:$16 sps:$4 sm:$0xff]  }
 0x571   : > { %v16160_v36 = vld [vmem:[#allocation7 + $0x1ec] ss:$16 sps:$4 sm:$0xff]  }
 0x574   : > { %6376 = vmatmul.mubr.bf16.vlgmr.msra.gmra.mrb[192].mxu0 %v19367_v14  ;;  %v16166_v14 = vld [vmem:[#allocation5 + $0x20] ss:$16 sps:$4 sm:$0xff]  }
 0x575   : > { %6385 = vmatprep.mubr.bf16.mxu0 %v19385_v52  ;;  %7491 = vmatpush1.bf16.msra.mxu0 %v16112_v5  ;;  %v16122_v52 = vld [vmem:[#allocation7 + $0x68] ss:$16 sps:$4 sm:$0xff]  }
 0x576   : > { %7492 = vmatprep.subr.bf16.mxu0 %v16118_v35  ;;  %8199 = vmatpush1.bf16.msra.mxu1 %v16166_v14  ;;  %v16143_v5 = vld [vmem:[#allocation7 + $0x148] ss:$16 sps:$4 sm:$0xff]   ;;  %v16148_v35 = vld [vmem:[#allocation7 + $0x16c] ss:$16 sps:$4 sm:$0xff]  }
 0x577   : > { %13403 = vmatmul.mubr.msk.bf16.gmra.mrb[20].mxu1 %vm1220_vm1, %v21228_v0  ;;  %8200 = vmatprep.subr.bf16.mxu1 %v16171_v28  ;;  %v16155_v14 = vld [vmem:[#allocation7 + $0x1c8] ss:$16 sps:$4 sm:$0xff]   ;;  %v16195_v28 = vld [vmem:[#allocation5 + $0x144] ss:$16 sps:$4 sm:$0xff]  }
 0x578   : > { %7389 = vmatprep.mubr.bf16.mxu1 %v21167_v21 }
 0x579   : > { %7493 = vmatpush1.bf16.msra.mxu0 %v16116_v46  ;;  %v16149_v46 = vld [vmem:[#allocation7 + $0x188] ss:$16 sps:$4 sm:$0xff]  }
 0x57a   : > { %7494 = vmatprep.subr.bf16.mxu0 %v16121_v27  ;;  %v16154_v27 = vld [vmem:[#allocation7 + $0x1ac] ss:$16 sps:$4 sm:$0xff]  }
 0x57c   : > { %6386 = vmatmul.mubr.bf16.gmra.mrb[196].mxu0 %v19381_v57  ;;  %v16169_v57 = vld [vmem:[#allocation5 + $0x40] ss:$16 sps:$4 sm:$0xff]  }
 0x57d   : > { %6395 = vmatprep.mubr.bf16.mxu0 %v19399_v55  ;;  %7495 = vmatpush1.bf16.msra.mxu0 %v16119_v25  ;;  %v16128_v55 = vld [vmem:[#allocation7 + $0xa8] ss:$16 sps:$4 sm:$0xff]   ;;  %v16183_v25 = vld [vmem:[#allocation5 + $0xc4] ss:$16 sps:$4 sm:$0xff]  }
 0x57e   : > { %7496 = vmatprep.subr.bf16.mxu0 %v16124_v18  ;;  %8201 = vmatpush1.bf16.msra.mxu1 %v16169_v57  ;;  %v16157_v18 = vld [vmem:[#allocation7 + $0x1cc] ss:$16 sps:$4 sm:$0xff]   ;;  %v16187_v57 = vld [vmem:[#allocation5 + $0x100] ss:$16 sps:$4 sm:$0xff]  }
 0x57f   : > { %13404 = vmatmul.mubr.msk.bf16.gmra.mrb[24].mxu1 %vm1220_vm1, %v17352_v17  ;;  %8202 = vmatprep.subr.bf16.mxu1 %v16174_v7  ;;  %v16210_v7 = vld [vmem:[#allocation5 + $0x1e4] ss:$16 sps:$4 sm:$0xff]  }
 0x580   : > { %7399 = vmatprep.mubr.bf16.mxu1 %v21167_v21 }
 0x581   : > { %7497 = vmatpush1.bf16.msra.mxu0 %v16122_v52  ;;  %v19627_v52 = vld [vmem:[#allocation7 + $0x208] sm:$0x11] }
 0x582   : > { %7498 = vmatprep.subr.bf16.mxu0 %v16127_v53  ;;  %v16158_v53 = vld [vmem:[#allocation7 + $0x1e8] ss:$16 sps:$4 sm:$0xff]  }
 0x584   : > { %6396 = vmatmul.mubr.bf16.gmra.mrb[200].mxu0 %v19397_v4  ;;  %v16172_v4 = vld [vmem:[#allocation5 + $0x60] ss:$16 sps:$4 sm:$0xff]  }
 0x585   : > { %6405 = vmatprep.mubr.bf16.mxu0 %v19413_v15  ;;  %7499 = vmatpush1.bf16.msra.mxu0 %v16125_v29  ;;  %v16134_v15 = vld [vmem:[#allocation7 + $0xe8] ss:$16 sps:$4 sm:$0xff]   ;;  %v16189_v29 = vld [vmem:[#allocation5 + $0x104] ss:$16 sps:$4 sm:$0xff]  }
 0x586   : > { %7500 = vmatprep.subr.bf16.mxu0 %v16130_v11  ;;  %8203 = vmatpush1.bf16.msra.mxu1 %v16172_v4  ;;  %v13396_v11 = vcombine.high %v19627_v52, %v19627_v52  ;;  %v16204_v4 = vld [vmem:[#allocation5 + $0x1a4] ss:$16 sps:$4 sm:$0xff]  }
 0x587   : > { %13405 = vmatmul.mubr.msk.bf16.gmra.mrb[28].mxu1 %vm1220_vm1, %v17381_v32  ;;  %8204 = vmatprep.subr.bf16.mxu1 %v16177_v16  ;;  %v16213_v16 = vld [vmem:[#allocation5 + $0xc] ss:$16 sps:$4 sm:$0xff]  }
 0x588   : > { %7409 = vmatprep.mubr.bf16.mxu1 %v21167_v21 }
 0x589   : > { %7501 = vmatpush1.bf16.msra.mxu0 %v16128_v55  ;;  %v16193_v55 = vld [vmem:[#allocation5 + $0x140] ss:$16 sps:$4 sm:$0xff]  }
 0x58a   : > { %7502 = vmatprep.subr.bf16.mxu0 %v16133_v38  ;;  %v16196_v38 = vld [vmem:[#allocation5 + $0x160] ss:$16 sps:$4 sm:$0xff]  }
 0x58c   : > { %6406 = vmatmul.mubr.bf16.gmra.mrb[204].mxu0 %v19411_v61  ;;  %v16175_v61 = vld [vmem:[#allocation5 + $0x80] ss:$16 sps:$4 sm:$0xff]  }
 0x58d   : > { %6415 = vmatprep.mubr.bf16.mxu0 %v19427_v34  ;;  %7503 = vmatpush1.bf16.msra.mxu0 %v16131_v40  ;;  %v16140_v34 = vld [vmem:[#allocation7 + $0x128] ss:$16 sps:$4 sm:$0xff]   ;;  %v16198_v40 = vld [vmem:[#allocation5 + $0x164] ss:$16 sps:$4 sm:$0xff]  }
 0x58e   : > { %7504 = vmatprep.subr.bf16.mxu0 %v16136_v43  ;;  %8205 = vmatpush1.bf16.msra.mxu1 %v16175_v61  ;;  %v16202_v43 = vld [vmem:[#allocation5 + $0x1a0] ss:$16 sps:$4 sm:$0xff]   ;;  %v21234_v61 = vld [vmem:[#allocation21_spill] sm:$0xff] }
 0x58f   : > { %13406 = vmatmul.mubr.msk.bf16.gmra.mrb[32].mxu1 %vm1220_vm1, %v17410_v48  ;;  %8206 = vmatprep.subr.bf16.mxu1 %v16180_v10  ;;  %v21244_v10 = vld [vmem:[#allocation32_spill] sm:$0xff] }
 0x590   : > { %7419 = vmatprep.mubr.bf16.mxu1 %v21167_v21 }
 0x591   : > { %7505 = vmatpush1.bf16.msra.mxu0 %v16134_v15  ;;  %v16208_v15 = vld [vmem:[#allocation5 + $0x1e0] ss:$16 sps:$4 sm:$0xff]  }
 0x592   : > { %7506 = vmatprep.subr.bf16.mxu0 %v16139_v37  ;;  %v21231_v37 = vld [vmem:[#allocation58_spill] sm:$0xff] }
 0x594   : > { %6416 = vmatmul.mubr.bf16.gmra.mrb[208].mxu0 %v19425_v13  ;;  %v16178_v13 = vld [vmem:[#allocation5 + $0xa0] ss:$16 sps:$4 sm:$0xff]  }
 0x595   : > { %6425 = vmatprep.mubr.bf16.mxu0 %v19441_v41  ;;  %7507 = vmatpush1.bf16.msra.mxu0 %v16137_v45  ;;  %v16146_v41 = vld [vmem:[#allocation7 + $0x168] ss:$16 sps:$4 sm:$0xff]  }
 0x596   : > { %7508 = vmatprep.subr.bf16.mxu0 %v16142_v60  ;;  %8207 = vmatpush1.bf16.msra.mxu1 %v16178_v13  ;;  %v21233_v60 = vld [vmem:[#allocation20_spill] sm:$0xff]  ;;  %v21243_v13 = vld [vmem:[#allocation31_spill] sm:$0xff] }
 0x597   : > { %13407 = vmatmul.mubr.msk.bf16.gmra.mrb[36].mxu1 %vm1220_vm1, %v17439_v62  ;;  %8208 = vmatprep.subr.bf16.mxu1 %v16183_v25  ;;  %v21250_v25 = vld [vmem:[#allocation38_spill] sm:$0xff] }
 0x598   : > { %7429 = vmatprep.mubr.bf16.mxu1 %v21167_v21 }
 0x599   : > { %7509 = vmatpush1.bf16.msra.mxu0 %v16140_v34  ;;  %v21239_v34 = vld [vmem:[#allocation27_spill] sm:$0xff] }
 0x59a   : > { %7510 = vmatprep.subr.bf16.mxu0 %v16145_v8  ;;  %v21240_v8 = vld [vmem:[#allocation28_spill] sm:$0xff] }
 0x59c   : > { %6426 = vmatmul.mubr.bf16.gmra.mrb[212].mxu0 %v19439_v19  ;;  %v16181_v19 = vld [vmem:[#allocation5 + $0xc0] ss:$16 sps:$4 sm:$0xff]  }
 0x59d   : > { %6435 = vmatprep.mubr.bf16.mxu0 %v19455_v6  ;;  %7511 = vmatpush1.bf16.msra.mxu0 %v16143_v5  ;;  %v16152_v6 = vld [vmem:[#allocation7 + $0x1a8] ss:$16 sps:$4 sm:$0xff]  }
 0x59e   : > { %7512 = vmatprep.subr.bf16.mxu0 %v16148_v35  ;;  %8209 = vmatpush1.bf16.msra.mxu1 %v16181_v19  ;;  %v21241_v5 = vld [vmem:[#allocation29_spill] sm:$0xff]  ;;  %v21242_v35 = vld [vmem:[#allocation30_spill] sm:$0xff] }
 0x59f   : > { %13408 = vmatmul.mubr.msk.bf16.gmra.mrb[40].mxu1 %vm1220_vm1, %v17480_v23  ;;  %v21249_v19 = vld [vmem:[#allocation37_spill] sm:$0xff] }
 0x5a0   : > { %7439 = vmatprep.mubr.bf16.mxu1 %v21167_v21 }
 0x5a1   : > { %7513 = vmatpush1.bf16.msra.mxu0 %v16146_v41  ;;  %v21245_v41 = vld [vmem:[#allocation33_spill] sm:$0xff] }
 0x5a2   : > { %7514 = vmatprep.subr.bf16.mxu0 %v16151_v51  ;;  %v21246_v51 = vld [vmem:[#allocation34_spill] sm:$0xff] }
 0x5a4   : > { %6436 = vmatmul.mubr.bf16.gmra.mrb[216].mxu0 %v19453_v54  ;;  %v16184_v54 = vld [vmem:[#allocation5 + $0xe0] ss:$16 sps:$4 sm:$0xff]  }
 0x5a5   : > { %6445 = vmatprep.mubr.bf16.mxu0 %v19469_v26  ;;  %7515 = vmatpush1.bf16.msra.mxu0 %v16149_v46  ;;  %v16186_v26 = vld [vmem:[#allocation5 + $0xe4] ss:$16 sps:$4 sm:$0xff]   ;;  %v21247_v46 = vld [vmem:[#allocation35_spill] sm:$0xff] }
 0x5a6   : > { %7516 = vmatprep.subr.bf16.mxu0 %v16154_v27  ;;  %8210 = vmatprep.subr.bf16.mxu1 %v16186_v26  ;;  %v21248_v27 = vld [vmem:[#allocation36_spill] sm:$0xff]  ;;  %v21255_v26 = vld [vmem:[#allocation54_spill] sm:$0xff] }
 0x5a7   : > { %13409 = vmatmul.mubr.msk.bf16.gmra.mrb[44].mxu1 %vm1220_vm1, %v17521_v50 }
 0x5a8   : > { %7449 = vmatprep.mubr.bf16.mxu1 %v21167_v21  ;;  %8211 = vmatpush1.bf16.msra.mxu1 %v16184_v54 }
 0x5a9   : > { %7517 = vmatpush1.bf16.msra.mxu0 %v16152_v6  ;;  %8212 = vmatprep.subr.bf16.mxu1 %v16189_v29  ;;  %v21251_v6 = vld [vmem:[#allocation39_spill] sm:$0xff]  ;;  %v21256_v29 = vld [vmem:[#allocation42_spill] sm:$0xff] }
 0x5aa   : > { %7518 = vmatprep.subr.bf16.mxu0 %v16157_v18  ;;  %v21252_v18 = vld [vmem:[#allocation40_spill] sm:$0xff] }
 0x5ac   : > { %6446 = vmatmul.mubr.bf16.gmra.mrb[220].mxu0 %v19467_v2  ;;  %8213 = vmatpush1.bf16.msra.mxu1 %v16187_v57  ;;  %v16190_v2 = vld [vmem:[#allocation5 + $0x120] ss:$16 sps:$4 sm:$0xff]  }
 0x5ad   : > { %6455 = vmatprep.mubr.bf16.mxu0 %v19483_v20  ;;  %7519 = vmatpush1.bf16.msra.mxu0 %v16155_v14  ;;  %v16192_v20 = vld [vmem:[#allocation5 + $0x124] ss:$16 sps:$4 sm:$0xff]   ;;  %v5818_v14 = vld [vmem:[%s20988_s8] sm:$0x3] }
 0x5ae   : > { %7520 = vmatprep.subr.bf16.mxu0 %v16160_v36  ;;  %8214 = vmatprep.subr.bf16.mxu1 %v16192_v20  ;;  %v21253_v36 = vld [vmem:[#allocation41_spill] sm:$0xff] }
 0x5af   : > { %13410 = vmatmul.mubr.msk.bf16.gmra.mrb[48].mxu1 %vm1220_vm1, %v17567_v12 }
 0x5b0   : > { %7459 = vmatprep.mubr.bf16.mxu1 %v21167_v21  ;;  %8215 = vmatpush1.bf16.msra.mxu1 %v16190_v2 }
 0x5b1   : > { %7521 = vmatpush1.bf16.msra.mxu0 %v16158_v53  ;;  %8216 = vmatprep.subr.bf16.mxu1 %v16195_v28  ;;  %v19693_v53 = vrot.slane %v5818_v14, %v21255_v26 }
 0x5b2   : > { %13414 = vmatprep.subr.msk.bf16.mxu0 %vm1269_vm0, %v13396_v11 }
 0x5b4   : > { %6456 = vmatmul.mubr.bf16.gmra.mrb[224].mxu0 %v19481_v59  ;;  %8217 = vmatpush1.bf16.msra.mxu1 %v16193_v55  ;;  %v16201_v59 = vld [vmem:[#allocation5 + $0x184] ss:$16 sps:$4 sm:$0xff]  }
 0x5b5   : > { %6465 = vmatprep.mubr.bf16.mxu0 %v19497_v1  ;;  %8218 = vmatprep.subr.bf16.mxu1 %v16198_v40  ;;  %v16199_v1 = vld [vmem:[#allocation5 + $0x180] ss:$16 sps:$4 sm:$0xff]  }
 0x5b7   : > { %13411 = vmatmul.mubr.msk.bf16.gmra.mrb[52].mxu1 %vm1220_vm1, %v17601_v39 }
 0x5b8   : > { %7469 = vmatprep.mubr.bf16.mxu1 %v21167_v21  ;;  %8219 = vmatpush1.bf16.msra.mxu1 %v16196_v38 }
 0x5b9   : > { %8220 = vmatprep.subr.bf16.mxu1 %v16201_v59 }
 0x5bc   : > { %6466 = vmatmul.mubr.bf16.gmra.mrb[228].mxu0 %v19495_v24  ;;  %8221 = vmatpush1.bf16.msra.mxu1 %v16199_v1  ;;  %v16205_v24 = vld [vmem:[#allocation5 + $0x1c0] ss:$16 sps:$4 sm:$0xff]  }
 0x5bd   : > { %6475 = vmatprep.mubr.bf16.mxu0 %v19511_v56  ;;  %8222 = vmatprep.subr.bf16.mxu1 %v16204_v4  ;;  %v16207_v56 = vld [vmem:[#allocation5 + $0x1c4] ss:$16 sps:$4 sm:$0xff]  }
 0x5bf   : > { %13412 = vmatmul.mubr.msk.bf16.gmra.mrb[56].mxu1 %vm1220_vm1, %v17631_v3 }
 0x5c0   : > { %7479 = vmatprep.mubr.bf16.mxu1 %v21167_v21  ;;  %8223 = vmatpush1.bf16.msra.mxu1 %v16202_v43  ;;  %v21257_v43 = vld [vmem:[#allocation43_spill] sm:$0xff] }
 0x5c1   : > { %8224 = vmatprep.subr.bf16.mxu1 %v16207_v56 }
 0x5c4   : > { %6476 = vmatmul.mubr.bf16.gmra.mrb[232].mxu0 %v19509_v49  ;;  %8225 = vmatpush1.bf16.msra.mxu1 %v16205_v24  ;;  %v21229_v49 = vld [vmem:[#allocation56_spill] sm:$0xff] }
 0x5c5   : > { %6485 = vmatprep.mubr.bf16.mxu0 %v19525_v22  ;;  %8226 = vmatprep.subr.bf16.mxu1 %v16210_v7  ;;  %v21230_v22 = vld [vmem:[#allocation59_spill] sm:$0xff]  ;;  %v21258_v24 = vld [vmem:[#allocation44_spill] sm:$0xff] }
 0x5c6   : > { %v16249_v7 = vld [vmem:[#allocation8 + $0x4] ss:$16 sps:$4 sm:$0xff]  }
 0x5c7   : > { %13413 = vmatmul.mubr.msk.bf16.gmra.mrb[60].mxu1 %vm1220_vm1, %v17660_v30 }
 0x5c8   : > { %8227 = vmatpush1.bf16.msra.mxu1 %v16208_v15 }
 0x5c9   : > { %9714 = vmatprep.subr.bf16.mxu1 %v16249_v7 }
 0x5cc   : > { %6486 = vmatmul.mubr.bf16.gmra.mrb[236].mxu0 %v19523_v31  ;;  %v21232_v31 = vld [vmem:[#allocation14_spill] sm:$0xff] }
 0x5cd   : > { %6495 = vmatprep.mubr.bf16.mxu0 %v19539_v47  ;;  %v13395_v47 = vcombine.low %v19627_v52, %v19627_v52  ;;  %v21254_v52 = vld [vmem:[#allocation53_spill] sm:$0xff] }
 0x5ce   : > { %v19690_v54 = vrot.slane %v5818_v14, %v21254_v52 }
 0x5cf   : > { %v7099_v45 = vsel %vm1269_vm0, %v13395_v47, 0 }
 0x5d4   : > { %6496 = vmatmul.mubr.bf16.gmra.mrb[240].mxu0 %v21229_v49 }
 0x5d5   : > { %6505 = vmatprep.mubr.bf16.mxu0 %v21230_v22 }
 0x5dc   : > { %6506 = vmatmul.mubr.bf16.gmra.mrb[244].mxu0 %v21231_v37  ;;  %v16247_v37 = vld [vmem:[#allocation8] ss:$16 sps:$4 sm:$0xff]  }
 0x5dd   : > { %6515 = vmatprep.mubr.bf16.mxu0 %v19569_v58  ;;  %v21235_v58 = vld [vmem:[#allocation23_spill] sm:$0xff] }
 0x5e4   : > { %6516 = vmatmul.mubr.bf16.gmra.mrb[248].mxu0 %v19567_v63  ;;  %v21236_v63 = vld [vmem:[#allocation24_spill] sm:$0xff] }
 0x5e5   : > { %6525 = vmatprep.mubr.bf16.mxu0 %v19584_v42  ;;  %v21237_v42 = vld [vmem:[#allocation25_spill] sm:$0xff] }
 0x5ec   : > { %6526 = vmatmul.mubr.bf16.gmra.mrb[252].mxu0 %v19582_v9  ;;  %v21238_v9 = vld [vmem:[#allocation26_spill] sm:$0xff] }
 0x5ed   : > { %7522 = vmatprep.mubr.bf16.mxu0 %v21232_v31 }
 0x5f4   : > { %7523 = vmatmul.mubr.bf16.vlgmr.msra.gmra.mrb[0].mxu0 %v21233_v60 }
 0x5f5   : > { %7684 = vmatpush1.bf16.msra.mxu0 %v7099_v45  ;;  %7532 = vmatprep.mubr.bf16.mxu0 %v21234_v61 }
 0x5f6   : > { %8389 = vmatprep.subr.bf16.mxu0 %v16213_v16 }
 0x5fc   : > { %7533 = vmatmul.mubr.bf16.gmra.mrb[4].mxu0 %v21235_v58 }
 0x5fd   : > { %7542 = vmatprep.mubr.bf16.mxu0 %v21236_v63 }
 0x604   : > { %7543 = vmatmul.mubr.bf16.gmra.mrb[8].mxu0 %v21237_v42 }
 0x605   : > { %7552 = vmatprep.mubr.bf16.mxu0 %v21238_v9  ;;  %v21259_v9 = vld [vmem:[#allocation45_spill] sm:$0xff] }
 0x60c   : > { %7553 = vmatmul.mubr.bf16.gmra.mrb[12].mxu0 %v21239_v34 }
 0x60d   : > { %7562 = vmatprep.mubr.bf16.mxu0 %v21240_v8 }
 0x614   : > { %7563 = vmatmul.mubr.bf16.gmra.mrb[16].mxu0 %v21241_v5  ;;  %v21260_v5 = vld [vmem:[#allocation46_spill] sm:$0xff] }
 0x615   : > { %7572 = vmatprep.mubr.bf16.mxu0 %v21242_v35  ;;  %v16253_v35 = vld [vmem:[#allocation8 + $0x20] ss:$16 sps:$4 sm:$0xff]  }
 0x61c   : > { %7573 = vmatmul.mubr.bf16.gmra.mrb[20].mxu0 %v21243_v13  ;;  %v16255_v13 = vld [vmem:[#allocation8 + $0x24] ss:$16 sps:$4 sm:$0xff]  }
 0x61d   : > { %7582 = vmatprep.mubr.bf16.mxu0 %v21244_v10 }
 0x624   : > { %7583 = vmatmul.mubr.bf16.gmra.mrb[24].mxu0 %v21245_v41 }
 0x625   : > { %7592 = vmatprep.mubr.bf16.mxu0 %v21246_v51 }
 0x62c   : > { %7593 = vmatmul.mubr.bf16.gmra.mrb[28].mxu0 %v21247_v46 }
 0x62d   : > { %7602 = vmatprep.mubr.bf16.mxu0 %v21248_v27 }
 0x634   : > { %7603 = vmatmul.mubr.bf16.gmra.mrb[32].mxu0 %v21249_v19 }
 0x635   : > { %7612 = vmatprep.mubr.bf16.mxu0 %v21250_v25 }
 0x63c   : > { %7613 = vmatmul.mubr.bf16.gmra.mrb[36].mxu0 %v21251_v6 }
 0x63d   : > { %7622 = vmatprep.mubr.bf16.mxu0 %v21252_v18 }
 0x644   : > { %7623 = vmatmul.mubr.bf16.gmra.mrb[40].mxu0 %v21253_v36 }
 0x645   : > { %7632 = vmatprep.mubr.bf16.mxu0 %v21256_v29 }
 0x647   : > { %v6377_v11 = vpop.f32.mrb[192].mxu0 }
 0x648   : > { %v14202_v57 = vadd.f32 %v6377_v11, %v19690_v54  ;;  %v6379_v2 = vpop.f32.mrb[193].mxu0  ;;  %v21261_v11 = vld [vmem:[#allocation47_spill] sm:$0xff] }
 0x649   : > { %v14203_v20 = vadd.f32 %v6379_v2, %v19693_v53  ;;  %v6381_v28 = vpop.f32.mrb[194].mxu0 }
 0x64a   : > { %v14204_v55 = vadd.f32 %v6381_v28, %v19690_v54  ;;  %v6383_v38 = vpop.f32.mrb[195].mxu0  ;;  %v6536_v59 = vmax.f32 %v14202_v57, 0.0  ;;  %v16259_v28 = vld [vmem:[#allocation8 + $0x40] ss:$16 sps:$4 sm:$0xff]  }
 0x64b   : > { %v14205_v40 = vadd.f32 %v6383_v38, %v19693_v53  ;;  %v6537_v4 = vmax.f32 %v14203_v20, 0.0  ;;  %v21262_v20 = vld [vmem:[#allocation48_spill] sm:$0xff] }
 0x64c   : > { %v6538_v1 = vmax.f32 %v14204_v55, 0.0  ;;  %7633 = vmatmul.mubr.bf16.gmra.mrb[44].mxu0 %v21257_v43  ;;  %v16261_v55 = vld [vmem:[#allocation8 + $0x44] ss:$16 sps:$4 sm:$0xff]  }
 0x64d   : > { %v6539_v56 = vmax.f32 %v14205_v40, 0.0  ;;  %7642 = vmatprep.mubr.bf16.mxu0 %v21258_v24 }
 0x64e   : > { %v19702_v15 = vpack.c.bf16 %v6538_v1, %v6536_v59 }
 0x64f   : > { %v19704_v49 = vpack.c.bf16 %v6539_v56, %v6537_v4  ;;  %v6387_v22 = vpop.f32.mrb[196].mxu0 }
 0x650   : > { %v14206_v31 = vadd.f32 %v6387_v22, %v19690_v54  ;;  %v6389_v47 = vpop.f32.mrb[197].mxu0 }
 0x651   : > { %v14207_v45 = vadd.f32 %v6389_v47, %v19693_v53  ;;  %v6391_v60 = vpop.f32.mrb[198].mxu0  ;;  %8228 = vmatprep.mubr.bf16.mxu1 %v19704_v49  ;;  %v21263_v47 = vld [vmem:[#allocation49_spill] sm:$0xff] }
 0x652   : > { %v14208_v61 = vadd.f32 %v6391_v60, %v19690_v54  ;;  %v6393_v16 = vpop.f32.mrb[199].mxu0  ;;  %8229 = vmatmul.mubr.bf16.vlgmr.msra.gmra.mrb[0].mxu1 %v19702_v15  ;;  %v6540_v63 = vmax.f32 %v14206_v31, 0.0 }
 0x653   : > { %v14209_v58 = vadd.f32 %v6393_v16, %v19693_v53  ;;  %9715 = vmatpush1.bf16.msra.mxu1 %v16247_v37  ;;  %v6541_v34 = vmax.f32 %v14207_v45, 0.0  ;;  %v16265_v16 = vld [vmem:[#allocation8 + $0x60] ss:$16 sps:$4 sm:$0xff]  }
 0x654   : > { %v6542_v42 = vmax.f32 %v14208_v61, 0.0  ;;  %7643 = vmatmul.mubr.bf16.gmra.mrb[48].mxu0 %v21259_v9  ;;  %9716 = vmatprep.subr.bf16.mxu1 %v16255_v13  ;;  %v21264_v61 = vld [vmem:[#allocation50_spill] sm:$0xff] }
 0x655   : > { %v6543_v8 = vmax.f32 %v14209_v58, 0.0  ;;  %7652 = vmatprep.mubr.bf16.mxu0 %v21260_v5  ;;  %v16267_v58 = vld [vmem:[#allocation8 + $0x64] ss:$16 sps:$4 sm:$0xff]  }
 0x656   : > { %v19714_v10 = vpack.c.bf16 %v6542_v42, %v6540_v63 }
 0x657   : > { %v19716_v41 = vpack.c.bf16 %v6543_v8, %v6541_v34  ;;  %v6397_v51 = vpop.f32.mrb[200].mxu0  ;;  %9717 = vmatpush1.bf16.msra.mxu1 %v16253_v35 }
 0x658   : > { %v14210_v46 = vadd.f32 %v6397_v51, %v19690_v54  ;;  %v6399_v27 = vpop.f32.mrb[201].mxu0  ;;  %9718 = vmatprep.subr.bf16.mxu1 %v16261_v55 }
 0x659   : > { %v14211_v19 = vadd.f32 %v6399_v27, %v19693_v53  ;;  %v6401_v25 = vpop.f32.mrb[202].mxu0  ;;  %8238 = vmatprep.mubr.bf16.mxu1 %v19716_v41 }
 0x65a   : > { %v14212_v6 = vadd.f32 %v6401_v25, %v19690_v54  ;;  %v6403_v18 = vpop.f32.mrb[203].mxu0  ;;  %8239 = vmatmul.mubr.bf16.gmra.mrb[4].mxu1 %v19714_v10  ;;  %v6544_v36 = vmax.f32 %v14210_v46, 0.0  ;;  %v21265_v25 = vld [vmem:[#allocation51_spill] sm:$0xff] }
 0x65b   : > { %v14213_v14 = vadd.f32 %v6403_v18, %v19693_v53  ;;  %v6545_v57 = vmax.f32 %v14211_v19, 0.0  ;;  %9719 = vmatpush1.bf16.msra.mxu1 %v16259_v28 }
 0x65c   : > { %v6546_v29 = vmax.f32 %v14212_v6, 0.0  ;;  %7653 = vmatmul.mubr.bf16.gmra.mrb[52].mxu0 %v21261_v11  ;;  %9720 = vmatprep.subr.bf16.mxu1 %v16267_v58 }
 0x65d   : > { %v6547_v2 = vmax.f32 %v14213_v14, 0.0  ;;  %7662 = vmatprep.mubr.bf16.mxu0 %v21262_v20  ;;  %v16271_v14 = vld [vmem:[#allocation8 + $0x80] ss:$16 sps:$4 sm:$0xff]  }
 0x65e   : > { %v19726_v38 = vpack.c.bf16 %v6546_v29, %v6544_v36  ;;  %v16273_v36 = vld [vmem:[#allocation8 + $0x84] ss:$16 sps:$4 sm:$0xff]  }
 0x65f   : > { %v19728_v40 = vpack.c.bf16 %v6547_v2, %v6545_v57  ;;  %v6407_v59 = vpop.f32.mrb[204].mxu0  ;;  %9721 = vmatpush1.bf16.msra.mxu1 %v16265_v16  ;;  %v16219_v16 = vld [vmem:[#allocation5 + $0x4c] ss:$16 sps:$4 sm:$0xff]  }
 0x660   : > { %v14214_v1 = vadd.f32 %v6407_v59, %v19690_v54  ;;  %v6409_v43 = vpop.f32.mrb[205].mxu0  ;;  %9722 = vmatprep.subr.bf16.mxu1 %v16273_v36  ;;  %v16211_v59 = vld [vmem:[#allocation5 + $0x8] ss:$16 sps:$4 sm:$0xff]  }
 0x661   : > { %v14215_v4 = vadd.f32 %v6409_v43, %v19693_v53  ;;  %v6411_v56 = vpop.f32.mrb[206].mxu0  ;;  %8248 = vmatprep.mubr.bf16.mxu1 %v19728_v40 }
 0x662   : > { %v14216_v24 = vadd.f32 %v6411_v56, %v19690_v54  ;;  %v6413_v7 = vpop.f32.mrb[207].mxu0  ;;  %8249 = vmatmul.mubr.bf16.gmra.mrb[8].mxu1 %v19726_v38  ;;  %v6548_v37 = vmax.f32 %v14214_v1, 0.0 }
 0x663   : > { %v14217_v22 = vadd.f32 %v6413_v7, %v19693_v53  ;;  %v6549_v45 = vmax.f32 %v14215_v4, 0.0  ;;  %9723 = vmatpush1.bf16.msra.mxu1 %v16271_v14  ;;  %v16216_v4 = vld [vmem:[#allocation5 + $0x2c] ss:$16 sps:$4 sm:$0xff]   ;;  %v16220_v14 = vld [vmem:[#allocation5 + $0x68] ss:$16 sps:$4 sm:$0xff]  }
 0x664   : > { %v6550_v31 = vmax.f32 %v14216_v24, 0.0  ;;  %7663 = vmatmul.mubr.bf16.gmra.mrb[56].mxu0 %v21263_v47 }
 0x665   : > { %v6551_v60 = vmax.f32 %v14217_v22, 0.0  ;;  %7672 = vmatprep.mubr.bf16.mxu0 %v21264_v61  ;;  %v21266_v22 = vld [vmem:[#allocation15_spill] sm:$0xff] }
 0x666   : > { %v19738_v63 = vpack.c.bf16 %v6550_v31, %v6548_v37  ;;  %v16214_v37 = vld [vmem:[#allocation5 + $0x28] ss:$16 sps:$4 sm:$0xff]  }
 0x667   : > { %v19740_v42 = vpack.c.bf16 %v6551_v60, %v6549_v45  ;;  %v6417_v9 = vpop.f32.mrb[208].mxu0  ;;  %v16274_v45 = vld [vmem:[#allocation8 + $0xa0] ss:$16 sps:$4 sm:$0xff]   ;;  %v16276_v60 = vld [vmem:[#allocation8 + $0xa4] ss:$16 sps:$4 sm:$0xff]  }
 0x668   : > { %v14218_v34 = vadd.f32 %v6417_v9, %v19690_v54  ;;  %v6419_v8 = vpop.f32.mrb[209].mxu0  ;;  %9724 = vmatprep.subr.bf16.mxu1 %v16276_v60 }
 0x669   : > { %v14219_v5 = vadd.f32 %v6419_v8, %v19693_v53  ;;  %v6421_v35 = vpop.f32.mrb[210].mxu0  ;;  %8258 = vmatprep.mubr.bf16.mxu1 %v19740_v42  ;;  %9725 = vmatpush1.bf16.msra.mxu1 %v16274_v45 }
 0x66a   : > { %v14220_v13 = vadd.f32 %v6421_v35, %v19690_v54  ;;  %v6423_v51 = vpop.f32.mrb[211].mxu0  ;;  %8259 = vmatmul.mubr.bf16.gmra.mrb[12].mxu1 %v19738_v63  ;;  %v6552_v27 = vmax.f32 %v14218_v34, 0.0 }
 0x66b   : > { %v14221_v46 = vadd.f32 %v6423_v51, %v19693_v53  ;;  %v6553_v6 = vmax.f32 %v14219_v5, 0.0 }
 0x66c   : > { %v6554_v19 = vmax.f32 %v14220_v13, 0.0  ;;  %7673 = vmatmul.mubr.bf16.gmra.mrb[60].mxu0 %v21265_v25  ;;  %v16217_v13 = vld [vmem:[#allocation5 + $0x48] ss:$16 sps:$4 sm:$0xff]  }
 0x66d   : > { %v6555_v18 = vmax.f32 %v14221_v46, 0.0  ;;  %7715 = vmatprep.mubr.bf16.mxu0 %v21167_v21 }
 0x66e   : > { %v19750_v29 = vpack.c.bf16 %v6554_v19, %v6552_v27  ;;  %v16222_v27 = vld [vmem:[#allocation5 + $0x6c] ss:$16 sps:$4 sm:$0xff]  }
 0x66f   : > { %v19752_v11 = vpack.c.bf16 %v6555_v18, %v6553_v6  ;;  %v6427_v57 = vpop.f32.mrb[212].mxu0  ;;  %v21267_v18 = vld [vmem:[#allocation16_spill] sm:$0xff] }
 0x670   : > { %v14222_v2 = vadd.f32 %v6427_v57, %v19690_v54  ;;  %v6429_v20 = vpop.f32.mrb[213].mxu0 }
 0x671   : > { %v14223_v28 = vadd.f32 %v6429_v20, %v19693_v53  ;;  %v6431_v55 = vpop.f32.mrb[214].mxu0  ;;  %8268 = vmatprep.mubr.bf16.mxu1 %v19752_v11  ;;  %v16279_v20 = vld [vmem:[#allocation8 + $0xc4] ss:$16 sps:$4 sm:$0xff]  }
 0x672   : > { %v14224_v1 = vadd.f32 %v6431_v55, %v19690_v54  ;;  %v6433_v43 = vpop.f32.mrb[215].mxu0  ;;  %8269 = vmatmul.mubr.bf16.gmra.mrb[16].mxu1 %v19750_v29  ;;  %v6556_v24 = vmax.f32 %v14222_v2, 0.0  ;;  %v16277_v2 = vld [vmem:[#allocation8 + $0xc0] ss:$16 sps:$4 sm:$0xff]   ;;  %v16225_v55 = vld [vmem:[#allocation5 + $0x8c] ss:$16 sps:$4 sm:$0xff]   ;;  %9726 = vmatprep.subr.bf16.mxu1 %v16279_v20 }
 0x673   : > { %v14225_v56 = vadd.f32 %v6433_v43, %v19693_v53  ;;  %v6557_v31 = vmax.f32 %v14223_v28, 0.0  ;;  %9727 = vmatpush1.bf16.msra.mxu1 %v16277_v2  ;;  %v16234_v2 = vld [vmem:[#allocation5 + $0xec] ss:$16 sps:$4 sm:$0xff]  }
 0x674   : > { %v6558_v7 = vmax.f32 %v14224_v1, 0.0  ;;  %13415 = vmatmul.mubr.msk.bf16.vlgmr.msra.gmra.mrb[0].mxu0 %vm1220_vm1, %v21266_v22 }
 0x675   : > { %v6559_v47 = vmax.f32 %v14225_v56, 0.0  ;;  %8390 = vmatpush1.bf16.msra.mxu0 %v16211_v59  ;;  %7725 = vmatprep.mubr.bf16.mxu0 %v21167_v21 }
 0x676   : > { %v19763_v61 = vpack.c.bf16 %v6558_v7, %v6556_v24  ;;  %8391 = vmatprep.subr.bf16.mxu0 %v16216_v4  ;;  %v16223_v7 = vld [vmem:[#allocation5 + $0x88] ss:$16 sps:$4 sm:$0xff]  }
 0x677   : > { %v19765_v58 = vpack.c.bf16 %v6559_v47, %v6557_v31  ;;  %v6437_v9 = vpop.f32.mrb[216].mxu0  ;;  %v16228_v31 = vld [vmem:[#allocation5 + $0xac] ss:$16 sps:$4 sm:$0xff]  }
 0x678   : > { %v14226_v34 = vadd.f32 %v6437_v9, %v19690_v54  ;;  %v6439_v8 = vpop.f32.mrb[217].mxu0  ;;  %v16226_v9 = vld [vmem:[#allocation5 + $0xa8] ss:$16 sps:$4 sm:$0xff]  }
 0x679   : > { %v14227_v5 = vadd.f32 %v6439_v8, %v19693_v53  ;;  %v6441_v35 = vpop.f32.mrb[218].mxu0  ;;  %8278 = vmatprep.mubr.bf16.mxu1 %v19765_v58  ;;  %8392 = vmatpush1.bf16.msra.mxu0 %v16214_v37 }
 0x67a   : > { %v14228_v51 = vadd.f32 %v6441_v35, %v19690_v54  ;;  %v6443_v46 = vpop.f32.mrb[219].mxu0  ;;  %8279 = vmatmul.mubr.bf16.gmra.mrb[20].mxu1 %v19763_v61  ;;  %8393 = vmatprep.subr.bf16.mxu0 %v16219_v16  ;;  %v6560_v25 = vmax.f32 %v14226_v34, 0.0  ;;  %v21268_v16 = vld [vmem:[#allocation17_spill] sm:$0xff]  ;;  %v16282_v35 = vld [vmem:[#allocation8 + $0xe4] ss:$16 sps:$4 sm:$0xff]  }
 0x67b   : > { %v14229_v19 = vadd.f32 %v6443_v46, %v19693_v53  ;;  %v6561_v36 = vmax.f32 %v14227_v5, 0.0  ;;  %v16280_v5 = vld [vmem:[#allocation8 + $0xe0] ss:$16 sps:$4 sm:$0xff]   ;;  %9728 = vmatprep.subr.bf16.mxu1 %v16282_v35  ;;  %v16288_v35 = vld [vmem:[#allocation8 + $0x124] ss:$16 sps:$4 sm:$0xff]  }
 0x67c   : > { %v6562_v6 = vmax.f32 %v14228_v51, 0.0  ;;  %13416 = vmatmul.mubr.msk.bf16.gmra.mrb[4].mxu0 %vm1220_vm1, %v21267_v18  ;;  %v16231_v51 = vld [vmem:[#allocation5 + $0xcc] ss:$16 sps:$4 sm:$0xff]   ;;  %9729 = vmatpush1.bf16.msra.mxu1 %v16280_v5 }
 0x67d   : > { %v6563_v57 = vmax.f32 %v14229_v19, 0.0  ;;  %7735 = vmatprep.mubr.bf16.mxu0 %v21167_v21  ;;  %8394 = vmatpush1.bf16.msra.mxu0 %v16217_v13  ;;  %v16240_v5 = vld [vmem:[#allocation5 + $0x12c] ss:$16 sps:$4 sm:$0xff]  }
 0x67e   : > { %v19776_v28 = vpack.c.bf16 %v6562_v6, %v6560_v25  ;;  %8395 = vmatprep.subr.bf16.mxu0 %v16222_v27 }
 0x67f   : > { %v19778_v59 = vpack.c.bf16 %v6563_v57, %v6561_v36  ;;  %v6447_v1 = vpop.f32.mrb[220].mxu0 }
 0x680   : > { %v14230_v43 = vadd.f32 %v6447_v1, %v19690_v54  ;;  %v6449_v4 = vpop.f32.mrb[221].mxu0 }
 0x681   : > { %v14231_v56 = vadd.f32 %v6449_v4, %v19693_v53  ;;  %v6451_v24 = vpop.f32.mrb[222].mxu0  ;;  %8288 = vmatprep.mubr.bf16.mxu1 %v19778_v59  ;;  %8396 = vmatpush1.bf16.msra.mxu0 %v16220_v14  ;;  %v16229_v14 = vld [vmem:[#allocation5 + $0xc8] ss:$16 sps:$4 sm:$0xff]  }
 0x682   : > { %v14232_v22 = vadd.f32 %v6451_v24, %v19690_v54  ;;  %v6453_v37 = vpop.f32.mrb[223].mxu0  ;;  %8289 = vmatmul.mubr.bf16.gmra.mrb[24].mxu1 %v19776_v28  ;;  %8397 = vmatprep.subr.bf16.mxu0 %v16225_v55  ;;  %v6564_v45 = vmax.f32 %v14230_v43, 0.0  ;;  %v16232_v43 = vld [vmem:[#allocation5 + $0xe8] ss:$16 sps:$4 sm:$0xff]   ;;  %v16283_v24 = vld [vmem:[#allocation8 + $0x100] ss:$16 sps:$4 sm:$0xff]  }
 0x683   : > { %v14233_v47 = vadd.f32 %v6453_v37, %v19693_v53  ;;  %v6565_v34 = vmax.f32 %v14231_v56, 0.0  ;;  %v16237_v37 = vld [vmem:[#allocation5 + $0x10c] ss:$16 sps:$4 sm:$0xff]  }
 0x684   : > { %v6566_v60 = vmax.f32 %v14232_v22, 0.0  ;;  %13417 = vmatmul.mubr.msk.bf16.gmra.mrb[8].mxu0 %vm1220_vm1, %v21268_v16 }
 0x685   : > { %v6567_v8 = vmax.f32 %v14233_v47, 0.0  ;;  %7745 = vmatprep.mubr.bf16.mxu0 %v21167_v21  ;;  %8398 = vmatpush1.bf16.msra.mxu0 %v16223_v7  ;;  %v16285_v7 = vld [vmem:[#allocation8 + $0x104] ss:$16 sps:$4 sm:$0xff]  }
 0x686   : > { %v19789_v13 = vpack.c.bf16 %v6566_v60, %v6564_v45  ;;  %8399 = vmatprep.subr.bf16.mxu0 %v16228_v31  ;;  %9730 = vmatprep.subr.bf16.mxu1 %v16285_v7 }
 0x687   : > { %v19791_v46 = vpack.c.bf16 %v6567_v8, %v6565_v34  ;;  %v6457_v27 = vpop.f32.mrb[224].mxu0  ;;  %9731 = vmatpush1.bf16.msra.mxu1 %v16283_v24  ;;  %v16241_v24 = vld [vmem:[#allocation5 + $0x148] ss:$16 sps:$4 sm:$0xff]  }
 0x688   : > { %v14234_v19 = vadd.f32 %v6457_v27, %v19690_v54  ;;  %v6459_v25 = vpop.f32.mrb[225].mxu0  ;;  %v16286_v27 = vld [vmem:[#allocation8 + $0x120] ss:$16 sps:$4 sm:$0xff]   ;;  %9732 = vmatprep.subr.bf16.mxu1 %v16288_v35  ;;  %v16297_v35 = vld [vmem:[#allocation8 + $0x184] ss:$16 sps:$4 sm:$0xff]  }
 0x689   : > { %v14235_v6 = vadd.f32 %v6459_v25, %v19693_v53  ;;  %v6461_v18 = vpop.f32.mrb[226].mxu0  ;;  %8298 = vmatprep.mubr.bf16.mxu1 %v19791_v46  ;;  %8400 = vmatpush1.bf16.msra.mxu0 %v16226_v9  ;;  %v16235_v9 = vld [vmem:[#allocation5 + $0x108] ss:$16 sps:$4 sm:$0xff]  }
 0x68a   : > { %v14236_v36 = vadd.f32 %v6461_v18, %v19690_v54  ;;  %v6463_v57 = vpop.f32.mrb[227].mxu0  ;;  %8299 = vmatmul.mubr.bf16.gmra.mrb[28].mxu1 %v19789_v13  ;;  %8401 = vmatprep.subr.bf16.mxu0 %v16231_v51  ;;  %v6568_v55 = vmax.f32 %v14234_v19, 0.0 }
 0x68b   : > { %v14237_v20 = vadd.f32 %v6463_v57, %v19693_v53  ;;  %v6569_v4 = vmax.f32 %v14235_v6, 0.0  ;;  %9733 = vmatpush1.bf16.msra.mxu1 %v16286_v27  ;;  %v16252_v27 = vld [vmem:[#allocation5 + $0x18c] ss:$16 sps:$4 sm:$0xff]  }
 0x68c   : > { %v6570_v1 = vmax.f32 %v14236_v36, 0.0  ;;  %13418 = vmatmul.mubr.msk.bf16.gmra.mrb[12].mxu0 %vm1220_vm1, %v21226_v44  ;;  %v16291_v36 = vld [vmem:[#allocation8 + $0x144] ss:$16 sps:$4 sm:$0xff]  }
 0x68d   : > { %v6571_v56 = vmax.f32 %v14237_v20, 0.0  ;;  %7755 = vmatprep.mubr.bf16.mxu0 %v21167_v21  ;;  %8402 = vmatpush1.bf16.msra.mxu0 %v16229_v14  ;;  %v16238_v14 = vld [vmem:[#allocation5 + $0x128] ss:$16 sps:$4 sm:$0xff]  }
 0x68e   : > { %v19802_v22 = vpack.c.bf16 %v6570_v1, %v6568_v55  ;;  %8403 = vmatprep.subr.bf16.mxu0 %v16234_v2  ;;  %v16243_v2 = vld [vmem:[#allocation5 + $0x14c] ss:$16 sps:$4 sm:$0xff]   ;;  %v16289_v1 = vld [vmem:[#allocation8 + $0x140] ss:$16 sps:$4 sm:$0xff]   ;;  %9734 = vmatprep.subr.bf16.mxu1 %v16291_v36 }
 0x68f   : > { %v19804_v31 = vpack.c.bf16 %v6571_v56, %v6569_v4  ;;  %v6467_v47 = vpop.f32.mrb[228].mxu0  ;;  %9735 = vmatpush1.bf16.msra.mxu1 %v16289_v1 }
 0x690   : > { %v14238_v45 = vadd.f32 %v6467_v47, %v19690_v54  ;;  %v6469_v60 = vpop.f32.mrb[229].mxu0  ;;  %v16246_v47 = vld [vmem:[#allocation5 + $0x16c] ss:$16 sps:$4 sm:$0xff]  }
 0x691   : > { %v14239_v44 = vadd.f32 %v6469_v60, %v19693_v53  ;;  %v6471_v16 = vpop.f32.mrb[230].mxu0  ;;  %8308 = vmatprep.mubr.bf16.mxu1 %v19804_v31  ;;  %8404 = vmatpush1.bf16.msra.mxu0 %v16232_v43 }
 0x692   : > { %v14240_v34 = vadd.f32 %v6471_v16, %v19690_v54  ;;  %v6473_v8 = vpop.f32.mrb[231].mxu0  ;;  %8309 = vmatmul.mubr.bf16.gmra.mrb[32].mxu1 %v19802_v22  ;;  %8405 = vmatprep.subr.bf16.mxu0 %v16237_v37  ;;  %v6572_v19 = vmax.f32 %v14238_v45, 0.0  ;;  %v16294_v45 = vld [vmem:[#allocation8 + $0x164] ss:$16 sps:$4 sm:$0xff]  }
 0x693   : > { %v14241_v51 = vadd.f32 %v6473_v8, %v19693_v53  ;;  %v6573_v6 = vmax.f32 %v14239_v44, 0.0  ;;  %v16292_v44 = vld [vmem:[#allocation8 + $0x160] ss:$16 sps:$4 sm:$0xff]   ;;  %9736 = vmatprep.subr.bf16.mxu1 %v16294_v45  ;;  %v16256_v45 = vld [vmem:[#allocation5 + $0x1a8] ss:$16 sps:$4 sm:$0xff]  }
 0x694   : > { %v6574_v25 = vmax.f32 %v14240_v34, 0.0  ;;  %13419 = vmatmul.mubr.msk.bf16.gmra.mrb[16].mxu0 %vm1220_vm1, %v21227_v33  ;;  %9737 = vmatpush1.bf16.msra.mxu1 %v16292_v44  ;;  %v16264_v44 = vld [vmem:[#allocation5 + $0x1cc] ss:$16 sps:$4 sm:$0xff]  }
 0x695   : > { %v6575_v18 = vmax.f32 %v14241_v51, 0.0  ;;  %7765 = vmatprep.mubr.bf16.mxu0 %v21167_v21  ;;  %8406 = vmatpush1.bf16.msra.mxu0 %v16235_v9 }
 0x696   : > { %v19815_v57 = vpack.c.bf16 %v6574_v25, %v6572_v19  ;;  %8407 = vmatprep.subr.bf16.mxu0 %v16240_v5  ;;  %v16244_v5 = vld [vmem:[#allocation5 + $0x168] ss:$16 sps:$4 sm:$0xff]   ;;  %9738 = vmatprep.subr.bf16.mxu1 %v16297_v35 }
 0x697   : > { %v19817_v20 = vpack.c.bf16 %v6575_v18, %v6573_v6  ;;  %v6477_v55 = vpop.f32.mrb[232].mxu0  ;;  %v16295_v6 = vld [vmem:[#allocation8 + $0x180] ss:$16 sps:$4 sm:$0xff]  }
 0x698   : > { %v14242_v33 = vadd.f32 %v6477_v55, %v19690_v54  ;;  %v6479_v43 = vpop.f32.mrb[233].mxu0  ;;  %9739 = vmatpush1.bf16.msra.mxu1 %v16295_v6 }
 0x699   : > { %v14243_v4 = vadd.f32 %v6479_v43, %v19693_v53  ;;  %v6481_v56 = vpop.f32.mrb[234].mxu0  ;;  %8318 = vmatprep.mubr.bf16.mxu1 %v19817_v20  ;;  %8408 = vmatpush1.bf16.msra.mxu0 %v16238_v14  ;;  %v16300_v43 = vld [vmem:[#allocation8 + $0x1a4] ss:$16 sps:$4 sm:$0xff]  }
 0x69a   : > { %v14244_v7 = vadd.f32 %v6481_v56, %v19690_v54  ;;  %v6483_v37 = vpop.f32.mrb[235].mxu0  ;;  %8319 = vmatmul.mubr.bf16.gmra.mrb[36].mxu1 %v19815_v57  ;;  %8409 = vmatprep.subr.bf16.mxu0 %v16243_v2  ;;  %v6576_v16 = vmax.f32 %v14242_v33, 0.0  ;;  %v16250_v2 = vld [vmem:[#allocation5 + $0x188] ss:$16 sps:$4 sm:$0xff]   ;;  %v16258_v33 = vld [vmem:[#allocation5 + $0x1ac] ss:$16 sps:$4 sm:$0xff]  }
 0x69b   : > { %v14245_v60 = vadd.f32 %v6483_v37, %v19693_v53  ;;  %v6577_v34 = vmax.f32 %v14243_v4, 0.0  ;;  %v16298_v56 = vld [vmem:[#allocation8 + $0x1a0] ss:$16 sps:$4 sm:$0xff]   ;;  %9740 = vmatprep.subr.bf16.mxu1 %v16300_v43 }
 0x69c   : > { %v6578_v9 = vmax.f32 %v14244_v7, 0.0  ;;  %13420 = vmatmul.mubr.msk.bf16.gmra.mrb[20].mxu0 %vm1220_vm1, %v21228_v0  ;;  %9741 = vmatpush1.bf16.msra.mxu1 %v16298_v56 }
 0x69d   : > { %v6579_v8 = vmax.f32 %v14245_v60, 0.0  ;;  %7775 = vmatprep.mubr.bf16.mxu0 %v21167_v21  ;;  %8410 = vmatpush1.bf16.msra.mxu0 %v16241_v24 }
 0x69e   : > { %v19828_v51 = vpack.c.bf16 %v6578_v9, %v6576_v16  ;;  %8411 = vmatprep.subr.bf16.mxu0 %v16246_v47  ;;  %v16303_v16 = vld [vmem:[#allocation8 + $0x1c4] ss:$16 sps:$4 sm:$0xff]  }
 0x69f   : > { %v19830_v19 = vpack.c.bf16 %v6579_v8, %v6577_v34  ;;  %v6487_v25 = vpop.f32.mrb[236].mxu0  ;;  %v16301_v8 = vld [vmem:[#allocation8 + $0x1c0] ss:$16 sps:$4 sm:$0xff]   ;;  %9742 = vmatprep.subr.bf16.mxu1 %v16303_v16 }
 0x6a0   : > { %v14246_v18 = vadd.f32 %v6487_v25, %v19690_v54  ;;  %v6489_v0 = vpop.f32.mrb[237].mxu0  ;;  %v16262_v25 = vld [vmem:[#allocation5 + $0x1c8] ss:$16 sps:$4 sm:$0xff]   ;;  %9743 = vmatpush1.bf16.msra.mxu1 %v16301_v8 }
 0x6a1   : > { %v14247_v14 = vadd.f32 %v6489_v0, %v19693_v53  ;;  %v6491_v36 = vpop.f32.mrb[238].mxu0  ;;  %8328 = vmatprep.mubr.bf16.mxu1 %v19830_v19  ;;  %8412 = vmatpush1.bf16.msra.mxu0 %v16244_v5  ;;  %v16270_v0 = vld [vmem:[#allocation5 + $0x1ec] ss:$16 sps:$4 sm:$0xff]  }
 0x6a2   : > { %v14248_v55 = vadd.f32 %v6491_v36, %v19690_v54  ;;  %v6493_v1 = vpop.f32.mrb[239].mxu0  ;;  %8329 = vmatmul.mubr.bf16.gmra.mrb[40].mxu1 %v19828_v51  ;;  %8413 = vmatprep.subr.bf16.mxu0 %v16252_v27  ;;  %v6580_v24 = vmax.f32 %v14246_v18, 0.0 }
 0x6a3   : > { %v14249_v4 = vadd.f32 %v6493_v1, %v19693_v53  ;;  %v6581_v37 = vmax.f32 %v14247_v14, 0.0  ;;  %v16306_v14 = vld [vmem:[#allocation8 + $0x1e4] ss:$16 sps:$4 sm:$0xff]  }
 0x6a4   : > { %v6582_v7 = vmax.f32 %v14248_v55, 0.0  ;;  %13421 = vmatmul.mubr.msk.bf16.gmra.mrb[24].mxu0 %vm1220_vm1, %v17352_v17  ;;  %9744 = vmatprep.subr.bf16.mxu1 %v16306_v14 }
 0x6a5   : > { %v6583_v47 = vmax.f32 %v14249_v4, 0.0  ;;  %7785 = vmatprep.mubr.bf16.mxu0 %v21167_v21  ;;  %8414 = vmatpush1.bf16.msra.mxu0 %v16250_v2  ;;  %v16304_v2 = vld [vmem:[#allocation8 + $0x1e0] ss:$16 sps:$4 sm:$0xff]   ;;  %v16268_v4 = vld [vmem:[#allocation5 + $0x1e8] ss:$16 sps:$4 sm:$0xff]  }
 0x6a6   : > { %v19841_v60 = vpack.c.bf16 %v6582_v7, %v6580_v24  ;;  %8415 = vmatprep.subr.bf16.mxu0 %v16258_v33  ;;  %9745 = vmatpush1.bf16.msra.mxu1 %v16304_v2 }
 0x6a7   : > { %v19843_v9 = vpack.c.bf16 %v6583_v47, %v6581_v37  ;;  %v6497_v34 = vpop.f32.mrb[240].mxu0 }
 0x6a8   : > { %v14250_v5 = vadd.f32 %v6497_v34, %v19690_v54  ;;  %v6499_v17 = vpop.f32.mrb[241].mxu0  ;;  %v16309_v34 = vld [vmem:[#allocation8 + $0xc] ss:$16 sps:$4 sm:$0xff]  }
 0x6a9   : > { %v14251_v35 = vadd.f32 %v6499_v17, %v19693_v53  ;;  %v6501_v27 = vpop.f32.mrb[242].mxu0  ;;  %8338 = vmatprep.mubr.bf16.mxu1 %v19843_v9  ;;  %8416 = vmatpush1.bf16.msra.mxu0 %v16256_v45 }
 0x6aa   : > { %v14252_v6 = vadd.f32 %v6501_v27, %v19690_v54  ;;  %v6503_v18 = vpop.f32.mrb[243].mxu0  ;;  %8339 = vmatmul.mubr.bf16.gmra.mrb[44].mxu1 %v19841_v60  ;;  %8417 = vmatprep.subr.bf16.mxu0 %v16264_v44  ;;  %v6584_v55 = vmax.f32 %v14250_v5, 0.0 }
 0x6ab   : > { %v14253_v36 = vadd.f32 %v6503_v18, %v19693_v53  ;;  %v6585_v33 = vmax.f32 %v14251_v35, 0.0 }
 0x6ac   : > { %v6586_v1 = vmax.f32 %v14252_v6, 0.0  ;;  %13422 = vmatmul.mubr.msk.bf16.gmra.mrb[28].mxu0 %vm1220_vm1, %v17381_v32 }
 0x6ad   : > { %v6587_v43 = vmax.f32 %v14253_v36, 0.0  ;;  %7795 = vmatprep.mubr.bf16.mxu0 %v21167_v21  ;;  %8418 = vmatpush1.bf16.msra.mxu0 %v16262_v25 }
 0x6ae   : > { %v19854_v56 = vpack.c.bf16 %v6586_v1, %v6584_v55  ;;  %8419 = vmatprep.subr.bf16.mxu0 %v16270_v0 }
 0x6af   : > { %v19856_v24 = vpack.c.bf16 %v6587_v43, %v6585_v33  ;;  %v6507_v7 = vpop.f32.mrb[244].mxu0 }
 0x6b0   : > { %v14254_v37 = vadd.f32 %v6507_v7, %v19690_v54  ;;  %v6509_v47 = vpop.f32.mrb[245].mxu0 }
 0x6b1   : > { %v14255_v45 = vadd.f32 %v6509_v47, %v19693_v53  ;;  %v6511_v32 = vpop.f32.mrb[246].mxu0  ;;  %8348 = vmatprep.mubr.bf16.mxu1 %v19856_v24  ;;  %8420 = vmatpush1.bf16.msra.mxu0 %v16268_v4 }
 0x6b2   : > { %v14256_v44 = vadd.f32 %v6511_v32, %v19690_v54  ;;  %v6513_v16 = vpop.f32.mrb[247].mxu0  ;;  %8349 = vmatmul.mubr.bf16.gmra.mrb[48].mxu1 %v19854_v56  ;;  %v6588_v5 = vmax.f32 %v14254_v37, 0.0  ;;  %10100 = vmatprep.subr.bf16.mxu0 %v16309_v34 }
 0x6b3   : > { %v14257_v8 = vadd.f32 %v6513_v16, %v19693_v53  ;;  %v6589_v35 = vmax.f32 %v14255_v45, 0.0 }
 0x6b4   : > { %v6590_v17 = vmax.f32 %v14256_v44, 0.0  ;;  %13423 = vmatmul.mubr.msk.bf16.gmra.mrb[32].mxu0 %vm1220_vm1, %v17410_v48 }
 0x6b5   : > { %v6591_v27 = vmax.f32 %v14257_v8, 0.0  ;;  %7805 = vmatprep.mubr.bf16.mxu0 %v21167_v21 }
 0x6b6   : > { %v19867_v25 = vpack.c.bf16 %v6590_v17, %v6588_v5 }
 0x6b7   : > { %v19869_v6 = vpack.c.bf16 %v6591_v27, %v6589_v35  ;;  %v6517_v18 = vpop.f32.mrb[248].mxu0 }
 0x6b8   : > { %v14258_v0 = vadd.f32 %v6517_v18, %v19690_v54  ;;  %v6519_v14 = vpop.f32.mrb[249].mxu0 }
 0x6b9   : > { %v14259_v36 = vadd.f32 %v6519_v14, %v19693_v53  ;;  %v6521_v2 = vpop.f32.mrb[250].mxu0  ;;  %8358 = vmatprep.mubr.bf16.mxu1 %v19869_v6 }
 0x6ba   : > { %v14260_v48 = vadd.f32 %v6521_v2, %v19690_v54  ;;  %v6523_v55 = vpop.f32.mrb[251].mxu0  ;;  %8359 = vmatmul.mubr.bf16.gmra.mrb[52].mxu1 %v19867_v25  ;;  %v6592_v33 = vmax.f32 %v14258_v0, 0.0  ;;  %v16328_v2 = vld [vmem:[#allocation8 + $0xe8] ss:$16 sps:$4 sm:$0xff]  }
 0x6bb   : > { %v14261_v1 = vadd.f32 %v6523_v55, %v19693_v53  ;;  %v6593_v4 = vmax.f32 %v14259_v36, 0.0  ;;  %v16327_v36 = vld [vmem:[#allocation8 + $0xcc] ss:$16 sps:$4 sm:$0xff]   ;;  %v16337_v55 = vld [vmem:[#allocation8 + $0x128] ss:$16 sps:$4 sm:$0xff]  }
 0x6bc   : > { %v6594_v43 = vmax.f32 %v14260_v48, 0.0  ;;  %13424 = vmatmul.mubr.msk.bf16.gmra.mrb[36].mxu0 %vm1220_vm1, %v17439_v62  ;;  %v16336_v48 = vld [vmem:[#allocation8 + $0x10c] ss:$16 sps:$4 sm:$0xff]  }
 0x6bd   : > { %v6595_v7 = vmax.f32 %v14261_v1, 0.0  ;;  %7815 = vmatprep.mubr.bf16.mxu0 %v21167_v21  ;;  %v16345_v1 = vld [vmem:[#allocation8 + $0x14c] ss:$16 sps:$4 sm:$0xff]  }
 0x6be   : > { %v19880_v37 = vpack.c.bf16 %v6594_v43, %v6592_v33  ;;  %v16346_v33 = vld [vmem:[#allocation8 + $0x168] ss:$16 sps:$4 sm:$0xff]   ;;  %v16354_v43 = vld [vmem:[#allocation8 + $0x18c] ss:$16 sps:$4 sm:$0xff]  }
 0x6bf   : > { %v19882_v47 = vpack.c.bf16 %v6595_v7, %v6593_v4  ;;  %v6527_v45 = vpop.f32.mrb[252].mxu0  ;;  %v16357_v7 = vld [vmem:[#allocation8 + $0x1ac] ss:$16 sps:$4 sm:$0xff]  }
 0x6c0   : > { %v14262_v32 = vadd.f32 %v6527_v45, %v19690_v54  ;;  %v6529_v44 = vpop.f32.mrb[253].mxu0  ;;  %v16355_v45 = vld [vmem:[#allocation8 + $0x1a8] ss:$16 sps:$4 sm:$0xff]  }
 0x6c1   : > { %v14263_v16 = vadd.f32 %v6529_v44, %v19693_v53  ;;  %v6531_v34 = vpop.f32.mrb[254].mxu0  ;;  %8368 = vmatprep.mubr.bf16.mxu1 %v19882_v47 }
 0x6c2   : > { %v14264_v8 = vadd.f32 %v6531_v34, %v19690_v54  ;;  %v6533_v62 = vpop.f32.mrb[255].mxu0  ;;  %8369 = vmatmul.mubr.bf16.gmra.mrb[56].mxu1 %v19880_v37  ;;  %v6596_v17 = vmax.f32 %v14262_v32, 0.0  ;;  %v16315_v54 = vld [vmem:[#allocation8 + $0x4c] ss:$16 sps:$4 sm:$0xff]  }
 0x6c3   : > { %v14265_v5 = vadd.f32 %v6533_v62, %v19693_v53  ;;  %v6597_v27 = vmax.f32 %v14263_v16, 0.0  ;;  %v16313_v53 = vld [vmem:[#allocation8 + $0x48] ss:$16 sps:$4 sm:$0xff]   ;;  %v16363_v16 = vld [vmem:[#allocation8 + $0x1cc] ss:$16 sps:$4 sm:$0xff]  }
 0x6c4   : > { %v6598_v35 = vmax.f32 %v14264_v8, 0.0  ;;  %13425 = vmatmul.mubr.msk.bf16.gmra.mrb[40].mxu0 %vm1220_vm1, %v17480_v23  ;;  %v16333_v23 = vld [vmem:[#allocation8 + $0x204] ss:$16 sps:$4 sm:$0xff]  }
 0x6c5   : > { %v6599_v18 = vmax.f32 %v14265_v5, 0.0  ;;  %7825 = vmatprep.mubr.bf16.mxu0 %v21167_v21  ;;  %9907 = vmatprep.subr.bf16.mxu1 %v16333_v23 }
 0x6c6   : > { %v19893_v0 = vpack.c.bf16 %v6598_v35, %v6596_v17 }
 0x6c7   : > { %v19895_v14 = vpack.c.bf16 %v6599_v18, %v6597_v27 }
 0x6c9   : > { %8378 = vmatprep.mubr.bf16.mxu1 %v19895_v14 }
 0x6ca   : > { %8379 = vmatmul.mubr.bf16.gmra.mrb[60].mxu1 %v19893_v0 }
 0x6cc   : > { %13426 = vmatmul.mubr.msk.bf16.gmra.mrb[44].mxu0 %vm1220_vm1, %v17521_v50  ;;  %v16307_v50 = vld [vmem:[#allocation8 + $0x8] ss:$16 sps:$4 sm:$0xff]  }
 0x6cd   : > { %7835 = vmatprep.mubr.bf16.mxu0 %v21167_v21 }
 0x6d4   : > { %13427 = vmatmul.mubr.msk.bf16.gmra.mrb[48].mxu0 %vm1220_vm1, %v17567_v12  ;;  %v16312_v12 = vld [vmem:[#allocation8 + $0x2c] ss:$16 sps:$4 sm:$0xff]  }
 0x6d5   : > { %7845 = vmatprep.mubr.bf16.mxu0 %v21167_v21 }
 0x6dc   : > { %13428 = vmatmul.mubr.msk.bf16.gmra.mrb[52].mxu0 %vm1220_vm1, %v17601_v39  ;;  %v16310_v39 = vld [vmem:[#allocation8 + $0x28] ss:$16 sps:$4 sm:$0xff]  }
 0x6dd   : > { %7855 = vmatprep.mubr.bf16.mxu0 %v21167_v21 }
 0x6e4   : > { %13429 = vmatmul.mubr.msk.bf16.gmra.mrb[56].mxu0 %vm1220_vm1, %v17631_v3  ;;  %v16318_v3 = vld [vmem:[#allocation8 + $0x6c] ss:$16 sps:$4 sm:$0xff]  }
 0x6e5   : > { %7865 = vmatprep.mubr.bf16.mxu0 %v21167_v21  ;;  %v16321_v21 = vld [vmem:[#allocation8 + $0x8c] ss:$16 sps:$4 sm:$0xff]  }
 0x6ec   : > { %13430 = vmatmul.mubr.msk.bf16.gmra.mrb[60].mxu0 %vm1220_vm1, %v17660_v30  ;;  %v16316_v30 = vld [vmem:[#allocation8 + $0x68] ss:$16 sps:$4 sm:$0xff]  }
 0x6ed   : > { %8421 = vmatprep.mubr.bf16.mxu0 %v19704_v49  ;;  %v16324_v49 = vld [vmem:[#allocation8 + $0xac] ss:$16 sps:$4 sm:$0xff]  }
 0x6f4   : > { %8422 = vmatmul.mubr.bf16.vlgmr.msra.gmra.mrb[0].mxu0 %v19702_v15  ;;  %v16319_v15 = vld [vmem:[#allocation8 + $0x88] ss:$16 sps:$4 sm:$0xff]  }
 0x6f5   : > { %8431 = vmatprep.mubr.bf16.mxu0 %v19716_v41  ;;  %10101 = vmatpush1.bf16.msra.mxu0 %v16307_v50  ;;  %v16322_v41 = vld [vmem:[#allocation8 + $0xa8] ss:$16 sps:$4 sm:$0xff]  }
 0x6f6   : > { %10102 = vmatprep.subr.bf16.mxu0 %v16312_v12 }
 0x6f9   : > { %10103 = vmatpush1.bf16.msra.mxu0 %v16310_v39 }
 0x6fa   : > { %10104 = vmatprep.subr.bf16.mxu0 %v16315_v54  ;;  %v16331_v54 = vld [vmem:[#allocation8 + $0x200] ss:$16 sps:$4 sm:$0xff]  }
 0x6fc   : > { %8432 = vmatmul.mubr.bf16.gmra.mrb[4].mxu0 %v19714_v10  ;;  %v16325_v10 = vld [vmem:[#allocation8 + $0xc8] ss:$16 sps:$4 sm:$0xff]  }
 0x6fd   : > { %8441 = vmatprep.mubr.bf16.mxu0 %v19728_v40  ;;  %10105 = vmatpush1.bf16.msra.mxu0 %v16313_v53  ;;  %v16330_v40 = vld [vmem:[#allocation8 + $0xec] ss:$16 sps:$4 sm:$0xff]   ;;  %v16364_v53 = vld [vmem:[#allocation8 + $0x1e8] ss:$16 sps:$4 sm:$0xff]  }
 0x6fe   : > { %10106 = vmatprep.subr.bf16.mxu0 %v16318_v3 }
 0x701   : > { %10107 = vmatpush1.bf16.msra.mxu0 %v16316_v30 }
 0x702   : > { %10108 = vmatprep.subr.bf16.mxu0 %v16321_v21  ;;  %v16342_v21 = vld [vmem:[#allocation8 + $0x224] ss:$16 sps:$4 sm:$0xff]  }
 0x704   : > { %8442 = vmatmul.mubr.bf16.gmra.mrb[8].mxu0 %v19726_v38  ;;  %v16334_v38 = vld [vmem:[#allocation8 + $0x108] ss:$16 sps:$4 sm:$0xff]  }
 0x705   : > { %8451 = vmatprep.mubr.bf16.mxu0 %v19740_v42  ;;  %10109 = vmatpush1.bf16.msra.mxu0 %v16319_v15  ;;  %v16339_v42 = vld [vmem:[#allocation8 + $0x12c] ss:$16 sps:$4 sm:$0xff]  }
 0x706   : > { %10110 = vmatprep.subr.bf16.mxu0 %v16324_v49  ;;  %v16396_v15 = vld [vmem:[#allocation8 + $0x20c] ss:$16 sps:$4 sm:$0xff]  }
 0x709   : > { %10111 = vmatpush1.bf16.msra.mxu0 %v16322_v41 }
 0x70a   : > { %10112 = vmatprep.subr.bf16.mxu0 %v16327_v36 }
 0x70c   : > { %8452 = vmatmul.mubr.bf16.gmra.mrb[12].mxu0 %v19738_v63  ;;  %v16343_v63 = vld [vmem:[#allocation8 + $0x148] ss:$16 sps:$4 sm:$0xff]  }
 0x70d   : > { %8461 = vmatprep.mubr.bf16.mxu0 %v19752_v11  ;;  %10113 = vmatpush1.bf16.msra.mxu0 %v16325_v10  ;;  %v16348_v11 = vld [vmem:[#allocation8 + $0x16c] ss:$16 sps:$4 sm:$0xff]   ;;  %v16340_v10 = vld [vmem:[#allocation8 + $0x220] ss:$16 sps:$4 sm:$0xff]  }
 0x70e   : > { %10114 = vmatprep.subr.bf16.mxu0 %v16330_v40 }
 0x711   : > { %10115 = vmatpush1.bf16.msra.mxu0 %v16328_v2 }
 0x712   : > { %10116 = vmatprep.subr.bf16.mxu0 %v16336_v48  ;;  %v16351_v48 = vld [vmem:[#allocation8 + $0x244] ss:$16 sps:$4 sm:$0xff]  }
 0x714   : > { %8462 = vmatmul.mubr.bf16.gmra.mrb[16].mxu0 %v19750_v29  ;;  %v19929_v29 = vld [vmem:[%s20991_s11] sm:$0xf] }
 0x715   : > { %8471 = vmatprep.mubr.bf16.mxu0 %v19765_v58  ;;  %10117 = vmatpush1.bf16.msra.mxu0 %v16334_v38  ;;  %v16352_v58 = vld [vmem:[#allocation8 + $0x188] ss:$16 sps:$4 sm:$0xff]   ;;  %v19933_v4 = vrot.slane %v19929_v29, %v21254_v52 }
 0x716   : > { %10118 = vmatprep.subr.bf16.mxu0 %v16339_v42 }
 0x719   : > { %10119 = vmatpush1.bf16.msra.mxu0 %v16337_v55 }
 0x71a   : > { %10120 = vmatprep.subr.bf16.mxu0 %v16345_v1 }
 0x71c   : > { %8472 = vmatmul.mubr.bf16.gmra.mrb[20].mxu0 %v19763_v61  ;;  %v19937_v61 = vrot.slane %v19929_v29, %v21255_v26 }
 0x71d   : > { %8481 = vmatprep.mubr.bf16.mxu0 %v19778_v59  ;;  %10121 = vmatpush1.bf16.msra.mxu0 %v16343_v63 }
 0x71e   : > { %10122 = vmatprep.subr.bf16.mxu0 %v16348_v11  ;;  %v16349_v11 = vld [vmem:[#allocation8 + $0x240] ss:$16 sps:$4 sm:$0xff]  }
 0x721   : > { %10123 = vmatpush1.bf16.msra.mxu0 %v16346_v33 }
 0x722   : > { %10124 = vmatprep.subr.bf16.mxu0 %v16354_v43 }
 0x724   : > { %8482 = vmatmul.mubr.bf16.gmra.mrb[24].mxu0 %v19776_v28  ;;  %v16361_v28 = vld [vmem:[#allocation8 + $0x1c8] ss:$16 sps:$4 sm:$0xff]  }
 0x725   : > { %v8230_v59 = vpop.f32.mrb[0].mxu1  ;;  %8491 = vmatprep.mubr.bf16.mxu0 %v19791_v46  ;;  %10125 = vmatpush1.bf16.msra.mxu0 %v16352_v58  ;;  %v16366_v46 = vld [vmem:[#allocation8 + $0x1ec] ss:$16 sps:$4 sm:$0xff]   ;;  %v16360_v58 = vld [vmem:[#allocation8 + $0x264] ss:$16 sps:$4 sm:$0xff]  }
 0x726   : > { %v8604_v32 = vadd.f32 %v19933_v4, %v8230_v59  ;;  %v8232_v44 = vpop.f32.mrb[1].mxu1  ;;  %10126 = vmatprep.subr.bf16.mxu0 %v16357_v7 }
 0x727   : > { %v8605_v34 = vadd.f32 %v19937_v61, %v8232_v44  ;;  %v8234_v8 = vpop.f32.mrb[2].mxu1 }
 0x728   : > { %v8608_v62 = vadd.f32 %v19933_v4, %v8234_v8  ;;  %v8236_v5 = vpop.f32.mrb[3].mxu1  ;;  %v8732_v35 = vmax.f32 %v8604_v32, 0.0 }
 0x729   : > { %v8609_v17 = vadd.f32 %v19937_v61, %v8236_v5  ;;  %10127 = vmatpush1.bf16.msra.mxu0 %v16355_v45  ;;  %v8733_v18 = vmax.f32 %v8605_v34, 0.0  ;;  %v16369_v34 = vld [vmem:[#allocation8 + $0x284] ss:$16 sps:$4 sm:$0xff]  }
 0x72a   : > { %v8736_v27 = vmax.f32 %v8608_v62, 0.0  ;;  %10128 = vmatprep.subr.bf16.mxu0 %v16363_v16 }
 0x72b   : > { %v8737_v23 = vmax.f32 %v8609_v17, 0.0 }
 0x72c   : > { %v19945_v50 = vpack.c.bf16 %v8736_v27, %v8732_v35  ;;  %8492 = vmatmul.mubr.bf16.gmra.mrb[28].mxu0 %v19789_v13  ;;  %v16367_v35 = vld [vmem:[#allocation8 + $0x280] ss:$16 sps:$4 sm:$0xff]  }
 0x72d   : > { %v19948_v12 = vpack.c.bf16 %v8737_v23, %v8733_v18  ;;  %v8240_v39 = vpop.f32.mrb[4].mxu1  ;;  %8501 = vmatprep.mubr.bf16.mxu0 %v19804_v31  ;;  %10129 = vmatpush1.bf16.msra.mxu0 %v16361_v28  ;;  %v16372_v18 = vld [vmem:[#allocation8 + $0x2a4] ss:$16 sps:$4 sm:$0xff]  }
 0x72e   : > { %v8612_v3 = vadd.f32 %v19933_v4, %v8240_v39  ;;  %v8242_v30 = vpop.f32.mrb[5].mxu1  ;;  %10130 = vmatprep.subr.bf16.mxu0 %v16366_v46 }
 0x72f   : > { %v8613_v49 = vadd.f32 %v19937_v61, %v8242_v30  ;;  %v8244_v41 = vpop.f32.mrb[6].mxu1  ;;  %9746 = vmatprep.mubr.bf16.mxu1 %v19948_v12 }
 0x730   : > { %v8616_v13 = vadd.f32 %v19933_v4, %v8244_v41  ;;  %v8246_v36 = vpop.f32.mrb[7].mxu1  ;;  %9747 = vmatmul.mubr.bf16.vlgmr.msra.gmra.mrb[64].mxu1 %v19945_v50  ;;  %v8740_v40 = vmax.f32 %v8612_v3, 0.0 }
 0x731   : > { %v8617_v31 = vadd.f32 %v19937_v61, %v8246_v36  ;;  %9908 = vmatpush1.bf16.msra.mxu1 %v16331_v54  ;;  %10131 = vmatpush1.bf16.msra.mxu0 %v16364_v53  ;;  %v8741_v38 = vmax.f32 %v8613_v49, 0.0 }
 0x732   : > { %v8744_v2 = vmax.f32 %v8616_v13, 0.0  ;;  %9909 = vmatprep.subr.bf16.mxu1 %v16342_v21  ;;  %10293 = vmatprep.subr.bf16.mxu0 %v16396_v15  ;;  %v16375_v21 = vld [vmem:[#allocation8 + $0x2c4] ss:$16 sps:$4 sm:$0xff]  }
 0x733   : > { %v8745_v42 = vmax.f32 %v8617_v31, 0.0  ;;  %v16373_v31 = vld [vmem:[#allocation8 + $0x2c0] ss:$16 sps:$4 sm:$0xff]  }
 0x734   : > { %v19957_v55 = vpack.c.bf16 %v8744_v2, %v8740_v40  ;;  %8502 = vmatmul.mubr.bf16.gmra.mrb[32].mxu0 %v19802_v22  ;;  %v16378_v2 = vld [vmem:[#allocation8 + $0x2e4] ss:$16 sps:$4 sm:$0xff]  }
 0x735   : > { %v19960_v1 = vpack.c.bf16 %v8745_v42, %v8741_v38  ;;  %v8250_v63 = vpop.f32.mrb[8].mxu1  ;;  %8511 = vmatprep.mubr.bf16.mxu0 %v19817_v20  ;;  %9910 = vmatpush1.bf16.msra.mxu1 %v16340_v10  ;;  %v16358_v20 = vld [vmem:[#allocation8 + $0x260] ss:$16 sps:$4 sm:$0xff]  }
 0x736   : > { %v8620_v33 = vadd.f32 %v19933_v4, %v8250_v63  ;;  %v8252_v43 = vpop.f32.mrb[9].mxu1  ;;  %9911 = vmatprep.subr.bf16.mxu1 %v16351_v48 }
 0x737   : > { %v8621_v7 = vadd.f32 %v19937_v61, %v8252_v43  ;;  %v8254_v59 = vpop.f32.mrb[10].mxu1  ;;  %9756 = vmatprep.mubr.bf16.mxu1 %v19960_v1  ;;  %v16381_v43 = vld [vmem:[#allocation8 + $0x304] ss:$16 sps:$4 sm:$0xff]  }
 0x738   : > { %v8624_v45 = vadd.f32 %v19933_v4, %v8254_v59  ;;  %v8256_v22 = vpop.f32.mrb[11].mxu1  ;;  %9757 = vmatmul.mubr.bf16.gmra.mrb[68].mxu1 %v19957_v55  ;;  %v8748_v44 = vmax.f32 %v8620_v33, 0.0 }
 0x739   : > { %v8625_v32 = vadd.f32 %v19937_v61, %v8256_v22  ;;  %9912 = vmatpush1.bf16.msra.mxu1 %v16349_v11  ;;  %v8749_v8 = vmax.f32 %v8621_v7, 0.0 }
 0x73a   : > { %v8752_v16 = vmax.f32 %v8624_v45, 0.0  ;;  %9913 = vmatprep.subr.bf16.mxu1 %v16360_v58 }
 0x73b   : > { %v8753_v62 = vmax.f32 %v8625_v32, 0.0  ;;  %v16379_v32 = vld [vmem:[#allocation8 + $0x300] ss:$16 sps:$4 sm:$0xff]  }
 0x73c   : > { %v19969_v5 = vpack.c.bf16 %v8752_v16, %v8748_v44  ;;  %8512 = vmatmul.mubr.bf16.gmra.mrb[36].mxu0 %v19815_v57  ;;  %v16384_v16 = vld [vmem:[#allocation8 + $0x324] ss:$16 sps:$4 sm:$0xff]  }
 0x73d   : > { %v19972_v17 = vpack.c.bf16 %v8753_v62, %v8749_v8  ;;  %v8260_v28 = vpop.f32.mrb[12].mxu1  ;;  %8521 = vmatprep.mubr.bf16.mxu0 %v19830_v19  ;;  %9914 = vmatpush1.bf16.msra.mxu1 %v16358_v20  ;;  %v16370_v19 = vld [vmem:[#allocation8 + $0x2a0] ss:$16 sps:$4 sm:$0xff]  }
 0x73e   : > { %v8628_v27 = vadd.f32 %v19933_v4, %v8260_v28  ;;  %v8262_v46 = vpop.f32.mrb[13].mxu1  ;;  %9915 = vmatprep.subr.bf16.mxu1 %v16369_v34 }
 0x73f   : > { %v8629_v23 = vadd.f32 %v19937_v61, %v8262_v46  ;;  %v8264_v39 = vpop.f32.mrb[14].mxu1  ;;  %9766 = vmatprep.mubr.bf16.mxu1 %v19972_v17  ;;  %v16387_v46 = vld [vmem:[#allocation8 + $0x344] ss:$16 sps:$4 sm:$0xff]  }
 0x740   : > { %v8632_v54 = vadd.f32 %v19933_v4, %v8264_v39  ;;  %v8266_v57 = vpop.f32.mrb[15].mxu1  ;;  %9767 = vmatmul.mubr.bf16.gmra.mrb[72].mxu1 %v19969_v5  ;;  %v8756_v3 = vmax.f32 %v8628_v27, 0.0 }
 0x741   : > { %v8633_v53 = vadd.f32 %v19937_v61, %v8266_v57  ;;  %9916 = vmatpush1.bf16.msra.mxu1 %v16367_v35  ;;  %v8757_v15 = vmax.f32 %v8629_v23, 0.0 }
 0x742   : > { %v8760_v30 = vmax.f32 %v8632_v54, 0.0  ;;  %9917 = vmatprep.subr.bf16.mxu1 %v16372_v18 }
 0x743   : > { %v8761_v49 = vmax.f32 %v8633_v53, 0.0  ;;  %v16385_v53 = vld [vmem:[#allocation8 + $0x340] ss:$16 sps:$4 sm:$0xff]  }
 0x744   : > { %v19981_v41 = vpack.c.bf16 %v8760_v30, %v8756_v3  ;;  %8522 = vmatmul.mubr.bf16.gmra.mrb[40].mxu0 %v19828_v51  ;;  %v16390_v30 = vld [vmem:[#allocation8 + $0x364] ss:$16 sps:$4 sm:$0xff]  }
 0x745   : > { %v19984_v13 = vpack.c.bf16 %v8761_v49, %v8757_v15  ;;  %v8270_v36 = vpop.f32.mrb[16].mxu1  ;;  %8531 = vmatprep.mubr.bf16.mxu0 %v19843_v9  ;;  %9918 = vmatpush1.bf16.msra.mxu1 %v16370_v19  ;;  %v16376_v9 = vld [vmem:[#allocation8 + $0x2e0] ss:$16 sps:$4 sm:$0xff]  }
 0x746   : > { %v8636_v10 = vadd.f32 %v19933_v4, %v8270_v36  ;;  %v8272_v40 = vpop.f32.mrb[17].mxu1  ;;  %9919 = vmatprep.subr.bf16.mxu1 %v16375_v21 }
 0x747   : > { %v8637_v48 = vadd.f32 %v19937_v61, %v8272_v40  ;;  %v8274_v38 = vpop.f32.mrb[18].mxu1  ;;  %9776 = vmatprep.mubr.bf16.mxu1 %v19984_v13  ;;  %v16393_v40 = vld [vmem:[#allocation8 + $0x384] ss:$16 sps:$4 sm:$0xff]  }
 0x748   : > { %v8640_v42 = vadd.f32 %v19933_v4, %v8274_v38  ;;  %v8276_v51 = vpop.f32.mrb[19].mxu1  ;;  %9777 = vmatmul.mubr.bf16.gmra.mrb[76].mxu1 %v19981_v41  ;;  %v8764_v11 = vmax.f32 %v8636_v10, 0.0 }
 0x749   : > { %v8641_v63 = vadd.f32 %v19937_v61, %v8276_v51  ;;  %9920 = vmatpush1.bf16.msra.mxu1 %v16373_v31  ;;  %v8765_v58 = vmax.f32 %v8637_v48, 0.0 }
 0x74a   : > { %v8768_v33 = vmax.f32 %v8640_v42, 0.0  ;;  %9921 = vmatprep.subr.bf16.mxu1 %v16378_v2 }
 0x74b   : > { %v8769_v7 = vmax.f32 %v8641_v63, 0.0  ;;  %v16391_v63 = vld [vmem:[#allocation8 + $0x380] ss:$16 sps:$4 sm:$0xff]  }
 0x74c   : > { %v19993_v59 = vpack.c.bf16 %v8768_v33, %v8764_v11  ;;  %8532 = vmatmul.mubr.bf16.gmra.mrb[44].mxu0 %v19841_v60  ;;  %v16402_v33 = vld [vmem:[#allocation8 + $0x3a4] ss:$16 sps:$4 sm:$0xff]  }
 0x74d   : > { %v19996_v45 = vpack.c.bf16 %v8769_v7, %v8765_v58  ;;  %v8280_v22 = vpop.f32.mrb[20].mxu1  ;;  %8541 = vmatprep.mubr.bf16.mxu0 %v19856_v24  ;;  %9922 = vmatpush1.bf16.msra.mxu1 %v16376_v9  ;;  %v16382_v24 = vld [vmem:[#allocation8 + $0x320] ss:$16 sps:$4 sm:$0xff]  }
 0x74e   : > { %v8644_v20 = vadd.f32 %v19933_v4, %v8280_v22  ;;  %v8282_v44 = vpop.f32.mrb[21].mxu1  ;;  %9923 = vmatprep.subr.bf16.mxu1 %v16381_v43 }
 0x74f   : > { %v8645_v34 = vadd.f32 %v19937_v61, %v8282_v44  ;;  %v8284_v8 = vpop.f32.mrb[22].mxu1  ;;  %9786 = vmatprep.mubr.bf16.mxu1 %v19996_v45  ;;  %v16411_v44 = vld [vmem:[#allocation8 + $0x3c4] ss:$16 sps:$4 sm:$0xff]  }
 0x750   : > { %v8648_v62 = vadd.f32 %v19933_v4, %v8284_v8  ;;  %v8286_v60 = vpop.f32.mrb[23].mxu1  ;;  %9787 = vmatmul.mubr.bf16.gmra.mrb[80].mxu1 %v19993_v59  ;;  %v8772_v35 = vmax.f32 %v8644_v20, 0.0 }
 0x751   : > { %v8649_v28 = vadd.f32 %v19937_v61, %v8286_v60  ;;  %9924 = vmatpush1.bf16.msra.mxu1 %v16379_v32  ;;  %v8773_v18 = vmax.f32 %v8645_v34, 0.0 }
 0x752   : > { %v8776_v27 = vmax.f32 %v8648_v62, 0.0  ;;  %9925 = vmatprep.subr.bf16.mxu1 %v16384_v16 }
 0x753   : > { %v8777_v23 = vmax.f32 %v8649_v28, 0.0  ;;  %v16409_v28 = vld [vmem:[#allocation8 + $0x3c0] ss:$16 sps:$4 sm:$0xff]  }
 0x754   : > { %v20005_v39 = vpack.c.bf16 %v8776_v27, %v8772_v35  ;;  %8542 = vmatmul.mubr.bf16.gmra.mrb[48].mxu0 %v19854_v56  ;;  %v16420_v27 = vld [vmem:[#allocation8 + $0x3e4] ss:$16 sps:$4 sm:$0xff]  }
 0x755   : > { %v20008_v54 = vpack.c.bf16 %v8777_v23, %v8773_v18  ;;  %v8290_v57 = vpop.f32.mrb[24].mxu1  ;;  %8551 = vmatprep.mubr.bf16.mxu0 %v19869_v6  ;;  %9926 = vmatpush1.bf16.msra.mxu1 %v16382_v24  ;;  %v16388_v6 = vld [vmem:[#allocation8 + $0x360] ss:$16 sps:$4 sm:$0xff]  }
 0x756   : > { %v8652_v19 = vadd.f32 %v19933_v4, %v8290_v57  ;;  %v8292_v3 = vpop.f32.mrb[25].mxu1  ;;  %9927 = vmatprep.subr.bf16.mxu1 %v16387_v46 }
 0x757   : > { %v8653_v21 = vadd.f32 %v19937_v61, %v8292_v3  ;;  %v8294_v15 = vpop.f32.mrb[26].mxu1  ;;  %9796 = vmatprep.mubr.bf16.mxu1 %v20008_v54 }
 0x758   : > { %v8656_v49 = vadd.f32 %v19933_v4, %v8294_v15  ;;  %v8296_v56 = vpop.f32.mrb[27].mxu1  ;;  %9797 = vmatmul.mubr.bf16.gmra.mrb[84].mxu1 %v20005_v39  ;;  %v8780_v31 = vmax.f32 %v8652_v19, 0.0 }
 0x759   : > { %v8657_v36 = vadd.f32 %v19937_v61, %v8296_v56  ;;  %9928 = vmatpush1.bf16.msra.mxu1 %v16385_v53  ;;  %v8781_v2 = vmax.f32 %v8653_v21, 0.0 }
 0x75a   : > { %v8784_v10 = vmax.f32 %v8656_v49, 0.0  ;;  %9929 = vmatprep.subr.bf16.mxu1 %v16390_v30 }
 0x75b   : > { %v8785_v48 = vmax.f32 %v8657_v36, 0.0 }
 0x75c   : > { %v20017_v38 = vpack.c.bf16 %v8784_v10, %v8780_v31  ;;  %8552 = vmatmul.mubr.bf16.gmra.mrb[52].mxu0 %v19867_v25 }
 0x75d   : > { %v20020_v42 = vpack.c.bf16 %v8785_v48, %v8781_v2  ;;  %v8300_v51 = vpop.f32.mrb[28].mxu1  ;;  %8561 = vmatprep.mubr.bf16.mxu0 %v19882_v47  ;;  %9930 = vmatpush1.bf16.msra.mxu1 %v16388_v6  ;;  %v16400_v47 = vld [vmem:[#allocation8 + $0x3a0] ss:$16 sps:$4 sm:$0xff]   ;;  %v16394_v2 = vld [vmem:[#allocation8 + $0x208] ss:$16 sps:$4 sm:$0xff]  }
 0x75e   : > { %v8660_v9 = vadd.f32 %v19933_v4, %v8300_v51  ;;  %v8302_v11 = vpop.f32.mrb[29].mxu1  ;;  %9931 = vmatprep.subr.bf16.mxu1 %v16393_v40 }
 0x75f   : > { %v8661_v43 = vadd.f32 %v19937_v61, %v8302_v11  ;;  %v8304_v58 = vpop.f32.mrb[30].mxu1  ;;  %9806 = vmatprep.mubr.bf16.mxu1 %v20020_v42 }
 0x760   : > { %v8664_v7 = vadd.f32 %v19933_v4, %v8304_v58  ;;  %v8306_v25 = vpop.f32.mrb[31].mxu1  ;;  %9807 = vmatmul.mubr.bf16.gmra.mrb[88].mxu1 %v20017_v38  ;;  %v8788_v32 = vmax.f32 %v8660_v9, 0.0  ;;  %v16397_v58 = vld [vmem:[#allocation8 + $0x228] ss:$16 sps:$4 sm:$0xff]  }
 0x761   : > { %v8665_v22 = vadd.f32 %v19937_v61, %v8306_v25  ;;  %9932 = vmatpush1.bf16.msra.mxu1 %v16391_v63  ;;  %v8789_v16 = vmax.f32 %v8661_v43, 0.0 }
 0x762   : > { %v8792_v20 = vmax.f32 %v8664_v7, 0.0  ;;  %9933 = vmatprep.subr.bf16.mxu1 %v16402_v33 }
 0x763   : > { %v8793_v34 = vmax.f32 %v8665_v22, 0.0  ;;  %v16405_v22 = vld [vmem:[#allocation8 + $0x24c] ss:$16 sps:$4 sm:$0xff]  }
 0x764   : > { %v20029_v8 = vpack.c.bf16 %v8792_v20, %v8788_v32  ;;  %8562 = vmatmul.mubr.bf16.gmra.mrb[56].mxu0 %v19880_v37 }
 0x765   : > { %v20032_v62 = vpack.c.bf16 %v8793_v34, %v8789_v16  ;;  %v8310_v60 = vpop.f32.mrb[32].mxu1  ;;  %8571 = vmatprep.mubr.bf16.mxu0 %v19895_v14  ;;  %9934 = vmatpush1.bf16.msra.mxu1 %v16400_v47  ;;  %v16418_v14 = vld [vmem:[#allocation8 + $0x3e0] ss:$16 sps:$4 sm:$0xff]  }
 0x766   : > { %v8668_v24 = vadd.f32 %v19933_v4, %v8310_v60  ;;  %v8312_v35 = vpop.f32.mrb[33].mxu1  ;;  %9935 = vmatprep.subr.bf16.mxu1 %v16411_v44  ;;  %v16408_v60 = vld [vmem:[#allocation8 + $0x26c] ss:$16 sps:$4 sm:$0xff]  }
 0x767   : > { %v8669_v46 = vadd.f32 %v19937_v61, %v8312_v35  ;;  %v8314_v18 = vpop.f32.mrb[34].mxu1  ;;  %9816 = vmatprep.mubr.bf16.mxu1 %v20032_v62 }
 0x768   : > { %v8672_v23 = vadd.f32 %v19933_v4, %v8314_v18  ;;  %v8316_v37 = vpop.f32.mrb[35].mxu1  ;;  %9817 = vmatmul.mubr.bf16.gmra.mrb[92].mxu1 %v20029_v8  ;;  %v8796_v53 = vmax.f32 %v8668_v24, 0.0  ;;  %v16406_v18 = vld [vmem:[#allocation8 + $0x268] ss:$16 sps:$4 sm:$0xff]  }
 0x769   : > { %v8673_v57 = vadd.f32 %v19937_v61, %v8316_v37  ;;  %9936 = vmatpush1.bf16.msra.mxu1 %v16409_v28  ;;  %v8797_v3 = vmax.f32 %v8669_v46, 0.0 }
 0x76a   : > { %v8800_v19 = vmax.f32 %v8672_v23, 0.0  ;;  %9937 = vmatprep.subr.bf16.mxu1 %v16420_v27 }
 0x76b   : > { %v8801_v30 = vmax.f32 %v8673_v57, 0.0  ;;  %v16414_v57 = vld [vmem:[#allocation8 + $0x28c] ss:$16 sps:$4 sm:$0xff]  }
 0x76c   : > { %v20041_v21 = vpack.c.bf16 %v8800_v19, %v8796_v53  ;;  %8572 = vmatmul.mubr.bf16.gmra.mrb[60].mxu0 %v19893_v0 }
 0x76d   : > { %v20044_v15 = vpack.c.bf16 %v8801_v30, %v8797_v3  ;;  %v8320_v49 = vpop.f32.mrb[36].mxu1  ;;  %10132 = vmatprep.mubr.bf16.mxu0 %v19948_v12  ;;  %9938 = vmatpush1.bf16.msra.mxu1 %v16418_v14  ;;  %v16399_v12 = vld [vmem:[#allocation8 + $0x22c] ss:$16 sps:$4 sm:$0xff]  }
 0x76e   : > { %v8676_v56 = vadd.f32 %v19933_v4, %v8320_v49  ;;  %v8322_v36 = vpop.f32.mrb[37].mxu1 }
 0x76f   : > { %v8677_v6 = vadd.f32 %v19937_v61, %v8322_v36  ;;  %v8324_v31 = vpop.f32.mrb[38].mxu1  ;;  %9826 = vmatprep.mubr.bf16.mxu1 %v20044_v15 }
 0x770   : > { %v8680_v10 = vadd.f32 %v19933_v4, %v8324_v31  ;;  %v8326_v40 = vpop.f32.mrb[39].mxu1  ;;  %9827 = vmatmul.mubr.bf16.gmra.mrb[96].mxu1 %v20041_v21  ;;  %v8804_v48 = vmax.f32 %v8676_v56, 0.0  ;;  %v16417_v56 = vld [vmem:[#allocation8 + $0x2ac] ss:$16 sps:$4 sm:$0xff]  }
 0x771   : > { %v8681_v0 = vadd.f32 %v19937_v61, %v8326_v40  ;;  %v8805_v63 = vmax.f32 %v8677_v6, 0.0 }
 0x772   : > { %v8808_v51 = vmax.f32 %v8680_v10, 0.0 }
 0x773   : > { %v8809_v9 = vmax.f32 %v8681_v0, 0.0  ;;  %v16415_v0 = vld [vmem:[#allocation8 + $0x2a8] ss:$16 sps:$4 sm:$0xff]  }
 0x774   : > { %v20053_v11 = vpack.c.bf16 %v8808_v51, %v8804_v48  ;;  %10133 = vmatmul.mubr.bf16.vlgmr.msra.gmra.mrb[64].mxu0 %v19945_v50  ;;  %v16423_v51 = vld [vmem:[#allocation8 + $0x2cc] ss:$16 sps:$4 sm:$0xff]  }
 0x775   : > { %v20056_v33 = vpack.c.bf16 %v8809_v9, %v8805_v63  ;;  %v8330_v43 = vpop.f32.mrb[40].mxu1  ;;  %10142 = vmatprep.mubr.bf16.mxu0 %v19960_v1  ;;  %10294 = vmatpush1.bf16.msra.mxu0 %v16394_v2  ;;  %v16403_v1 = vld [vmem:[#allocation8 + $0x248] ss:$16 sps:$4 sm:$0xff]  }
 0x776   : > { %v8684_v7 = vadd.f32 %v19933_v4, %v8330_v43  ;;  %v8332_v25 = vpop.f32.mrb[41].mxu1  ;;  %10295 = vmatprep.subr.bf16.mxu0 %v16399_v12 }
 0x777   : > { %v8685_v47 = vadd.f32 %v19937_v61, %v8332_v25  ;;  %v8334_v32 = vpop.f32.mrb[42].mxu1  ;;  %9836 = vmatprep.mubr.bf16.mxu1 %v20056_v33  ;;  %v16426_v25 = vld [vmem:[#allocation8 + $0x2ec] ss:$16 sps:$4 sm:$0xff]  }
 0x778   : > { %v8688_v20 = vadd.f32 %v19933_v4, %v8334_v32  ;;  %v8336_v50 = vpop.f32.mrb[43].mxu1  ;;  %9837 = vmatmul.mubr.bf16.gmra.mrb[100].mxu1 %v20053_v11  ;;  %v8812_v16 = vmax.f32 %v8684_v7, 0.0 }
 0x779   : > { %v8689_v44 = vadd.f32 %v19937_v61, %v8336_v50  ;;  %10296 = vmatpush1.bf16.msra.mxu0 %v16397_v58  ;;  %v8813_v28 = vmax.f32 %v8685_v47, 0.0 }
 0x77a   : > { %v8816_v34 = vmax.f32 %v8688_v20, 0.0  ;;  %10297 = vmatprep.subr.bf16.mxu0 %v16405_v22 }
 0x77b   : > { %v8817_v24 = vmax.f32 %v8689_v44, 0.0  ;;  %v16424_v44 = vld [vmem:[#allocation8 + $0x2e8] ss:$16 sps:$4 sm:$0xff]  }
 0x77c   : > { %v20065_v35 = vpack.c.bf16 %v8816_v34, %v8812_v16  ;;  %10143 = vmatmul.mubr.bf16.gmra.mrb[68].mxu0 %v19957_v55  ;;  %v16429_v34 = vld [vmem:[#allocation8 + $0x30c] ss:$16 sps:$4 sm:$0xff]  }
 0x77d   : > { %v20068_v27 = vpack.c.bf16 %v8817_v24, %v8813_v28  ;;  %v8340_v46 = vpop.f32.mrb[44].mxu1  ;;  %10152 = vmatprep.mubr.bf16.mxu0 %v19972_v17  ;;  %10298 = vmatpush1.bf16.msra.mxu0 %v16403_v1  ;;  %v16412_v17 = vld [vmem:[#allocation8 + $0x288] ss:$16 sps:$4 sm:$0xff]  }
 0x77e   : > { %v8692_v23 = vadd.f32 %v19933_v4, %v8340_v46  ;;  %v8342_v37 = vpop.f32.mrb[45].mxu1  ;;  %10299 = vmatprep.subr.bf16.mxu0 %v16408_v60 }
 0x77f   : > { %v8693_v14 = vadd.f32 %v19937_v61, %v8342_v37  ;;  %v8344_v53 = vpop.f32.mrb[46].mxu1  ;;  %9846 = vmatprep.mubr.bf16.mxu1 %v20068_v27  ;;  %v16432_v37 = vld [vmem:[#allocation8 + $0x32c] ss:$16 sps:$4 sm:$0xff]  }
 0x780   : > { %v8696_v19 = vadd.f32 %v19933_v4, %v8344_v53  ;;  %v8346_v55 = vpop.f32.mrb[47].mxu1  ;;  %9847 = vmatmul.mubr.bf16.gmra.mrb[104].mxu1 %v20065_v35  ;;  %v8820_v30 = vmax.f32 %v8692_v23, 0.0 }
 0x781   : > { %v8697_v3 = vadd.f32 %v19937_v61, %v8346_v55  ;;  %10300 = vmatpush1.bf16.msra.mxu0 %v16406_v18  ;;  %v8821_v36 = vmax.f32 %v8693_v14, 0.0 }
 0x782   : > { %v8824_v49 = vmax.f32 %v8696_v19, 0.0  ;;  %10301 = vmatprep.subr.bf16.mxu0 %v16414_v57 }
 0x783   : > { %v8825_v6 = vmax.f32 %v8697_v3, 0.0  ;;  %v16430_v3 = vld [vmem:[#allocation8 + $0x328] ss:$16 sps:$4 sm:$0xff]  }
 0x784   : > { %v20077_v31 = vpack.c.bf16 %v8824_v49, %v8820_v30  ;;  %10153 = vmatmul.mubr.bf16.gmra.mrb[72].mxu0 %v19969_v5  ;;  %v16435_v49 = vld [vmem:[#allocation8 + $0x34c] ss:$16 sps:$4 sm:$0xff]  }
 0x785   : > { %v20080_v10 = vpack.c.bf16 %v8825_v6, %v8821_v36  ;;  %v8350_v40 = vpop.f32.mrb[48].mxu1  ;;  %10162 = vmatprep.mubr.bf16.mxu0 %v19984_v13  ;;  %10302 = vmatpush1.bf16.msra.mxu0 %v16412_v17  ;;  %v16421_v13 = vld [vmem:[#allocation8 + $0x2c8] ss:$16 sps:$4 sm:$0xff]  }
 0x786   : > { %v8700_v2 = vadd.f32 %v19933_v4, %v8350_v40  ;;  %v8352_v48 = vpop.f32.mrb[49].mxu1  ;;  %10303 = vmatprep.subr.bf16.mxu0 %v16417_v56 }
 0x787   : > { %v8701_v12 = vadd.f32 %v19937_v61, %v8352_v48  ;;  %v8354_v63 = vpop.f32.mrb[50].mxu1  ;;  %9856 = vmatprep.mubr.bf16.mxu1 %v20080_v10  ;;  %v16438_v48 = vld [vmem:[#allocation8 + $0x36c] ss:$16 sps:$4 sm:$0xff]  }
 0x788   : > { %v8704_v9 = vadd.f32 %v19933_v4, %v8354_v63  ;;  %v8356_v5 = vpop.f32.mrb[51].mxu1  ;;  %9857 = vmatmul.mubr.bf16.gmra.mrb[108].mxu1 %v20077_v31  ;;  %v8828_v58 = vmax.f32 %v8700_v2, 0.0 }
 0x789   : > { %v8705_v43 = vadd.f32 %v19937_v61, %v8356_v5  ;;  %10304 = vmatpush1.bf16.msra.mxu0 %v16415_v0  ;;  %v8829_v22 = vmax.f32 %v8701_v12, 0.0 }
 0x78a   : > { %v8832_v7 = vmax.f32 %v8704_v9, 0.0  ;;  %10305 = vmatprep.subr.bf16.mxu0 %v16423_v51 }
 0x78b   : > { %v8833_v47 = vmax.f32 %v8705_v43, 0.0  ;;  %v16436_v43 = vld [vmem:[#allocation8 + $0x368] ss:$16 sps:$4 sm:$0xff]  }
 0x78c   : > { %v20089_v32 = vpack.c.bf16 %v8832_v7, %v8828_v58  ;;  %10163 = vmatmul.mubr.bf16.gmra.mrb[76].mxu0 %v19981_v41  ;;  %v16441_v7 = vld [vmem:[#allocation8 + $0x38c] ss:$16 sps:$4 sm:$0xff]  }
 0x78d   : > { %v20092_v20 = vpack.c.bf16 %v8833_v47, %v8829_v22  ;;  %v8360_v50 = vpop.f32.mrb[52].mxu1  ;;  %10172 = vmatprep.mubr.bf16.mxu0 %v19996_v45  ;;  %10306 = vmatpush1.bf16.msra.mxu0 %v16421_v13  ;;  %v16427_v45 = vld [vmem:[#allocation8 + $0x308] ss:$16 sps:$4 sm:$0xff]  }
 0x78e   : > { %v8708_v1 = vadd.f32 %v19933_v4, %v8360_v50  ;;  %v8362_v16 = vpop.f32.mrb[53].mxu1  ;;  %10307 = vmatprep.subr.bf16.mxu0 %v16426_v25 }
 0x78f   : > { %v8709_v60 = vadd.f32 %v19937_v61, %v8362_v16  ;;  %v8364_v28 = vpop.f32.mrb[54].mxu1  ;;  %9866 = vmatprep.mubr.bf16.mxu1 %v20092_v20  ;;  %v16444_v16 = vld [vmem:[#allocation8 + $0x3ac] ss:$16 sps:$4 sm:$0xff]  }
 0x790   : > { %v8712_v24 = vadd.f32 %v19933_v4, %v8364_v28  ;;  %v8366_v41 = vpop.f32.mrb[55].mxu1  ;;  %9867 = vmatmul.mubr.bf16.gmra.mrb[112].mxu1 %v20089_v32  ;;  %v8836_v18 = vmax.f32 %v8708_v1, 0.0 }
 0x791   : > { %v8713_v46 = vadd.f32 %v19937_v61, %v8366_v41  ;;  %10308 = vmatpush1.bf16.msra.mxu0 %v16424_v44  ;;  %v8837_v57 = vmax.f32 %v8709_v60, 0.0  ;;  %v16445_v41 = vld [vmem:[#allocation8 + $0x3c8] ss:$16 sps:$4 sm:$0xff]  }
 0x792   : > { %v8840_v23 = vmax.f32 %v8712_v24, 0.0  ;;  %10309 = vmatprep.subr.bf16.mxu0 %v16429_v34 }
 0x793   : > { %v8841_v14 = vmax.f32 %v8713_v46, 0.0  ;;  %v16450_v46 = vld [vmem:[#allocation8 + $0x3ec] ss:$16 sps:$4 sm:$0xff]  }
 0x794   : > { %v20101_v53 = vpack.c.bf16 %v8840_v23, %v8836_v18  ;;  %10173 = vmatmul.mubr.bf16.gmra.mrb[80].mxu0 %v19993_v59  ;;  %v21270_v18 = vld [vmem:[#allocation57_spill] sm:$0xff] }
 0x795   : > { %v20104_v19 = vpack.c.bf16 %v8841_v14, %v8837_v57  ;;  %v8370_v55 = vpop.f32.mrb[56].mxu1  ;;  %10182 = vmatprep.mubr.bf16.mxu0 %v20008_v54  ;;  %10310 = vmatpush1.bf16.msra.mxu0 %v16427_v45  ;;  %v16433_v54 = vld [vmem:[#allocation8 + $0x348] ss:$16 sps:$4 sm:$0xff]   ;;  %v16456_v45 = vld [vmem:[#allocation10 + $0xc] ss:$16 sps:$4 sm:$0xff]  }
 0x796   : > { %v8716_v17 = vadd.f32 %v19933_v4, %v8370_v55  ;;  %v8372_v30 = vpop.f32.mrb[57].mxu1  ;;  %10311 = vmatprep.subr.bf16.mxu0 %v16432_v37 }
 0x797   : > { %v8717_v56 = vadd.f32 %v19937_v61, %v8372_v30  ;;  %v8374_v36 = vpop.f32.mrb[58].mxu1  ;;  %9876 = vmatprep.mubr.bf16.mxu1 %v20104_v19 }
 0x798   : > { %v8720_v6 = vadd.f32 %v19933_v4, %v8374_v36  ;;  %v8376_v59 = vpop.f32.mrb[59].mxu1  ;;  %9877 = vmatmul.mubr.bf16.gmra.mrb[116].mxu1 %v20101_v53  ;;  %v8844_v0 = vmax.f32 %v8716_v17, 0.0 }
 0x799   : > { %v8721_v40 = vadd.f32 %v19937_v61, %v8376_v59  ;;  %10312 = vmatpush1.bf16.msra.mxu0 %v16430_v3  ;;  %v8845_v51 = vmax.f32 %v8717_v56, 0.0  ;;  %v16451_v56 = vld [vmem:[#allocation10] ss:$16 sps:$4 sm:$0xff]   ;;  %v16459_v59 = vld [vmem:[#allocation10 + $0x24] ss:$16 sps:$4 sm:$0xff]  }
 0x79a   : > { %v8848_v2 = vmax.f32 %v8720_v6, 0.0  ;;  %10313 = vmatprep.subr.bf16.mxu0 %v16435_v49 }
 0x79b   : > { %v8849_v12 = vmax.f32 %v8721_v40, 0.0 }
 0x79c   : > { %v20113_v63 = vpack.c.bf16 %v8848_v2, %v8844_v0  ;;  %10183 = vmatmul.mubr.bf16.gmra.mrb[84].mxu0 %v20005_v39  ;;  %v16457_v2 = vld [vmem:[#allocation10 + $0x20] ss:$16 sps:$4 sm:$0xff]  }
 0x79d   : > { %v20116_v9 = vpack.c.bf16 %v8849_v12, %v8845_v51  ;;  %v8380_v5 = vpop.f32.mrb[60].mxu1  ;;  %10192 = vmatprep.mubr.bf16.mxu0 %v20020_v42  ;;  %10314 = vmatpush1.bf16.msra.mxu0 %v16433_v54  ;;  %v16439_v42 = vld [vmem:[#allocation8 + $0x388] ss:$16 sps:$4 sm:$0xff]   ;;  %v16465_v12 = vld [vmem:[#allocation10 + $0x44] ss:$16 sps:$4 sm:$0xff]  }
 0x79e   : > { %v8724_v13 = vadd.f32 %v19933_v4, %v8380_v5  ;;  %v8382_v58 = vpop.f32.mrb[61].mxu1  ;;  %10315 = vmatprep.subr.bf16.mxu0 %v16438_v48 }
 0x79f   : > { %v8725_v25 = vadd.f32 %v19937_v61, %v8382_v58  ;;  %v8384_v22 = vpop.f32.mrb[62].mxu1  ;;  %9886 = vmatprep.mubr.bf16.mxu1 %v20116_v9 }
 0x7a0   : > { %v8728_v47 = vadd.f32 %v19933_v4, %v8384_v22  ;;  %v8386_v39 = vpop.f32.mrb[63].mxu1  ;;  %9887 = vmatmul.mubr.bf16.gmra.mrb[120].mxu1 %v20113_v63  ;;  %v8852_v44 = vmax.f32 %v8724_v13, 0.0  ;;  %v16442_v4 = vld [vmem:[#allocation8 + $0x3a8] ss:$16 sps:$4 sm:$0xff]  }
 0x7a1   : > { %v8729_v50 = vadd.f32 %v19937_v61, %v8386_v39  ;;  %10316 = vmatpush1.bf16.msra.mxu0 %v16436_v43  ;;  %v8853_v34 = vmax.f32 %v8725_v25, 0.0  ;;  %v16447_v61 = vld [vmem:[#allocation8 + $0x3cc] ss:$16 sps:$4 sm:$0xff]   ;;  %v16463_v25 = vld [vmem:[#allocation10 + $0x40] ss:$16 sps:$4 sm:$0xff]  }
 0x7a2   : > { %v8856_v1 = vmax.f32 %v8728_v47, 0.0  ;;  %10317 = vmatprep.subr.bf16.mxu0 %v16441_v7  ;;  %v16471_v39 = vld [vmem:[#allocation10 + $0x64] ss:$16 sps:$4 sm:$0xff]  }
 0x7a3   : > { %v8857_v60 = vmax.f32 %v8729_v50, 0.0 }
 0x7a4   : > { %v20125_v28 = vpack.c.bf16 %v8856_v1, %v8852_v44  ;;  %10193 = vmatmul.mubr.bf16.gmra.mrb[88].mxu0 %v20017_v38  ;;  %v16448_v38 = vld [vmem:[#allocation8 + $0x3e8] ss:$16 sps:$4 sm:$0xff]   ;;  %v16469_v1 = vld [vmem:[#allocation10 + $0x60] ss:$16 sps:$4 sm:$0xff]  }
 0x7a5   : > { %v20128_v24 = vpack.c.bf16 %v8857_v60, %v8853_v34  ;;  %10202 = vmatprep.mubr.bf16.mxu0 %v20032_v62  ;;  %10318 = vmatpush1.bf16.msra.mxu0 %v16439_v42  ;;  %v16453_v62 = vld [vmem:[#allocation10 + $0x4] ss:$16 sps:$4 sm:$0xff]  }
 0x7a6   : > { %10319 = vmatprep.subr.bf16.mxu0 %v16444_v16  ;;  %11468 = vmatprep.subr.bf16.mxu1 %v16453_v62  ;;  %v16477_v60 = vld [vmem:[#allocation10 + $0x84] ss:$16 sps:$4 sm:$0xff]   ;;  %v16475_v62 = vld [vmem:[#allocation10 + $0x80] ss:$16 sps:$4 sm:$0xff]  }
 0x7a7   : > { %9896 = vmatprep.mubr.bf16.mxu1 %v20128_v24 }
 0x7a8   : > { %9897 = vmatmul.mubr.bf16.gmra.mrb[124].mxu1 %v20125_v28 }
 0x7a9   : > { %10320 = vmatpush1.bf16.msra.mxu0 %v16442_v4 }
 0x7aa   : > { %10321 = vmatprep.subr.bf16.mxu0 %v16447_v61 }
 0x7ac   : > { %10203 = vmatmul.mubr.bf16.gmra.mrb[92].mxu0 %v20029_v8  ;;  %v21269_v8 = vld [vmem:[#allocation55_spill] sm:$0xff] }
 0x7ad   : > { %10212 = vmatprep.mubr.bf16.mxu0 %v20044_v15  ;;  %10322 = vmatpush1.bf16.msra.mxu0 %v16445_v41  ;;  %v20142_v15 = vrot.slane %v19929_v29, %v21269_v8 }
 0x7ae   : > { %10323 = vmatprep.subr.bf16.mxu0 %v16450_v46 }
 0x7b1   : > { %10324 = vmatpush1.bf16.msra.mxu0 %v16448_v38 }
 0x7b2   : > { %11854 = vmatprep.subr.bf16.mxu0 %v16456_v45 }
 0x7b4   : > { %10213 = vmatmul.mubr.bf16.gmra.mrb[96].mxu0 %v20041_v21  ;;  %v20147_v21 = vrot.slane %v19929_v29, %v21270_v18 }
 0x7b5   : > { %10222 = vmatprep.mubr.bf16.mxu0 %v20056_v33 }
 0x7bc   : > { %10223 = vmatmul.mubr.bf16.gmra.mrb[100].mxu0 %v20053_v11 }
 0x7bd   : > { %10232 = vmatprep.mubr.bf16.mxu0 %v20068_v27 }
 0x7c4   : > { %10233 = vmatmul.mubr.bf16.gmra.mrb[104].mxu0 %v20065_v35 }
 0x7c5   : > { %10242 = vmatprep.mubr.bf16.mxu0 %v20080_v10 }
 0x7c7   : > { %v8423_v33 = vpop.f32.mrb[0].mxu0 }
 0x7c8   : > { %v8606_v23 = vadd.f32 %v20142_v15, %v8423_v33  ;;  %v8425_v37 = vpop.f32.mrb[1].mxu0 }
 0x7c9   : > { %v8607_v11 = vadd.f32 %v20147_v21, %v8425_v37  ;;  %v8427_v57 = vpop.f32.mrb[2].mxu0 }
 0x7ca   : > { %v8610_v27 = vadd.f32 %v20142_v15, %v8427_v57  ;;  %v8429_v35 = vpop.f32.mrb[3].mxu0  ;;  %v8734_v55 = vmax.f32 %v8606_v23, 0.0  ;;  %v16483_v23 = vld [vmem:[#allocation10 + $0xa4] ss:$16 sps:$4 sm:$0xff]  }
 0x7cb   : > { %v8611_v14 = vadd.f32 %v20147_v21, %v8429_v35  ;;  %v8735_v10 = vmax.f32 %v8607_v11, 0.0 }
 0x7cc   : > { %v8738_v3 = vmax.f32 %v8610_v27, 0.0  ;;  %10243 = vmatmul.mubr.bf16.gmra.mrb[108].mxu0 %v20077_v31  ;;  %v16481_v27 = vld [vmem:[#allocation10 + $0xa0] ss:$16 sps:$4 sm:$0xff]  }
 0x7cd   : > { %v8739_v17 = vmax.f32 %v8611_v14, 0.0  ;;  %10252 = vmatprep.mubr.bf16.mxu0 %v20092_v20 }
 0x7ce   : > { %v20155_v29 = vpack.c.bf16 %v8738_v3, %v8734_v55  ;;  %v16489_v55 = vld [vmem:[#allocation10 + $0xc4] ss:$16 sps:$4 sm:$0xff]  }
 0x7cf   : > { %v20157_v30 = vpack.c.bf16 %v8739_v17, %v8735_v10  ;;  %v8433_v49 = vpop.f32.mrb[4].mxu0 }
 0x7d0   : > { %v8614_v36 = vadd.f32 %v20142_v15, %v8433_v49  ;;  %v8435_v6 = vpop.f32.mrb[5].mxu0 }
 0x7d1   : > { %v8615_v40 = vadd.f32 %v20147_v21, %v8435_v6  ;;  %v8437_v54 = vpop.f32.mrb[6].mxu0  ;;  %9939 = vmatprep.mubr.bf16.mxu1 %v20157_v30 }
 0x7d2   : > { %v8618_v31 = vadd.f32 %v20142_v15, %v8437_v54  ;;  %v8439_v0 = vpop.f32.mrb[7].mxu0  ;;  %9940 = vmatmul.mubr.bf16.vlgmr.msra.gmra.mrb[64].mxu1 %v20155_v29  ;;  %v8742_v48 = vmax.f32 %v8614_v36, 0.0  ;;  %v16487_v36 = vld [vmem:[#allocation10 + $0xc0] ss:$16 sps:$4 sm:$0xff]  }
 0x7d3   : > { %v8619_v20 = vadd.f32 %v20147_v21, %v8439_v0  ;;  %11469 = vmatpush1.bf16.msra.mxu1 %v16451_v56  ;;  %v8743_v5 = vmax.f32 %v8615_v40, 0.0  ;;  %v16495_v40 = vld [vmem:[#allocation10 + $0xe4] ss:$16 sps:$4 sm:$0xff]  }
 0x7d4   : > { %v8746_v51 = vmax.f32 %v8618_v31, 0.0  ;;  %10253 = vmatmul.mubr.bf16.gmra.mrb[112].mxu0 %v20089_v32  ;;  %11470 = vmatprep.subr.bf16.mxu1 %v16459_v59 }
 0x7d5   : > { %v8747_v43 = vmax.f32 %v8619_v20, 0.0  ;;  %10262 = vmatprep.mubr.bf16.mxu0 %v20104_v19  ;;  %v16493_v20 = vld [vmem:[#allocation10 + $0xe0] ss:$16 sps:$4 sm:$0xff]  }
 0x7d6   : > { %v20167_v13 = vpack.c.bf16 %v8746_v51, %v8742_v48  ;;  %v16501_v51 = vld [vmem:[#allocation10 + $0x104] ss:$16 sps:$4 sm:$0xff]  }
 0x7d7   : > { %v20169_v58 = vpack.c.bf16 %v8747_v43, %v8743_v5  ;;  %v8443_v7 = vpop.f32.mrb[8].mxu0  ;;  %11471 = vmatpush1.bf16.msra.mxu1 %v16457_v2 }
 0x7d8   : > { %v8622_v22 = vadd.f32 %v20142_v15, %v8443_v7  ;;  %v8445_v47 = vpop.f32.mrb[9].mxu0  ;;  %11472 = vmatprep.subr.bf16.mxu1 %v16465_v12 }
 0x7d9   : > { %v8623_v32 = vadd.f32 %v20147_v21, %v8445_v47  ;;  %v8447_v50 = vpop.f32.mrb[10].mxu0  ;;  %9949 = vmatprep.mubr.bf16.mxu1 %v20169_v58 }
 0x7da   : > { %v8626_v42 = vadd.f32 %v20142_v15, %v8447_v50  ;;  %v8449_v19 = vpop.f32.mrb[11].mxu0  ;;  %9950 = vmatmul.mubr.bf16.gmra.mrb[68].mxu1 %v20167_v13  ;;  %v8750_v16 = vmax.f32 %v8622_v22, 0.0  ;;  %v16499_v22 = vld [vmem:[#allocation10 + $0x100] ss:$16 sps:$4 sm:$0xff]  }
 0x7db   : > { %v8627_v44 = vadd.f32 %v20147_v21, %v8449_v19  ;;  %11473 = vmatpush1.bf16.msra.mxu1 %v16463_v25  ;;  %v8751_v4 = vmax.f32 %v8623_v32, 0.0  ;;  %v16507_v32 = vld [vmem:[#allocation10 + $0x124] ss:$16 sps:$4 sm:$0xff]  }
 0x7dc   : > { %v8754_v34 = vmax.f32 %v8626_v42, 0.0  ;;  %10263 = vmatmul.mubr.bf16.gmra.mrb[116].mxu0 %v20101_v53  ;;  %11474 = vmatprep.subr.bf16.mxu1 %v16471_v39  ;;  %v16454_v42 = vld [vmem:[#allocation10 + $0x8] ss:$16 sps:$4 sm:$0xff]  }
 0x7dd   : > { %v8755_v61 = vmax.f32 %v8627_v44, 0.0  ;;  %10272 = vmatprep.mubr.bf16.mxu0 %v20116_v9  ;;  %v16462_v44 = vld [vmem:[#allocation10 + $0x2c] ss:$16 sps:$4 sm:$0xff]  }
 0x7de   : > { %v20179_v41 = vpack.c.bf16 %v8754_v34, %v8750_v16  ;;  %v16505_v16 = vld [vmem:[#allocation10 + $0x120] ss:$16 sps:$4 sm:$0xff]  }
 0x7df   : > { %v20181_v46 = vpack.c.bf16 %v8755_v61, %v8751_v4  ;;  %v8453_v38 = vpop.f32.mrb[12].mxu0  ;;  %11475 = vmatpush1.bf16.msra.mxu1 %v16469_v1  ;;  %v16513_v4 = vld [vmem:[#allocation10 + $0x144] ss:$16 sps:$4 sm:$0xff]  }
 0x7e0   : > { %v8630_v45 = vadd.f32 %v20142_v15, %v8453_v38  ;;  %v8455_v33 = vpop.f32.mrb[13].mxu0  ;;  %11476 = vmatprep.subr.bf16.mxu1 %v16477_v60 }
 0x7e1   : > { %v8631_v53 = vadd.f32 %v20147_v21, %v8455_v33  ;;  %v8457_v37 = vpop.f32.mrb[14].mxu0  ;;  %9959 = vmatprep.mubr.bf16.mxu1 %v20181_v46  ;;  %v16468_v33 = vld [vmem:[#allocation10 + $0x4c] ss:$16 sps:$4 sm:$0xff]  }
 0x7e2   : > { %v8634_v11 = vadd.f32 %v20142_v15, %v8457_v37  ;;  %v8459_v9 = vpop.f32.mrb[15].mxu0  ;;  %9960 = vmatmul.mubr.bf16.gmra.mrb[72].mxu1 %v20179_v41  ;;  %v8758_v35 = vmax.f32 %v8630_v45, 0.0  ;;  %v16511_v37 = vld [vmem:[#allocation10 + $0x140] ss:$16 sps:$4 sm:$0xff]  }
 0x7e3   : > { %v8635_v57 = vadd.f32 %v20147_v21, %v8459_v9  ;;  %11477 = vmatpush1.bf16.msra.mxu1 %v16475_v62  ;;  %v8759_v3 = vmax.f32 %v8631_v53, 0.0  ;;  %v16460_v62 = vld [vmem:[#allocation10 + $0x28] ss:$16 sps:$4 sm:$0xff]   ;;  %v16519_v9 = vld [vmem:[#allocation10 + $0x164] ss:$16 sps:$4 sm:$0xff]  }
 0x7e4   : > { %v8762_v14 = vmax.f32 %v8634_v11, 0.0  ;;  %10273 = vmatmul.mubr.bf16.gmra.mrb[120].mxu0 %v20113_v63  ;;  %11478 = vmatprep.subr.bf16.mxu1 %v16483_v23 }
 0x7e5   : > { %v8763_v10 = vmax.f32 %v8635_v57, 0.0  ;;  %10282 = vmatprep.mubr.bf16.mxu0 %v20128_v24 }
 0x7e6   : > { %v20191_v17 = vpack.c.bf16 %v8762_v14, %v8758_v35 }
 0x7e7   : > { %v20193_v49 = vpack.c.bf16 %v8763_v10, %v8759_v3  ;;  %v8463_v56 = vpop.f32.mrb[16].mxu0  ;;  %11479 = vmatpush1.bf16.msra.mxu1 %v16481_v27  ;;  %v16517_v10 = vld [vmem:[#allocation10 + $0x160] ss:$16 sps:$4 sm:$0xff]  }
 0x7e8   : > { %v8638_v6 = vadd.f32 %v20142_v15, %v8463_v56  ;;  %v8465_v59 = vpop.f32.mrb[17].mxu0  ;;  %11480 = vmatprep.subr.bf16.mxu1 %v16489_v55  ;;  %v16474_v55 = vld [vmem:[#allocation10 + $0x6c] ss:$16 sps:$4 sm:$0xff]  }
 0x7e9   : > { %v8639_v63 = vadd.f32 %v20147_v21, %v8465_v59  ;;  %v8467_v54 = vpop.f32.mrb[18].mxu0  ;;  %9969 = vmatprep.mubr.bf16.mxu1 %v20193_v49 }
 0x7ea   : > { %v8642_v31 = vadd.f32 %v20142_v15, %v8467_v54  ;;  %v8469_v24 = vpop.f32.mrb[19].mxu0  ;;  %9970 = vmatmul.mubr.bf16.gmra.mrb[76].mxu1 %v20191_v17  ;;  %v8766_v2 = vmax.f32 %v8638_v6, 0.0  ;;  %v16525_v6 = vld [vmem:[#allocation10 + $0x184] ss:$16 sps:$4 sm:$0xff]  }
 0x7eb   : > { %v8643_v0 = vadd.f32 %v20147_v21, %v8469_v24  ;;  %11481 = vmatpush1.bf16.msra.mxu1 %v16487_v36  ;;  %v8767_v12 = vmax.f32 %v8639_v63, 0.0  ;;  %v16472_v63 = vld [vmem:[#allocation10 + $0x68] ss:$16 sps:$4 sm:$0xff]  }
 0x7ec   : > { %v8770_v48 = vmax.f32 %v8642_v31, 0.0  ;;  %10283 = vmatmul.mubr.bf16.gmra.mrb[124].mxu0 %v20125_v28  ;;  %11482 = vmatprep.subr.bf16.mxu1 %v16495_v40  ;;  %v16480_v31 = vld [vmem:[#allocation10 + $0x8c] ss:$16 sps:$4 sm:$0xff]  }
 0x7ed   : > { %v8771_v5 = vmax.f32 %v8643_v0, 0.0  ;;  %10325 = vmatprep.mubr.bf16.mxu0 %v20157_v30 }
 0x7ee   : > { %v20203_v43 = vpack.c.bf16 %v8770_v48, %v8766_v2  ;;  %v16531_v48 = vld [vmem:[#allocation10 + $0x1a4] ss:$16 sps:$4 sm:$0xff]  }
 0x7ef   : > { %v20205_v7 = vpack.c.bf16 %v8771_v5, %v8767_v12  ;;  %v8473_v25 = vpop.f32.mrb[20].mxu0  ;;  %11483 = vmatpush1.bf16.msra.mxu1 %v16493_v20  ;;  %v16523_v20 = vld [vmem:[#allocation10 + $0x180] ss:$16 sps:$4 sm:$0xff]  }
 0x7f0   : > { %v8646_v47 = vadd.f32 %v20142_v15, %v8473_v25  ;;  %v8475_v39 = vpop.f32.mrb[21].mxu0  ;;  %11484 = vmatprep.subr.bf16.mxu1 %v16501_v51 }
 0x7f1   : > { %v8647_v28 = vadd.f32 %v20147_v21, %v8475_v39  ;;  %v8477_v50 = vpop.f32.mrb[22].mxu0  ;;  %9979 = vmatprep.mubr.bf16.mxu1 %v20205_v7  ;;  %v16529_v39 = vld [vmem:[#allocation10 + $0x1a0] ss:$16 sps:$4 sm:$0xff]  }
 0x7f2   : > { %v8650_v30 = vadd.f32 %v20142_v15, %v8477_v50  ;;  %v8479_v19 = vpop.f32.mrb[23].mxu0  ;;  %9980 = vmatmul.mubr.bf16.gmra.mrb[80].mxu1 %v20203_v43  ;;  %v8774_v34 = vmax.f32 %v8646_v47, 0.0  ;;  %v16537_v50 = vld [vmem:[#allocation10 + $0x1c4] ss:$16 sps:$4 sm:$0xff]  }
 0x7f3   : > { %v8651_v1 = vadd.f32 %v20147_v21, %v8479_v19  ;;  %11485 = vmatpush1.bf16.msra.mxu1 %v16499_v22  ;;  %v8775_v61 = vmax.f32 %v8647_v28, 0.0  ;;  %v16486_v22 = vld [vmem:[#allocation10 + $0xac] ss:$16 sps:$4 sm:$0xff]   ;;  %v16484_v19 = vld [vmem:[#allocation10 + $0xa8] ss:$16 sps:$4 sm:$0xff]  }
 0x7f4   : > { %v8778_v60 = vmax.f32 %v8650_v30, 0.0  ;;  %10326 = vmatmul.mubr.bf16.vlgmr.msra.gmra.mrb[64].mxu0 %v20155_v29  ;;  %11486 = vmatprep.subr.bf16.mxu1 %v16507_v32 }
 0x7f5   : > { %v8779_v38 = vmax.f32 %v8651_v1, 0.0  ;;  %10335 = vmatprep.mubr.bf16.mxu0 %v20169_v58  ;;  %11855 = vmatpush1.bf16.msra.mxu0 %v16454_v42  ;;  %v16466_v58 = vld [vmem:[#allocation10 + $0x48] ss:$16 sps:$4 sm:$0xff]   ;;  %v16492_v1 = vld [vmem:[#allocation10 + $0xcc] ss:$16 sps:$4 sm:$0xff]  }
 0x7f6   : > { %v20215_v45 = vpack.c.bf16 %v8778_v60, %v8774_v34  ;;  %11856 = vmatprep.subr.bf16.mxu0 %v16462_v44  ;;  %v16535_v60 = vld [vmem:[#allocation10 + $0x1c0] ss:$16 sps:$4 sm:$0xff]  }
 0x7f7   : > { %v20217_v23 = vpack.c.bf16 %v8779_v38, %v8775_v61  ;;  %v8483_v53 = vpop.f32.mrb[24].mxu0  ;;  %11487 = vmatpush1.bf16.msra.mxu1 %v16505_v16 }
 0x7f8   : > { %v8654_v11 = vadd.f32 %v20142_v15, %v8483_v53  ;;  %v8485_v29 = vpop.f32.mrb[25].mxu0  ;;  %11488 = vmatprep.subr.bf16.mxu1 %v16513_v4  ;;  %v16498_v53 = vld [vmem:[#allocation10 + $0xec] ss:$16 sps:$4 sm:$0xff]  }
 0x7f9   : > { %v8655_v57 = vadd.f32 %v20147_v21, %v8485_v29  ;;  %v8487_v27 = vpop.f32.mrb[26].mxu0  ;;  %9989 = vmatprep.mubr.bf16.mxu1 %v20217_v23  ;;  %11857 = vmatpush1.bf16.msra.mxu0 %v16460_v62 }
 0x7fa   : > { %v8658_v35 = vadd.f32 %v20142_v15, %v8487_v27  ;;  %v8489_v14 = vpop.f32.mrb[27].mxu0  ;;  %9990 = vmatmul.mubr.bf16.gmra.mrb[84].mxu1 %v20215_v45  ;;  %11858 = vmatprep.subr.bf16.mxu0 %v16468_v33  ;;  %v8782_v56 = vmax.f32 %v8654_v11, 0.0  ;;  %v16496_v27 = vld [vmem:[#allocation10 + $0xe8] ss:$16 sps:$4 sm:$0xff]  }
 0x7fb   : > { %v8659_v3 = vadd.f32 %v20147_v21, %v8489_v14  ;;  %11489 = vmatpush1.bf16.msra.mxu1 %v16511_v37  ;;  %v8783_v59 = vmax.f32 %v8655_v57, 0.0 }
 0x7fc   : > { %v8786_v36 = vmax.f32 %v8658_v35, 0.0  ;;  %10336 = vmatmul.mubr.bf16.gmra.mrb[68].mxu0 %v20167_v13  ;;  %11490 = vmatprep.subr.bf16.mxu1 %v16519_v9  ;;  %v16504_v35 = vld [vmem:[#allocation10 + $0x10c] ss:$16 sps:$4 sm:$0xff]  }
 0x7fd   : > { %v8787_v40 = vmax.f32 %v8659_v3, 0.0  ;;  %10345 = vmatprep.mubr.bf16.mxu0 %v20181_v46  ;;  %11859 = vmatpush1.bf16.msra.mxu0 %v16466_v58  ;;  %v16478_v46 = vld [vmem:[#allocation10 + $0x88] ss:$16 sps:$4 sm:$0xff]  }
 0x7fe   : > { %v20227_v54 = vpack.c.bf16 %v8786_v36, %v8782_v56  ;;  %11860 = vmatprep.subr.bf16.mxu0 %v16474_v55 }
 0x7ff   : > { %v20229_v24 = vpack.c.bf16 %v8787_v40, %v8783_v59  ;;  %v8493_v0 = vpop.f32.mrb[28].mxu0  ;;  %11491 = vmatpush1.bf16.msra.mxu1 %v16517_v10  ;;  %v16510_v59 = vld [vmem:[#allocation10 + $0x12c] ss:$16 sps:$4 sm:$0xff]  }
 0x800   : > { %v8662_v2 = vadd.f32 %v20142_v15, %v8493_v0  ;;  %v8495_v13 = vpop.f32.mrb[29].mxu0  ;;  %11492 = vmatprep.subr.bf16.mxu1 %v16525_v6 }
 0x801   : > { %v8663_v51 = vadd.f32 %v20147_v21, %v8495_v13  ;;  %v8497_v12 = vpop.f32.mrb[30].mxu0  ;;  %9999 = vmatprep.mubr.bf16.mxu1 %v20229_v24  ;;  %11861 = vmatpush1.bf16.msra.mxu0 %v16472_v63 }
 0x802   : > { %v8666_v5 = vadd.f32 %v20142_v15, %v8497_v12  ;;  %v8499_v25 = vpop.f32.mrb[31].mxu0  ;;  %10000 = vmatmul.mubr.bf16.gmra.mrb[88].mxu1 %v20227_v54  ;;  %11862 = vmatprep.subr.bf16.mxu0 %v16480_v31  ;;  %v8790_v32 = vmax.f32 %v8662_v2, 0.0  ;;  %v16508_v2 = vld [vmem:[#allocation10 + $0x128] ss:$16 sps:$4 sm:$0xff]  }
 0x803   : > { %v8667_v47 = vadd.f32 %v20147_v21, %v8499_v25  ;;  %11493 = vmatpush1.bf16.msra.mxu1 %v16523_v20  ;;  %v8791_v42 = vmax.f32 %v8663_v51, 0.0 }
 0x804   : > { %v8794_v28 = vmax.f32 %v8666_v5, 0.0  ;;  %10346 = vmatmul.mubr.bf16.gmra.mrb[72].mxu0 %v20179_v41  ;;  %11494 = vmatprep.subr.bf16.mxu1 %v16531_v48  ;;  %v16516_v48 = vld [vmem:[#allocation10 + $0x14c] ss:$16 sps:$4 sm:$0xff]  }
 0x805   : > { %v8795_v30 = vmax.f32 %v8667_v47, 0.0  ;;  %10355 = vmatprep.mubr.bf16.mxu0 %v20193_v49  ;;  %11863 = vmatpush1.bf16.msra.mxu0 %v16478_v46  ;;  %v16490_v49 = vld [vmem:[#allocation10 + $0xc8] ss:$16 sps:$4 sm:$0xff]  }
 0x806   : > { %v20239_v44 = vpack.c.bf16 %v8794_v28, %v8790_v32  ;;  %11864 = vmatprep.subr.bf16.mxu0 %v16486_v22 }
 0x807   : > { %v20241_v16 = vpack.c.bf16 %v8795_v30, %v8791_v42  ;;  %v8503_v34 = vpop.f32.mrb[32].mxu0  ;;  %11495 = vmatpush1.bf16.msra.mxu1 %v16529_v39  ;;  %v16522_v39 = vld [vmem:[#allocation10 + $0x16c] ss:$16 sps:$4 sm:$0xff]  }
 0x808   : > { %v8670_v4 = vadd.f32 %v20142_v15, %v8503_v34  ;;  %v8505_v41 = vpop.f32.mrb[33].mxu0  ;;  %11496 = vmatprep.subr.bf16.mxu1 %v16537_v50  ;;  %v16528_v34 = vld [vmem:[#allocation10 + $0x18c] ss:$16 sps:$4 sm:$0xff]  }
 0x809   : > { %v8671_v61 = vadd.f32 %v20147_v21, %v8505_v41  ;;  %v8507_v38 = vpop.f32.mrb[34].mxu0  ;;  %10009 = vmatprep.mubr.bf16.mxu1 %v20241_v16  ;;  %11865 = vmatpush1.bf16.msra.mxu0 %v16484_v19  ;;  %v16520_v19 = vld [vmem:[#allocation10 + $0x168] ss:$16 sps:$4 sm:$0xff]  }
 0x80a   : > { %v8674_v62 = vadd.f32 %v20142_v15, %v8507_v38  ;;  %v8509_v33 = vpop.f32.mrb[35].mxu0  ;;  %10010 = vmatmul.mubr.bf16.gmra.mrb[92].mxu1 %v20239_v44  ;;  %11866 = vmatprep.subr.bf16.mxu0 %v16492_v1  ;;  %v8798_v11 = vmax.f32 %v8670_v4, 0.0 }
 0x80b   : > { %v8675_v37 = vadd.f32 %v20147_v21, %v8509_v33  ;;  %11497 = vmatpush1.bf16.msra.mxu1 %v16535_v60  ;;  %v8799_v9 = vmax.f32 %v8671_v61, 0.0  ;;  %v16534_v33 = vld [vmem:[#allocation10 + $0x1ac] ss:$16 sps:$4 sm:$0xff]  }
 0x80c   : > { %v8802_v29 = vmax.f32 %v8674_v62, 0.0  ;;  %10356 = vmatmul.mubr.bf16.gmra.mrb[76].mxu0 %v20191_v17  ;;  %v16502_v17 = vld [vmem:[#allocation10 + $0x108] ss:$16 sps:$4 sm:$0xff]  }
 0x80d   : > { %v8803_v57 = vmax.f32 %v8675_v37, 0.0  ;;  %10365 = vmatprep.mubr.bf16.mxu0 %v20205_v7  ;;  %11867 = vmatpush1.bf16.msra.mxu0 %v16490_v49 }
 0x80e   : > { %v20251_v58 = vpack.c.bf16 %v8802_v29, %v8798_v11  ;;  %11868 = vmatprep.subr.bf16.mxu0 %v16498_v53 }
 0x80f   : > { %v20253_v14 = vpack.c.bf16 %v8803_v57, %v8799_v9  ;;  %v8513_v55 = vpop.f32.mrb[36].mxu0  ;;  %v16532_v57 = vld [vmem:[#allocation10 + $0x1a8] ss:$16 sps:$4 sm:$0xff]  }
 0x810   : > { %v8678_v3 = vadd.f32 %v20142_v15, %v8513_v55  ;;  %v8515_v10 = vpop.f32.mrb[37].mxu0 }
 0x811   : > { %v8679_v56 = vadd.f32 %v20147_v21, %v8515_v10  ;;  %v8517_v36 = vpop.f32.mrb[38].mxu0  ;;  %10019 = vmatprep.mubr.bf16.mxu1 %v20253_v14  ;;  %11869 = vmatpush1.bf16.msra.mxu0 %v16496_v27 }
 0x812   : > { %v8682_v7 = vadd.f32 %v20142_v15, %v8517_v36  ;;  %v8519_v6 = vpop.f32.mrb[39].mxu0  ;;  %10020 = vmatmul.mubr.bf16.gmra.mrb[96].mxu1 %v20251_v58  ;;  %11870 = vmatprep.subr.bf16.mxu0 %v16504_v35  ;;  %v8806_v63 = vmax.f32 %v8678_v3, 0.0  ;;  %v16540_v35 = vld [vmem:[#allocation10 + $0x1cc] ss:$16 sps:$4 sm:$0xff]  }
 0x813   : > { %v8683_v40 = vadd.f32 %v20147_v21, %v8519_v6  ;;  %v8807_v0 = vmax.f32 %v8679_v56, 0.0  ;;  %v16543_v6 = vld [vmem:[#allocation10 + $0x1e4] ss:$16 sps:$4 sm:$0xff]  }
 0x814   : > { %v8810_v31 = vmax.f32 %v8682_v7, 0.0  ;;  %10366 = vmatmul.mubr.bf16.gmra.mrb[80].mxu0 %v20203_v43  ;;  %v16514_v43 = vld [vmem:[#allocation10 + $0x148] ss:$16 sps:$4 sm:$0xff]   ;;  %11498 = vmatprep.subr.bf16.mxu1 %v16543_v6 }
 0x815   : > { %v8811_v20 = vmax.f32 %v8683_v40, 0.0  ;;  %10375 = vmatprep.mubr.bf16.mxu0 %v20217_v23  ;;  %11871 = vmatpush1.bf16.msra.mxu0 %v16502_v17 }
 0x816   : > { %v20263_v13 = vpack.c.bf16 %v8810_v31, %v8806_v63  ;;  %11872 = vmatprep.subr.bf16.mxu0 %v16510_v59  ;;  %v16546_v59 = vld [vmem:[#allocation10 + $0x1ec] ss:$16 sps:$4 sm:$0xff]   ;;  %v16541_v63 = vld [vmem:[#allocation10 + $0x1e0] ss:$16 sps:$4 sm:$0xff]  }
 0x817   : > { %v20265_v51 = vpack.c.bf16 %v8811_v20, %v8807_v0  ;;  %v8523_v12 = vpop.f32.mrb[40].mxu0  ;;  %11499 = vmatpush1.bf16.msra.mxu1 %v16541_v63 }
 0x818   : > { %v8686_v46 = vadd.f32 %v20142_v15, %v8523_v12  ;;  %v8525_v5 = vpop.f32.mrb[41].mxu0 }
 0x819   : > { %v8687_v25 = vadd.f32 %v20147_v21, %v8525_v5  ;;  %v8527_v22 = vpop.f32.mrb[42].mxu0  ;;  %10029 = vmatprep.mubr.bf16.mxu1 %v20265_v51  ;;  %11873 = vmatpush1.bf16.msra.mxu0 %v16508_v2 }
 0x81a   : > { %v8690_v23 = vadd.f32 %v20142_v15, %v8527_v22  ;;  %v8529_v47 = vpop.f32.mrb[43].mxu0  ;;  %10030 = vmatmul.mubr.bf16.gmra.mrb[100].mxu1 %v20263_v13  ;;  %11874 = vmatprep.subr.bf16.mxu0 %v16516_v48  ;;  %v8814_v28 = vmax.f32 %v8686_v46, 0.0  ;;  %v16544_v48 = vld [vmem:[#allocation10 + $0x1e8] ss:$16 sps:$4 sm:$0xff]  }
 0x81b   : > { %v8691_v32 = vadd.f32 %v20147_v21, %v8529_v47  ;;  %v8815_v42 = vmax.f32 %v8687_v25, 0.0 }
 0x81c   : > { %v8818_v50 = vmax.f32 %v8690_v23, 0.0  ;;  %10376 = vmatmul.mubr.bf16.gmra.mrb[84].mxu0 %v20215_v45  ;;  %v16526_v45 = vld [vmem:[#allocation10 + $0x188] ss:$16 sps:$4 sm:$0xff]  }
 0x81d   : > { %v8819_v30 = vmax.f32 %v8691_v32, 0.0  ;;  %10385 = vmatprep.mubr.bf16.mxu0 %v20229_v24  ;;  %11875 = vmatpush1.bf16.msra.mxu0 %v16514_v43 }
 0x81e   : > { %v20275_v1 = vpack.c.bf16 %v8818_v50, %v8814_v28  ;;  %11876 = vmatprep.subr.bf16.mxu0 %v16522_v39 }
 0x81f   : > { %v20277_v60 = vpack.c.bf16 %v8819_v30, %v8815_v42  ;;  %v8533_v4 = vpop.f32.mrb[44].mxu0  ;;  %v16549_v42 = vld [vmem:[#allocation10 + $0x204] ss:$16 sps:$4 sm:$0xff]  }
 0x820   : > { %v8694_v41 = vadd.f32 %v20142_v15, %v8533_v4  ;;  %v8535_v61 = vpop.f32.mrb[45].mxu0  ;;  %11661 = vmatprep.subr.bf16.mxu1 %v16549_v42 }
 0x821   : > { %v8695_v38 = vadd.f32 %v20147_v21, %v8535_v61  ;;  %v8537_v49 = vpop.f32.mrb[46].mxu0  ;;  %10039 = vmatprep.mubr.bf16.mxu1 %v20277_v60  ;;  %11877 = vmatpush1.bf16.msra.mxu0 %v16520_v19  ;;  %v16552_v19 = vld [vmem:[#allocation10 + $0x20c] ss:$16 sps:$4 sm:$0xff]  }
 0x822   : > { %v8698_v24 = vadd.f32 %v20142_v15, %v8537_v49  ;;  %v8539_v62 = vpop.f32.mrb[47].mxu0  ;;  %10040 = vmatmul.mubr.bf16.gmra.mrb[104].mxu1 %v20275_v1  ;;  %11878 = vmatprep.subr.bf16.mxu0 %v16528_v34  ;;  %v8822_v37 = vmax.f32 %v8694_v41, 0.0 }
 0x823   : > { %v8699_v53 = vadd.f32 %v20147_v21, %v8539_v62  ;;  %v8823_v29 = vmax.f32 %v8695_v38, 0.0 }
 0x824   : > { %v8826_v11 = vmax.f32 %v8698_v24, 0.0  ;;  %10386 = vmatmul.mubr.bf16.gmra.mrb[88].mxu0 %v20227_v54  ;;  %v16538_v54 = vld [vmem:[#allocation10 + $0x1c8] ss:$16 sps:$4 sm:$0xff]  }
 0x825   : > { %v8827_v9 = vmax.f32 %v8699_v53, 0.0  ;;  %10395 = vmatprep.mubr.bf16.mxu0 %v20241_v16  ;;  %11879 = vmatpush1.bf16.msra.mxu0 %v16526_v45 }
 0x826   : > { %v20287_v27 = vpack.c.bf16 %v8826_v11, %v8822_v37  ;;  %11880 = vmatprep.subr.bf16.mxu0 %v16534_v33 }
 0x827   : > { %v20289_v55 = vpack.c.bf16 %v8827_v9, %v8823_v29  ;;  %v8543_v3 = vpop.f32.mrb[48].mxu0 }
 0x828   : > { %v8702_v10 = vadd.f32 %v20142_v15, %v8543_v3  ;;  %v8545_v56 = vpop.f32.mrb[49].mxu0 }
 0x829   : > { %v8703_v36 = vadd.f32 %v20147_v21, %v8545_v56  ;;  %v8547_v17 = vpop.f32.mrb[50].mxu0  ;;  %10049 = vmatprep.mubr.bf16.mxu1 %v20289_v55  ;;  %11881 = vmatpush1.bf16.msra.mxu0 %v16532_v57 }
 0x82a   : > { %v8706_v16 = vadd.f32 %v20142_v15, %v8547_v17  ;;  %v8549_v7 = vpop.f32.mrb[51].mxu0  ;;  %10050 = vmatmul.mubr.bf16.gmra.mrb[108].mxu1 %v20287_v27  ;;  %11882 = vmatprep.subr.bf16.mxu0 %v16540_v35  ;;  %v8830_v31 = vmax.f32 %v8702_v10, 0.0 }
 0x82b   : > { %v8707_v40 = vadd.f32 %v20147_v21, %v8549_v7  ;;  %v8831_v20 = vmax.f32 %v8703_v36, 0.0 }
 0x82c   : > { %v8834_v0 = vmax.f32 %v8706_v16, 0.0  ;;  %10396 = vmatmul.mubr.bf16.gmra.mrb[92].mxu0 %v20239_v44 }
 0x82d   : > { %v8835_v2 = vmax.f32 %v8707_v40, 0.0  ;;  %10405 = vmatprep.mubr.bf16.mxu0 %v20253_v14  ;;  %11883 = vmatpush1.bf16.msra.mxu0 %v16538_v54 }
 0x82e   : > { %v20299_v12 = vpack.c.bf16 %v8834_v0, %v8830_v31  ;;  %11884 = vmatprep.subr.bf16.mxu0 %v16546_v59 }
 0x82f   : > { %v8911_v46 = vpack.c.bf16 %v8835_v2, %v8831_v20  ;;  %v8553_v5 = vpop.f32.mrb[52].mxu0 }
 0x830   : > { %v8710_v25 = vadd.f32 %v20142_v15, %v8553_v5  ;;  %v8555_v22 = vpop.f32.mrb[53].mxu0 }
 0x831   : > { %v8711_v43 = vadd.f32 %v20147_v21, %v8555_v22  ;;  %v8557_v23 = vpop.f32.mrb[54].mxu0  ;;  %10059 = vmatprep.mubr.bf16.mxu1 %v8911_v46  ;;  %11885 = vmatpush1.bf16.msra.mxu0 %v16544_v48  ;;  %v16547_v22 = vld [vmem:[#allocation10 + $0x200] ss:$16 sps:$4 sm:$0xff]  }
 0x832   : > { %v8714_v44 = vadd.f32 %v20142_v15, %v8557_v23  ;;  %v8559_v47 = vpop.f32.mrb[55].mxu0  ;;  %10060 = vmatmul.mubr.bf16.gmra.mrb[112].mxu1 %v20299_v12  ;;  %v8838_v39 = vmax.f32 %v8710_v25, 0.0  ;;  %12047 = vmatprep.subr.bf16.mxu0 %v16552_v19  ;;  %v16556_v19 = vld [vmem:[#allocation10 + $0x228] ss:$16 sps:$4 sm:$0xff]  }
 0x833   : > { %v8715_v14 = vadd.f32 %v20147_v21, %v8559_v47  ;;  %v8839_v28 = vmax.f32 %v8711_v43, 0.0  ;;  %v16550_v43 = vld [vmem:[#allocation10 + $0x208] ss:$16 sps:$4 sm:$0xff]   ;;  %v16555_v47 = vld [vmem:[#allocation10 + $0x224] ss:$16 sps:$4 sm:$0xff]  }
 0x834   : > { %v8842_v32 = vmax.f32 %v8714_v44, 0.0  ;;  %10406 = vmatmul.mubr.bf16.gmra.mrb[96].mxu0 %v20251_v58 }
 0x835   : > { %v8843_v50 = vmax.f32 %v8715_v14, 0.0  ;;  %10415 = vmatprep.mubr.bf16.mxu0 %v20265_v51  ;;  %v16558_v14 = vld [vmem:[#allocation10 + $0x22c] ss:$16 sps:$4 sm:$0xff]  }
 0x836   : > { %v8914_v30 = vpack.c.bf16 %v8842_v32, %v8838_v39 }
 0x837   : > { %v8915_v34 = vpack.c.bf16 %v8843_v50, %v8839_v28  ;;  %v8563_v4 = vpop.f32.mrb[56].mxu0 }
 0x838   : > { %v8718_v41 = vadd.f32 %v20142_v15, %v8563_v4  ;;  %v8565_v61 = vpop.f32.mrb[57].mxu0 }
 0x839   : > { %v8719_v38 = vadd.f32 %v20147_v21, %v8565_v61  ;;  %v8567_v49 = vpop.f32.mrb[58].mxu0  ;;  %10069 = vmatprep.mubr.bf16.mxu1 %v8915_v34  ;;  %v16564_v61 = vld [vmem:[#allocation10 + $0x24c] ss:$16 sps:$4 sm:$0xff]  }
 0x83a   : > { %v8722_v58 = vadd.f32 %v20142_v15, %v8567_v49  ;;  %v8569_v45 = vpop.f32.mrb[59].mxu0  ;;  %10070 = vmatmul.mubr.bf16.gmra.mrb[116].mxu1 %v8914_v30  ;;  %v8846_v24 = vmax.f32 %v8718_v41, 0.0  ;;  %v16561_v41 = vld [vmem:[#allocation10 + $0x244] ss:$16 sps:$4 sm:$0xff]  }
 0x83b   : > { %v8723_v51 = vadd.f32 %v20147_v21, %v8569_v45  ;;  %v8847_v33 = vmax.f32 %v8719_v38, 0.0 }
 0x83c   : > { %v8850_v62 = vmax.f32 %v8722_v58, 0.0  ;;  %10416 = vmatmul.mubr.bf16.gmra.mrb[100].mxu0 %v20263_v13 }
 0x83d   : > { %v8851_v53 = vmax.f32 %v8723_v51, 0.0  ;;  %10425 = vmatprep.mubr.bf16.mxu0 %v20277_v60 }
 0x83e   : > { %v8918_v37 = vpack.c.bf16 %v8850_v62, %v8846_v24  ;;  %v16559_v24 = vld [vmem:[#allocation10 + $0x240] ss:$16 sps:$4 sm:$0xff]   ;;  %v16562_v62 = vld [vmem:[#allocation10 + $0x248] ss:$16 sps:$4 sm:$0xff]  }
 0x83f   : > { %v8919_v11 = vpack.c.bf16 %v8851_v53, %v8847_v33  ;;  %v8573_v29 = vpop.f32.mrb[60].mxu0 }
 0x840   : > { %v8726_v9 = vadd.f32 %v20142_v15, %v8573_v29  ;;  %v8575_v57 = vpop.f32.mrb[61].mxu0 }
 0x841   : > { %v8727_v35 = vadd.f32 %v20147_v21, %v8575_v57  ;;  %v8577_v3 = vpop.f32.mrb[62].mxu0  ;;  %10079 = vmatprep.mubr.bf16.mxu1 %v8919_v11 }
 0x842   : > { %v8730_v10 = vadd.f32 %v20142_v15, %v8577_v3  ;;  %v8579_v56 = vpop.f32.mrb[63].mxu0  ;;  %10080 = vmatmul.mubr.bf16.gmra.mrb[120].mxu1 %v8918_v37  ;;  %v8854_v36 = vmax.f32 %v8726_v9, 0.0  ;;  %v20325_v15 = vld [vmem:[%s20993_s13] sm:$0xf] }
 0x843   : > { %v8731_v13 = vadd.f32 %v20147_v21, %v8579_v56  ;;  %v8855_v60 = vmax.f32 %v8727_v35, 0.0  ;;  %v20329_v21 = vrot.slane %v20325_v15, %v21254_v52  ;;  %v16568_v56 = vld [vmem:[#allocation10 + $0x268] ss:$16 sps:$4 sm:$0xff]  }
 0x844   : > { %v8858_v17 = vmax.f32 %v8730_v10, 0.0  ;;  %10426 = vmatmul.mubr.bf16.gmra.mrb[104].mxu0 %v20275_v1  ;;  %v20333_v1 = vrot.slane %v20325_v15, %v21255_v26  ;;  %v16565_v10 = vld [vmem:[#allocation10 + $0x260] ss:$16 sps:$4 sm:$0xff]  }
 0x845   : > { %v8859_v54 = vmax.f32 %v8731_v13, 0.0  ;;  %10435 = vmatprep.mubr.bf16.mxu0 %v20289_v55 }
 0x846   : > { %v8922_v16 = vpack.c.bf16 %v8858_v17, %v8854_v36  ;;  %v16573_v17 = vld [vmem:[#allocation10 + $0x284] ss:$16 sps:$4 sm:$0xff]  }
 0x847   : > { %v8923_v7 = vpack.c.bf16 %v8859_v54, %v8855_v60  ;;  %v16576_v60 = vld [vmem:[#allocation10 + $0x28c] ss:$16 sps:$4 sm:$0xff]  }
 0x849   : > { %10089 = vmatprep.mubr.bf16.mxu1 %v8923_v7 }
 0x84a   : > { %10090 = vmatmul.mubr.bf16.gmra.mrb[124].mxu1 %v8922_v16 }
 0x84c   : > { %10436 = vmatmul.mubr.bf16.gmra.mrb[108].mxu0 %v20287_v27 }
 0x84d   : > { %10445 = vmatprep.mubr.bf16.mxu0 %v8911_v46 }
 0x854   : > { %10446 = vmatmul.mubr.bf16.gmra.mrb[112].mxu0 %v20299_v12 }
 0x855   : > { %10455 = vmatprep.mubr.bf16.mxu0 %v8915_v34 }
 0x85c   : > { %10456 = vmatmul.mubr.bf16.gmra.mrb[116].mxu0 %v8914_v30  ;;  %v16553_v30 = vld [vmem:[#allocation10 + $0x220] ss:$16 sps:$4 sm:$0xff]  }
 0x85d   : > { %10465 = vmatprep.mubr.bf16.mxu0 %v8919_v11  ;;  %v16570_v11 = vld [vmem:[#allocation10 + $0x26c] ss:$16 sps:$4 sm:$0xff]  }
 0x864   : > { %10466 = vmatmul.mubr.bf16.gmra.mrb[120].mxu0 %v8918_v37  ;;  %v16567_v37 = vld [vmem:[#allocation10 + $0x264] ss:$16 sps:$4 sm:$0xff]  }
 0x865   : > { %10475 = vmatprep.mubr.bf16.mxu0 %v8923_v7 }
 0x86c   : > { %10476 = vmatmul.mubr.bf16.gmra.mrb[124].mxu0 %v8922_v16 }
 0x8a5   : > { %v9941_v27 = vpop.f32.mrb[64].mxu1 }
 0x8a6   : > { %v14266_v55 = vadd.f32 %v9941_v27, %v20329_v21  ;;  %v9943_v6 = vpop.f32.mrb[65].mxu1 }
 0x8a7   : > { %v14267_v59 = vadd.f32 %v9943_v6, %v20333_v1  ;;  %v9945_v40 = vpop.f32.mrb[66].mxu1  ;;  %v16571_v6 = vld [vmem:[#allocation10 + $0x280] ss:$16 sps:$4 sm:$0xff]  }
 0x8a8   : > { %v14268_v63 = vadd.f32 %v9945_v40, %v20329_v21  ;;  %v9947_v31 = vpop.f32.mrb[67].mxu1  ;;  %v10486_v20 = vmax.f32 %v14266_v55, 0.0 }
 0x8a9   : > { %v14269_v0 = vadd.f32 %v9947_v31, %v20333_v1  ;;  %v10487_v48 = vmax.f32 %v14267_v59, 0.0  ;;  %v16574_v59 = vld [vmem:[#allocation10 + $0x288] ss:$16 sps:$4 sm:$0xff]   ;;  %v16579_v31 = vld [vmem:[#allocation10 + $0x2a4] ss:$16 sps:$4 sm:$0xff]  }
 0x8aa   : > { %v10490_v2 = vmax.f32 %v14268_v63, 0.0 }
 0x8ab   : > { %v10491_v12 = vmax.f32 %v14269_v0, 0.0  ;;  %v16582_v0 = vld [vmem:[#allocation10 + $0x2ac] ss:$16 sps:$4 sm:$0xff]  }
 0x8ac   : > { %v10614_v46 = vpack.c.bf16 %v10490_v2, %v10486_v20 }
 0x8ad   : > { %v10615_v5 = vpack.c.bf16 %v10491_v12, %v10487_v48  ;;  %v9951_v25 = vpop.f32.mrb[68].mxu1 }
 0x8ae   : > { %v14270_v23 = vadd.f32 %v9951_v25, %v20329_v21  ;;  %v9953_v44 = vpop.f32.mrb[69].mxu1  ;;  %v16580_v25 = vld [vmem:[#allocation10 + $0x2a8] ss:$16 sps:$4 sm:$0xff]  }
 0x8af   : > { %v14271_v39 = vadd.f32 %v9953_v44, %v20333_v1  ;;  %v9955_v32 = vpop.f32.mrb[70].mxu1  ;;  %11500 = vmatprep.mubr.bf16.mxu1 %v10615_v5  ;;  %11886 = vmatprep.mubr.bf16.mxu0 %v10615_v5  ;;  %v16577_v5 = vld [vmem:[#allocation10 + $0x2a0] ss:$16 sps:$4 sm:$0xff]   ;;  %v16588_v44 = vld [vmem:[#allocation10 + $0x2cc] ss:$16 sps:$4 sm:$0xff]  }
 0x8b0   : > { %v14272_v28 = vadd.f32 %v9955_v32, %v20329_v21  ;;  %v9957_v50 = vpop.f32.mrb[71].mxu1  ;;  %11501 = vmatmul.mubr.bf16.vlgmr.msra.gmra.mrb[128].mxu1 %v10614_v46  ;;  %11887 = vmatmul.mubr.bf16.vlgmr.msra.gmra.mrb[128].mxu0 %v10614_v46  ;;  %v10494_v34 = vmax.f32 %v14270_v23, 0.0  ;;  %v16585_v23 = vld [vmem:[#allocation10 + $0x2c4] ss:$16 sps:$4 sm:$0xff]   ;;  %v20353_v32 = vrot.slane %v20325_v15, %v21269_v8 }
 0x8b1   : > { %v14273_v42 = vadd.f32 %v9957_v50, %v20333_v1  ;;  %11662 = vmatpush1.bf16.msra.mxu1 %v16547_v22  ;;  %12048 = vmatpush1.bf16.msra.mxu0 %v16550_v43  ;;  %v10495_v38 = vmax.f32 %v14271_v39, 0.0 }
 0x8b2   : > { %v10498_v4 = vmax.f32 %v14272_v28, 0.0  ;;  %11663 = vmatprep.subr.bf16.mxu1 %v16555_v47  ;;  %12049 = vmatprep.subr.bf16.mxu0 %v16558_v14 }
 0x8b3   : > { %v10499_v49 = vmax.f32 %v14273_v42, 0.0  ;;  %v20357_v42 = vrot.slane %v20325_v15, %v21270_v18 }
 0x8b4   : > { %v10618_v58 = vpack.c.bf16 %v10498_v4, %v10494_v34 }
 0x8b5   : > { %v10619_v45 = vpack.c.bf16 %v10499_v49, %v10495_v38  ;;  %v9961_v51 = vpop.f32.mrb[72].mxu1  ;;  %11664 = vmatpush1.bf16.msra.mxu1 %v16553_v30  ;;  %12050 = vmatpush1.bf16.msra.mxu0 %v16556_v19  ;;  %v16583_v30 = vld [vmem:[#allocation10 + $0x2c0] ss:$16 sps:$4 sm:$0xff]   ;;  %v16586_v19 = vld [vmem:[#allocation10 + $0x2c8] ss:$16 sps:$4 sm:$0xff]  }
 0x8b6   : > { %v14274_v33 = vadd.f32 %v9961_v51, %v20329_v21  ;;  %v9963_v53 = vpop.f32.mrb[73].mxu1  ;;  %11665 = vmatprep.subr.bf16.mxu1 %v16561_v41  ;;  %12051 = vmatprep.subr.bf16.mxu0 %v16564_v61  ;;  %v16591_v41 = vld [vmem:[#allocation10 + $0x2e4] ss:$16 sps:$4 sm:$0xff]   ;;  %v16594_v61 = vld [vmem:[#allocation10 + $0x2ec] ss:$16 sps:$4 sm:$0xff]  }
 0x8b7   : > { %v14275_v29 = vadd.f32 %v9963_v53, %v20333_v1  ;;  %v9965_v9 = vpop.f32.mrb[74].mxu1  ;;  %11510 = vmatprep.mubr.bf16.mxu1 %v10619_v45  ;;  %11896 = vmatprep.mubr.bf16.mxu0 %v10619_v45 }
 0x8b8   : > { %v14276_v57 = vadd.f32 %v9965_v9, %v20329_v21  ;;  %v9967_v35 = vpop.f32.mrb[75].mxu1  ;;  %11511 = vmatmul.mubr.bf16.gmra.mrb[132].mxu1 %v10618_v58  ;;  %11897 = vmatmul.mubr.bf16.gmra.mrb[132].mxu0 %v10618_v58  ;;  %v10502_v13 = vmax.f32 %v14274_v33, 0.0 }
 0x8b9   : > { %v14277_v3 = vadd.f32 %v9967_v35, %v20333_v1  ;;  %11666 = vmatpush1.bf16.msra.mxu1 %v16559_v24  ;;  %12052 = vmatpush1.bf16.msra.mxu0 %v16562_v62  ;;  %v10503_v54 = vmax.f32 %v14275_v29, 0.0  ;;  %v16589_v62 = vld [vmem:[#allocation10 + $0x2e0] ss:$16 sps:$4 sm:$0xff]   ;;  %v16597_v29 = vld [vmem:[#allocation10 + $0x304] ss:$16 sps:$4 sm:$0xff]  }
 0x8ba   : > { %v10506_v36 = vmax.f32 %v14276_v57, 0.0  ;;  %11667 = vmatprep.subr.bf16.mxu1 %v16567_v37  ;;  %12053 = vmatprep.subr.bf16.mxu0 %v16570_v11  ;;  %v16592_v11 = vld [vmem:[#allocation10 + $0x2e8] ss:$16 sps:$4 sm:$0xff]  }
 0x8bb   : > { %v10507_v16 = vmax.f32 %v14277_v3, 0.0 }
 0x8bc   : > { %v10622_v7 = vpack.c.bf16 %v10506_v36, %v10502_v13 }
 0x8bd   : > { %v10623_v27 = vpack.c.bf16 %v10507_v16, %v10503_v54  ;;  %v9971_v55 = vpop.f32.mrb[76].mxu1  ;;  %11668 = vmatpush1.bf16.msra.mxu1 %v16565_v10  ;;  %12054 = vmatpush1.bf16.msra.mxu0 %v16568_v56  ;;  %v16600_v10 = vld [vmem:[#allocation10 + $0x30c] ss:$16 sps:$4 sm:$0xff]   ;;  %v16595_v16 = vld [vmem:[#allocation10 + $0x300] ss:$16 sps:$4 sm:$0xff]  }
 0x8be   : > { %v14278_v40 = vadd.f32 %v9971_v55, %v20329_v21  ;;  %v9973_v63 = vpop.f32.mrb[77].mxu1  ;;  %11669 = vmatprep.subr.bf16.mxu1 %v16573_v17  ;;  %12055 = vmatprep.subr.bf16.mxu0 %v16576_v60 }
 0x8bf   : > { %v14279_v20 = vadd.f32 %v9973_v63, %v20333_v1  ;;  %v9975_v2 = vpop.f32.mrb[78].mxu1  ;;  %11520 = vmatprep.mubr.bf16.mxu1 %v10623_v27  ;;  %11906 = vmatprep.mubr.bf16.mxu0 %v10623_v27 }
 0x8c0   : > { %v14280_v48 = vadd.f32 %v9975_v2, %v20329_v21  ;;  %v9977_v12 = vpop.f32.mrb[79].mxu1  ;;  %11521 = vmatmul.mubr.bf16.gmra.mrb[136].mxu1 %v10622_v7  ;;  %11907 = vmatmul.mubr.bf16.gmra.mrb[136].mxu0 %v10622_v7  ;;  %v10510_v22 = vmax.f32 %v14278_v40, 0.0 }
 0x8c1   : > { %v14281_v46 = vadd.f32 %v9977_v12, %v20333_v1  ;;  %11670 = vmatpush1.bf16.msra.mxu1 %v16571_v6  ;;  %12056 = vmatpush1.bf16.msra.mxu0 %v16574_v59  ;;  %v10511_v47 = vmax.f32 %v14279_v20, 0.0  ;;  %v16598_v59 = vld [vmem:[#allocation10 + $0x308] ss:$16 sps:$4 sm:$0xff]   ;;  %v16606_v20 = vld [vmem:[#allocation10 + $0x32c] ss:$16 sps:$4 sm:$0xff]  }
 0x8c2   : > { %v10514_v43 = vmax.f32 %v14280_v48, 0.0  ;;  %11671 = vmatprep.subr.bf16.mxu1 %v16579_v31  ;;  %12057 = vmatprep.subr.bf16.mxu0 %v16582_v0  ;;  %v16603_v0 = vld [vmem:[#allocation10 + $0x324] ss:$16 sps:$4 sm:$0xff]  }
 0x8c3   : > { %v10515_v14 = vmax.f32 %v14281_v46, 0.0 }
 0x8c4   : > { %v10626_v39 = vpack.c.bf16 %v10514_v43, %v10510_v22 }
 0x8c5   : > { %v10627_v28 = vpack.c.bf16 %v10515_v14, %v10511_v47  ;;  %v9981_v50 = vpop.f32.mrb[80].mxu1  ;;  %11672 = vmatpush1.bf16.msra.mxu1 %v16577_v5  ;;  %12058 = vmatpush1.bf16.msra.mxu0 %v16580_v25 }
 0x8c6   : > { %v14282_v34 = vadd.f32 %v9981_v50, %v20329_v21  ;;  %v9983_v4 = vpop.f32.mrb[81].mxu1  ;;  %11673 = vmatprep.subr.bf16.mxu1 %v16585_v23  ;;  %12059 = vmatprep.subr.bf16.mxu0 %v16588_v44  ;;  %v16601_v23 = vld [vmem:[#allocation10 + $0x320] ss:$16 sps:$4 sm:$0xff]  }
 0x8c7   : > { %v14283_v38 = vadd.f32 %v9983_v4, %v20333_v1  ;;  %v9985_v49 = vpop.f32.mrb[82].mxu1  ;;  %v10327_v58 = vpop.f32.mrb[64].mxu0  ;;  %11530 = vmatprep.mubr.bf16.mxu1 %v10627_v28  ;;  %11916 = vmatprep.mubr.bf16.mxu0 %v10627_v28  ;;  %v16609_v28 = vld [vmem:[#allocation10 + $0x344] ss:$16 sps:$4 sm:$0xff]   ;;  %v16612_v4 = vld [vmem:[#allocation10 + $0x34c] ss:$16 sps:$4 sm:$0xff]  }
 0x8c8   : > { %v14284_v15 = vadd.f32 %v9985_v49, %v20329_v21  ;;  %v14330_v45 = vadd.f32 %v10327_v58, %v20353_v32  ;;  %v9987_v51 = vpop.f32.mrb[83].mxu1  ;;  %v10329_v24 = vpop.f32.mrb[65].mxu0  ;;  %11531 = vmatmul.mubr.bf16.gmra.mrb[140].mxu1 %v10626_v39  ;;  %11917 = vmatmul.mubr.bf16.gmra.mrb[140].mxu0 %v10626_v39  ;;  %v10518_v9 = vmax.f32 %v14282_v34, 0.0  ;;  %v16604_v39 = vld [vmem:[#allocation10 + $0x328] ss:$16 sps:$4 sm:$0xff]  }
 0x8c9   : > { %v14285_v33 = vadd.f32 %v9987_v51, %v20333_v1  ;;  %v14331_v53 = vadd.f32 %v10329_v24, %v20357_v42  ;;  %v10331_v37 = vpop.f32.mrb[66].mxu0  ;;  %11674 = vmatpush1.bf16.msra.mxu1 %v16583_v30  ;;  %12060 = vmatpush1.bf16.msra.mxu0 %v16586_v19  ;;  %v10519_v56 = vmax.f32 %v14283_v38, 0.0 }
 0x8ca   : > { %v10522_v57 = vmax.f32 %v14284_v15, 0.0  ;;  %v14332_v35 = vadd.f32 %v10331_v37, %v20353_v32  ;;  %v10333_v3 = vpop.f32.mrb[67].mxu0  ;;  %11675 = vmatprep.subr.bf16.mxu1 %v16591_v41  ;;  %12061 = vmatprep.subr.bf16.mxu0 %v16594_v61  ;;  %v10488_v60 = vmax.f32 %v14330_v45, 0.0  ;;  %v16607_v45 = vld [vmem:[#allocation10 + $0x340] ss:$16 sps:$4 sm:$0xff]  }
 0x8cb   : > { %v10523_v13 = vmax.f32 %v14285_v33, 0.0  ;;  %v14333_v36 = vadd.f32 %v10333_v3, %v20357_v42  ;;  %v10489_v27 = vmax.f32 %v14331_v53, 0.0  ;;  %v16610_v53 = vld [vmem:[#allocation10 + $0x348] ss:$16 sps:$4 sm:$0xff]  }
 0x8cc   : > { %v10630_v17 = vpack.c.bf16 %v10522_v57, %v10518_v9  ;;  %v10492_v54 = vmax.f32 %v14332_v35, 0.0  ;;  %v16615_v9 = vld [vmem:[#allocation10 + $0x364] ss:$16 sps:$4 sm:$0xff]   ;;  %v16618_v57 = vld [vmem:[#allocation10 + $0x36c] ss:$16 sps:$4 sm:$0xff]  }
 0x8cd   : > { %v10631_v7 = vpack.c.bf16 %v10523_v13, %v10519_v56  ;;  %v10493_v55 = vmax.f32 %v14333_v36, 0.0  ;;  %v9991_v6 = vpop.f32.mrb[84].mxu1  ;;  %11676 = vmatpush1.bf16.msra.mxu1 %v16589_v62  ;;  %12062 = vmatpush1.bf16.msra.mxu0 %v16592_v11 }
 0x8ce   : > { %v20367_v40 = vpack.c.bf16 %v10492_v54, %v10488_v60  ;;  %v14286_v63 = vadd.f32 %v9991_v6, %v20329_v21  ;;  %v9993_v31 = vpop.f32.mrb[85].mxu1  ;;  %11677 = vmatprep.subr.bf16.mxu1 %v16597_v29  ;;  %12063 = vmatprep.subr.bf16.mxu0 %v16600_v10  ;;  %v16613_v54 = vld [vmem:[#allocation10 + $0x360] ss:$16 sps:$4 sm:$0xff]   ;;  %v16621_v6 = vld [vmem:[#allocation10 + $0x384] ss:$16 sps:$4 sm:$0xff]  }
 0x8cf   : > { %v20370_v2 = vpack.c.bf16 %v10493_v55, %v10489_v27  ;;  %v14287_v48 = vadd.f32 %v9993_v31, %v20333_v1  ;;  %v9995_v12 = vpop.f32.mrb[86].mxu1  ;;  %v10337_v46 = vpop.f32.mrb[68].mxu0  ;;  %11540 = vmatprep.mubr.bf16.mxu1 %v10631_v7  ;;  %11926 = vmatprep.mubr.bf16.mxu0 %v10631_v7  ;;  %v16616_v55 = vld [vmem:[#allocation10 + $0x368] ss:$16 sps:$4 sm:$0xff]  }
 0x8d0   : > { %v14288_v5 = vadd.f32 %v9995_v12, %v20329_v21  ;;  %v14334_v25 = vadd.f32 %v10337_v46, %v20353_v32  ;;  %v9997_v22 = vpop.f32.mrb[87].mxu1  ;;  %v10339_v43 = vpop.f32.mrb[69].mxu0  ;;  %11541 = vmatmul.mubr.bf16.gmra.mrb[144].mxu1 %v10630_v17  ;;  %11927 = vmatmul.mubr.bf16.gmra.mrb[144].mxu0 %v10630_v17  ;;  %v10526_v50 = vmax.f32 %v14286_v63, 0.0 }
 0x8d1   : > { %v14289_v44 = vadd.f32 %v9997_v22, %v20333_v1  ;;  %v14335_v47 = vadd.f32 %v10339_v43, %v20357_v42  ;;  %v10341_v14 = vpop.f32.mrb[70].mxu0  ;;  %11678 = vmatpush1.bf16.msra.mxu1 %v16595_v16  ;;  %12064 = vmatpush1.bf16.msra.mxu0 %v16598_v59  ;;  %v10527_v41 = vmax.f32 %v14287_v48, 0.0  ;;  %v16619_v43 = vld [vmem:[#allocation10 + $0x380] ss:$16 sps:$4 sm:$0xff]  }
 0x8d2   : > { %v10530_v30 = vmax.f32 %v14288_v5, 0.0  ;;  %v14336_v19 = vadd.f32 %v10341_v14, %v20353_v32  ;;  %v10343_v34 = vpop.f32.mrb[71].mxu0  ;;  %11679 = vmatprep.subr.bf16.mxu1 %v16603_v0  ;;  %12065 = vmatprep.subr.bf16.mxu0 %v16606_v20  ;;  %v10496_v58 = vmax.f32 %v14334_v25, 0.0  ;;  %v16624_v20 = vld [vmem:[#allocation10 + $0x38c] ss:$16 sps:$4 sm:$0xff]  }
 0x8d3   : > { %v10531_v61 = vmax.f32 %v14289_v44, 0.0  ;;  %v14337_v38 = vadd.f32 %v10343_v34, %v20357_v42  ;;  %v10497_v24 = vmax.f32 %v14335_v47, 0.0  ;;  %v16630_v34 = vld [vmem:[#allocation10 + $0x3ac] ss:$16 sps:$4 sm:$0xff]  }
 0x8d4   : > { %v10634_v49 = vpack.c.bf16 %v10530_v30, %v10526_v50  ;;  %v10500_v15 = vmax.f32 %v14336_v19, 0.0  ;;  %v16627_v19 = vld [vmem:[#allocation10 + $0x3a4] ss:$16 sps:$4 sm:$0xff]  }
 0x8d5   : > { %v10635_v51 = vpack.c.bf16 %v10531_v61, %v10527_v41  ;;  %v10501_v62 = vmax.f32 %v14337_v38, 0.0  ;;  %v10001_v33 = vpop.f32.mrb[88].mxu1  ;;  %11680 = vmatpush1.bf16.msra.mxu1 %v16601_v23  ;;  %12066 = vmatpush1.bf16.msra.mxu0 %v16604_v39  ;;  %v16622_v39 = vld [vmem:[#allocation10 + $0x388] ss:$16 sps:$4 sm:$0xff]  }
 0x8d6   : > { %v20379_v37 = vpack.c.bf16 %v10500_v15, %v10496_v58  ;;  %v14290_v11 = vadd.f32 %v10001_v33, %v20329_v21  ;;  %v10003_v29 = vpop.f32.mrb[89].mxu1  ;;  %11681 = vmatprep.subr.bf16.mxu1 %v16609_v28  ;;  %12067 = vmatprep.subr.bf16.mxu0 %v16612_v4 }
 0x8d7   : > { %v20382_v35 = vpack.c.bf16 %v10501_v62, %v10497_v24  ;;  %v14291_v3 = vadd.f32 %v10003_v29, %v20333_v1  ;;  %v10005_v10 = vpop.f32.mrb[90].mxu1  ;;  %v10347_v56 = vpop.f32.mrb[72].mxu0  ;;  %11550 = vmatprep.mubr.bf16.mxu1 %v10635_v51  ;;  %11936 = vmatprep.mubr.bf16.mxu0 %v10635_v51  ;;  %v16625_v51 = vld [vmem:[#allocation10 + $0x3a0] ss:$16 sps:$4 sm:$0xff]  }
 0x8d8   : > { %v14292_v13 = vadd.f32 %v10005_v10, %v20329_v21  ;;  %v14338_v36 = vadd.f32 %v10347_v56, %v20353_v32  ;;  %v10007_v17 = vpop.f32.mrb[91].mxu1  ;;  %v10349_v60 = vpop.f32.mrb[73].mxu0  ;;  %11551 = vmatmul.mubr.bf16.gmra.mrb[148].mxu1 %v10634_v49  ;;  %11937 = vmatmul.mubr.bf16.gmra.mrb[148].mxu0 %v10634_v49  ;;  %v10534_v59 = vmax.f32 %v14290_v11, 0.0  ;;  %v16633_v11 = vld [vmem:[#allocation10 + $0x3c4] ss:$16 sps:$4 sm:$0xff]  }
 0x8d9   : > { %v14293_v16 = vadd.f32 %v10007_v17, %v20333_v1  ;;  %v14339_v7 = vadd.f32 %v10349_v60, %v20357_v42  ;;  %v10351_v27 = vpop.f32.mrb[74].mxu0  ;;  %11682 = vmatpush1.bf16.msra.mxu1 %v16607_v45  ;;  %12068 = vmatpush1.bf16.msra.mxu0 %v16610_v53  ;;  %v10535_v48 = vmax.f32 %v14291_v3, 0.0  ;;  %v16628_v53 = vld [vmem:[#allocation10 + $0x3a8] ss:$16 sps:$4 sm:$0xff]   ;;  %v16636_v10 = vld [vmem:[#allocation10 + $0x3cc] ss:$16 sps:$4 sm:$0xff]  }
 0x8da   : > { %v10538_v63 = vmax.f32 %v14292_v13, 0.0  ;;  %v14340_v31 = vadd.f32 %v10351_v27, %v20353_v32  ;;  %v10353_v0 = vpop.f32.mrb[75].mxu0  ;;  %11683 = vmatprep.subr.bf16.mxu1 %v16615_v9  ;;  %12069 = vmatprep.subr.bf16.mxu0 %v16618_v57  ;;  %v10504_v25 = vmax.f32 %v14338_v36, 0.0 }
 0x8db   : > { %v10539_v12 = vmax.f32 %v14293_v16, 0.0  ;;  %v14341_v46 = vadd.f32 %v10353_v0, %v20357_v42  ;;  %v10505_v44 = vmax.f32 %v14339_v7, 0.0  ;;  %v16631_v16 = vld [vmem:[#allocation10 + $0x3c0] ss:$16 sps:$4 sm:$0xff]  }
 0x8dc   : > { %v10638_v5 = vpack.c.bf16 %v10538_v63, %v10534_v59  ;;  %v10508_v22 = vmax.f32 %v14340_v31, 0.0  ;;  %v16634_v59 = vld [vmem:[#allocation10 + $0x3c8] ss:$16 sps:$4 sm:$0xff]  }
 0x8dd   : > { %v10639_v23 = vpack.c.bf16 %v10539_v12, %v10535_v48  ;;  %v10509_v47 = vmax.f32 %v14341_v46, 0.0  ;;  %v10011_v14 = vpop.f32.mrb[92].mxu1  ;;  %11684 = vmatpush1.bf16.msra.mxu1 %v16613_v54  ;;  %12070 = vmatpush1.bf16.msra.mxu0 %v16616_v55  ;;  %v16642_v48 = vld [vmem:[#allocation10 + $0x3ec] ss:$16 sps:$4 sm:$0xff]  }
 0x8de   : > { %v20391_v28 = vpack.c.bf16 %v10508_v22, %v10504_v25  ;;  %v14294_v50 = vadd.f32 %v10011_v14, %v20329_v21  ;;  %v10013_v30 = vpop.f32.mrb[93].mxu1  ;;  %11685 = vmatprep.subr.bf16.mxu1 %v16621_v6  ;;  %12071 = vmatprep.subr.bf16.mxu0 %v16624_v20  ;;  %v16639_v20 = vld [vmem:[#allocation10 + $0x3e4] ss:$16 sps:$4 sm:$0xff]  }
 0x8df   : > { %v20394_v4 = vpack.c.bf16 %v10509_v47, %v10505_v44  ;;  %v14295_v41 = vadd.f32 %v10013_v30, %v20333_v1  ;;  %v10015_v61 = vpop.f32.mrb[94].mxu1  ;;  %v10357_v38 = vpop.f32.mrb[76].mxu0  ;;  %11560 = vmatprep.mubr.bf16.mxu1 %v10639_v23  ;;  %11946 = vmatprep.mubr.bf16.mxu0 %v10639_v23  ;;  %v16640_v30 = vld [vmem:[#allocation10 + $0x3e8] ss:$16 sps:$4 sm:$0xff]  }
 0x8e0   : > { %v14296_v49 = vadd.f32 %v10015_v61, %v20329_v21  ;;  %v14342_v58 = vadd.f32 %v10357_v38, %v20353_v32  ;;  %v10017_v15 = vpop.f32.mrb[95].mxu1  ;;  %v10359_v45 = vpop.f32.mrb[77].mxu0  ;;  %11561 = vmatmul.mubr.bf16.gmra.mrb[152].mxu1 %v10638_v5  ;;  %11947 = vmatmul.mubr.bf16.gmra.mrb[152].mxu0 %v10638_v5  ;;  %v10542_v29 = vmax.f32 %v14294_v50, 0.0  ;;  %v16637_v50 = vld [vmem:[#allocation10 + $0x3e0] ss:$16 sps:$4 sm:$0xff]  }
 0x8e1   : > { %v14297_v24 = vadd.f32 %v10017_v15, %v20333_v1  ;;  %v14343_v62 = vadd.f32 %v10359_v45, %v20357_v42  ;;  %v10361_v33 = vpop.f32.mrb[78].mxu0  ;;  %11686 = vmatpush1.bf16.msra.mxu1 %v16619_v43  ;;  %12072 = vmatpush1.bf16.msra.mxu0 %v16622_v39  ;;  %v10543_v56 = vmax.f32 %v14295_v41, 0.0 }
 0x8e2   : > { %v10546_v9 = vmax.f32 %v14296_v49, 0.0  ;;  %v14344_v57 = vadd.f32 %v10361_v33, %v20353_v32  ;;  %v10363_v3 = vpop.f32.mrb[79].mxu0  ;;  %11687 = vmatprep.subr.bf16.mxu1 %v16627_v19  ;;  %12073 = vmatprep.subr.bf16.mxu0 %v16630_v34  ;;  %v10512_v60 = vmax.f32 %v14342_v58, 0.0 }
 0x8e3   : > { %v10547_v13 = vmax.f32 %v14297_v24, 0.0  ;;  %v14345_v36 = vadd.f32 %v10363_v3, %v20357_v42  ;;  %v10513_v27 = vmax.f32 %v14343_v62, 0.0 }
 0x8e4   : > { %v10642_v17 = vpack.c.bf16 %v10546_v9, %v10542_v29  ;;  %v10516_v54 = vmax.f32 %v14344_v57, 0.0 }
 0x8e5   : > { %v10643_v7 = vpack.c.bf16 %v10547_v13, %v10543_v56  ;;  %v10517_v55 = vmax.f32 %v14345_v36, 0.0  ;;  %v10021_v6 = vpop.f32.mrb[96].mxu1  ;;  %11688 = vmatpush1.bf16.msra.mxu1 %v16625_v51  ;;  %12074 = vmatpush1.bf16.msra.mxu0 %v16628_v53 }
 0x8e6   : > { %v20403_v63 = vpack.c.bf16 %v10516_v54, %v10512_v60  ;;  %v14298_v31 = vadd.f32 %v10021_v6, %v20329_v21  ;;  %v10023_v0 = vpop.f32.mrb[97].mxu1  ;;  %11689 = vmatprep.subr.bf16.mxu1 %v16633_v11  ;;  %12075 = vmatprep.subr.bf16.mxu0 %v16636_v10 }
 0x8e7   : > { %v20406_v12 = vpack.c.bf16 %v10517_v55, %v10513_v27  ;;  %v14299_v46 = vadd.f32 %v10023_v0, %v20333_v1  ;;  %v10025_v5 = vpop.f32.mrb[98].mxu1  ;;  %v10367_v25 = vpop.f32.mrb[80].mxu0  ;;  %11570 = vmatprep.mubr.bf16.mxu1 %v10643_v7  ;;  %11956 = vmatprep.mubr.bf16.mxu0 %v10643_v7 }
 0x8e8   : > { %v14300_v22 = vadd.f32 %v10025_v5, %v20329_v21  ;;  %v14346_v43 = vadd.f32 %v10367_v25, %v20353_v32  ;;  %v10027_v23 = vpop.f32.mrb[99].mxu1  ;;  %v10369_v44 = vpop.f32.mrb[81].mxu0  ;;  %11571 = vmatmul.mubr.bf16.gmra.mrb[156].mxu1 %v10642_v17  ;;  %11957 = vmatmul.mubr.bf16.gmra.mrb[156].mxu0 %v10642_v17  ;;  %v10550_v19 = vmax.f32 %v14298_v31, 0.0 }
 0x8e9   : > { %v14301_v47 = vadd.f32 %v10027_v23, %v20333_v1  ;;  %v14347_v14 = vadd.f32 %v10369_v44, %v20357_v42  ;;  %v10371_v39 = vpop.f32.mrb[82].mxu0  ;;  %11690 = vmatpush1.bf16.msra.mxu1 %v16631_v16  ;;  %12076 = vmatpush1.bf16.msra.mxu0 %v16634_v59  ;;  %v10551_v38 = vmax.f32 %v14299_v46, 0.0 }
 0x8ea   : > { %v10554_v34 = vmax.f32 %v14300_v22, 0.0  ;;  %v14348_v41 = vadd.f32 %v10371_v39, %v20353_v32  ;;  %v10373_v61 = vpop.f32.mrb[83].mxu0  ;;  %11691 = vmatprep.subr.bf16.mxu1 %v16639_v20  ;;  %12077 = vmatprep.subr.bf16.mxu0 %v16642_v48  ;;  %v10520_v45 = vmax.f32 %v14346_v43, 0.0 }
 0x8eb   : > { %v10555_v49 = vmax.f32 %v14301_v47, 0.0  ;;  %v14349_v58 = vadd.f32 %v10373_v61, %v20357_v42  ;;  %v10521_v62 = vmax.f32 %v14347_v14, 0.0 }
 0x8ec   : > { %v10646_v15 = vpack.c.bf16 %v10554_v34, %v10550_v19  ;;  %v10524_v51 = vmax.f32 %v14348_v41, 0.0 }
 0x8ed   : > { %v10647_v24 = vpack.c.bf16 %v10555_v49, %v10551_v38  ;;  %v10525_v33 = vmax.f32 %v14349_v58, 0.0  ;;  %v10031_v53 = vpop.f32.mrb[100].mxu1  ;;  %11692 = vmatpush1.bf16.msra.mxu1 %v16637_v50  ;;  %12078 = vmatpush1.bf16.msra.mxu0 %v16640_v30 }
 0x8ee   : > { %v20415_v11 = vpack.c.bf16 %v10524_v51, %v10520_v45  ;;  %v14302_v29 = vadd.f32 %v10031_v53, %v20329_v21  ;;  %v10033_v9 = vpop.f32.mrb[101].mxu1 }
 0x8ef   : > { %v20418_v57 = vpack.c.bf16 %v10525_v33, %v10521_v62  ;;  %v14303_v3 = vadd.f32 %v10033_v9, %v20333_v1  ;;  %v10035_v10 = vpop.f32.mrb[102].mxu1  ;;  %v10377_v56 = vpop.f32.mrb[84].mxu0  ;;  %11580 = vmatprep.mubr.bf16.mxu1 %v10647_v24  ;;  %11966 = vmatprep.mubr.bf16.mxu0 %v10647_v24 }
 0x8f0   : > { %v14304_v13 = vadd.f32 %v10035_v10, %v20329_v21  ;;  %v14350_v36 = vadd.f32 %v10377_v56, %v20353_v32  ;;  %v10037_v17 = vpop.f32.mrb[103].mxu1  ;;  %v10379_v60 = vpop.f32.mrb[85].mxu0  ;;  %11581 = vmatmul.mubr.bf16.gmra.mrb[160].mxu1 %v10646_v15  ;;  %11967 = vmatmul.mubr.bf16.gmra.mrb[160].mxu0 %v10646_v15  ;;  %v10558_v27 = vmax.f32 %v14302_v29, 0.0 }
 0x8f1   : > { %v14305_v54 = vadd.f32 %v10037_v17, %v20333_v1  ;;  %v14351_v16 = vadd.f32 %v10379_v60, %v20357_v42  ;;  %v10381_v7 = vpop.f32.mrb[86].mxu0  ;;  %v10559_v31 = vmax.f32 %v14303_v3, 0.0 }
 0x8f2   : > { %v10562_v55 = vmax.f32 %v14304_v13, 0.0  ;;  %v14352_v6 = vadd.f32 %v10381_v7, %v20353_v32  ;;  %v10383_v59 = vpop.f32.mrb[87].mxu0  ;;  %v10528_v46 = vmax.f32 %v14350_v36, 0.0 }
 0x8f3   : > { %v10563_v0 = vmax.f32 %v14305_v54, 0.0  ;;  %v14353_v20 = vadd.f32 %v10383_v59, %v20357_v42  ;;  %v10529_v22 = vmax.f32 %v14351_v16, 0.0 }
 0x8f4   : > { %v10650_v48 = vpack.c.bf16 %v10562_v55, %v10558_v27  ;;  %v10532_v5 = vmax.f32 %v14352_v6, 0.0 }
 0x8f5   : > { %v10651_v25 = vpack.c.bf16 %v10563_v0, %v10559_v31  ;;  %v10533_v43 = vmax.f32 %v14353_v20, 0.0  ;;  %v10041_v23 = vpop.f32.mrb[104].mxu1 }
 0x8f6   : > { %v20427_v44 = vpack.c.bf16 %v10532_v5, %v10528_v46  ;;  %v14306_v47 = vadd.f32 %v10041_v23, %v20329_v21  ;;  %v10043_v14 = vpop.f32.mrb[105].mxu1 }
 0x8f7   : > { %v20430_v39 = vpack.c.bf16 %v10533_v43, %v10529_v22  ;;  %v14307_v50 = vadd.f32 %v10043_v14, %v20333_v1  ;;  %v10045_v30 = vpop.f32.mrb[106].mxu1  ;;  %v10387_v19 = vpop.f32.mrb[88].mxu0  ;;  %11590 = vmatprep.mubr.bf16.mxu1 %v10651_v25  ;;  %11976 = vmatprep.mubr.bf16.mxu0 %v10651_v25 }
 0x8f8   : > { %v14308_v34 = vadd.f32 %v10045_v30, %v20329_v21  ;;  %v14354_v41 = vadd.f32 %v10387_v19, %v20353_v32  ;;  %v10047_v61 = vpop.f32.mrb[107].mxu1  ;;  %v10389_v38 = vpop.f32.mrb[89].mxu0  ;;  %11591 = vmatmul.mubr.bf16.gmra.mrb[164].mxu1 %v10650_v48  ;;  %11977 = vmatmul.mubr.bf16.gmra.mrb[164].mxu0 %v10650_v48  ;;  %v10566_v45 = vmax.f32 %v14306_v47, 0.0 }
 0x8f9   : > { %v14309_v49 = vadd.f32 %v10047_v61, %v20333_v1  ;;  %v14355_v58 = vadd.f32 %v10389_v38, %v20357_v42  ;;  %v10391_v15 = vpop.f32.mrb[90].mxu0  ;;  %v10567_v33 = vmax.f32 %v14307_v50, 0.0 }
 0x8fa   : > { %v10570_v51 = vmax.f32 %v14308_v34, 0.0  ;;  %v14356_v24 = vadd.f32 %v10391_v15, %v20353_v32  ;;  %v10393_v62 = vpop.f32.mrb[91].mxu0  ;;  %v10536_v3 = vmax.f32 %v14354_v41, 0.0 }
 0x8fb   : > { %v10571_v53 = vmax.f32 %v14309_v49, 0.0  ;;  %v14357_v29 = vadd.f32 %v10393_v62, %v20357_v42  ;;  %v10537_v13 = vmax.f32 %v14355_v58, 0.0 }
 0x8fc   : > { %v10654_v9 = vpack.c.bf16 %v10570_v51, %v10566_v45  ;;  %v10540_v10 = vmax.f32 %v14356_v24, 0.0 }
 0x8fd   : > { %v10655_v56 = vpack.c.bf16 %v10571_v53, %v10567_v33  ;;  %v10541_v36 = vmax.f32 %v14357_v29, 0.0  ;;  %v10051_v17 = vpop.f32.mrb[108].mxu1 }
 0x8fe   : > { %v20439_v60 = vpack.c.bf16 %v10540_v10, %v10536_v3  ;;  %v14310_v54 = vadd.f32 %v10051_v17, %v20329_v21  ;;  %v10053_v16 = vpop.f32.mrb[109].mxu1 }
 0x8ff   : > { %v20442_v7 = vpack.c.bf16 %v10541_v36, %v10537_v13  ;;  %v14311_v27 = vadd.f32 %v10053_v16, %v20333_v1  ;;  %v10055_v55 = vpop.f32.mrb[110].mxu1  ;;  %v10397_v6 = vpop.f32.mrb[92].mxu0  ;;  %11600 = vmatprep.mubr.bf16.mxu1 %v10655_v56  ;;  %11986 = vmatprep.mubr.bf16.mxu0 %v10655_v56 }
 0x900   : > { %v14312_v59 = vadd.f32 %v10055_v55, %v20329_v21  ;;  %v14358_v31 = vadd.f32 %v10397_v6, %v20353_v32  ;;  %v10057_v0 = vpop.f32.mrb[111].mxu1  ;;  %v10399_v20 = vpop.f32.mrb[93].mxu0  ;;  %11601 = vmatmul.mubr.bf16.gmra.mrb[168].mxu1 %v10654_v9  ;;  %11987 = vmatmul.mubr.bf16.gmra.mrb[168].mxu0 %v10654_v9  ;;  %v10574_v25 = vmax.f32 %v14310_v54, 0.0 }
 0x901   : > { %v14313_v48 = vadd.f32 %v10057_v0, %v20333_v1  ;;  %v14359_v46 = vadd.f32 %v10399_v20, %v20357_v42  ;;  %v10401_v5 = vpop.f32.mrb[94].mxu0  ;;  %v10575_v47 = vmax.f32 %v14311_v27, 0.0 }
 0x902   : > { %v10578_v22 = vmax.f32 %v14312_v59, 0.0  ;;  %v14360_v43 = vadd.f32 %v10401_v5, %v20353_v32  ;;  %v10403_v23 = vpop.f32.mrb[95].mxu0  ;;  %v10544_v19 = vmax.f32 %v14358_v31, 0.0 }
 0x903   : > { %v10579_v14 = vmax.f32 %v14313_v48, 0.0  ;;  %v14361_v50 = vadd.f32 %v10403_v23, %v20357_v42  ;;  %v10545_v61 = vmax.f32 %v14359_v46, 0.0 }
 0x904   : > { %v10658_v30 = vpack.c.bf16 %v10578_v22, %v10574_v25  ;;  %v10548_v34 = vmax.f32 %v14360_v43, 0.0 }
 0x905   : > { %v10659_v41 = vpack.c.bf16 %v10579_v14, %v10575_v47  ;;  %v10549_v38 = vmax.f32 %v14361_v50, 0.0  ;;  %v10061_v49 = vpop.f32.mrb[112].mxu1 }
 0x906   : > { %v20451_v58 = vpack.c.bf16 %v10548_v34, %v10544_v19  ;;  %v14314_v15 = vadd.f32 %v10061_v49, %v20329_v21  ;;  %v10063_v45 = vpop.f32.mrb[113].mxu1 }
 0x907   : > { %v20454_v51 = vpack.c.bf16 %v10549_v38, %v10545_v61  ;;  %v14315_v24 = vadd.f32 %v10063_v45, %v20333_v1  ;;  %v10065_v62 = vpop.f32.mrb[114].mxu1  ;;  %v10407_v33 = vpop.f32.mrb[96].mxu0  ;;  %11610 = vmatprep.mubr.bf16.mxu1 %v10659_v41  ;;  %11996 = vmatprep.mubr.bf16.mxu0 %v10659_v41 }
 0x908   : > { %v14316_v53 = vadd.f32 %v10065_v62, %v20329_v21  ;;  %v14362_v29 = vadd.f32 %v10407_v33, %v20353_v32  ;;  %v10067_v9 = vpop.f32.mrb[115].mxu1  ;;  %v10409_v3 = vpop.f32.mrb[97].mxu0  ;;  %11611 = vmatmul.mubr.bf16.gmra.mrb[172].mxu1 %v10658_v30  ;;  %11997 = vmatmul.mubr.bf16.gmra.mrb[172].mxu0 %v10658_v30  ;;  %v10582_v36 = vmax.f32 %v14314_v15, 0.0 }
 0x909   : > { %v14317_v10 = vadd.f32 %v10067_v9, %v20333_v1  ;;  %v14363_v56 = vadd.f32 %v10409_v3, %v20357_v42  ;;  %v10411_v13 = vpop.f32.mrb[98].mxu0  ;;  %v10583_v27 = vmax.f32 %v14315_v24, 0.0 }
 0x90a   : > { %v10586_v17 = vmax.f32 %v14316_v53, 0.0  ;;  %v14364_v54 = vadd.f32 %v10411_v13, %v20353_v32  ;;  %v10413_v16 = vpop.f32.mrb[99].mxu0  ;;  %v10552_v31 = vmax.f32 %v14362_v29, 0.0 }
 0x90b   : > { %v10587_v55 = vmax.f32 %v14317_v10, 0.0  ;;  %v14365_v6 = vadd.f32 %v10413_v16, %v20357_v42  ;;  %v10553_v48 = vmax.f32 %v14363_v56, 0.0 }
 0x90c   : > { %v10662_v59 = vpack.c.bf16 %v10586_v17, %v10582_v36  ;;  %v10556_v0 = vmax.f32 %v14364_v54, 0.0 }
 0x90d   : > { %v10663_v20 = vpack.c.bf16 %v10587_v55, %v10583_v27  ;;  %v10557_v46 = vmax.f32 %v14365_v6, 0.0  ;;  %v10071_v5 = vpop.f32.mrb[116].mxu1 }
 0x90e   : > { %v20463_v25 = vpack.c.bf16 %v10556_v0, %v10552_v31  ;;  %v14318_v22 = vadd.f32 %v10071_v5, %v20329_v21  ;;  %v10073_v43 = vpop.f32.mrb[117].mxu1 }
 0x90f   : > { %v20466_v23 = vpack.c.bf16 %v10557_v46, %v10553_v48  ;;  %v14319_v47 = vadd.f32 %v10073_v43, %v20333_v1  ;;  %v10075_v14 = vpop.f32.mrb[118].mxu1  ;;  %v10417_v50 = vpop.f32.mrb[100].mxu0  ;;  %11620 = vmatprep.mubr.bf16.mxu1 %v10663_v20  ;;  %12006 = vmatprep.mubr.bf16.mxu0 %v10663_v20 }
 0x910   : > { %v14320_v30 = vadd.f32 %v10075_v14, %v20329_v21  ;;  %v14366_v19 = vadd.f32 %v10417_v50, %v20353_v32  ;;  %v10077_v34 = vpop.f32.mrb[119].mxu1  ;;  %v10419_v41 = vpop.f32.mrb[101].mxu0  ;;  %11621 = vmatmul.mubr.bf16.gmra.mrb[176].mxu1 %v10662_v59  ;;  %12007 = vmatmul.mubr.bf16.gmra.mrb[176].mxu0 %v10662_v59  ;;  %v10590_v15 = vmax.f32 %v14318_v22, 0.0 }
 0x911   : > { %v14321_v61 = vadd.f32 %v10077_v34, %v20333_v1  ;;  %v14367_v38 = vadd.f32 %v10419_v41, %v20357_v42  ;;  %v10421_v49 = vpop.f32.mrb[102].mxu0  ;;  %v10591_v33 = vmax.f32 %v14319_v47, 0.0 }
 0x912   : > { %v10594_v45 = vmax.f32 %v14320_v30, 0.0  ;;  %v14368_v24 = vadd.f32 %v10421_v49, %v20353_v32  ;;  %v10423_v62 = vpop.f32.mrb[103].mxu0  ;;  %v10560_v3 = vmax.f32 %v14366_v19, 0.0 }
 0x913   : > { %v10595_v53 = vmax.f32 %v14321_v61, 0.0  ;;  %v14369_v29 = vadd.f32 %v10423_v62, %v20357_v42  ;;  %v10561_v13 = vmax.f32 %v14367_v38, 0.0 }
 0x914   : > { %v10666_v9 = vpack.c.bf16 %v10594_v45, %v10590_v15  ;;  %v10564_v10 = vmax.f32 %v14368_v24, 0.0 }
 0x915   : > { %v10667_v56 = vpack.c.bf16 %v10595_v53, %v10591_v33  ;;  %v10565_v36 = vmax.f32 %v14369_v29, 0.0  ;;  %v10081_v17 = vpop.f32.mrb[120].mxu1 }
 0x916   : > { %v20475_v54 = vpack.c.bf16 %v10564_v10, %v10560_v3  ;;  %v14322_v16 = vadd.f32 %v10081_v17, %v20329_v21  ;;  %v10083_v27 = vpop.f32.mrb[121].mxu1 }
 0x917   : > { %v20478_v55 = vpack.c.bf16 %v10565_v36, %v10561_v13  ;;  %v14323_v6 = vadd.f32 %v10083_v27, %v20333_v1  ;;  %v10085_v59 = vpop.f32.mrb[122].mxu1  ;;  %v10427_v31 = vpop.f32.mrb[104].mxu0  ;;  %11630 = vmatprep.mubr.bf16.mxu1 %v10667_v56  ;;  %12016 = vmatprep.mubr.bf16.mxu0 %v10667_v56 }
 0x918   : > { %v14324_v0 = vadd.f32 %v10085_v59, %v20329_v21  ;;  %v14370_v20 = vadd.f32 %v10427_v31, %v20353_v32  ;;  %v10087_v48 = vpop.f32.mrb[123].mxu1  ;;  %v10429_v46 = vpop.f32.mrb[105].mxu0  ;;  %11631 = vmatmul.mubr.bf16.gmra.mrb[180].mxu1 %v10666_v9  ;;  %12017 = vmatmul.mubr.bf16.gmra.mrb[180].mxu0 %v10666_v9  ;;  %v10598_v47 = vmax.f32 %v14322_v16, 0.0 }
 0x919   : > { %v14325_v5 = vadd.f32 %v10087_v48, %v20333_v1  ;;  %v14371_v22 = vadd.f32 %v10429_v46, %v20357_v42  ;;  %v10431_v43 = vpop.f32.mrb[106].mxu0  ;;  %v10599_v19 = vmax.f32 %v14323_v6, 0.0 }
 0x91a   : > { %v10602_v14 = vmax.f32 %v14324_v0, 0.0  ;;  %v14372_v50 = vadd.f32 %v10431_v43, %v20353_v32  ;;  %v10433_v30 = vpop.f32.mrb[107].mxu0  ;;  %v10568_v38 = vmax.f32 %v14370_v20, 0.0 }
 0x91b   : > { %v10603_v34 = vmax.f32 %v14325_v5, 0.0  ;;  %v14373_v41 = vadd.f32 %v10433_v30, %v20357_v42  ;;  %v10569_v45 = vmax.f32 %v14371_v22, 0.0 }
 0x91c   : > { %v10670_v61 = vpack.c.bf16 %v10602_v14, %v10598_v47  ;;  %v10572_v49 = vmax.f32 %v14372_v50, 0.0 }
 0x91d   : > { %v10671_v15 = vpack.c.bf16 %v10603_v34, %v10599_v19  ;;  %v10573_v24 = vmax.f32 %v14373_v41, 0.0  ;;  %v10091_v62 = vpop.f32.mrb[124].mxu1 }
 0x91e   : > { %v20487_v33 = vpack.c.bf16 %v10572_v49, %v10568_v38  ;;  %v14326_v53 = vadd.f32 %v10091_v62, %v20329_v21  ;;  %v10093_v29 = vpop.f32.mrb[125].mxu1 }
 0x91f   : > { %v20490_v9 = vpack.c.bf16 %v10573_v24, %v10569_v45  ;;  %v14327_v3 = vadd.f32 %v10093_v29, %v20333_v1  ;;  %v10095_v10 = vpop.f32.mrb[126].mxu1  ;;  %v10437_v56 = vpop.f32.mrb[108].mxu0  ;;  %11640 = vmatprep.mubr.bf16.mxu1 %v10671_v15  ;;  %12026 = vmatprep.mubr.bf16.mxu0 %v10671_v15 }
 0x920   : > { %v14328_v13 = vadd.f32 %v10095_v10, %v20329_v21  ;;  %v14374_v36 = vadd.f32 %v10437_v56, %v20353_v32  ;;  %v10097_v17 = vpop.f32.mrb[127].mxu1  ;;  %v10439_v16 = vpop.f32.mrb[109].mxu0  ;;  %11641 = vmatmul.mubr.bf16.gmra.mrb[184].mxu1 %v10670_v61  ;;  %12027 = vmatmul.mubr.bf16.gmra.mrb[184].mxu0 %v10670_v61  ;;  %v10606_v31 = vmax.f32 %v14326_v53, 0.0 }
 0x921   : > { %v14329_v27 = vadd.f32 %v10097_v17, %v20333_v1  ;;  %v14375_v6 = vadd.f32 %v10439_v16, %v20357_v42  ;;  %v10441_v59 = vpop.f32.mrb[110].mxu0  ;;  %v10607_v46 = vmax.f32 %v14327_v3, 0.0 }
 0x922   : > { %v10610_v0 = vmax.f32 %v14328_v13, 0.0  ;;  %v14376_v20 = vadd.f32 %v10441_v59, %v20353_v32  ;;  %v10443_v48 = vpop.f32.mrb[111].mxu0  ;;  %v10576_v43 = vmax.f32 %v14374_v36, 0.0 }
 0x923   : > { %v10611_v5 = vmax.f32 %v14329_v27, 0.0  ;;  %v14377_v21 = vadd.f32 %v10443_v48, %v20357_v42  ;;  %v10577_v50 = vmax.f32 %v14375_v6, 0.0 }
 0x924   : > { %v10674_v22 = vpack.c.bf16 %v10610_v0, %v10606_v31  ;;  %v10580_v47 = vmax.f32 %v14376_v20, 0.0 }
 0x925   : > { %v10675_v14 = vpack.c.bf16 %v10611_v5, %v10607_v46  ;;  %v10581_v30 = vmax.f32 %v14377_v21, 0.0 }
 0x926   : > { %v20499_v19 = vpack.c.bf16 %v10580_v47, %v10576_v43 }
 0x927   : > { %v20501_v1 = vpack.c.bf16 %v10581_v30, %v10577_v50  ;;  %v10447_v34 = vpop.f32.mrb[112].mxu0  ;;  %11650 = vmatprep.mubr.bf16.mxu1 %v10675_v14  ;;  %12036 = vmatprep.mubr.bf16.mxu0 %v10675_v14 }
 0x928   : > { %v14378_v41 = vadd.f32 %v10447_v34, %v20353_v32  ;;  %v10449_v61 = vpop.f32.mrb[113].mxu0  ;;  %11651 = vmatmul.mubr.bf16.gmra.mrb[188].mxu1 %v10674_v22  ;;  %12037 = vmatmul.mubr.bf16.gmra.mrb[188].mxu0 %v10674_v22 }
 0x929   : > { %v14379_v38 = vadd.f32 %v10449_v61, %v20357_v42  ;;  %v10451_v49 = vpop.f32.mrb[114].mxu0  ;;  %11693 = vmatprep.mubr.bf16.mxu1 %v20370_v2  ;;  %12079 = vmatprep.mubr.bf16.mxu0 %v20370_v2 }
 0x92a   : > { %v14380_v15 = vadd.f32 %v10451_v49, %v20353_v32  ;;  %v10453_v45 = vpop.f32.mrb[115].mxu0  ;;  %v10584_v62 = vmax.f32 %v14378_v41, 0.0 }
 0x92b   : > { %v14381_v24 = vadd.f32 %v10453_v45, %v20357_v42  ;;  %v10585_v29 = vmax.f32 %v14379_v38, 0.0 }
 0x92c   : > { %v10588_v53 = vmax.f32 %v14380_v15, 0.0 }
 0x92d   : > { %v10589_v3 = vmax.f32 %v14381_v24, 0.0 }
 0x92e   : > { %v20509_v10 = vpack.c.bf16 %v10588_v53, %v10584_v62 }
 0x92f   : > { %v20511_v56 = vpack.c.bf16 %v10589_v3, %v10585_v29  ;;  %v10457_v13 = vpop.f32.mrb[116].mxu0 }
 0x930   : > { %v14382_v36 = vadd.f32 %v10457_v13, %v20353_v32  ;;  %v10459_v17 = vpop.f32.mrb[117].mxu0  ;;  %11694 = vmatmul.mubr.bf16.vlgmr.msra.gmra.mrb[128].mxu1 %v20367_v40  ;;  %12080 = vmatmul.mubr.bf16.vlgmr.msra.gmra.mrb[128].mxu0 %v20367_v40 }
 0x931   : > { %v14383_v2 = vadd.f32 %v10459_v17, %v20357_v42  ;;  %v10461_v16 = vpop.f32.mrb[118].mxu0  ;;  %11703 = vmatprep.mubr.bf16.mxu1 %v20382_v35  ;;  %12089 = vmatprep.mubr.bf16.mxu0 %v20382_v35 }
 0x932   : > { %v14384_v27 = vadd.f32 %v10461_v16, %v20353_v32  ;;  %v10463_v6 = vpop.f32.mrb[119].mxu0  ;;  %v10592_v31 = vmax.f32 %v14382_v36, 0.0 }
 0x933   : > { %v14385_v59 = vadd.f32 %v10463_v6, %v20357_v42  ;;  %v10593_v20 = vmax.f32 %v14383_v2, 0.0 }
 0x934   : > { %v10596_v0 = vmax.f32 %v14384_v27, 0.0 }
 0x935   : > { %v10597_v48 = vmax.f32 %v14385_v59, 0.0 }
 0x936   : > { %v20521_v46 = vpack.c.bf16 %v10596_v0, %v10592_v31 }
 0x937   : > { %v20523_v5 = vpack.c.bf16 %v10597_v48, %v10593_v20  ;;  %v10467_v40 = vpop.f32.mrb[120].mxu0 }
 0x938   : > { %v14386_v21 = vadd.f32 %v10467_v40, %v20353_v32  ;;  %v10469_v22 = vpop.f32.mrb[121].mxu0  ;;  %11704 = vmatmul.mubr.bf16.gmra.mrb[132].mxu1 %v20379_v37  ;;  %12090 = vmatmul.mubr.bf16.gmra.mrb[132].mxu0 %v20379_v37 }
 0x939   : > { %v14387_v35 = vadd.f32 %v10469_v22, %v20357_v42  ;;  %v10471_v43 = vpop.f32.mrb[122].mxu0  ;;  %11713 = vmatprep.mubr.bf16.mxu1 %v20394_v4  ;;  %12099 = vmatprep.mubr.bf16.mxu0 %v20394_v4 }
 0x93a   : > { %v14388_v47 = vadd.f32 %v10471_v43, %v20353_v32  ;;  %v10473_v14 = vpop.f32.mrb[123].mxu0  ;;  %v10600_v30 = vmax.f32 %v14386_v21, 0.0 }
 0x93b   : > { %v14389_v50 = vadd.f32 %v10473_v14, %v20357_v42  ;;  %v10601_v41 = vmax.f32 %v14387_v35, 0.0 }
 0x93c   : > { %v10604_v34 = vmax.f32 %v14388_v47, 0.0 }
 0x93d   : > { %v10605_v61 = vmax.f32 %v14389_v50, 0.0 }
 0x93e   : > { %v20533_v38 = vpack.c.bf16 %v10604_v34, %v10600_v30 }
 0x93f   : > { %v10673_v49 = vpack.c.bf16 %v10605_v61, %v10601_v41  ;;  %v10477_v37 = vpop.f32.mrb[124].mxu0 }
 0x940   : > { %v14390_v15 = vadd.f32 %v10477_v37, %v20353_v32  ;;  %v10479_v45 = vpop.f32.mrb[125].mxu0  ;;  %11714 = vmatmul.mubr.bf16.gmra.mrb[136].mxu1 %v20391_v28  ;;  %12100 = vmatmul.mubr.bf16.gmra.mrb[136].mxu0 %v20391_v28 }
 0x941   : > { %v14391_v4 = vadd.f32 %v10479_v45, %v20357_v42  ;;  %v10481_v24 = vpop.f32.mrb[126].mxu0  ;;  %11723 = vmatprep.mubr.bf16.mxu1 %v20406_v12  ;;  %12109 = vmatprep.mubr.bf16.mxu0 %v20406_v12 }
 0x942   : > { %v14392_v62 = vadd.f32 %v10481_v24, %v20353_v32  ;;  %v10483_v53 = vpop.f32.mrb[127].mxu0  ;;  %v10608_v3 = vmax.f32 %v14390_v15, 0.0  ;;  %v10806_v32 = vld [vmem:[%s21271_s26] sm:$0xf] }
 0x943   : > { %v14393_v29 = vadd.f32 %v10483_v53, %v20357_v42  ;;  %v10609_v36 = vmax.f32 %v14391_v4, 0.0  ;;  %v20591_v42 = vrot.slane %v10806_v32, %v21254_v52  ;;  %v20594_v28 = vrot.slane %v10806_v32, %v21269_v8 }
 0x944   : > { %v10612_v13 = vmax.f32 %v14392_v62, 0.0  ;;  %v20600_v12 = vrot.slane %v10806_v32, %v21255_v26 }
 0x945   : > { %v10613_v17 = vmax.f32 %v14393_v29, 0.0 }
 0x946   : > { %v10676_v2 = vpack.c.bf16 %v10612_v13, %v10608_v3 }
 0x947   : > { %v10677_v16 = vpack.c.bf16 %v10613_v17, %v10609_v36 }
 0x948   : > { %11724 = vmatmul.mubr.bf16.gmra.mrb[140].mxu1 %v20403_v63  ;;  %12110 = vmatmul.mubr.bf16.gmra.mrb[140].mxu0 %v20403_v63  ;;  %v12368_v63 = vld [vmem:[%s21272_s17] sm:$0xf] }
 0x949   : > { %11733 = vmatprep.mubr.bf16.mxu1 %v20418_v57  ;;  %12119 = vmatprep.mubr.bf16.mxu0 %v20418_v57 }
 0x950   : > { %11734 = vmatmul.mubr.bf16.gmra.mrb[144].mxu1 %v20415_v11  ;;  %12120 = vmatmul.mubr.bf16.gmra.mrb[144].mxu0 %v20415_v11 }
 0x951   : > { %11743 = vmatprep.mubr.bf16.mxu1 %v20430_v39  ;;  %12129 = vmatprep.mubr.bf16.mxu0 %v20430_v39 }
 0x958   : > { %11744 = vmatmul.mubr.bf16.gmra.mrb[148].mxu1 %v20427_v44  ;;  %12130 = vmatmul.mubr.bf16.gmra.mrb[148].mxu0 %v20427_v44  ;;  %v20603_v44 = vrot.slane %v10806_v32, %v21270_v18 }
 0x959   : > { %11753 = vmatprep.mubr.bf16.mxu1 %v20442_v7  ;;  %12139 = vmatprep.mubr.bf16.mxu0 %v20442_v7 }
 0x960   : > { %11754 = vmatmul.mubr.bf16.gmra.mrb[152].mxu1 %v20439_v60  ;;  %12140 = vmatmul.mubr.bf16.gmra.mrb[152].mxu0 %v20439_v60  ;;  %v20607_v60 = vrot.slane %v12368_v63, %v21254_v52 }
 0x961   : > { %11763 = vmatprep.mubr.bf16.mxu1 %v20454_v51  ;;  %12149 = vmatprep.mubr.bf16.mxu0 %v20454_v51 }
 0x968   : > { %11764 = vmatmul.mubr.bf16.gmra.mrb[156].mxu1 %v20451_v58  ;;  %12150 = vmatmul.mubr.bf16.gmra.mrb[156].mxu0 %v20451_v58 }
 0x969   : > { %11773 = vmatprep.mubr.bf16.mxu1 %v20466_v23  ;;  %12159 = vmatprep.mubr.bf16.mxu0 %v20466_v23  ;;  %v20612_v23 = vrot.slane %v12368_v63, %v21255_v26 }
 0x970   : > { %11774 = vmatmul.mubr.bf16.gmra.mrb[160].mxu1 %v20463_v25  ;;  %12160 = vmatmul.mubr.bf16.gmra.mrb[160].mxu0 %v20463_v25 }
 0x971   : > { %11783 = vmatprep.mubr.bf16.mxu1 %v20478_v55  ;;  %12169 = vmatprep.mubr.bf16.mxu0 %v20478_v55 }
 0x978   : > { %11784 = vmatmul.mubr.bf16.gmra.mrb[164].mxu1 %v20475_v54  ;;  %12170 = vmatmul.mubr.bf16.gmra.mrb[164].mxu0 %v20475_v54 }
 0x979   : > { %11793 = vmatprep.mubr.bf16.mxu1 %v20490_v9  ;;  %12179 = vmatprep.mubr.bf16.mxu0 %v20490_v9  ;;  %v20615_v9 = vrot.slane %v12368_v63, %v21269_v8 }
 0x980   : > { %11794 = vmatmul.mubr.bf16.gmra.mrb[168].mxu1 %v20487_v33  ;;  %12180 = vmatmul.mubr.bf16.gmra.mrb[168].mxu0 %v20487_v33 }
 0x981   : > { %11803 = vmatprep.mubr.bf16.mxu1 %v20501_v1  ;;  %12189 = vmatprep.mubr.bf16.mxu0 %v20501_v1 }
 0x988   : > { %11804 = vmatmul.mubr.bf16.gmra.mrb[172].mxu1 %v20499_v19  ;;  %12190 = vmatmul.mubr.bf16.gmra.mrb[172].mxu0 %v20499_v19 }
 0x989   : > { %11813 = vmatprep.mubr.bf16.mxu1 %v20511_v56  ;;  %12199 = vmatprep.mubr.bf16.mxu0 %v20511_v56 }
 0x990   : > { %11814 = vmatmul.mubr.bf16.gmra.mrb[176].mxu1 %v20509_v10  ;;  %12200 = vmatmul.mubr.bf16.gmra.mrb[176].mxu0 %v20509_v10 }
 0x991   : > { %11823 = vmatprep.mubr.bf16.mxu1 %v20523_v5  ;;  %12209 = vmatprep.mubr.bf16.mxu0 %v20523_v5 }
 0x998   : > { %11824 = vmatmul.mubr.bf16.gmra.mrb[180].mxu1 %v20521_v46  ;;  %12210 = vmatmul.mubr.bf16.gmra.mrb[180].mxu0 %v20521_v46  ;;  %v20626_v46 = vrot.slane %v12368_v63, %v21270_v18 }
 0x999   : > { %11833 = vmatprep.mubr.bf16.mxu1 %v10673_v49  ;;  %12219 = vmatprep.mubr.bf16.mxu0 %v10673_v49 }
 0x9a0   : > { %11834 = vmatmul.mubr.bf16.gmra.mrb[184].mxu1 %v20533_v38  ;;  %12220 = vmatmul.mubr.bf16.gmra.mrb[184].mxu0 %v20533_v38 }
 0x9a1   : > { %11843 = vmatprep.mubr.bf16.mxu1 %v10677_v16  ;;  %12229 = vmatprep.mubr.bf16.mxu0 %v10677_v16 }
 0x9a8   : > { %11844 = vmatmul.mubr.bf16.gmra.mrb[188].mxu1 %v10676_v2  ;;  %12230 = vmatmul.mubr.bf16.gmra.mrb[188].mxu0 %v10676_v2 }
 0xa03   : > { %v11695_v11 = vpop.f32.mrb[128].mxu1  ;;  %v12081_v57 = vpop.f32.mrb[128].mxu0 }
 0xa04   : > { %v14394_v39 = vadd.f32 %v11695_v11, %v20591_v42  ;;  %v14458_v7 = vadd.f32 %v12081_v57, %v20594_v28  ;;  %v11697_v58 = vpop.f32.mrb[129].mxu1  ;;  %v12083_v51 = vpop.f32.mrb[129].mxu0 }
 0xa05   : > { %v14395_v25 = vadd.f32 %v11697_v58, %v20600_v12  ;;  %v11699_v54 = vpop.f32.mrb[130].mxu1  ;;  %v12085_v55 = vpop.f32.mrb[130].mxu0  ;;  %v14459_v27 = vadd.f32 %v12083_v51, %v20603_v44 }
 0xa06   : > { %v12240_v33 = vmax.f32 %v14394_v39, 0.0  ;;  %v14396_v19 = vadd.f32 %v11699_v54, %v20591_v42  ;;  %v11701_v1 = vpop.f32.mrb[131].mxu1  ;;  %v12087_v52 = vpop.f32.mrb[131].mxu0  ;;  %v12242_v10 = vmax.f32 %v14458_v7, 0.0  ;;  %v14460_v31 = vadd.f32 %v12085_v55, %v20594_v28 }
 0xa07   : > { %v12241_v56 = vmax.f32 %v14395_v25, 0.0  ;;  %v14397_v6 = vadd.f32 %v11701_v1, %v20600_v12  ;;  %v14461_v48 = vadd.f32 %v12087_v52, %v20603_v44  ;;  %v12243_v40 = vmax.f32 %v14459_v27, 0.0 }
 0xa08   : > { %v12390_v59 = vmul.f32 %v20607_v60, %v12240_v33  ;;  %v12244_v26 = vmax.f32 %v14396_v19, 0.0  ;;  %v12392_v5 = vmul.f32 %v20615_v9, %v12242_v10  ;;  %v12246_v47 = vmax.f32 %v14460_v31, 0.0 }
 0xa09   : > { %v12391_v0 = vmul.f32 %v20612_v23, %v12241_v56  ;;  %v12245_v20 = vmax.f32 %v14397_v6, 0.0  ;;  %v12247_v37 = vmax.f32 %v14461_v48, 0.0  ;;  %v12393_v13 = vmul.f32 %v20626_v46, %v12243_v40 }
 0xa0a   : > { %v12394_v8 = vmul.f32 %v20607_v60, %v12244_v26  ;;  %v12396_v36 = vmul.f32 %v20615_v9, %v12246_v47 }
 0xa0b   : > { %v12395_v21 = vmul.f32 %v20612_v23, %v12245_v20  ;;  %v11705_v22 = vpop.f32.mrb[132].mxu1  ;;  %v12091_v35 = vpop.f32.mrb[132].mxu0  ;;  %v12518_v43 = vadd.f32 %v12391_v0, %v12390_v59  ;;  %v12397_v39 = vmul.f32 %v20626_v46, %v12247_v37 }
 0xa0c   : > { %v14398_v14 = vadd.f32 %v11705_v22, %v20591_v42  ;;  %v14462_v50 = vadd.f32 %v12091_v35, %v20594_v28  ;;  %v11707_v30 = vpop.f32.mrb[133].mxu1  ;;  %v12093_v34 = vpop.f32.mrb[133].mxu0 }
 0xa0d   : > { %v12523_v41 = vadd.f32 %v12395_v21, %v12394_v8  ;;  %v14399_v61 = vadd.f32 %v11707_v30, %v20600_v12  ;;  %v11709_v18 = vpop.f32.mrb[134].mxu1  ;;  %v12095_v38 = vpop.f32.mrb[134].mxu0  ;;  %v12519_v49 = vadd.f32 %v12518_v43, %v12392_v5  ;;  %v14463_v2 = vadd.f32 %v12093_v34, %v20603_v44 }
 0xa0e   : > { %v12248_v15 = vmax.f32 %v14398_v14, 0.0  ;;  %v14400_v45 = vadd.f32 %v11709_v18, %v20591_v42  ;;  %v14464_v4 = vadd.f32 %v12095_v38, %v20594_v28  ;;  %v11711_v24 = vpop.f32.mrb[135].mxu1  ;;  %v12097_v62 = vpop.f32.mrb[135].mxu0  ;;  %v12250_v53 = vmax.f32 %v14462_v50, 0.0 }
 0xa0f   : > { %v12249_v29 = vmax.f32 %v14399_v61, 0.0  ;;  %v14401_v3 = vadd.f32 %v11711_v24, %v20600_v12  ;;  %v14465_v11 = vadd.f32 %v12097_v62, %v20603_v44  ;;  %v12520_v57 = vadd.f32 %v12519_v49, %v12393_v13 }
 0xa10   : > { %v12398_v17 = vmul.f32 %v20607_v60, %v12248_v15  ;;  %v12252_v16 = vmax.f32 %v14400_v45, 0.0  ;;  %v12254_v58 = vmax.f32 %v14464_v4, 0.0  ;;  %v12524_v51 = vadd.f32 %v12523_v41, %v12396_v36 }
 0xa11   : > { %v12399_v32 = vmul.f32 %v20612_v23, %v12249_v29  ;;  %v12253_v63 = vmax.f32 %v14401_v3, 0.0  ;;  %v12400_v25 = vmul.f32 %v20615_v9, %v12250_v53  ;;  %12521 = vadd.xlane.f32.xlu0 %v12520_v57  ;;  %v12251_v1 = vmax.f32 %v14463_v2, 0.0 }
 0xa12   : > { %v12402_v7 = vmul.f32 %v20607_v60, %v12252_v16  ;;  %v12525_v6 = vadd.f32 %v12524_v51, %v12397_v39  ;;  %v12255_v26 = vmax.f32 %v14465_v11, 0.0  ;;  %v12404_v48 = vmul.f32 %v20615_v9, %v12254_v58 }
 0xa13   : > { %v12403_v54 = vmul.f32 %v20612_v23, %v12253_v63  ;;  %v11715_v55 = vpop.f32.mrb[136].mxu1  ;;  %v12101_v33 = vpop.f32.mrb[136].mxu0  ;;  %v12528_v19 = vadd.f32 %v12399_v32, %v12398_v17  ;;  %v12401_v61 = vmul.f32 %v20626_v46, %v12251_v1 }
 0xa14   : > { %v14402_v52 = vadd.f32 %v11715_v55, %v20591_v42  ;;  %v14466_v10 = vadd.f32 %v12101_v33, %v20594_v28  ;;  %v11717_v56 = vpop.f32.mrb[137].mxu1  ;;  %v12103_v27 = vpop.f32.mrb[137].mxu0  ;;  %v12405_v18 = vmul.f32 %v20626_v46, %v12255_v26 }
 0xa15   : > { %v12533_v59 = vadd.f32 %v12403_v54, %v12402_v7  ;;  %v14403_v31 = vadd.f32 %v11717_v56, %v20600_v12  ;;  %v11719_v0 = vpop.f32.mrb[138].mxu1  ;;  %v12105_v20 = vpop.f32.mrb[138].mxu0  ;;  %v12529_v8 = vadd.f32 %v12528_v19, %v12400_v25  ;;  %v14467_v40 = vadd.f32 %v12103_v27, %v20603_v44  ;;  %12526 = vadd.xlane.f32.xlu0 %v12525_v6 }
 0xa16   : > { %v12256_v5 = vmax.f32 %v14402_v52, 0.0  ;;  %v14404_v21 = vadd.f32 %v11719_v0, %v20591_v42  ;;  %v11721_v22 = vpop.f32.mrb[139].mxu1  ;;  %v12107_v35 = vpop.f32.mrb[139].mxu0  ;;  %v12258_v43 = vmax.f32 %v14466_v10, 0.0  ;;  %v14468_v14 = vadd.f32 %v12105_v20, %v20594_v28 }
 0xa17   : > { %v12257_v47 = vmax.f32 %v14403_v31, 0.0  ;;  %v14405_v50 = vadd.f32 %v11721_v22, %v20600_v12  ;;  %v14469_v41 = vadd.f32 %v12107_v35, %v20603_v44  ;;  %v12259_v37 = vmax.f32 %v14467_v40, 0.0 }
 0xa18   : > { %v12406_v30 = vmul.f32 %v20607_v60, %v12256_v5  ;;  %v12260_v34 = vmax.f32 %v14404_v21, 0.0  ;;  %v12530_v45 = vadd.f32 %v12529_v8, %v12401_v61  ;;  %v12534_v4 = vadd.f32 %v12533_v59, %v12404_v48 }
 0xa19   : > { %v12407_v38 = vmul.f32 %v20612_v23, %v12257_v47  ;;  %v12261_v49 = vmax.f32 %v14405_v50, 0.0  ;;  %v12408_v24 = vmul.f32 %v20615_v9, %v12258_v43  ;;  %v12262_v53 = vmax.f32 %v14468_v14, 0.0 }
 0xa1a   : > { %v12410_v15 = vmul.f32 %v20607_v60, %v12260_v34  ;;  %v12263_v36 = vmax.f32 %v14469_v41, 0.0  ;;  %12531 = vadd.xlane.f32.xlu1 %v12530_v45  ;;  %v12535_v63 = vadd.f32 %v12534_v4, %v12405_v18  ;;  %v12409_v19 = vmul.f32 %v20626_v46, %v12259_v37 }
 0xa1b   : > { %v12538_v62 = vadd.f32 %v12407_v38, %v12406_v30  ;;  %v12411_v29 = vmul.f32 %v20612_v23, %v12261_v49  ;;  %v11725_v3 = vpop.f32.mrb[140].mxu1  ;;  %v12111_v13 = vpop.f32.mrb[140].mxu0  ;;  %v12412_v56 = vmul.f32 %v20615_v9, %v12262_v53 }
 0xa1c   : > { %v14406_v17 = vadd.f32 %v11725_v3, %v20591_v42  ;;  %v14470_v2 = vadd.f32 %v12111_v13, %v20594_v28  ;;  %v11727_v16 = vpop.f32.mrb[141].mxu1  ;;  %v12113_v32 = vpop.f32.mrb[141].mxu0  ;;  %v12413_v26 = vmul.f32 %v20626_v46, %v12263_v36 }
 0xa1d   : > { %v12543_v11 = vadd.f32 %v12411_v29, %v12410_v15  ;;  %v14407_v57 = vadd.f32 %v11727_v16, %v20600_v12  ;;  %v14471_v39 = vadd.f32 %v12113_v32, %v20603_v44  ;;  %v11729_v7 = vpop.f32.mrb[142].mxu1  ;;  %v12115_v58 = vpop.f32.mrb[142].mxu0  ;;  %v12539_v51 = vadd.f32 %v12538_v62, %v12408_v24 }
 0xa1e   : > { %v12264_v25 = vmax.f32 %v14406_v17, 0.0  ;;  %v14408_v54 = vadd.f32 %v11729_v7, %v20591_v42  ;;  %v11731_v55 = vpop.f32.mrb[143].mxu1  ;;  %v12117_v33 = vpop.f32.mrb[143].mxu0  ;;  %v12266_v1 = vmax.f32 %v14470_v2, 0.0  ;;  %v14472_v59 = vadd.f32 %v12115_v58, %v20594_v28  ;;  %12536 = vadd.xlane.f32.xlu1 %v12535_v63 }
 0xa1f   : > { %v12265_v52 = vmax.f32 %v14407_v57, 0.0  ;;  %v14409_v10 = vadd.f32 %v11731_v55, %v20600_v12  ;;  %v12267_v0 = vmax.f32 %v14471_v39, 0.0  ;;  %v14473_v48 = vadd.f32 %v12117_v33, %v20603_v44 }
 0xa20   : > { %v12414_v27 = vmul.f32 %v20607_v60, %v12264_v25  ;;  %v12268_v6 = vmax.f32 %v14408_v54, 0.0  ;;  %v12540_v5 = vadd.f32 %v12539_v51, %v12409_v19  ;;  %v12544_v40 = vadd.f32 %v12543_v11, %v12412_v56 }
 0xa21   : > { %v12415_v31 = vmul.f32 %v20612_v23, %v12265_v52  ;;  %v12269_v20 = vmax.f32 %v14409_v10, 0.0  ;;  %v12416_v21 = vmul.f32 %v20615_v9, %v12266_v1  ;;  %v12270_v14 = vmax.f32 %v14472_v59, 0.0 }
 0xa22   : > { %v12418_v8 = vmul.f32 %v20607_v60, %v12268_v6  ;;  %12541 = vadd.xlane.f32.xlu0 %v12540_v5  ;;  %v12545_v34 = vadd.f32 %v12544_v40, %v12413_v26  ;;  %v12417_v45 = vmul.f32 %v20626_v46, %v12267_v0  ;;  %v12271_v4 = vmax.f32 %v14473_v48, 0.0 }
 0xa23   : > { %v12548_v22 = vadd.f32 %v12415_v31, %v12414_v27  ;;  %v12419_v35 = vmul.f32 %v20612_v23, %v12269_v20  ;;  %v11735_v43 = vpop.f32.mrb[144].mxu1  ;;  %v12121_v47 = vpop.f32.mrb[144].mxu0  ;;  %v12420_v2 = vmul.f32 %v20615_v9, %v12270_v14 }
 0xa24   : > { %v14410_v50 = vadd.f32 %v11735_v43, %v20591_v42  ;;  %v14474_v30 = vadd.f32 %v12121_v47, %v20594_v28  ;;  %v11737_v41 = vpop.f32.mrb[145].mxu1  ;;  %v12123_v61 = vpop.f32.mrb[145].mxu0  ;;  %12546 = vadd.xlane.f32.xlu1 %v12545_v34  ;;  %v12421_v7 = vmul.f32 %v20626_v46, %v12271_v4 }
 0xa25   : > { %v12553_v18 = vadd.f32 %v12419_v35, %v12418_v8  ;;  %v14411_v38 = vadd.f32 %v11737_v41, %v20600_v12  ;;  %v11739_v49 = vpop.f32.mrb[146].mxu1  ;;  %v12125_v37 = vpop.f32.mrb[146].mxu0  ;;  %v12549_v15 = vadd.f32 %v12548_v22, %v12416_v21  ;;  %v14475_v36 = vadd.f32 %v12123_v61, %v20603_v44 }
 0xa26   : > { %v12272_v24 = vmax.f32 %v14410_v50, 0.0  ;;  %v14412_v62 = vadd.f32 %v11739_v49, %v20591_v42  ;;  %v11741_v53 = vpop.f32.mrb[147].mxu1  ;;  %v12127_v29 = vpop.f32.mrb[147].mxu0  ;;  %v12274_v3 = vmax.f32 %v14474_v30, 0.0  ;;  %v14476_v63 = vadd.f32 %v12125_v37, %v20594_v28 }
 0xa27   : > { %v12273_v13 = vmax.f32 %v14411_v38, 0.0  ;;  %v14413_v17 = vadd.f32 %v11741_v53, %v20600_v12  ;;  %v14477_v39 = vadd.f32 %v12127_v29, %v20603_v44  ;;  %v12550_v51 = vadd.f32 %v12549_v15, %v12417_v45 }
 0xa28   : > { %v12422_v16 = vmul.f32 %v20607_v60, %v12272_v24  ;;  %v12276_v32 = vmax.f32 %v14412_v62, 0.0  ;;  %v12554_v25 = vadd.f32 %v12553_v18, %v12420_v2  ;;  %v12424_v54 = vmul.f32 %v20615_v9, %v12274_v3 }
 0xa29   : > { %v12423_v11 = vmul.f32 %v20612_v23, %v12273_v13  ;;  %v12277_v57 = vmax.f32 %v14413_v17, 0.0  ;;  %v12275_v33 = vmax.f32 %v14475_v36, 0.0  ;;  %v12278_v10 = vmax.f32 %v14476_v63, 0.0  ;;  %12551 = vadd.xlane.f32.xlu0 %v12550_v51 }
 0xa2a   : > { %v12426_v58 = vmul.f32 %v20607_v60, %v12276_v32  ;;  %v12555_v6 = vadd.f32 %v12554_v25, %v12421_v7  ;;  %v12279_v0 = vmax.f32 %v14477_v39, 0.0 }
 0xa2b   : > { %v12558_v55 = vadd.f32 %v12423_v11, %v12422_v16  ;;  %v12427_v19 = vmul.f32 %v20612_v23, %v12277_v57  ;;  %v11745_v1 = vpop.f32.mrb[148].mxu1  ;;  %v12131_v52 = vpop.f32.mrb[148].mxu0  ;;  %v12425_v47 = vmul.f32 %v20626_v46, %v12275_v33  ;;  %v12428_v34 = vmul.f32 %v20615_v9, %v12278_v10 }
 0xa2c   : > { %v14414_v56 = vadd.f32 %v11745_v1, %v20591_v42  ;;  %v14478_v27 = vadd.f32 %v12131_v52, %v20594_v28  ;;  %v11747_v59 = vpop.f32.mrb[149].mxu1  ;;  %v12133_v26 = vpop.f32.mrb[149].mxu0  ;;  %12556 = vadd.xlane.f32.xlu1 %v12555_v6  ;;  %v12429_v38 = vmul.f32 %v20626_v46, %v12279_v0 }
 0xa2d   : > { %v12563_v31 = vadd.f32 %v12427_v19, %v12426_v58  ;;  %v14415_v20 = vadd.f32 %v11747_v59, %v20600_v12  ;;  %v11749_v8 = vpop.f32.mrb[150].mxu1  ;;  %v12135_v48 = vpop.f32.mrb[150].mxu0  ;;  %v12559_v5 = vadd.f32 %v12558_v55, %v12424_v54  ;;  %v14479_v21 = vadd.f32 %v12133_v26, %v20603_v44 }
 0xa2e   : > { %v12280_v40 = vmax.f32 %v14414_v56, 0.0  ;;  %v14416_v22 = vadd.f32 %v11749_v8, %v20591_v42  ;;  %v11751_v35 = vpop.f32.mrb[151].mxu1  ;;  %v12137_v43 = vpop.f32.mrb[151].mxu0  ;;  %v12282_v14 = vmax.f32 %v14478_v27, 0.0  ;;  %v14480_v18 = vadd.f32 %v12135_v48, %v20594_v28 }
 0xa2f   : > { %v12281_v50 = vmax.f32 %v14415_v20, 0.0  ;;  %v14417_v30 = vadd.f32 %v11751_v35, %v20600_v12  ;;  %v14481_v15 = vadd.f32 %v12137_v43, %v20603_v44  ;;  %v12283_v45 = vmax.f32 %v14479_v21, 0.0 }
 0xa30   : > { %v12430_v41 = vmul.f32 %v20607_v60, %v12280_v40  ;;  %v12284_v61 = vmax.f32 %v14416_v22, 0.0  ;;  %v12560_v24 = vadd.f32 %v12559_v5, %v12425_v47  ;;  %v12564_v62 = vadd.f32 %v12563_v31, %v12428_v34 }
 0xa31   : > { %v12431_v49 = vmul.f32 %v20612_v23, %v12281_v50  ;;  %v12285_v37 = vmax.f32 %v14417_v30, 0.0  ;;  %v12432_v53 = vmul.f32 %v20615_v9, %v12282_v14  ;;  %v12286_v17 = vmax.f32 %v14480_v18, 0.0 }
 0xa32   : > { %v12434_v4 = vmul.f32 %v20607_v60, %v12284_v61  ;;  %12561 = vadd.xlane.f32.xlu0 %v12560_v24  ;;  %v12565_v32 = vadd.f32 %v12564_v62, %v12429_v38  ;;  %v12287_v39 = vmax.f32 %v14481_v15, 0.0  ;;  %v12433_v54 = vmul.f32 %v20626_v46, %v12283_v45 }
 0xa33   : > { %v12568_v29 = vadd.f32 %v12431_v49, %v12430_v41  ;;  %v12435_v3 = vmul.f32 %v20612_v23, %v12285_v37  ;;  %v11755_v13 = vpop.f32.mrb[152].mxu1  ;;  %v12141_v36 = vpop.f32.mrb[152].mxu0  ;;  %v12436_v59 = vmul.f32 %v20615_v9, %v12286_v17 }
 0xa34   : > { %v14418_v2 = vadd.f32 %v11755_v13, %v20591_v42  ;;  %v14482_v16 = vadd.f32 %v12141_v36, %v20594_v28  ;;  %v11757_v63 = vpop.f32.mrb[153].mxu1  ;;  %v12143_v11 = vpop.f32.mrb[153].mxu0  ;;  %12566 = vadd.xlane.f32.xlu1 %v12565_v32  ;;  %v12437_v20 = vmul.f32 %v20626_v46, %v12287_v39 }
 0xa35   : > { %v12573_v57 = vadd.f32 %v12435_v3, %v12434_v4  ;;  %v14419_v7 = vadd.f32 %v11757_v63, %v20600_v12  ;;  %v11759_v58 = vpop.f32.mrb[154].mxu1  ;;  %v12145_v51 = vpop.f32.mrb[154].mxu0  ;;  %v12569_v25 = vadd.f32 %v12568_v29, %v12432_v53  ;;  %v14483_v33 = vadd.f32 %v12143_v11, %v20603_v44 }
 0xa36   : > { %v12288_v55 = vmax.f32 %v14418_v2, 0.0  ;;  %v14420_v19 = vadd.f32 %v11759_v58, %v20591_v42  ;;  %v11761_v1 = vpop.f32.mrb[155].mxu1  ;;  %v12147_v52 = vpop.f32.mrb[155].mxu0  ;;  %v12290_v10 = vmax.f32 %v14482_v16, 0.0  ;;  %v14484_v27 = vadd.f32 %v12145_v51, %v20594_v28 }
 0xa37   : > { %v12289_v56 = vmax.f32 %v14419_v7, 0.0  ;;  %v14421_v6 = vadd.f32 %v11761_v1, %v20600_v12  ;;  %v14485_v0 = vadd.f32 %v12147_v52, %v20603_v44  ;;  %v12291_v5 = vmax.f32 %v14483_v33, 0.0 }
 0xa38   : > { %v12438_v26 = vmul.f32 %v20607_v60, %v12288_v55  ;;  %v12292_v31 = vmax.f32 %v14420_v19, 0.0  ;;  %v12570_v21 = vadd.f32 %v12569_v25, %v12433_v54  ;;  %v12574_v22 = vadd.f32 %v12573_v57, %v12436_v59 }
 0xa39   : > { %v12439_v8 = vmul.f32 %v20612_v23, %v12289_v56  ;;  %v12293_v48 = vmax.f32 %v14421_v6, 0.0  ;;  %v12440_v35 = vmul.f32 %v20615_v9, %v12290_v10  ;;  %v12294_v47 = vmax.f32 %v14484_v27, 0.0 }
 0xa3a   : > { %v12442_v40 = vmul.f32 %v20607_v60, %v12292_v31  ;;  %v12295_v34 = vmax.f32 %v14485_v0, 0.0  ;;  %12571 = vadd.xlane.f32.xlu0 %v12570_v21  ;;  %v12575_v18 = vadd.f32 %v12574_v22, %v12437_v20  ;;  %v12441_v36 = vmul.f32 %v20626_v46, %v12291_v5 }
 0xa3b   : > { %v12578_v43 = vadd.f32 %v12439_v8, %v12438_v26  ;;  %v12443_v14 = vmul.f32 %v20612_v23, %v12293_v48  ;;  %v11765_v50 = vpop.f32.mrb[156].mxu1  ;;  %v12151_v30 = vpop.f32.mrb[156].mxu0  ;;  %v12444_v32 = vmul.f32 %v20615_v9, %v12294_v47 }
 0xa3c   : > { %v14422_v41 = vadd.f32 %v11765_v50, %v20591_v42  ;;  %v14486_v61 = vadd.f32 %v12151_v30, %v20594_v28  ;;  %v11767_v38 = vpop.f32.mrb[157].mxu1  ;;  %v12153_v49 = vpop.f32.mrb[157].mxu0  ;;  %12576 = vadd.xlane.f32.xlu1 %v12575_v18  ;;  %v12445_v39 = vmul.f32 %v20626_v46, %v12295_v34 }
 0xa3d   : > { %v12583_v37 = vadd.f32 %v12443_v14, %v12442_v40  ;;  %v14423_v15 = vadd.f32 %v11767_v38, %v20600_v12  ;;  %v14487_v45 = vadd.f32 %v12153_v49, %v20603_v44  ;;  %v11769_v4 = vpop.f32.mrb[158].mxu1  ;;  %v12155_v24 = vpop.f32.mrb[158].mxu0  ;;  %v12579_v62 = vadd.f32 %v12578_v43, %v12440_v35 }
 0xa3e   : > { %v12296_v53 = vmax.f32 %v14422_v41, 0.0  ;;  %v14424_v29 = vadd.f32 %v11769_v4, %v20591_v42  ;;  %v11771_v3 = vpop.f32.mrb[159].mxu1  ;;  %v12157_v13 = vpop.f32.mrb[159].mxu0  ;;  %v12298_v17 = vmax.f32 %v14486_v61, 0.0  ;;  %v14488_v57 = vadd.f32 %v12155_v24, %v20594_v28 }
 0xa3f   : > { %v12297_v2 = vmax.f32 %v14423_v15, 0.0  ;;  %v14425_v16 = vadd.f32 %v11771_v3, %v20600_v12  ;;  %v12299_v58 = vmax.f32 %v14487_v45, 0.0  ;;  %v14489_v54 = vadd.f32 %v12157_v13, %v20603_v44 }
 0xa40   : > { %v12446_v63 = vmul.f32 %v20607_v60, %v12296_v53  ;;  %v12300_v11 = vmax.f32 %v14424_v29, 0.0  ;;  %v12580_v55 = vadd.f32 %v12579_v62, %v12441_v36  ;;  %v12584_v33 = vadd.f32 %v12583_v37, %v12444_v32 }
 0xa41   : > { %v12447_v7 = vmul.f32 %v20612_v23, %v12297_v2  ;;  %v12301_v51 = vmax.f32 %v14425_v16, 0.0  ;;  %v12448_v19 = vmul.f32 %v20615_v9, %v12298_v17  ;;  %v12302_v27 = vmax.f32 %v14488_v57, 0.0 }
 0xa42   : > { %v12450_v25 = vmul.f32 %v20607_v60, %v12300_v11  ;;  %12581 = vadd.xlane.f32.xlu0 %v12580_v55  ;;  %v12585_v26 = vadd.f32 %v12584_v33, %v12445_v39  ;;  %v12449_v21 = vmul.f32 %v20626_v46, %v12299_v58  ;;  %v12303_v22 = vmax.f32 %v14489_v54, 0.0 }
 0xa43   : > { %v12588_v1 = vadd.f32 %v12447_v7, %v12446_v63  ;;  %v12451_v52 = vmul.f32 %v20612_v23, %v12301_v51  ;;  %v11775_v10 = vpop.f32.mrb[160].mxu1  ;;  %v12161_v56 = vpop.f32.mrb[160].mxu0  ;;  %v12452_v61 = vmul.f32 %v20615_v9, %v12302_v27 }
 0xa44   : > { %v14426_v6 = vadd.f32 %v11775_v10, %v20591_v42  ;;  %v14490_v59 = vadd.f32 %v12161_v56, %v20594_v28  ;;  %v11777_v31 = vpop.f32.mrb[161].mxu1  ;;  %v12163_v0 = vpop.f32.mrb[161].mxu0  ;;  %12586 = vadd.xlane.f32.xlu1 %v12585_v26  ;;  %v12453_v4 = vmul.f32 %v20626_v46, %v12303_v22 }
 0xa45   : > { %v12593_v20 = vadd.f32 %v12451_v52, %v12450_v25  ;;  %v14427_v8 = vadd.f32 %v11777_v31, %v20600_v12  ;;  %v11779_v48 = vpop.f32.mrb[162].mxu1  ;;  %v12165_v5 = vpop.f32.mrb[162].mxu0  ;;  %v12589_v40 = vadd.f32 %v12588_v1, %v12448_v19  ;;  %v14491_v34 = vadd.f32 %v12163_v0, %v20603_v44 }
 0xa46   : > { %v12304_v35 = vmax.f32 %v14426_v6, 0.0  ;;  %v14428_v43 = vadd.f32 %v11779_v48, %v20591_v42  ;;  %v11781_v47 = vpop.f32.mrb[163].mxu1  ;;  %v12167_v14 = vpop.f32.mrb[163].mxu0  ;;  %v12306_v50 = vmax.f32 %v14490_v59, 0.0  ;;  %v14492_v49 = vadd.f32 %v12165_v5, %v20594_v28 }
 0xa47   : > { %v12305_v30 = vmax.f32 %v14427_v8, 0.0  ;;  %v14429_v41 = vadd.f32 %v11781_v47, %v20600_v12  ;;  %v14493_v45 = vadd.f32 %v12167_v14, %v20603_v44  ;;  %v12590_v62 = vadd.f32 %v12589_v40, %v12449_v21 }
 0xa48   : > { %v12454_v18 = vmul.f32 %v20607_v60, %v12304_v35  ;;  %v12308_v38 = vmax.f32 %v14428_v43, 0.0  ;;  %v12594_v53 = vadd.f32 %v12593_v20, %v12452_v61  ;;  %v12456_v29 = vmul.f32 %v20615_v9, %v12306_v50 }
 0xa49   : > { %v12455_v37 = vmul.f32 %v20612_v23, %v12305_v30  ;;  %v12309_v15 = vmax.f32 %v14429_v41, 0.0  ;;  %v12307_v13 = vmax.f32 %v14491_v34, 0.0  ;;  %v12310_v16 = vmax.f32 %v14492_v49, 0.0  ;;  %12591 = vadd.xlane.f32.xlu0 %v12590_v62 }
 0xa4a   : > { %v12458_v24 = vmul.f32 %v20607_v60, %v12308_v38  ;;  %v12595_v11 = vadd.f32 %v12594_v53, %v12453_v4  ;;  %v12311_v58 = vmax.f32 %v14493_v45, 0.0 }
 0xa4b   : > { %v12598_v3 = vadd.f32 %v12455_v37, %v12454_v18  ;;  %v12459_v36 = vmul.f32 %v20612_v23, %v12309_v15  ;;  %v11785_v17 = vpop.f32.mrb[164].mxu1  ;;  %v12171_v2 = vpop.f32.mrb[164].mxu0  ;;  %v12457_v56 = vmul.f32 %v20626_v46, %v12307_v13  ;;  %v12460_v26 = vmul.f32 %v20615_v9, %v12310_v16 }
 0xa4c   : > { %v14430_v32 = vadd.f32 %v11785_v17, %v20591_v42  ;;  %v14494_v63 = vadd.f32 %v12171_v2, %v20594_v28  ;;  %v11787_v57 = vpop.f32.mrb[165].mxu1  ;;  %v12173_v39 = vpop.f32.mrb[165].mxu0  ;;  %12596 = vadd.xlane.f32.xlu1 %v12595_v11  ;;  %v12461_v8 = vmul.f32 %v20626_v46, %v12311_v58 }
 0xa4d   : > { %v12603_v7 = vadd.f32 %v12459_v36, %v12458_v24  ;;  %v14431_v51 = vadd.f32 %v11787_v57, %v20600_v12  ;;  %v11789_v25 = vpop.f32.mrb[166].mxu1  ;;  %v12175_v54 = vpop.f32.mrb[166].mxu0  ;;  %v12599_v55 = vadd.f32 %v12598_v3, %v12456_v29  ;;  %v14495_v19 = vadd.f32 %v12173_v39, %v20603_v44 }
 0xa4e   : > { %v12312_v33 = vmax.f32 %v14430_v32, 0.0  ;;  %v14432_v1 = vadd.f32 %v11789_v25, %v20591_v42  ;;  %v11791_v52 = vpop.f32.mrb[167].mxu1  ;;  %v12177_v10 = vpop.f32.mrb[167].mxu0  ;;  %v12314_v27 = vmax.f32 %v14494_v63, 0.0  ;;  %v14496_v20 = vadd.f32 %v12175_v54, %v20594_v28 }
 0xa4f   : > { %v12313_v6 = vmax.f32 %v14431_v51, 0.0  ;;  %v14433_v59 = vadd.f32 %v11791_v52, %v20600_v12  ;;  %v14497_v40 = vadd.f32 %v12177_v10, %v20603_v44  ;;  %v12315_v21 = vmax.f32 %v14495_v19, 0.0 }
 0xa50   : > { %v12462_v31 = vmul.f32 %v20607_v60, %v12312_v33  ;;  %v12316_v0 = vmax.f32 %v14432_v1, 0.0  ;;  %v12600_v35 = vadd.f32 %v12599_v55, %v12457_v56  ;;  %v12604_v43 = vadd.f32 %v12603_v7, %v12460_v26 }
 0xa51   : > { %v12463_v48 = vmul.f32 %v20612_v23, %v12313_v6  ;;  %v12317_v5 = vmax.f32 %v14433_v59, 0.0  ;;  %v12464_v47 = vmul.f32 %v20615_v9, %v12314_v27  ;;  %v12318_v41 = vmax.f32 %v14496_v20, 0.0 }
 0xa52   : > { %v12466_v22 = vmul.f32 %v20607_v60, %v12316_v0  ;;  %12601 = vadd.xlane.f32.xlu0 %v12600_v35  ;;  %v12605_v38 = vadd.f32 %v12604_v43, %v12461_v8  ;;  %v12319_v45 = vmax.f32 %v14497_v40, 0.0  ;;  %v12465_v29 = vmul.f32 %v20626_v46, %v12315_v21 }
 0xa53   : > { %v12608_v14 = vadd.f32 %v12463_v48, %v12462_v31  ;;  %v12467_v50 = vmul.f32 %v20612_v23, %v12317_v5  ;;  %v11795_v30 = vpop.f32.mrb[168].mxu1  ;;  %v12181_v34 = vpop.f32.mrb[168].mxu0  ;;  %v12468_v57 = vmul.f32 %v20615_v9, %v12318_v41 }
 0xa54   : > { %v14434_v61 = vadd.f32 %v11795_v30, %v20591_v42  ;;  %v14498_v18 = vadd.f32 %v12181_v34, %v20594_v28  ;;  %v11797_v49 = vpop.f32.mrb[169].mxu1  ;;  %v12183_v37 = vpop.f32.mrb[169].mxu0  ;;  %12606 = vadd.xlane.f32.xlu1 %v12605_v38  ;;  %v12469_v51 = vmul.f32 %v20626_v46, %v12319_v45 }
 0xa55   : > { %v12613_v15 = vadd.f32 %v12467_v50, %v12466_v22  ;;  %v14435_v4 = vadd.f32 %v11797_v49, %v20600_v12  ;;  %v11799_v24 = vpop.f32.mrb[170].mxu1  ;;  %v12185_v62 = vpop.f32.mrb[170].mxu0  ;;  %v12609_v53 = vadd.f32 %v12608_v14, %v12464_v47  ;;  %v14499_v13 = vadd.f32 %v12183_v37, %v20603_v44 }
 0xa56   : > { %v12320_v3 = vmax.f32 %v14434_v61, 0.0  ;;  %v14436_v36 = vadd.f32 %v11799_v24, %v20591_v42  ;;  %v11801_v17 = vpop.f32.mrb[171].mxu1  ;;  %v12187_v2 = vpop.f32.mrb[171].mxu0  ;;  %v12322_v16 = vmax.f32 %v14498_v18, 0.0  ;;  %v14500_v63 = vadd.f32 %v12185_v62, %v20594_v28 }
 0xa57   : > { %v12321_v32 = vmax.f32 %v14435_v4, 0.0  ;;  %v14437_v11 = vadd.f32 %v11801_v17, %v20600_v12  ;;  %v14501_v58 = vadd.f32 %v12187_v2, %v20603_v44  ;;  %v12323_v55 = vmax.f32 %v14499_v13, 0.0 }
 0xa58   : > { %v12470_v39 = vmul.f32 %v20607_v60, %v12320_v3  ;;  %v12324_v7 = vmax.f32 %v14436_v36, 0.0  ;;  %v12610_v19 = vadd.f32 %v12609_v53, %v12465_v29  ;;  %v12614_v1 = vadd.f32 %v12613_v15, %v12468_v57 }
 0xa59   : > { %v12471_v25 = vmul.f32 %v20612_v23, %v12321_v32  ;;  %v12325_v54 = vmax.f32 %v14437_v11, 0.0  ;;  %v12472_v52 = vmul.f32 %v20615_v9, %v12322_v16  ;;  %v12326_v56 = vmax.f32 %v14500_v63, 0.0 }
 0xa5a   : > { %v12474_v33 = vmul.f32 %v20607_v60, %v12324_v7  ;;  %v12327_v26 = vmax.f32 %v14501_v58, 0.0  ;;  %12611 = vadd.xlane.f32.xlu0 %v12610_v19  ;;  %v12615_v20 = vadd.f32 %v12614_v1, %v12469_v51  ;;  %v12473_v34 = vmul.f32 %v20626_v46, %v12323_v55 }
 0xa5b   : > { %v12618_v10 = vadd.f32 %v12471_v25, %v12470_v39  ;;  %v12475_v27 = vmul.f32 %v20612_v23, %v12325_v54  ;;  %v11805_v6 = vpop.f32.mrb[172].mxu1  ;;  %v12191_v59 = vpop.f32.mrb[172].mxu0  ;;  %v12476_v38 = vmul.f32 %v20615_v9, %v12326_v56 }
 0xa5c   : > { %v14438_v31 = vadd.f32 %v11805_v6, %v20591_v42  ;;  %v14502_v0 = vadd.f32 %v12191_v59, %v20594_v28  ;;  %v11807_v8 = vpop.f32.mrb[173].mxu1  ;;  %v12193_v48 = vpop.f32.mrb[173].mxu0  ;;  %12616 = vadd.xlane.f32.xlu1 %v12615_v20  ;;  %v12477_v45 = vmul.f32 %v20626_v46, %v12327_v26 }
 0xa5d   : > { %v12623_v5 = vadd.f32 %v12475_v27, %v12474_v33  ;;  %v14439_v40 = vadd.f32 %v11807_v8, %v20600_v12  ;;  %v14503_v21 = vadd.f32 %v12193_v48, %v20603_v44  ;;  %v11809_v22 = vpop.f32.mrb[174].mxu1  ;;  %v12195_v35 = vpop.f32.mrb[174].mxu0  ;;  %v12619_v43 = vadd.f32 %v12618_v10, %v12472_v52 }
 0xa5e   : > { %v12328_v47 = vmax.f32 %v14438_v31, 0.0  ;;  %v14440_v14 = vadd.f32 %v11809_v22, %v20591_v42  ;;  %v11811_v50 = vpop.f32.mrb[175].mxu1  ;;  %v12197_v30 = vpop.f32.mrb[175].mxu0  ;;  %v12330_v41 = vmax.f32 %v14502_v0, 0.0  ;;  %v14504_v15 = vadd.f32 %v12195_v35, %v20594_v28 }
 0xa5f   : > { %v12329_v61 = vmax.f32 %v14439_v40, 0.0  ;;  %v14441_v18 = vadd.f32 %v11811_v50, %v20600_v12  ;;  %v12331_v24 = vmax.f32 %v14503_v21, 0.0  ;;  %v14505_v29 = vadd.f32 %v12197_v30, %v20603_v44 }
 0xa60   : > { %v12478_v49 = vmul.f32 %v20607_v60, %v12328_v47  ;;  %v12332_v37 = vmax.f32 %v14440_v14, 0.0  ;;  %v12620_v3 = vadd.f32 %v12619_v43, %v12473_v34  ;;  %v12624_v13 = vadd.f32 %v12623_v5, %v12476_v38 }
 0xa61   : > { %v12479_v4 = vmul.f32 %v20612_v23, %v12329_v61  ;;  %v12333_v62 = vmax.f32 %v14441_v18, 0.0  ;;  %v12480_v36 = vmul.f32 %v20615_v9, %v12330_v41  ;;  %v12334_v63 = vmax.f32 %v14504_v15, 0.0 }
 0xa62   : > { %v12482_v53 = vmul.f32 %v20607_v60, %v12332_v37  ;;  %12621 = vadd.xlane.f32.xlu0 %v12620_v3  ;;  %v12625_v39 = vadd.f32 %v12624_v13, %v12477_v45  ;;  %v12481_v19 = vmul.f32 %v20626_v46, %v12331_v24  ;;  %v12335_v1 = vmax.f32 %v14505_v29, 0.0 }
 0xa63   : > { %v12628_v17 = vadd.f32 %v12479_v4, %v12478_v49  ;;  %v12483_v2 = vmul.f32 %v20612_v23, %v12333_v62  ;;  %v11815_v16 = vpop.f32.mrb[176].mxu1  ;;  %v12201_v32 = vpop.f32.mrb[176].mxu0  ;;  %v12484_v0 = vmul.f32 %v20615_v9, %v12334_v63 }
 0xa64   : > { %v14442_v11 = vadd.f32 %v11815_v16, %v20591_v42  ;;  %v14506_v57 = vadd.f32 %v12201_v32, %v20594_v28  ;;  %v11817_v7 = vpop.f32.mrb[177].mxu1  ;;  %v12203_v58 = vpop.f32.mrb[177].mxu0  ;;  %12626 = vadd.xlane.f32.xlu1 %v12625_v39  ;;  %v12485_v22 = vmul.f32 %v20626_v46, %v12335_v1 }
 0xa65   : > { %v12633_v51 = vadd.f32 %v12483_v2, %v12482_v53  ;;  %v14443_v25 = vadd.f32 %v11817_v7, %v20600_v12  ;;  %v11819_v54 = vpop.f32.mrb[178].mxu1  ;;  %v12205_v55 = vpop.f32.mrb[178].mxu0  ;;  %v12629_v33 = vadd.f32 %v12628_v17, %v12480_v36  ;;  %v14507_v26 = vadd.f32 %v12203_v58, %v20603_v44 }
 0xa66   : > { %v12336_v52 = vmax.f32 %v14442_v11, 0.0  ;;  %v14444_v10 = vadd.f32 %v11819_v54, %v20591_v42  ;;  %v11821_v56 = vpop.f32.mrb[179].mxu1  ;;  %v12207_v27 = vpop.f32.mrb[179].mxu0  ;;  %v12338_v6 = vmax.f32 %v14506_v57, 0.0  ;;  %v14508_v48 = vadd.f32 %v12205_v55, %v20594_v28 }
 0xa67   : > { %v12337_v59 = vmax.f32 %v14443_v25, 0.0  ;;  %v14445_v31 = vadd.f32 %v11821_v56, %v20600_v12  ;;  %v14509_v21 = vadd.f32 %v12207_v27, %v20603_v44  ;;  %v12630_v43 = vadd.f32 %v12629_v33, %v12481_v19 }
 0xa68   : > { %v12486_v20 = vmul.f32 %v20607_v60, %v12336_v52  ;;  %v12340_v8 = vmax.f32 %v14444_v10, 0.0  ;;  %v12634_v47 = vadd.f32 %v12633_v51, %v12484_v0  ;;  %v12488_v14 = vmul.f32 %v20615_v9, %v12338_v6 }
 0xa69   : > { %v12487_v5 = vmul.f32 %v20612_v23, %v12337_v59  ;;  %v12341_v40 = vmax.f32 %v14445_v31, 0.0  ;;  %v12339_v30 = vmax.f32 %v14507_v26, 0.0  ;;  %v12342_v18 = vmax.f32 %v14508_v48, 0.0  ;;  %12631 = vadd.xlane.f32.xlu0 %v12630_v43 }
 0xa6a   : > { %v12490_v35 = vmul.f32 %v20607_v60, %v12340_v8  ;;  %v12635_v37 = vadd.f32 %v12634_v47, %v12485_v22  ;;  %v12343_v24 = vmax.f32 %v14509_v21, 0.0 }
 0xa6b   : > { %v12638_v50 = vadd.f32 %v12487_v5, %v12486_v20  ;;  %v12491_v34 = vmul.f32 %v20612_v23, %v12341_v40  ;;  %v11825_v41 = vpop.f32.mrb[180].mxu1  ;;  %v12211_v61 = vpop.f32.mrb[180].mxu0  ;;  %v12489_v32 = vmul.f32 %v20626_v46, %v12339_v30  ;;  %v12492_v39 = vmul.f32 %v20615_v9, %v12342_v18 }
 0xa6c   : > { %v14446_v38 = vadd.f32 %v11825_v41, %v20591_v42  ;;  %v14510_v49 = vadd.f32 %v12211_v61, %v20594_v28  ;;  %v11827_v15 = vpop.f32.mrb[181].mxu1  ;;  %v12213_v45 = vpop.f32.mrb[181].mxu0  ;;  %12636 = vadd.xlane.f32.xlu1 %v12635_v37  ;;  %v12493_v25 = vmul.f32 %v20626_v46, %v12343_v24 }
 0xa6d   : > { %v12643_v4 = vadd.f32 %v12491_v34, %v12490_v35  ;;  %v14447_v62 = vadd.f32 %v11827_v15, %v20600_v12  ;;  %v11829_v53 = vpop.f32.mrb[182].mxu1  ;;  %v12215_v29 = vpop.f32.mrb[182].mxu0  ;;  %v12639_v3 = vadd.f32 %v12638_v50, %v12488_v14  ;;  %v14511_v36 = vadd.f32 %v12213_v45, %v20603_v44 }
 0xa6e   : > { %v12344_v13 = vmax.f32 %v14446_v38, 0.0  ;;  %v14448_v17 = vadd.f32 %v11829_v53, %v20591_v42  ;;  %v11831_v2 = vpop.f32.mrb[183].mxu1  ;;  %v12217_v16 = vpop.f32.mrb[183].mxu0  ;;  %v12346_v63 = vmax.f32 %v14510_v49, 0.0  ;;  %v14512_v51 = vadd.f32 %v12215_v29, %v20594_v28 }
 0xa6f   : > { %v12345_v11 = vmax.f32 %v14447_v62, 0.0  ;;  %v14449_v57 = vadd.f32 %v11831_v2, %v20600_v12  ;;  %v14513_v33 = vadd.f32 %v12217_v16, %v20603_v44  ;;  %v12347_v19 = vmax.f32 %v14511_v36, 0.0 }
 0xa70   : > { %v12494_v7 = vmul.f32 %v20607_v60, %v12344_v13  ;;  %v12348_v58 = vmax.f32 %v14448_v17, 0.0  ;;  %v12640_v52 = vadd.f32 %v12639_v3, %v12489_v32  ;;  %v12644_v10 = vadd.f32 %v12643_v4, %v12492_v39 }
 0xa71   : > { %v12495_v54 = vmul.f32 %v20612_v23, %v12345_v11  ;;  %v12349_v55 = vmax.f32 %v14449_v57, 0.0  ;;  %v12496_v56 = vmul.f32 %v20615_v9, %v12346_v63  ;;  %v12350_v31 = vmax.f32 %v14512_v51, 0.0 }
 0xa72   : > { %v12498_v1 = vmul.f32 %v20607_v60, %v12348_v58  ;;  %12641 = vadd.xlane.f32.xlu0 %v12640_v52  ;;  %v12645_v8 = vadd.f32 %v12644_v10, %v12493_v25  ;;  %v12351_v21 = vmax.f32 %v14513_v33, 0.0  ;;  %v12497_v14 = vmul.f32 %v20626_v46, %v12347_v19 }
 0xa73   : > { %v12648_v27 = vadd.f32 %v12495_v54, %v12494_v7  ;;  %v12499_v6 = vmul.f32 %v20612_v23, %v12349_v55  ;;  %v11835_v59 = vpop.f32.mrb[184].mxu1  ;;  %v12221_v26 = vpop.f32.mrb[184].mxu0  ;;  %v12500_v37 = vmul.f32 %v20615_v9, %v12350_v31 }
 0xa74   : > { %v14450_v0 = vadd.f32 %v11835_v59, %v20591_v42  ;;  %v14514_v20 = vadd.f32 %v12221_v26, %v20594_v28  ;;  %v11837_v48 = vpop.f32.mrb[185].mxu1  ;;  %v12223_v5 = vpop.f32.mrb[185].mxu0  ;;  %12646 = vadd.xlane.f32.xlu1 %v12645_v8  ;;  %v12501_v24 = vmul.f32 %v20626_v46, %v12351_v21 }
 0xa75   : > { %v12653_v40 = vadd.f32 %v12499_v6, %v12498_v1  ;;  %v14451_v22 = vadd.f32 %v11837_v48, %v20600_v12  ;;  %v11839_v35 = vpop.f32.mrb[186].mxu1  ;;  %v12225_v43 = vpop.f32.mrb[186].mxu0  ;;  %v12649_v47 = vadd.f32 %v12648_v27, %v12496_v56  ;;  %v14515_v38 = vadd.f32 %v12223_v5, %v20603_v44 }
 0xa76   : > { %v12352_v50 = vmax.f32 %v14450_v0, 0.0  ;;  %v14452_v30 = vadd.f32 %v11839_v35, %v20591_v42  ;;  %v11841_v34 = vpop.f32.mrb[187].mxu1  ;;  %v12227_v41 = vpop.f32.mrb[187].mxu0  ;;  %v12354_v61 = vmax.f32 %v14514_v20, 0.0  ;;  %v14516_v4 = vadd.f32 %v12225_v43, %v20594_v28 }
 0xa77   : > { %v12353_v18 = vmax.f32 %v14451_v22, 0.0  ;;  %v14453_v49 = vadd.f32 %v11841_v34, %v20600_v12  ;;  %v14517_v3 = vadd.f32 %v12227_v41, %v20603_v44  ;;  %v12650_v13 = vadd.f32 %v12649_v47, %v12497_v14 }
 0xa78   : > { %v12502_v15 = vmul.f32 %v20607_v60, %v12352_v50  ;;  %v12356_v45 = vmax.f32 %v14452_v30, 0.0  ;;  %v12654_v36 = vadd.f32 %v12653_v40, %v12500_v37  ;;  %v12504_v17 = vmul.f32 %v20615_v9, %v12354_v61 }
 0xa79   : > { %v12503_v62 = vmul.f32 %v20612_v23, %v12353_v18  ;;  %v12357_v53 = vmax.f32 %v14453_v49, 0.0  ;;  %v12355_v16 = vmax.f32 %v14515_v38, 0.0  ;;  %v12358_v57 = vmax.f32 %v14516_v4, 0.0  ;;  %12651 = vadd.xlane.f32.xlu0 %v12650_v13  ;;  %v20873_v4 = vld [vmem:[#allocation2] ss:$0 sm:$0xff] }
 0xa7a   : > { %v12506_v29 = vmul.f32 %v20607_v60, %v12356_v45  ;;  %v12655_v58 = vadd.f32 %v12654_v36, %v12501_v24  ;;  %v12359_v10 = vmax.f32 %v14517_v3, 0.0 }
 0xa7b   : > { %v12658_v2 = vadd.f32 %v12503_v62, %v12502_v15  ;;  %v12507_v32 = vmul.f32 %v20612_v23, %v12357_v53  ;;  %v11845_v63 = vpop.f32.mrb[188].mxu1  ;;  %v12231_v11 = vpop.f32.mrb[188].mxu0  ;;  %v12505_v48 = vmul.f32 %v20626_v46, %v12355_v16  ;;  %v12508_v5 = vmul.f32 %v20615_v9, %v12358_v57 }
 0xa7c   : > { %v14454_v39 = vadd.f32 %v11845_v63, %v20591_v42  ;;  %v14518_v7 = vadd.f32 %v12231_v11, %v20594_v28  ;;  %v11847_v51 = vpop.f32.mrb[189].mxu1  ;;  %v12233_v25 = vpop.f32.mrb[189].mxu0  ;;  %12656 = vadd.xlane.f32.xlu1 %v12655_v58  ;;  %v12509_v43 = vmul.f32 %v20626_v46, %v12359_v10 }
 0xa7d   : > { %v12663_v54 = vadd.f32 %v12507_v32, %v12506_v29  ;;  %v14455_v55 = vadd.f32 %v11847_v51, %v20600_v12  ;;  %v14519_v33 = vadd.f32 %v12233_v25, %v20603_v44  ;;  %v11849_v19 = vpop.f32.mrb[190].mxu1  ;;  %v12235_v1 = vpop.f32.mrb[190].mxu0  ;;  %v12659_v52 = vadd.f32 %v12658_v2, %v12504_v17 }
 0xa7e   : > { %v12360_v56 = vmax.f32 %v14454_v39, 0.0  ;;  %v14456_v27 = vadd.f32 %v11849_v19, %v20591_v42  ;;  %v14520_v6 = vadd.f32 %v12235_v1, %v20594_v28  ;;  %v11851_v59 = vpop.f32.mrb[191].mxu1  ;;  %v12237_v26 = vpop.f32.mrb[191].mxu0  ;;  %v12362_v31 = vmax.f32 %v14518_v7, 0.0 }
 0xa7f   : > { %v12361_v0 = vmax.f32 %v14455_v55, 0.0  ;;  %v14457_v20 = vadd.f32 %v11851_v59, %v20600_v12  ;;  %v14521_v8 = vadd.f32 %v12237_v26, %v20603_v44  ;;  %v12363_v42 = vmax.f32 %v14519_v33, 0.0 }
 0xa80   : > { %v12510_v40 = vmul.f32 %v20607_v60, %v12360_v56  ;;  %v12364_v21 = vmax.f32 %v14456_v27, 0.0  ;;  %v12366_v35 = vmax.f32 %v14520_v6, 0.0  ;;  %v12660_v14 = vadd.f32 %v12659_v52, %v12505_v48 }
 0xa81   : > { %v12511_v22 = vmul.f32 %v20612_v23, %v12361_v0  ;;  %v12365_v28 = vmax.f32 %v14457_v20, 0.0  ;;  %v12664_v12 = vadd.f32 %v12663_v54, %v12508_v5  ;;  %v12512_v44 = vmul.f32 %v20615_v9, %v12362_v31 }
 0xa82   : > { %v12514_v47 = vmul.f32 %v20607_v60, %v12364_v21  ;;  %v12367_v34 = vmax.f32 %v14521_v8, 0.0  ;;  %12661 = vadd.xlane.f32.xlu0 %v12660_v14  ;;  %v12513_v61 = vmul.f32 %v20626_v46, %v12363_v42  ;;  %v12516_v18 = vmul.f32 %v20615_v9, %v12366_v35 }
 0xa83   : > { %v12668_v50 = vadd.f32 %v12511_v22, %v12510_v40  ;;  %v12515_v30 = vmul.f32 %v20612_v23, %v12365_v28  ;;  %v12665_v41 = vadd.f32 %v12664_v12, %v12509_v43 }
 0xa84   : > { %v12517_v60 = vmul.f32 %v20626_v46, %v12367_v34 }
 0xa85   : > { %v12673_v38 = vadd.f32 %v12515_v30, %v12514_v47  ;;  %v12669_v49 = vadd.f32 %v12668_v50, %v12512_v44  ;;  %12666 = vadd.xlane.f32.xlu1 %v12665_v41 }
 0xa87   : > { %v12670_v37 = vadd.f32 %v12669_v49, %v12513_v61  ;;  %v12674_v15 = vadd.f32 %v12673_v38, %v12516_v18 }
 0xa89   : > { %12671 = vadd.xlane.f32.xlu0 %v12670_v37  ;;  %v12675_v45 = vadd.f32 %v12674_v15, %v12517_v60 }
 0xa8b   : > { %12676 = vadd.xlane.f32.xlu1 %v12675_v45 }
 0xa9e   : > { %v12522_v23 = vpop.xlane.xlu0 %12521 }
 0xa9f   : > { %v12685_v24 = vadd.f32 %v20873_v4, %v12522_v23 }
 0xaa1   : > { %16643 = vtanh.f32 %v12685_v24 }
 0xaa2   : > { %v12527_v62 = vpop.xlane.xlu0 %12526 }
 0xaa3   : > { %v12686_v9 = vadd.f32 %v20873_v4, %v12527_v62 }
 0xaa5   : > { %16645 = vtanh.f32 %v12686_v9 }
 0xaa7   : > { %v12532_v53 = vpop.xlane.xlu1 %12531 }
 0xaa8   : > { %v12687_v29 = vadd.f32 %v20873_v4, %v12532_v53 }
 0xaaa   : > { %16647 = vtanh.f32 %v12687_v29 }
 0xaab   : > { %v16644_v46 = vpop.eup %16643  ;;  %v12537_v3 = vpop.xlane.xlu1 %12536 }
 0xaac   : > { %12750 = vst.msk [vmem:[%s20882_s27] sm:$0xff] %vm12749_vm2, %v16644_v46  ;;  %v12688_v13 = vadd.f32 %v20873_v4, %v12537_v3 }
 0xaae   : > { %16649 = vtanh.f32 %v12688_v13 }
 0xaaf   : > { %v16646_v36 = vpop.eup %16645  ;;  %v12542_v17 = vpop.xlane.xlu0 %12541 }
 0xab0   : > { %12751 = vst.msk [vmem:[%s20882_s27 + $0x8] sm:$0xff] %vm12749_vm2, %v16646_v36  ;;  %v12689_v2 = vadd.f32 %v20873_v4, %v12542_v17 }
 0xab1   : > { %v12547_v16 = vpop.xlane.xlu1 %12546 }
 0xab2   : > { %16651 = vtanh.f32 %v12689_v2  ;;  %v12690_v32 = vadd.f32 %v20873_v4, %v12547_v16 }
 0xab4   : > { %v16648_v63 = vpop.eup %16647  ;;  %16653 = vtanh.f32 %v12690_v32 }
 0xab5   : > { %12752 = vst.msk [vmem:[%s20882_s27 + $0x10] sm:$0xff] %vm12749_vm2, %v16648_v63 }
 0xab6   : > { %v12552_v11 = vpop.xlane.xlu0 %12551 }
 0xab7   : > { %v12691_v39 = vadd.f32 %v20873_v4, %v12552_v11 }
 0xab8   : > { %v16650_v57 = vpop.eup %16649 }
 0xab9   : > { %12753 = vst.msk [vmem:[%s20882_s27 + $0x18] sm:$0xff] %vm12749_vm2, %v16650_v57  ;;  %v12557_v7 = vpop.xlane.xlu1 %12556  ;;  %16655 = vtanh.f32 %v12691_v39 }
 0xaba   : > { %v12692_v58 = vadd.f32 %v20873_v4, %v12557_v7 }
 0xabc   : > { %v16652_v51 = vpop.eup %16651  ;;  %16657 = vtanh.f32 %v12692_v58 }
 0xabd   : > { %12754 = vst.msk [vmem:[%s20882_s27 + $0x20] sm:$0xff] %vm12749_vm2, %v16652_v51 }
 0xabe   : > { %v16654_v25 = vpop.eup %16653 }
 0xabf   : > { %12755 = vst.msk [vmem:[%s20882_s27 + $0x28] sm:$0xff] %vm12749_vm2, %v16654_v25  ;;  %v12562_v54 = vpop.xlane.xlu0 %12561 }
 0xac0   : > { %v12693_v55 = vadd.f32 %v20873_v4, %v12562_v54 }
 0xac1   : > { %v12567_v33 = vpop.xlane.xlu1 %12566 }
 0xac2   : > { %16659 = vtanh.f32 %v12693_v55  ;;  %v12694_v19 = vadd.f32 %v20873_v4, %v12567_v33 }
 0xac3   : > { %v16656_v1 = vpop.eup %16655 }
 0xac4   : > { %16661 = vtanh.f32 %v12694_v19  ;;  %12756 = vst.msk [vmem:[%s20882_s27 + $0x30] sm:$0xff] %vm12749_vm2, %v16656_v1 }
 0xac6   : > { %v16658_v52 = vpop.eup %16657 }
 0xac7   : > { %12757 = vst.msk [vmem:[%s20882_s27 + $0x38] sm:$0xff] %vm12749_vm2, %v16658_v52  ;;  %v12572_v10 = vpop.xlane.xlu0 %12571 }
 0xac8   : > { %v12695_v56 = vadd.f32 %v20873_v4, %v12572_v10 }
 0xac9   : > { %v12577_v27 = vpop.xlane.xlu1 %12576 }
 0xaca   : > { %16663 = vtanh.f32 %v12695_v56  ;;  %v12696_v6 = vadd.f32 %v20873_v4, %v12577_v27 }
 0xacc   : > { %v16660_v59 = vpop.eup %16659  ;;  %16665 = vtanh.f32 %v12696_v6 }
 0xacd   : > { %12758 = vst.msk [vmem:[%s20882_s27 + $0x40] sm:$0xff] %vm12749_vm2, %v16660_v59 }
 0xace   : > { %v16662_v26 = vpop.eup %16661 }
 0xacf   : > { %12759 = vst.msk [vmem:[%s20882_s27 + $0x48] sm:$0xff] %vm12749_vm2, %v16662_v26  ;;  %v12582_v31 = vpop.xlane.xlu0 %12581 }
 0xad0   : > { %v12697_v0 = vadd.f32 %v20873_v4, %v12582_v31 }
 0xad1   : > { %v12587_v20 = vpop.xlane.xlu1 %12586 }
 0xad2   : > { %16667 = vtanh.f32 %v12697_v0  ;;  %v12698_v8 = vadd.f32 %v20873_v4, %v12587_v20 }
 0xad4   : > { %v16664_v48 = vpop.eup %16663  ;;  %16669 = vtanh.f32 %v12698_v8 }
 0xad5   : > { %12760 = vst.msk [vmem:[%s20882_s27 + $0x50] sm:$0xff] %vm12749_vm2, %v16664_v48 }
 0xad6   : > { %v16666_v5 = vpop.eup %16665  ;;  %v12592_v40 = vpop.xlane.xlu0 %12591 }
 0xad7   : > { %12761 = vst.msk [vmem:[%s20882_s27 + $0x58] sm:$0xff] %vm12749_vm2, %v16666_v5  ;;  %v12699_v21 = vadd.f32 %v20873_v4, %v12592_v40 }
 0xad9   : > { %v12597_v22 = vpop.xlane.xlu1 %12596  ;;  %16671 = vtanh.f32 %v12699_v21 }
 0xada   : > { %v12700_v42 = vadd.f32 %v20873_v4, %v12597_v22 }
 0xadc   : > { %v16668_v35 = vpop.eup %16667  ;;  %16673 = vtanh.f32 %v12700_v42 }
 0xadd   : > { %12762 = vst.msk [vmem:[%s20882_s27 + $0x60] sm:$0xff] %vm12749_vm2, %v16668_v35 }
 0xade   : > { %v16670_v28 = vpop.eup %16669 }
 0xadf   : > { %12763 = vst.msk [vmem:[%s20882_s27 + $0x68] sm:$0xff] %vm12749_vm2, %v16670_v28  ;;  %v12602_v43 = vpop.xlane.xlu0 %12601 }
 0xae0   : > { %v12701_v47 = vadd.f32 %v20873_v4, %v12602_v43 }
 0xae1   : > { %v12607_v14 = vpop.xlane.xlu1 %12606 }
 0xae2   : > { %16675 = vtanh.f32 %v12701_v47  ;;  %v12702_v12 = vadd.f32 %v20873_v4, %v12607_v14 }
 0xae3   : > { %v16672_v44 = vpop.eup %16671 }
 0xae4   : > { %16677 = vtanh.f32 %v12702_v12  ;;  %12764 = vst.msk [vmem:[%s20882_s27 + $0x70] sm:$0xff] %vm12749_vm2, %v16672_v44 }
 0xae6   : > { %v16674_v50 = vpop.eup %16673 }
 0xae7   : > { %12765 = vst.msk [vmem:[%s20882_s27 + $0x78] sm:$0xff] %vm12749_vm2, %v16674_v50  ;;  %v12612_v30 = vpop.xlane.xlu0 %12611 }
 0xae8   : > { %v12703_v34 = vadd.f32 %v20873_v4, %v12612_v30 }
 0xae9   : > { %v12617_v41 = vpop.xlane.xlu1 %12616 }
 0xaea   : > { %16679 = vtanh.f32 %v12703_v34  ;;  %v12704_v61 = vadd.f32 %v20873_v4, %v12617_v41 }
 0xaec   : > { %v16676_v18 = vpop.eup %16675  ;;  %16681 = vtanh.f32 %v12704_v61 }
 0xaed   : > { %12766 = vst.msk [vmem:[%s20882_s27 + $0x80] sm:$0xff] %vm12749_vm2, %v16676_v18 }
 0xaee   : > { %v16678_v38 = vpop.eup %16677 }
 0xaef   : > { %12767 = vst.msk [vmem:[%s20882_s27 + $0x88] sm:$0xff] %vm12749_vm2, %v16678_v38  ;;  %v12622_v49 = vpop.xlane.xlu0 %12621 }
 0xaf0   : > { %v12705_v60 = vadd.f32 %v20873_v4, %v12622_v49 }
 0xaf1   : > { %v12627_v37 = vpop.xlane.xlu1 %12626 }
 0xaf2   : > { %16683 = vtanh.f32 %v12705_v60  ;;  %v12706_v15 = vadd.f32 %v20873_v4, %v12627_v37 }
 0xaf4   : > { %v16680_v45 = vpop.eup %16679  ;;  %16685 = vtanh.f32 %v12706_v15 }
 0xaf5   : > { %12768 = vst.msk [vmem:[%s20882_s27 + $0x90] sm:$0xff] %vm12749_vm2, %v16680_v45 }
 0xaf6   : > { %v16682_v23 = vpop.eup %16681  ;;  %v12632_v24 = vpop.xlane.xlu0 %12631 }
 0xaf7   : > { %12769 = vst.msk [vmem:[%s20882_s27 + $0x98] sm:$0xff] %vm12749_vm2, %v16682_v23  ;;  %v12707_v62 = vadd.f32 %v20873_v4, %v12632_v24 }
 0xaf9   : > { %v12637_v9 = vpop.xlane.xlu1 %12636  ;;  %16687 = vtanh.f32 %v12707_v62 }
 0xafa   : > { %v12708_v53 = vadd.f32 %v20873_v4, %v12637_v9 }
 0xafc   : > { %v16684_v29 = vpop.eup %16683  ;;  %16689 = vtanh.f32 %v12708_v53 }
 0xafd   : > { %12770 = vst.msk [vmem:[%s20882_s27 + $0xa0] sm:$0xff] %vm12749_vm2, %v16684_v29 }
 0xafe   : > { %v16686_v46 = vpop.eup %16685 }
 0xaff   : > { %12771 = vst.msk [vmem:[%s20882_s27 + $0xa8] sm:$0xff] %vm12749_vm2, %v16686_v46  ;;  %v12642_v3 = vpop.xlane.xlu0 %12641 }
 0xb00   : > { %v12709_v13 = vadd.f32 %v20873_v4, %v12642_v3 }
 0xb01   : > { %v12647_v36 = vpop.xlane.xlu1 %12646 }
 0xb02   : > { %16691 = vtanh.f32 %v12709_v13  ;;  %v12710_v17 = vadd.f32 %v20873_v4, %v12647_v36 }
 0xb03   : > { %v16688_v2 = vpop.eup %16687 }
 0xb04   : > { %16693 = vtanh.f32 %v12710_v17  ;;  %12772 = vst.msk [vmem:[%s20882_s27 + $0xb0] sm:$0xff] %vm12749_vm2, %v16688_v2 }
 0xb06   : > { %v16690_v16 = vpop.eup %16689  ;;  %v12652_v32 = vpop.xlane.xlu0 %12651 }
 0xb07   : > { %12773 = vst.msk [vmem:[%s20882_s27 + $0xb8] sm:$0xff] %vm12749_vm2, %v16690_v16  ;;  %v12711_v63 = vadd.f32 %v20873_v4, %v12652_v32 }
 0xb09   : > { %v12657_v11 = vpop.xlane.xlu1 %12656  ;;  %16695 = vtanh.f32 %v12711_v63 }
 0xb0a   : > { %v12712_v57 = vadd.f32 %v20873_v4, %v12657_v11 }
 0xb0c   : > { %v16692_v39 = vpop.eup %16691  ;;  %16697 = vtanh.f32 %v12712_v57 }
 0xb0d   : > { %12774 = vst.msk [vmem:[%s20882_s27 + $0xc0] sm:$0xff] %vm12749_vm2, %v16692_v39 }
 0xb0e   : > { %v16694_v7 = vpop.eup %16693 }
 0xb0f   : > { %12775 = vst.msk [vmem:[%s20882_s27 + $0xc8] sm:$0xff] %vm12749_vm2, %v16694_v7  ;;  %v12662_v58 = vpop.xlane.xlu0 %12661 }
 0xb10   : > { %v12713_v51 = vadd.f32 %v20873_v4, %v12662_v58 }
 0xb12   : > { %v12667_v25 = vpop.xlane.xlu1 %12666  ;;  %16699 = vtanh.f32 %v12713_v51 }
 0xb13   : > { %v12714_v54 = vadd.f32 %v20873_v4, %v12667_v25  ;;  %v16696_v55 = vpop.eup %16695 }
 0xb14   : > { %12776 = vst.msk [vmem:[%s20882_s27 + $0xd0] sm:$0xff] %vm12749_vm2, %v16696_v55 }
 0xb15   : > { %16701 = vtanh.f32 %v12714_v54 }
 0xb16   : > { %v12672_v33 = vpop.xlane.xlu0 %12671  ;;  %v16698_v1 = vpop.eup %16697 }
 0xb17   : > { %v12715_v19 = vadd.f32 %v20873_v4, %v12672_v33  ;;  %12777 = vst.msk [vmem:[%s20882_s27 + $0xd8] sm:$0xff] %vm12749_vm2, %v16698_v1 }
 0xb18   : > { %v12677_v52 = vpop.xlane.xlu1 %12676 }
 0xb19   : > { %16703 = vtanh.f32 %v12715_v19  ;;  %v12716_v10 = vadd.f32 %v20873_v4, %v12677_v52 }
 0xb1b   : > { %16705 = vtanh.f32 %v12716_v10 }
 0xb1c   : > { %v16700_v56 = vpop.eup %16699 }
 0xb1d   : > { %12778 = vst.msk [vmem:[%s20882_s27 + $0xe0] sm:$0xff] %vm12749_vm2, %v16700_v56 }
 0xb1f   : > { %v16702_v27 = vpop.eup %16701 }
 0xb20   : > { %12779 = vst.msk [vmem:[%s20882_s27 + $0xe8] sm:$0xff] %vm12749_vm2, %v16702_v27 }
 0xb23   : > { %v16704_v6 = vpop.eup %16703 }
 0xb24   : > { %12780 = vst.msk [vmem:[%s20882_s27 + $0xf0] sm:$0xff] %vm12749_vm2, %v16704_v6 }
 0xb25   : > { %v16706_v59 = vpop.eup %16705 }
 0xb26   : > { %12781 = vst.msk [vmem:[%s20882_s27 + $0xf8] sm:$0xff] %vm12749_vm2, %v16706_v59 }
 0xb27 PF: > { %s33_s29 = sadd.s32 1, %s16866_s29  }
 0xb28   : > { %p30_p2 = scmp.ge.s32.totalorder %s33_s29, 4  }
 0xb2a   :  { %32 = sbr.rel (!%p30_p2) target bundleno = 10 (0xa), region = 143 }
 0xb31   :  { %12804 = vsyncpa [#allocation4], 1 }
 0xb32   :  { %12806 = vsyncpa [#allocation4 + $0x1], 1 }
 0xb33   :  { %12807 = vsyncpa [#allocation6], 1 }
 0xb34   :  { %12808 = vsyncpa [#allocation9], 1 }

</bundles_post_ra>
